<compile_context>
chip_gen: v7x
topology: tpu7x:2x2x1
jax: 0.10.0
libtpu: 0.0.40
codegen_flags: <defaults>
</compile_context>

<pallas_src>
import numpy as np

import jax
import jax.numpy as jnp
from jax import lax
from jax.experimental import pallas as pl
from jax.experimental.pallas import tpu as pltpu

BERT_HIDDEN_SIZE = 768
LANE = 128


# ----------------------------------------------------------------------------
# Pallas kernel
# ----------------------------------------------------------------------------
def _summarizer_decoder_kernel(
    active_ref,                          # SMEM (dec_len,) f32: 1.0 if step active
    y_ref, enc_ref,                      # (B, dec_len, Lp), (B, Lp, D)
    wbr_ref, bbr_ref,                    # bert_reduce
    wih_ref, bih_ref, whh_ref, bhh_ref,  # LSTMCell
    wenc_ref, benc_ref,                  # enc_linear
    wdec_ref, bdec_ref,                  # dec_linear
    wattT_ref, batt_ref,                 # att_linear, watt pre-transposed to (1, A)
    out_ref, hout_ref, cout_ref,         # (dec_len, B, Lp), (B, H), (B, H)
):
    B, dec_len, Lp = y_ref.shape
    D = enc_ref.shape[-1]
    H = wbr_ref.shape[-1]
    A = wenc_ref.shape[-1]

    enc = enc_ref[...]                   # (B, Lp, D)
    y = y_ref[...]                       # (B, dec_len, Lp)

    # ---------------- hoisted, loop-invariant work (big-M MXU matmuls) --------
    # state=None branch: h = bert_reduce(enc[:, 0, :]); c = h
    h = jnp.dot(enc[:, 0, :], wbr_ref[...],
                preferred_element_type=jnp.float32) + bbr_ref[...]      # (B, H)
    c = h

    # masked-mean decoder input for every step at once
    msum = jnp.sum(y, axis=-1, keepdims=True)                           # (B, dec_len, 1)
    hsum = jnp.einsum('btl,bld->btd', y, enc,
                      preferred_element_type=jnp.float32)               # (B, dec_len, D)
    inp_all = hsum / (msum + 1e-30)                                     # (B, dec_len, D)

    # input-side LSTM gate contributions for all steps: one (B*T, D) @ (D, 4H)
    gates_x = (jnp.dot(inp_all.reshape(B * dec_len, D), wih_ref[...],
                       preferred_element_type=jnp.float32)
               + bih_ref[...] + bhh_ref[...])                           # (B*T, 4H)
    gates_x = gates_x.reshape(B, dec_len, 4 * H)

    # encoder-side attention projection (loop invariant)
    enc4att = (jnp.dot(enc.reshape(B * Lp, D), wenc_ref[...],
                       preferred_element_type=jnp.float32)
               + benc_ref[...]).reshape(B, Lp, A)

    whh = whh_ref[...]
    wdec = wdec_ref[...]
    bdec = bdec_ref[...]
    wattT = wattT_ref[...]               # (1, A)
    batt = batt_ref[...]                 # (1, 1)

    # ---------------- fully unrolled recurrence (only h @ whh on the chain) ---
    for i in range(dec_len):
        a = active_ref[i]                # scalar f32: 1.0 active / 0.0 skipped step

        gates = gates_x[:, i, :] + jnp.dot(h, whh,
                                           preferred_element_type=jnp.float32)
        i_g = jax.nn.sigmoid(gates[:, 0:H])
        f_g = jax.nn.sigmoid(gates[:, H:2 * H])
        g_g = jnp.tanh(gates[:, 2 * H:3 * H])
        o_g = jax.nn.sigmoid(gates[:, 3 * H:4 * H])
        c_new = f_g * c + i_g * g_g
        h_new = o_g * jnp.tanh(c_new)

        # PyTorch `continue` semantics: skipped step leaves (h, c) untouched and
        # its output row zero. a is exactly 0.0 or 1.0 -> blend is exact.
        h = a * h_new + (1.0 - a) * h
        c = a * c_new + (1.0 - a) * c

        dec4att = jnp.dot(h, wdec, preferred_element_type=jnp.float32) + bdec   # (B, A)
        t = jnp.tanh(enc4att + dec4att[:, None, :])                             # (B, Lp, A)
        # att_linear has out_features == 1: VPU multiply + cross-lane reduce
        e = jnp.sum(t * wattT, axis=-1) + batt                                  # (B, Lp)
        out_ref[i] = a * e

    hout_ref[...] = h
    cout_ref[...] = c


# ----------------------------------------------------------------------------
# Wrapper
# ----------------------------------------------------------------------------
def summarizer_decoder_forward(y, enc, params, dec_len):
    """y: (B, dec_len, L) mask, enc: (B, L, 768). Returns (outputs, (h, c))."""
    B, _, L = y.shape
    H = params["wbr"].shape[-1]

    # Lane-dense padding of the encoder-length axis (output last dim -> 128-mult).
    Lp = ((L + LANE - 1) // LANE) * LANE
    y_p = jnp.pad(y, ((0, 0), (0, 0), (0, Lp - L)))
    enc_p = jnp.pad(enc, ((0, 0), (0, Lp - L), (0, 0)))

    # Per-step "any mask active" flags -> SMEM scalar loads inside the kernel.
    active = jnp.any(jnp.sum(y, axis=-1) > 0.0, axis=0).astype(jnp.float32)   # (dec_len,)

    vmem = pl.BlockSpec(memory_space=pltpu.MemorySpace.VMEM)
    smem = pl.BlockSpec(memory_space=pltpu.MemorySpace.SMEM)

    args = (
        active, y_p, enc_p,
        params["wbr"], params["bbr"],
        params["wih"], params["bih"], params["whh"], params["bhh"],
        params["wenc"], params["benc"],
        params["wdec"], params["bdec"],
        jnp.transpose(params["watt"]),    # (A, 1) -> (1, A) for the VPU reduce
        params["batt"],
    )

    outT, h, c = pl.pallas_call(
        _summarizer_decoder_kernel,
        out_shape=(
            jax.ShapeDtypeStruct((dec_len, B, Lp), jnp.float32),
            jax.ShapeDtypeStruct((B, H), jnp.float32),
            jax.ShapeDtypeStruct((B, H), jnp.float32),
        ),
        in_specs=[smem] + [vmem] * (len(args) - 1),
        out_specs=(vmem, vmem, vmem),
    )(*args)

    outputs = jnp.transpose(outT, (1, 0, 2))[:, :, :L]   # (B, dec_len, L)
    return outputs, (h, c)


# ----------------------------------------------------------------------------
# Deterministic parameter init (xavier-uniform weights, small uniform biases)
# ----------------------------------------------------------------------------
def _xavier(key, fan_in, fan_out):
    bound = float(np.sqrt(6.0 / (fan_in + fan_out)))
    return jax.random.uniform(key, (fan_in, fan_out), jnp.float32, -bound, bound)


def _bias(key, fan_in, n):
    bound = 1.0 / float(np.sqrt(fan_in))
    return jax.random.uniform(key, (1, n), jnp.float32, -bound, bound)


def init_params(key, hidden_size, att_hidden_size):
    D, H, A = BERT_HIDDEN_SIZE, hidden_size, att_hidden_size
    ks = jax.random.split(key, 12)
    return {
        "wbr": _xavier(ks[0], D, H),        "bbr": _bias(ks[1], D, H),
        "wih": _xavier(ks[2], D, 4 * H),    "bih": _bias(ks[3], H, 4 * H),
        "whh": _xavier(ks[4], H, 4 * H),    "bhh": _bias(ks[5], H, 4 * H),
        "wenc": _xavier(ks[6], D, A),       "benc": _bias(ks[7], D, A),
        "wdec": _xavier(ks[8], H, A),       "bdec": _bias(ks[9], H, A),
        "watt": _xavier(ks[10], A, 1),      "batt": _bias(ks[11], A, 1),
    }


# ----------------------------------------------------------------------------
# Pure-JAX reference (mirrors the PyTorch forward exactly; HIGHEST precision)
# ----------------------------------------------------------------------------
def reference_forward(y, enc, p, dec_len):
    HIGH = lax.Precision.HIGHEST
    B, _, L = y.shape
    H = p["wbr"].shape[-1]
    h = jnp.dot(enc[:, 0, :], p["wbr"], precision=HIGH) + p["bbr"][0]
    c = h
    outputs = jnp.zeros((B, dec_len, L), jnp.float32)
    enc4att = jnp.einsum("bld,da->bla", enc, p["wenc"], precision=HIGH) + p["benc"][0]
    for i in range(dec_len):
        mask = y[:, i, :]
        msum = mask.sum(-1)
        if not bool((msum > 0).any()):
            continue
        hsum = jnp.einsum("bl,bld->bd", mask, enc, precision=HIGH)
        inp = hsum / (msum[:, None] + 1e-30)
        gates = (jnp.dot(inp, p["wih"], precision=HIGH) + p["bih"][0]
                 + jnp.dot(h, p["whh"], precision=HIGH) + p["bhh"][0])
        i_g = jax.nn.sigmoid(gates[:, :H])
        f_g = jax.nn.sigmoid(gates[:, H:2 * H])
        g_g = jnp.tanh(gates[:, 2 * H:3 * H])
        o_g = jax.nn.sigmoid(gates[:, 3 * H:])
        c = f_g * c + i_g * g_g
        h = o_g * jnp.tanh(c)
        dec4att = jnp.dot(h, p["wdec"], precision=HIGH) + p["bdec"][0]
        t = jnp.tanh(enc4att + dec4att[:, None, :])
        e = jnp.einsum("bla,ao->blo", t, p["watt"], precision=HIGH)[..., 0] + p["batt"][0]
        outputs = outputs.at[:, i, :].set(e)
    return outputs, (h, c)


# ----------------------------------------------------------------------------
if __name__ == "__main__":
    B, L, dec_len = 2, 16, 8
    hidden_size, att_hidden_size = 32, 32

    key = jax.random.PRNGKey(0)
    k_enc, k_y, k_p = jax.random.split(key, 3)

    enc = jax.random.normal(k_enc, (B, L, BERT_HIDDEN_SIZE), jnp.float32)
    # y acts as a (hard) selection mask over encoder positions.
    y = (jax.random.uniform(k_y, (B, dec_len, L)) > 0.6).astype(jnp.float32)
    # make one decode step fully empty to exercise the skip ("continue") branch
    y = y.at[:, 3, :].set(0.0)

    params = init_params(k_p, hidden_size, att_hidden_size)

    outputs, (h, c) = summarizer_decoder_forward(y, enc, params, dec_len)
    jax.block_until_ready((outputs, h, c))

    ref_out, (ref_h, ref_c) = reference_forward(y, enc, params, dec_len)
    np.testing.assert_allclose(np.asarray(outputs), np.asarray(ref_out),
                               rtol=5e-3, atol=5e-3)
    np.testing.assert_allclose(np.asarray(h), np.asarray(ref_h),
                               rtol=5e-3, atol=5e-3)
    np.testing.assert_allclose(np.asarray(c), np.asarray(ref_c),
                               rtol=5e-3, atol=5e-3)

    print("KERNEL_OK")
</pallas_src>

<mosaic_0001>
module attributes {stable_mosaic.version = 11 : i64} {
  func.func @_summarizer_decoder_kernel(%arg0: memref<8xf32, #tpu.memory_space<smem>>, %arg1: memref<2x8x128xf32, #tpu.memory_space<vmem>>, %arg2: memref<2x128x768xf32, #tpu.memory_space<vmem>>, %arg3: memref<768x32xf32, #tpu.memory_space<vmem>>, %arg4: memref<1x32xf32, #tpu.memory_space<vmem>>, %arg5: memref<768x128xf32, #tpu.memory_space<vmem>>, %arg6: memref<1x128xf32, #tpu.memory_space<vmem>>, %arg7: memref<32x128xf32, #tpu.memory_space<vmem>>, %arg8: memref<1x128xf32, #tpu.memory_space<vmem>>, %arg9: memref<768x32xf32, #tpu.memory_space<vmem>>, %arg10: memref<1x32xf32, #tpu.memory_space<vmem>>, %arg11: memref<32x32xf32, #tpu.memory_space<vmem>>, %arg12: memref<1x32xf32, #tpu.memory_space<vmem>>, %arg13: memref<1x32xf32, #tpu.memory_space<vmem>>, %arg14: memref<1x1xf32, #tpu.memory_space<vmem>>, %arg15: memref<8x2x128xf32, #tpu.memory_space<vmem>>, %arg16: memref<2x32xf32, #tpu.memory_space<vmem>>, %arg17: memref<2x32xf32, #tpu.memory_space<vmem>>) attributes {dimension_semantics = [], scalar_prefetch = 0 : i64, scratch_operands = 0 : i64, tpu.core_type = #tpu.core_type<tc>} {
    %c0 = arith.constant 0 : index
    %c0_0 = arith.constant 0 : index
    %c0_1 = arith.constant 0 : index
    %0 = vector.load %arg2[%c0, %c0_0, %c0_1] : memref<2x128x768xf32, #tpu.memory_space<vmem>>, vector<2x128x768xf32>
    %c0_2 = arith.constant 0 : index
    %c0_3 = arith.constant 0 : index
    %c0_4 = arith.constant 0 : index
    %1 = vector.load %arg1[%c0_2, %c0_3, %c0_4] : memref<2x8x128xf32, #tpu.memory_space<vmem>>, vector<2x8x128xf32>
    %2 = vector.extract_strided_slice %0 {offsets = [0, 0, 0], sizes = [2, 1, 768], strides = [1, 1, 1]} : vector<2x128x768xf32> to vector<2x1x768xf32>
    %3 = vector.shape_cast %2 : vector<2x1x768xf32> to vector<2x768xf32>
    %c0_5 = arith.constant 0 : index
    %c0_6 = arith.constant 0 : index
    %4 = vector.load %arg3[%c0_5, %c0_6] : memref<768x32xf32, #tpu.memory_space<vmem>>, vector<768x32xf32>
    %cst = arith.constant dense<0.000000e+00> : vector<2x32xf32>
    %5 = tpu.matmul %3, %4, %cst {dimension_numbers = #tpu.dot_dimension_numbers<[1], [0], [0], [1], [0, 0, 1, 1], [], []>} : vector<2x768xf32>, vector<768x32xf32>, vector<2x32xf32> -> vector<2x32xf32>
    %c0_7 = arith.constant 0 : index
    %c0_8 = arith.constant 0 : index
    %6 = vector.load %arg4[%c0_7, %c0_8] : memref<1x32xf32, #tpu.memory_space<vmem>>, vector<1x32xf32>
    %7 = vector.broadcast %6 : vector<1x32xf32> to vector<2x32xf32>
    %8 = arith.addf %5, %7 : vector<2x32xf32>
    %cst_9 = arith.constant dense<0.000000e+00> : vector<2x8xf32>
    %9 = vector.multi_reduction <add>, %1, %cst_9 [2] : vector<2x8x128xf32> to vector<2x8xf32>
    %10 = vector.shape_cast %9 : vector<2x8xf32> to vector<2x8x1xf32>
    "tpu.trace_start"() <{level = 10 : i32, message = "btl,bld->btd"}> : () -> ()
    %cst_10 = arith.constant dense<0.000000e+00> : vector<2x8x768xf32>
    %11 = tpu.matmul %1, %0, %cst_10 {dimension_numbers = #tpu.dot_dimension_numbers<[2], [1], [1], [2], [0, 0, 0, 1, 1, 2], [0], [0]>} : vector<2x8x128xf32>, vector<2x128x768xf32>, vector<2x8x768xf32> -> vector<2x8x768xf32>
    "tpu.trace_stop"() : () -> ()
    %cst_11 = arith.constant 1.000000e-30 : f32
    %12 = vector.broadcast %cst_11 : f32 to vector<2x8x1xf32>
    %13 = arith.addf %10, %12 : vector<2x8x1xf32>
    %14 = vector.broadcast %13 : vector<2x8x1xf32> to vector<2x8x768xf32>
    %15 = arith.divf %11, %14 : vector<2x8x768xf32>
    %16 = vector.shape_cast %15 : vector<2x8x768xf32> to vector<16x768xf32>
    %c0_12 = arith.constant 0 : index
    %c0_13 = arith.constant 0 : index
    %17 = vector.load %arg5[%c0_12, %c0_13] : memref<768x128xf32, #tpu.memory_space<vmem>>, vector<768x128xf32>
    %cst_14 = arith.constant dense<0.000000e+00> : vector<16x128xf32>
    %18 = tpu.matmul %16, %17, %cst_14 {dimension_numbers = #tpu.dot_dimension_numbers<[1], [0], [0], [1], [0, 0, 1, 1], [], []>} : vector<16x768xf32>, vector<768x128xf32>, vector<16x128xf32> -> vector<16x128xf32>
    %c0_15 = arith.constant 0 : index
    %c0_16 = arith.constant 0 : index
    %19 = vector.load %arg6[%c0_15, %c0_16] : memref<1x128xf32, #tpu.memory_space<vmem>>, vector<1x128xf32>
    %20 = vector.broadcast %19 : vector<1x128xf32> to vector<16x128xf32>
    %21 = arith.addf %18, %20 : vector<16x128xf32>
    %c0_17 = arith.constant 0 : index
    %c0_18 = arith.constant 0 : index
    %22 = vector.load %arg8[%c0_17, %c0_18] : memref<1x128xf32, #tpu.memory_space<vmem>>, vector<1x128xf32>
    %23 = vector.broadcast %22 : vector<1x128xf32> to vector<16x128xf32>
    %24 = arith.addf %21, %23 : vector<16x128xf32>
    %25 = vector.shape_cast %24 : vector<16x128xf32> to vector<2x8x128xf32>
    %26 = vector.shape_cast %0 : vector<2x128x768xf32> to vector<256x768xf32>
    %c0_19 = arith.constant 0 : index
    %c0_20 = arith.constant 0 : index
    %27 = vector.load %arg9[%c0_19, %c0_20] : memref<768x32xf32, #tpu.memory_space<vmem>>, vector<768x32xf32>
    %cst_21 = arith.constant dense<0.000000e+00> : vector<256x32xf32>
    %28 = tpu.matmul %26, %27, %cst_21 {dimension_numbers = #tpu.dot_dimension_numbers<[1], [0], [0], [1], [0, 0, 1, 1], [], []>} : vector<256x768xf32>, vector<768x32xf32>, vector<256x32xf32> -> vector<256x32xf32>
    %c0_22 = arith.constant 0 : index
    %c0_23 = arith.constant 0 : index
    %29 = vector.load %arg10[%c0_22, %c0_23] : memref<1x32xf32, #tpu.memory_space<vmem>>, vector<1x32xf32>
    %30 = vector.broadcast %29 : vector<1x32xf32> to vector<256x32xf32>
    %31 = arith.addf %28, %30 : vector<256x32xf32>
    %32 = vector.shape_cast %31 : vector<256x32xf32> to vector<2x128x32xf32>
    %c0_24 = arith.constant 0 : index
    %c0_25 = arith.constant 0 : index
    %33 = vector.load %arg7[%c0_24, %c0_25] : memref<32x128xf32, #tpu.memory_space<vmem>>, vector<32x128xf32>
    %c0_26 = arith.constant 0 : index
    %c0_27 = arith.constant 0 : index
    %34 = vector.load %arg11[%c0_26, %c0_27] : memref<32x32xf32, #tpu.memory_space<vmem>>, vector<32x32xf32>
    %c0_28 = arith.constant 0 : index
    %c0_29 = arith.constant 0 : index
    %35 = vector.load %arg12[%c0_28, %c0_29] : memref<1x32xf32, #tpu.memory_space<vmem>>, vector<1x32xf32>
    %c0_30 = arith.constant 0 : index
    %c0_31 = arith.constant 0 : index
    %36 = vector.load %arg13[%c0_30, %c0_31] : memref<1x32xf32, #tpu.memory_space<vmem>>, vector<1x32xf32>
    %c0_32 = arith.constant 0 : index
    %c0_33 = arith.constant 0 : index
    %37 = vector.load %arg14[%c0_32, %c0_33] : memref<1x1xf32, #tpu.memory_space<vmem>>, vector<1x1xf32>
    %c0_34 = arith.constant 0 : index
    %38 = memref.load %arg0[%c0_34] : memref<8xf32, #tpu.memory_space<smem>>
    %39 = vector.extract_strided_slice %25 {offsets = [0, 0, 0], sizes = [2, 1, 128], strides = [1, 1, 1]} : vector<2x8x128xf32> to vector<2x1x128xf32>
    %40 = vector.shape_cast %39 : vector<2x1x128xf32> to vector<2x128xf32>
    %cst_35 = arith.constant dense<0.000000e+00> : vector<2x128xf32>
    %41 = tpu.matmul %8, %33, %cst_35 {dimension_numbers = #tpu.dot_dimension_numbers<[1], [0], [0], [1], [0, 0, 1, 1], [], []>} : vector<2x32xf32>, vector<32x128xf32>, vector<2x128xf32> -> vector<2x128xf32>
    %42 = arith.addf %40, %41 : vector<2x128xf32>
    %43 = vector.extract_strided_slice %42 {offsets = [0, 0], sizes = [2, 32], strides = [1, 1]} : vector<2x128xf32> to vector<2x32xf32>
    %44 = arith.negf %43 : vector<2x32xf32>
    %45 = math.exp %44 : vector<2x32xf32>
    %cst_36 = arith.constant 1.000000e+00 : f32
    %46 = vector.broadcast %cst_36 : f32 to vector<2x32xf32>
    %47 = arith.addf %46, %45 : vector<2x32xf32>
    %48 = arith.divf %46, %47 : vector<2x32xf32>
    %49 = vector.extract_strided_slice %42 {offsets = [0, 32], sizes = [2, 32], strides = [1, 1]} : vector<2x128xf32> to vector<2x32xf32>
    %50 = arith.negf %49 : vector<2x32xf32>
    %51 = math.exp %50 : vector<2x32xf32>
    %cst_37 = arith.constant 1.000000e+00 : f32
    %52 = vector.broadcast %cst_37 : f32 to vector<2x32xf32>
    %53 = arith.addf %52, %51 : vector<2x32xf32>
    %54 = arith.divf %52, %53 : vector<2x32xf32>
    %55 = vector.extract_strided_slice %42 {offsets = [0, 64], sizes = [2, 32], strides = [1, 1]} : vector<2x128xf32> to vector<2x32xf32>
    %56 = math.tanh %55 : vector<2x32xf32>
    %57 = vector.extract_strided_slice %42 {offsets = [0, 96], sizes = [2, 32], strides = [1, 1]} : vector<2x128xf32> to vector<2x32xf32>
    %58 = arith.negf %57 : vector<2x32xf32>
    %59 = math.exp %58 : vector<2x32xf32>
    %cst_38 = arith.constant 1.000000e+00 : f32
    %60 = vector.broadcast %cst_38 : f32 to vector<2x32xf32>
    %61 = arith.addf %60, %59 : vector<2x32xf32>
    %62 = arith.divf %60, %61 : vector<2x32xf32>
    %63 = arith.mulf %54, %8 : vector<2x32xf32>
    %64 = arith.mulf %48, %56 : vector<2x32xf32>
    %65 = arith.addf %63, %64 : vector<2x32xf32>
    %66 = math.tanh %65 : vector<2x32xf32>
    %67 = arith.mulf %62, %66 : vector<2x32xf32>
    %68 = vector.broadcast %38 : f32 to vector<2x32xf32>
    %69 = arith.mulf %68, %67 : vector<2x32xf32>
    %cst_39 = arith.constant 1.000000e+00 : f32
    %70 = arith.subf %cst_39, %38 : f32
    %71 = vector.broadcast %70 : f32 to vector<2x32xf32>
    %72 = arith.mulf %71, %8 : vector<2x32xf32>
    %73 = arith.addf %69, %72 : vector<2x32xf32>
    %74 = vector.broadcast %38 : f32 to vector<2x32xf32>
    %75 = arith.mulf %74, %65 : vector<2x32xf32>
    %cst_40 = arith.constant 1.000000e+00 : f32
    %76 = arith.subf %cst_40, %38 : f32
    %77 = vector.broadcast %76 : f32 to vector<2x32xf32>
    %78 = arith.mulf %77, %8 : vector<2x32xf32>
    %79 = arith.addf %75, %78 : vector<2x32xf32>
    %cst_41 = arith.constant dense<0.000000e+00> : vector<2x32xf32>
    %80 = tpu.matmul %73, %34, %cst_41 {dimension_numbers = #tpu.dot_dimension_numbers<[1], [0], [0], [1], [0, 0, 1, 1], [], []>} : vector<2x32xf32>, vector<32x32xf32>, vector<2x32xf32> -> vector<2x32xf32>
    %81 = vector.broadcast %35 : vector<1x32xf32> to vector<2x32xf32>
    %82 = arith.addf %80, %81 : vector<2x32xf32>
    %83 = vector.shape_cast %82 : vector<2x32xf32> to vector<2x1x32xf32>
    %84 = vector.broadcast %83 : vector<2x1x32xf32> to vector<2x128x32xf32>
    %85 = arith.addf %32, %84 : vector<2x128x32xf32>
    %86 = math.tanh %85 : vector<2x128x32xf32>
    %87 = vector.shape_cast %36 : vector<1x32xf32> to vector<1x1x32xf32>
    %88 = vector.broadcast %87 : vector<1x1x32xf32> to vector<2x128x32xf32>
    %89 = arith.mulf %86, %88 : vector<2x128x32xf32>
    %cst_42 = arith.constant dense<0.000000e+00> : vector<2x128xf32>
    %90 = vector.multi_reduction <add>, %89, %cst_42 [2] : vector<2x128x32xf32> to vector<2x128xf32>
    %91 = vector.broadcast %37 : vector<1x1xf32> to vector<2x128xf32>
    %92 = arith.addf %90, %91 : vector<2x128xf32>
    %93 = vector.broadcast %38 : f32 to vector<2x128xf32>
    %94 = arith.mulf %93, %92 : vector<2x128xf32>
    %c0_43 = arith.constant 0 : index
    %c0_44 = arith.constant 0 : index
    %c0_45 = arith.constant 0 : index
    %95 = vector.load %arg15[%c0_43, %c0_44, %c0_45] : memref<8x2x128xf32, #tpu.memory_space<vmem>>, vector<1x2x128xf32>
    %96 = vector.shape_cast %95 : vector<1x2x128xf32> to vector<2x128xf32>
    %97 = vector.shape_cast %94 : vector<2x128xf32> to vector<1x2x128xf32>
    tpu.vector_store %arg15[%c0_43, %c0_44, %c0_45], %97 {strides = array<i32>} : memref<8x2x128xf32, #tpu.memory_space<vmem>>, vector<1x2x128xf32>,
    %c1 = arith.constant 1 : index
    %98 = memref.load %arg0[%c1] : memref<8xf32, #tpu.memory_space<smem>>
    %99 = vector.extract_strided_slice %25 {offsets = [0, 1, 0], sizes = [2, 1, 128], strides = [1, 1, 1]} : vector<2x8x128xf32> to vector<2x1x128xf32>
    %100 = vector.shape_cast %99 : vector<2x1x128xf32> to vector<2x128xf32>
    %cst_46 = arith.constant dense<0.000000e+00> : vector<2x128xf32>
    %101 = tpu.matmul %73, %33, %cst_46 {dimension_numbers = #tpu.dot_dimension_numbers<[1], [0], [0], [1], [0, 0, 1, 1], [], []>} : vector<2x32xf32>, vector<32x128xf32>, vector<2x128xf32> -> vector<2x128xf32>
    %102 = arith.addf %100, %101 : vector<2x128xf32>
    %103 = vector.extract_strided_slice %102 {offsets = [0, 0], sizes = [2, 32], strides = [1, 1]} : vector<2x128xf32> to vector<2x32xf32>
    %104 = arith.negf %103 : vector<2x32xf32>
    %105 = math.exp %104 : vector<2x32xf32>
    %cst_47 = arith.constant 1.000000e+00 : f32
    %106 = vector.broadcast %cst_47 : f32 to vector<2x32xf32>
    %107 = arith.addf %106, %105 : vector<2x32xf32>
    %108 = arith.divf %106, %107 : vector<2x32xf32>
    %109 = vector.extract_strided_slice %102 {offsets = [0, 32], sizes = [2, 32], strides = [1, 1]} : vector<2x128xf32> to vector<2x32xf32>
    %110 = arith.negf %109 : vector<2x32xf32>
    %111 = math.exp %110 : vector<2x32xf32>
    %cst_48 = arith.constant 1.000000e+00 : f32
    %112 = vector.broadcast %cst_48 : f32 to vector<2x32xf32>
    %113 = arith.addf %112, %111 : vector<2x32xf32>
    %114 = arith.divf %112, %113 : vector<2x32xf32>
    %115 = vector.extract_strided_slice %102 {offsets = [0, 64], sizes = [2, 32], strides = [1, 1]} : vector<2x128xf32> to vector<2x32xf32>
    %116 = math.tanh %115 : vector<2x32xf32>
    %117 = vector.extract_strided_slice %102 {offsets = [0, 96], sizes = [2, 32], strides = [1, 1]} : vector<2x128xf32> to vector<2x32xf32>
    %118 = arith.negf %117 : vector<2x32xf32>
    %119 = math.exp %118 : vector<2x32xf32>
    %cst_49 = arith.constant 1.000000e+00 : f32
    %120 = vector.broadcast %cst_49 : f32 to vector<2x32xf32>
    %121 = arith.addf %120, %119 : vector<2x32xf32>
    %122 = arith.divf %120, %121 : vector<2x32xf32>
    %123 = arith.mulf %114, %79 : vector<2x32xf32>
    %124 = arith.mulf %108, %116 : vector<2x32xf32>
    %125 = arith.addf %123, %124 : vector<2x32xf32>
    %126 = math.tanh %125 : vector<2x32xf32>
    %127 = arith.mulf %122, %126 : vector<2x32xf32>
    %128 = vector.broadcast %98 : f32 to vector<2x32xf32>
    %129 = arith.mulf %128, %127 : vector<2x32xf32>
    %cst_50 = arith.constant 1.000000e+00 : f32
    %130 = arith.subf %cst_50, %98 : f32
    %131 = vector.broadcast %130 : f32 to vector<2x32xf32>
    %132 = arith.mulf %131, %73 : vector<2x32xf32>
    %133 = arith.addf %129, %132 : vector<2x32xf32>
    %134 = vector.broadcast %98 : f32 to vector<2x32xf32>
    %135 = arith.mulf %134, %125 : vector<2x32xf32>
    %cst_51 = arith.constant 1.000000e+00 : f32
    %136 = arith.subf %cst_51, %98 : f32
    %137 = vector.broadcast %136 : f32 to vector<2x32xf32>
    %138 = arith.mulf %137, %79 : vector<2x32xf32>
    %139 = arith.addf %135, %138 : vector<2x32xf32>
    %cst_52 = arith.constant dense<0.000000e+00> : vector<2x32xf32>
    %140 = tpu.matmul %133, %34, %cst_52 {dimension_numbers = #tpu.dot_dimension_numbers<[1], [0], [0], [1], [0, 0, 1, 1], [], []>} : vector<2x32xf32>, vector<32x32xf32>, vector<2x32xf32> -> vector<2x32xf32>
    %141 = vector.broadcast %35 : vector<1x32xf32> to vector<2x32xf32>
    %142 = arith.addf %140, %141 : vector<2x32xf32>
    %143 = vector.shape_cast %142 : vector<2x32xf32> to vector<2x1x32xf32>
    %144 = vector.broadcast %143 : vector<2x1x32xf32> to vector<2x128x32xf32>
    %145 = arith.addf %32, %144 : vector<2x128x32xf32>
    %146 = math.tanh %145 : vector<2x128x32xf32>
    %147 = vector.shape_cast %36 : vector<1x32xf32> to vector<1x1x32xf32>
    %148 = vector.broadcast %147 : vector<1x1x32xf32> to vector<2x128x32xf32>
    %149 = arith.mulf %146, %148 : vector<2x128x32xf32>
    %cst_53 = arith.constant dense<0.000000e+00> : vector<2x128xf32>
    %150 = vector.multi_reduction <add>, %149, %cst_53 [2] : vector<2x128x32xf32> to vector<2x128xf32>
    %151 = vector.broadcast %37 : vector<1x1xf32> to vector<2x128xf32>
    %152 = arith.addf %150, %151 : vector<2x128xf32>
    %153 = vector.broadcast %98 : f32 to vector<2x128xf32>
    %154 = arith.mulf %153, %152 : vector<2x128xf32>
    %c1_54 = arith.constant 1 : index
    %c0_55 = arith.constant 0 : index
    %c0_56 = arith.constant 0 : index
    %155 = vector.load %arg15[%c1_54, %c0_55, %c0_56] : memref<8x2x128xf32, #tpu.memory_space<vmem>>, vector<1x2x128xf32>
    %156 = vector.shape_cast %155 : vector<1x2x128xf32> to vector<2x128xf32>
    %157 = vector.shape_cast %154 : vector<2x128xf32> to vector<1x2x128xf32>
    tpu.vector_store %arg15[%c1_54, %c0_55, %c0_56], %157 {strides = array<i32>} : memref<8x2x128xf32, #tpu.memory_space<vmem>>, vector<1x2x128xf32>,
    %c2 = arith.constant 2 : index
    %158 = memref.load %arg0[%c2] : memref<8xf32, #tpu.memory_space<smem>>
    %159 = vector.extract_strided_slice %25 {offsets = [0, 2, 0], sizes = [2, 1, 128], strides = [1, 1, 1]} : vector<2x8x128xf32> to vector<2x1x128xf32>
    %160 = vector.shape_cast %159 : vector<2x1x128xf32> to vector<2x128xf32>
    %cst_57 = arith.constant dense<0.000000e+00> : vector<2x128xf32>
    %161 = tpu.matmul %133, %33, %cst_57 {dimension_numbers = #tpu.dot_dimension_numbers<[1], [0], [0], [1], [0, 0, 1, 1], [], []>} : vector<2x32xf32>, vector<32x128xf32>, vector<2x128xf32> -> vector<2x128xf32>
    %162 = arith.addf %160, %161 : vector<2x128xf32>
    %163 = vector.extract_strided_slice %162 {offsets = [0, 0], sizes = [2, 32], strides = [1, 1]} : vector<2x128xf32> to vector<2x32xf32>
    %164 = arith.negf %163 : vector<2x32xf32>
    %165 = math.exp %164 : vector<2x32xf32>
    %cst_58 = arith.constant 1.000000e+00 : f32
    %166 = vector.broadcast %cst_58 : f32 to vector<2x32xf32>
    %167 = arith.addf %166, %165 : vector<2x32xf32>
    %168 = arith.divf %166, %167 : vector<2x32xf32>
    %169 = vector.extract_strided_slice %162 {offsets = [0, 32], sizes = [2, 32], strides = [1, 1]} : vector<2x128xf32> to vector<2x32xf32>
    %170 = arith.negf %169 : vector<2x32xf32>
    %171 = math.exp %170 : vector<2x32xf32>
    %cst_59 = arith.constant 1.000000e+00 : f32
    %172 = vector.broadcast %cst_59 : f32 to vector<2x32xf32>
    %173 = arith.addf %172, %171 : vector<2x32xf32>
    %174 = arith.divf %172, %173 : vector<2x32xf32>
    %175 = vector.extract_strided_slice %162 {offsets = [0, 64], sizes = [2, 32], strides = [1, 1]} : vector<2x128xf32> to vector<2x32xf32>
    %176 = math.tanh %175 : vector<2x32xf32>
    %177 = vector.extract_strided_slice %162 {offsets = [0, 96], sizes = [2, 32], strides = [1, 1]} : vector<2x128xf32> to vector<2x32xf32>
    %178 = arith.negf %177 : vector<2x32xf32>
    %179 = math.exp %178 : vector<2x32xf32>
    %cst_60 = arith.constant 1.000000e+00 : f32
    %180 = vector.broadcast %cst_60 : f32 to vector<2x32xf32>
    %181 = arith.addf %180, %179 : vector<2x32xf32>
    %182 = arith.divf %180, %181 : vector<2x32xf32>
    %183 = arith.mulf %174, %139 : vector<2x32xf32>
    %184 = arith.mulf %168, %176 : vector<2x32xf32>
    %185 = arith.addf %183, %184 : vector<2x32xf32>
    %186 = math.tanh %185 : vector<2x32xf32>
    %187 = arith.mulf %182, %186 : vector<2x32xf32>
    %188 = vector.broadcast %158 : f32 to vector<2x32xf32>
    %189 = arith.mulf %188, %187 : vector<2x32xf32>
    %cst_61 = arith.constant 1.000000e+00 : f32
    %190 = arith.subf %cst_61, %158 : f32
    %191 = vector.broadcast %190 : f32 to vector<2x32xf32>
    %192 = arith.mulf %191, %133 : vector<2x32xf32>
    %193 = arith.addf %189, %192 : vector<2x32xf32>
    %194 = vector.broadcast %158 : f32 to vector<2x32xf32>
    %195 = arith.mulf %194, %185 : vector<2x32xf32>
    %cst_62 = arith.constant 1.000000e+00 : f32
    %196 = arith.subf %cst_62, %158 : f32
    %197 = vector.broadcast %196 : f32 to vector<2x32xf32>
    %198 = arith.mulf %197, %139 : vector<2x32xf32>
    %199 = arith.addf %195, %198 : vector<2x32xf32>
    %cst_63 = arith.constant dense<0.000000e+00> : vector<2x32xf32>
    %200 = tpu.matmul %193, %34, %cst_63 {dimension_numbers = #tpu.dot_dimension_numbers<[1], [0], [0], [1], [0, 0, 1, 1], [], []>} : vector<2x32xf32>, vector<32x32xf32>, vector<2x32xf32> -> vector<2x32xf32>
    %201 = vector.broadcast %35 : vector<1x32xf32> to vector<2x32xf32>
    %202 = arith.addf %200, %201 : vector<2x32xf32>
    %203 = vector.shape_cast %202 : vector<2x32xf32> to vector<2x1x32xf32>
    %204 = vector.broadcast %203 : vector<2x1x32xf32> to vector<2x128x32xf32>
    %205 = arith.addf %32, %204 : vector<2x128x32xf32>
    %206 = math.tanh %205 : vector<2x128x32xf32>
    %207 = vector.shape_cast %36 : vector<1x32xf32> to vector<1x1x32xf32>
    %208 = vector.broadcast %207 : vector<1x1x32xf32> to vector<2x128x32xf32>
    %209 = arith.mulf %206, %208 : vector<2x128x32xf32>
    %cst_64 = arith.constant dense<0.000000e+00> : vector<2x128xf32>
    %210 = vector.multi_reduction <add>, %209, %cst_64 [2] : vector<2x128x32xf32> to vector<2x128xf32>
    %211 = vector.broadcast %37 : vector<1x1xf32> to vector<2x128xf32>
    %212 = arith.addf %210, %211 : vector<2x128xf32>
    %213 = vector.broadcast %158 : f32 to vector<2x128xf32>
    %214 = arith.mulf %213, %212 : vector<2x128xf32>
    %c2_65 = arith.constant 2 : index
    %c0_66 = arith.constant 0 : index
    %c0_67 = arith.constant 0 : index
    %215 = vector.load %arg15[%c2_65, %c0_66, %c0_67] : memref<8x2x128xf32, #tpu.memory_space<vmem>>, vector<1x2x128xf32>
    %216 = vector.shape_cast %215 : vector<1x2x128xf32> to vector<2x128xf32>
    %217 = vector.shape_cast %214 : vector<2x128xf32> to vector<1x2x128xf32>
    tpu.vector_store %arg15[%c2_65, %c0_66, %c0_67], %217 {strides = array<i32>} : memref<8x2x128xf32, #tpu.memory_space<vmem>>, vector<1x2x128xf32>,
    %c3 = arith.constant 3 : index
    %218 = memref.load %arg0[%c3] : memref<8xf32, #tpu.memory_space<smem>>
    %219 = vector.extract_strided_slice %25 {offsets = [0, 3, 0], sizes = [2, 1, 128], strides = [1, 1, 1]} : vector<2x8x128xf32> to vector<2x1x128xf32>
    %220 = vector.shape_cast %219 : vector<2x1x128xf32> to vector<2x128xf32>
    %cst_68 = arith.constant dense<0.000000e+00> : vector<2x128xf32>
    %221 = tpu.matmul %193, %33, %cst_68 {dimension_numbers = #tpu.dot_dimension_numbers<[1], [0], [0], [1], [0, 0, 1, 1], [], []>} : vector<2x32xf32>, vector<32x128xf32>, vector<2x128xf32> -> vector<2x128xf32>
    %222 = arith.addf %220, %221 : vector<2x128xf32>
    %223 = vector.extract_strided_slice %222 {offsets = [0, 0], sizes = [2, 32], strides = [1, 1]} : vector<2x128xf32> to vector<2x32xf32>
    %224 = arith.negf %223 : vector<2x32xf32>
    %225 = math.exp %224 : vector<2x32xf32>
    %cst_69 = arith.constant 1.000000e+00 : f32
    %226 = vector.broadcast %cst_69 : f32 to vector<2x32xf32>
    %227 = arith.addf %226, %225 : vector<2x32xf32>
    %228 = arith.divf %226, %227 : vector<2x32xf32>
    %229 = vector.extract_strided_slice %222 {offsets = [0, 32], sizes = [2, 32], strides = [1, 1]} : vector<2x128xf32> to vector<2x32xf32>
    %230 = arith.negf %229 : vector<2x32xf32>
    %231 = math.exp %230 : vector<2x32xf32>
    %cst_70 = arith.constant 1.000000e+00 : f32
    %232 = vector.broadcast %cst_70 : f32 to vector<2x32xf32>
    %233 = arith.addf %232, %231 : vector<2x32xf32>
    %234 = arith.divf %232, %233 : vector<2x32xf32>
    %235 = vector.extract_strided_slice %222 {offsets = [0, 64], sizes = [2, 32], strides = [1, 1]} : vector<2x128xf32> to vector<2x32xf32>
    %236 = math.tanh %235 : vector<2x32xf32>
    %237 = vector.extract_strided_slice %222 {offsets = [0, 96], sizes = [2, 32], strides = [1, 1]} : vector<2x128xf32> to vector<2x32xf32>
    %238 = arith.negf %237 : vector<2x32xf32>
    %239 = math.exp %238 : vector<2x32xf32>
    %cst_71 = arith.constant 1.000000e+00 : f32
    %240 = vector.broadcast %cst_71 : f32 to vector<2x32xf32>
    %241 = arith.addf %240, %239 : vector<2x32xf32>
    %242 = arith.divf %240, %241 : vector<2x32xf32>
    %243 = arith.mulf %234, %199 : vector<2x32xf32>
    %244 = arith.mulf %228, %236 : vector<2x32xf32>
    %245 = arith.addf %243, %244 : vector<2x32xf32>
    %246 = math.tanh %245 : vector<2x32xf32>
    %247 = arith.mulf %242, %246 : vector<2x32xf32>
    %248 = vector.broadcast %218 : f32 to vector<2x32xf32>
    %249 = arith.mulf %248, %247 : vector<2x32xf32>
    %cst_72 = arith.constant 1.000000e+00 : f32
    %250 = arith.subf %cst_72, %218 : f32
    %251 = vector.broadcast %250 : f32 to vector<2x32xf32>
    %252 = arith.mulf %251, %193 : vector<2x32xf32>
    %253 = arith.addf %249, %252 : vector<2x32xf32>
    %254 = vector.broadcast %218 : f32 to vector<2x32xf32>
    %255 = arith.mulf %254, %245 : vector<2x32xf32>
    %cst_73 = arith.constant 1.000000e+00 : f32
    %256 = arith.subf %cst_73, %218 : f32
    %257 = vector.broadcast %256 : f32 to vector<2x32xf32>
    %258 = arith.mulf %257, %199 : vector<2x32xf32>
    %259 = arith.addf %255, %258 : vector<2x32xf32>
    %cst_74 = arith.constant dense<0.000000e+00> : vector<2x32xf32>
    %260 = tpu.matmul %253, %34, %cst_74 {dimension_numbers = #tpu.dot_dimension_numbers<[1], [0], [0], [1], [0, 0, 1, 1], [], []>} : vector<2x32xf32>, vector<32x32xf32>, vector<2x32xf32> -> vector<2x32xf32>
    %261 = vector.broadcast %35 : vector<1x32xf32> to vector<2x32xf32>
    %262 = arith.addf %260, %261 : vector<2x32xf32>
    %263 = vector.shape_cast %262 : vector<2x32xf32> to vector<2x1x32xf32>
    %264 = vector.broadcast %263 : vector<2x1x32xf32> to vector<2x128x32xf32>
    %265 = arith.addf %32, %264 : vector<2x128x32xf32>
    %266 = math.tanh %265 : vector<2x128x32xf32>
    %267 = vector.shape_cast %36 : vector<1x32xf32> to vector<1x1x32xf32>
    %268 = vector.broadcast %267 : vector<1x1x32xf32> to vector<2x128x32xf32>
    %269 = arith.mulf %266, %268 : vector<2x128x32xf32>
    %cst_75 = arith.constant dense<0.000000e+00> : vector<2x128xf32>
    %270 = vector.multi_reduction <add>, %269, %cst_75 [2] : vector<2x128x32xf32> to vector<2x128xf32>
    %271 = vector.broadcast %37 : vector<1x1xf32> to vector<2x128xf32>
    %272 = arith.addf %270, %271 : vector<2x128xf32>
    %273 = vector.broadcast %218 : f32 to vector<2x128xf32>
    %274 = arith.mulf %273, %272 : vector<2x128xf32>
    %c3_76 = arith.constant 3 : index
    %c0_77 = arith.constant 0 : index
    %c0_78 = arith.constant 0 : index
    %275 = vector.load %arg15[%c3_76, %c0_77, %c0_78] : memref<8x2x128xf32, #tpu.memory_space<vmem>>, vector<1x2x128xf32>
    %276 = vector.shape_cast %275 : vector<1x2x128xf32> to vector<2x128xf32>
    %277 = vector.shape_cast %274 : vector<2x128xf32> to vector<1x2x128xf32>
    tpu.vector_store %arg15[%c3_76, %c0_77, %c0_78], %277 {strides = array<i32>} : memref<8x2x128xf32, #tpu.memory_space<vmem>>, vector<1x2x128xf32>,
    %c4 = arith.constant 4 : index
    %278 = memref.load %arg0[%c4] : memref<8xf32, #tpu.memory_space<smem>>
    %279 = vector.extract_strided_slice %25 {offsets = [0, 4, 0], sizes = [2, 1, 128], strides = [1, 1, 1]} : vector<2x8x128xf32> to vector<2x1x128xf32>
    %280 = vector.shape_cast %279 : vector<2x1x128xf32> to vector<2x128xf32>
    %cst_79 = arith.constant dense<0.000000e+00> : vector<2x128xf32>
    %281 = tpu.matmul %253, %33, %cst_79 {dimension_numbers = #tpu.dot_dimension_numbers<[1], [0], [0], [1], [0, 0, 1, 1], [], []>} : vector<2x32xf32>, vector<32x128xf32>, vector<2x128xf32> -> vector<2x128xf32>
    %282 = arith.addf %280, %281 : vector<2x128xf32>
    %283 = vector.extract_strided_slice %282 {offsets = [0, 0], sizes = [2, 32], strides = [1, 1]} : vector<2x128xf32> to vector<2x32xf32>
    %284 = arith.negf %283 : vector<2x32xf32>
    %285 = math.exp %284 : vector<2x32xf32>
    %cst_80 = arith.constant 1.000000e+00 : f32
    %286 = vector.broadcast %cst_80 : f32 to vector<2x32xf32>
    %287 = arith.addf %286, %285 : vector<2x32xf32>
    %288 = arith.divf %286, %287 : vector<2x32xf32>
    %289 = vector.extract_strided_slice %282 {offsets = [0, 32], sizes = [2, 32], strides = [1, 1]} : vector<2x128xf32> to vector<2x32xf32>
    %290 = arith.negf %289 : vector<2x32xf32>
    %291 = math.exp %290 : vector<2x32xf32>
    %cst_81 = arith.constant 1.000000e+00 : f32
    %292 = vector.broadcast %cst_81 : f32 to vector<2x32xf32>
    %293 = arith.addf %292, %291 : vector<2x32xf32>
    %294 = arith.divf %292, %293 : vector<2x32xf32>
    %295 = vector.extract_strided_slice %282 {offsets = [0, 64], sizes = [2, 32], strides = [1, 1]} : vector<2x128xf32> to vector<2x32xf32>
    %296 = math.tanh %295 : vector<2x32xf32>
    %297 = vector.extract_strided_slice %282 {offsets = [0, 96], sizes = [2, 32], strides = [1, 1]} : vector<2x128xf32> to vector<2x32xf32>
    %298 = arith.negf %297 : vector<2x32xf32>
    %299 = math.exp %298 : vector<2x32xf32>
    %cst_82 = arith.constant 1.000000e+00 : f32
    %300 = vector.broadcast %cst_82 : f32 to vector<2x32xf32>
    %301 = arith.addf %300, %299 : vector<2x32xf32>
    %302 = arith.divf %300, %301 : vector<2x32xf32>
    %303 = arith.mulf %294, %259 : vector<2x32xf32>
    %304 = arith.mulf %288, %296 : vector<2x32xf32>
    %305 = arith.addf %303, %304 : vector<2x32xf32>
    %306 = math.tanh %305 : vector<2x32xf32>
    %307 = arith.mulf %302, %306 : vector<2x32xf32>
    %308 = vector.broadcast %278 : f32 to vector<2x32xf32>
    %309 = arith.mulf %308, %307 : vector<2x32xf32>
    %cst_83 = arith.constant 1.000000e+00 : f32
    %310 = arith.subf %cst_83, %278 : f32
    %311 = vector.broadcast %310 : f32 to vector<2x32xf32>
    %312 = arith.mulf %311, %253 : vector<2x32xf32>
    %313 = arith.addf %309, %312 : vector<2x32xf32>
    %314 = vector.broadcast %278 : f32 to vector<2x32xf32>
    %315 = arith.mulf %314, %305 : vector<2x32xf32>
    %cst_84 = arith.constant 1.000000e+00 : f32
    %316 = arith.subf %cst_84, %278 : f32
    %317 = vector.broadcast %316 : f32 to vector<2x32xf32>
    %318 = arith.mulf %317, %259 : vector<2x32xf32>
    %319 = arith.addf %315, %318 : vector<2x32xf32>
    %cst_85 = arith.constant dense<0.000000e+00> : vector<2x32xf32>
    %320 = tpu.matmul %313, %34, %cst_85 {dimension_numbers = #tpu.dot_dimension_numbers<[1], [0], [0], [1], [0, 0, 1, 1], [], []>} : vector<2x32xf32>, vector<32x32xf32>, vector<2x32xf32> -> vector<2x32xf32>
    %321 = vector.broadcast %35 : vector<1x32xf32> to vector<2x32xf32>
    %322 = arith.addf %320, %321 : vector<2x32xf32>
    %323 = vector.shape_cast %322 : vector<2x32xf32> to vector<2x1x32xf32>
    %324 = vector.broadcast %323 : vector<2x1x32xf32> to vector<2x128x32xf32>
    %325 = arith.addf %32, %324 : vector<2x128x32xf32>
    %326 = math.tanh %325 : vector<2x128x32xf32>
    %327 = vector.shape_cast %36 : vector<1x32xf32> to vector<1x1x32xf32>
    %328 = vector.broadcast %327 : vector<1x1x32xf32> to vector<2x128x32xf32>
    %329 = arith.mulf %326, %328 : vector<2x128x32xf32>
    %cst_86 = arith.constant dense<0.000000e+00> : vector<2x128xf32>
    %330 = vector.multi_reduction <add>, %329, %cst_86 [2] : vector<2x128x32xf32> to vector<2x128xf32>
    %331 = vector.broadcast %37 : vector<1x1xf32> to vector<2x128xf32>
    %332 = arith.addf %330, %331 : vector<2x128xf32>
    %333 = vector.broadcast %278 : f32 to vector<2x128xf32>
    %334 = arith.mulf %333, %332 : vector<2x128xf32>
    %c4_87 = arith.constant 4 : index
    %c0_88 = arith.constant 0 : index
    %c0_89 = arith.constant 0 : index
    %335 = vector.load %arg15[%c4_87, %c0_88, %c0_89] : memref<8x2x128xf32, #tpu.memory_space<vmem>>, vector<1x2x128xf32>
    %336 = vector.shape_cast %335 : vector<1x2x128xf32> to vector<2x128xf32>
    %337 = vector.shape_cast %334 : vector<2x128xf32> to vector<1x2x128xf32>
    tpu.vector_store %arg15[%c4_87, %c0_88, %c0_89], %337 {strides = array<i32>} : memref<8x2x128xf32, #tpu.memory_space<vmem>>, vector<1x2x128xf32>,
    %c5 = arith.constant 5 : index
    %338 = memref.load %arg0[%c5] : memref<8xf32, #tpu.memory_space<smem>>
    %339 = vector.extract_strided_slice %25 {offsets = [0, 5, 0], sizes = [2, 1, 128], strides = [1, 1, 1]} : vector<2x8x128xf32> to vector<2x1x128xf32>
    %340 = vector.shape_cast %339 : vector<2x1x128xf32> to vector<2x128xf32>
    %cst_90 = arith.constant dense<0.000000e+00> : vector<2x128xf32>
    %341 = tpu.matmul %313, %33, %cst_90 {dimension_numbers = #tpu.dot_dimension_numbers<[1], [0], [0], [1], [0, 0, 1, 1], [], []>} : vector<2x32xf32>, vector<32x128xf32>, vector<2x128xf32> -> vector<2x128xf32>
    %342 = arith.addf %340, %341 : vector<2x128xf32>
    %343 = vector.extract_strided_slice %342 {offsets = [0, 0], sizes = [2, 32], strides = [1, 1]} : vector<2x128xf32> to vector<2x32xf32>
    %344 = arith.negf %343 : vector<2x32xf32>
    %345 = math.exp %344 : vector<2x32xf32>
    %cst_91 = arith.constant 1.000000e+00 : f32
    %346 = vector.broadcast %cst_91 : f32 to vector<2x32xf32>
    %347 = arith.addf %346, %345 : vector<2x32xf32>
    %348 = arith.divf %346, %347 : vector<2x32xf32>
    %349 = vector.extract_strided_slice %342 {offsets = [0, 32], sizes = [2, 32], strides = [1, 1]} : vector<2x128xf32> to vector<2x32xf32>
    %350 = arith.negf %349 : vector<2x32xf32>
    %351 = math.exp %350 : vector<2x32xf32>
    %cst_92 = arith.constant 1.000000e+00 : f32
    %352 = vector.broadcast %cst_92 : f32 to vector<2x32xf32>
    %353 = arith.addf %352, %351 : vector<2x32xf32>
    %354 = arith.divf %352, %353 : vector<2x32xf32>
    %355 = vector.extract_strided_slice %342 {offsets = [0, 64], sizes = [2, 32], strides = [1, 1]} : vector<2x128xf32> to vector<2x32xf32>
    %356 = math.tanh %355 : vector<2x32xf32>
    %357 = vector.extract_strided_slice %342 {offsets = [0, 96], sizes = [2, 32], strides = [1, 1]} : vector<2x128xf32> to vector<2x32xf32>
    %358 = arith.negf %357 : vector<2x32xf32>
    %359 = math.exp %358 : vector<2x32xf32>
    %cst_93 = arith.constant 1.000000e+00 : f32
    %360 = vector.broadcast %cst_93 : f32 to vector<2x32xf32>
    %361 = arith.addf %360, %359 : vector<2x32xf32>
    %362 = arith.divf %360, %361 : vector<2x32xf32>
    %363 = arith.mulf %354, %319 : vector<2x32xf32>
    %364 = arith.mulf %348, %356 : vector<2x32xf32>
    %365 = arith.addf %363, %364 : vector<2x32xf32>
    %366 = math.tanh %365 : vector<2x32xf32>
    %367 = arith.mulf %362, %366 : vector<2x32xf32>
    %368 = vector.broadcast %338 : f32 to vector<2x32xf32>
    %369 = arith.mulf %368, %367 : vector<2x32xf32>
    %cst_94 = arith.constant 1.000000e+00 : f32
    %370 = arith.subf %cst_94, %338 : f32
    %371 = vector.broadcast %370 : f32 to vector<2x32xf32>
    %372 = arith.mulf %371, %313 : vector<2x32xf32>
    %373 = arith.addf %369, %372 : vector<2x32xf32>
    %374 = vector.broadcast %338 : f32 to vector<2x32xf32>
    %375 = arith.mulf %374, %365 : vector<2x32xf32>
    %cst_95 = arith.constant 1.000000e+00 : f32
    %376 = arith.subf %cst_95, %338 : f32
    %377 = vector.broadcast %376 : f32 to vector<2x32xf32>
    %378 = arith.mulf %377, %319 : vector<2x32xf32>
    %379 = arith.addf %375, %378 : vector<2x32xf32>
    %cst_96 = arith.constant dense<0.000000e+00> : vector<2x32xf32>
    %380 = tpu.matmul %373, %34, %cst_96 {dimension_numbers = #tpu.dot_dimension_numbers<[1], [0], [0], [1], [0, 0, 1, 1], [], []>} : vector<2x32xf32>, vector<32x32xf32>, vector<2x32xf32> -> vector<2x32xf32>
    %381 = vector.broadcast %35 : vector<1x32xf32> to vector<2x32xf32>
    %382 = arith.addf %380, %381 : vector<2x32xf32>
    %383 = vector.shape_cast %382 : vector<2x32xf32> to vector<2x1x32xf32>
    %384 = vector.broadcast %383 : vector<2x1x32xf32> to vector<2x128x32xf32>
    %385 = arith.addf %32, %384 : vector<2x128x32xf32>
    %386 = math.tanh %385 : vector<2x128x32xf32>
    %387 = vector.shape_cast %36 : vector<1x32xf32> to vector<1x1x32xf32>
    %388 = vector.broadcast %387 : vector<1x1x32xf32> to vector<2x128x32xf32>
    %389 = arith.mulf %386, %388 : vector<2x128x32xf32>
    %cst_97 = arith.constant dense<0.000000e+00> : vector<2x128xf32>
    %390 = vector.multi_reduction <add>, %389, %cst_97 [2] : vector<2x128x32xf32> to vector<2x128xf32>
    %391 = vector.broadcast %37 : vector<1x1xf32> to vector<2x128xf32>
    %392 = arith.addf %390, %391 : vector<2x128xf32>
    %393 = vector.broadcast %338 : f32 to vector<2x128xf32>
    %394 = arith.mulf %393, %392 : vector<2x128xf32>
    %c5_98 = arith.constant 5 : index
    %c0_99 = arith.constant 0 : index
    %c0_100 = arith.constant 0 : index
    %395 = vector.load %arg15[%c5_98, %c0_99, %c0_100] : memref<8x2x128xf32, #tpu.memory_space<vmem>>, vector<1x2x128xf32>
    %396 = vector.shape_cast %395 : vector<1x2x128xf32> to vector<2x128xf32>
    %397 = vector.shape_cast %394 : vector<2x128xf32> to vector<1x2x128xf32>
    tpu.vector_store %arg15[%c5_98, %c0_99, %c0_100], %397 {strides = array<i32>} : memref<8x2x128xf32, #tpu.memory_space<vmem>>, vector<1x2x128xf32>,
    %c6 = arith.constant 6 : index
    %398 = memref.load %arg0[%c6] : memref<8xf32, #tpu.memory_space<smem>>
    %399 = vector.extract_strided_slice %25 {offsets = [0, 6, 0], sizes = [2, 1, 128], strides = [1, 1, 1]} : vector<2x8x128xf32> to vector<2x1x128xf32>
    %400 = vector.shape_cast %399 : vector<2x1x128xf32> to vector<2x128xf32>
    %cst_101 = arith.constant dense<0.000000e+00> : vector<2x128xf32>
    %401 = tpu.matmul %373, %33, %cst_101 {dimension_numbers = #tpu.dot_dimension_numbers<[1], [0], [0], [1], [0, 0, 1, 1], [], []>} : vector<2x32xf32>, vector<32x128xf32>, vector<2x128xf32> -> vector<2x128xf32>
    %402 = arith.addf %400, %401 : vector<2x128xf32>
    %403 = vector.extract_strided_slice %402 {offsets = [0, 0], sizes = [2, 32], strides = [1, 1]} : vector<2x128xf32> to vector<2x32xf32>
    %404 = arith.negf %403 : vector<2x32xf32>
    %405 = math.exp %404 : vector<2x32xf32>
    %cst_102 = arith.constant 1.000000e+00 : f32
    %406 = vector.broadcast %cst_102 : f32 to vector<2x32xf32>
    %407 = arith.addf %406, %405 : vector<2x32xf32>
    %408 = arith.divf %406, %407 : vector<2x32xf32>
    %409 = vector.extract_strided_slice %402 {offsets = [0, 32], sizes = [2, 32], strides = [1, 1]} : vector<2x128xf32> to vector<2x32xf32>
    %410 = arith.negf %409 : vector<2x32xf32>
    %411 = math.exp %410 : vector<2x32xf32>
    %cst_103 = arith.constant 1.000000e+00 : f32
    %412 = vector.broadcast %cst_103 : f32 to vector<2x32xf32>
    %413 = arith.addf %412, %411 : vector<2x32xf32>
    %414 = arith.divf %412, %413 : vector<2x32xf32>
    %415 = vector.extract_strided_slice %402 {offsets = [0, 64], sizes = [2, 32], strides = [1, 1]} : vector<2x128xf32> to vector<2x32xf32>
    %416 = math.tanh %415 : vector<2x32xf32>
    %417 = vector.extract_strided_slice %402 {offsets = [0, 96], sizes = [2, 32], strides = [1, 1]} : vector<2x128xf32> to vector<2x32xf32>
    %418 = arith.negf %417 : vector<2x32xf32>
    %419 = math.exp %418 : vector<2x32xf32>
    %cst_104 = arith.constant 1.000000e+00 : f32
    %420 = vector.broadcast %cst_104 : f32 to vector<2x32xf32>
    %421 = arith.addf %420, %419 : vector<2x32xf32>
    %422 = arith.divf %420, %421 : vector<2x32xf32>
    %423 = arith.mulf %414, %379 : vector<2x32xf32>
    %424 = arith.mulf %408, %416 : vector<2x32xf32>
    %425 = arith.addf %423, %424 : vector<2x32xf32>
    %426 = math.tanh %425 : vector<2x32xf32>
    %427 = arith.mulf %422, %426 : vector<2x32xf32>
    %428 = vector.broadcast %398 : f32 to vector<2x32xf32>
    %429 = arith.mulf %428, %427 : vector<2x32xf32>
    %cst_105 = arith.constant 1.000000e+00 : f32
    %430 = arith.subf %cst_105, %398 : f32
    %431 = vector.broadcast %430 : f32 to vector<2x32xf32>
    %432 = arith.mulf %431, %373 : vector<2x32xf32>
    %433 = arith.addf %429, %432 : vector<2x32xf32>
    %434 = vector.broadcast %398 : f32 to vector<2x32xf32>
    %435 = arith.mulf %434, %425 : vector<2x32xf32>
    %cst_106 = arith.constant 1.000000e+00 : f32
    %436 = arith.subf %cst_106, %398 : f32
    %437 = vector.broadcast %436 : f32 to vector<2x32xf32>
    %438 = arith.mulf %437, %379 : vector<2x32xf32>
    %439 = arith.addf %435, %438 : vector<2x32xf32>
    %cst_107 = arith.constant dense<0.000000e+00> : vector<2x32xf32>
    %440 = tpu.matmul %433, %34, %cst_107 {dimension_numbers = #tpu.dot_dimension_numbers<[1], [0], [0], [1], [0, 0, 1, 1], [], []>} : vector<2x32xf32>, vector<32x32xf32>, vector<2x32xf32> -> vector<2x32xf32>
    %441 = vector.broadcast %35 : vector<1x32xf32> to vector<2x32xf32>
    %442 = arith.addf %440, %441 : vector<2x32xf32>
    %443 = vector.shape_cast %442 : vector<2x32xf32> to vector<2x1x32xf32>
    %444 = vector.broadcast %443 : vector<2x1x32xf32> to vector<2x128x32xf32>
    %445 = arith.addf %32, %444 : vector<2x128x32xf32>
    %446 = math.tanh %445 : vector<2x128x32xf32>
    %447 = vector.shape_cast %36 : vector<1x32xf32> to vector<1x1x32xf32>
    %448 = vector.broadcast %447 : vector<1x1x32xf32> to vector<2x128x32xf32>
    %449 = arith.mulf %446, %448 : vector<2x128x32xf32>
    %cst_108 = arith.constant dense<0.000000e+00> : vector<2x128xf32>
    %450 = vector.multi_reduction <add>, %449, %cst_108 [2] : vector<2x128x32xf32> to vector<2x128xf32>
    %451 = vector.broadcast %37 : vector<1x1xf32> to vector<2x128xf32>
    %452 = arith.addf %450, %451 : vector<2x128xf32>
    %453 = vector.broadcast %398 : f32 to vector<2x128xf32>
    %454 = arith.mulf %453, %452 : vector<2x128xf32>
    %c6_109 = arith.constant 6 : index
    %c0_110 = arith.constant 0 : index
    %c0_111 = arith.constant 0 : index
    %455 = vector.load %arg15[%c6_109, %c0_110, %c0_111] : memref<8x2x128xf32, #tpu.memory_space<vmem>>, vector<1x2x128xf32>
    %456 = vector.shape_cast %455 : vector<1x2x128xf32> to vector<2x128xf32>
    %457 = vector.shape_cast %454 : vector<2x128xf32> to vector<1x2x128xf32>
    tpu.vector_store %arg15[%c6_109, %c0_110, %c0_111], %457 {strides = array<i32>} : memref<8x2x128xf32, #tpu.memory_space<vmem>>, vector<1x2x128xf32>,
    %c7 = arith.constant 7 : index
    %458 = memref.load %arg0[%c7] : memref<8xf32, #tpu.memory_space<smem>>
    %459 = vector.extract_strided_slice %25 {offsets = [0, 7, 0], sizes = [2, 1, 128], strides = [1, 1, 1]} : vector<2x8x128xf32> to vector<2x1x128xf32>
    %460 = vector.shape_cast %459 : vector<2x1x128xf32> to vector<2x128xf32>
    %cst_112 = arith.constant dense<0.000000e+00> : vector<2x128xf32>
    %461 = tpu.matmul %433, %33, %cst_112 {dimension_numbers = #tpu.dot_dimension_numbers<[1], [0], [0], [1], [0, 0, 1, 1], [], []>} : vector<2x32xf32>, vector<32x128xf32>, vector<2x128xf32> -> vector<2x128xf32>
    %462 = arith.addf %460, %461 : vector<2x128xf32>
    %463 = vector.extract_strided_slice %462 {offsets = [0, 0], sizes = [2, 32], strides = [1, 1]} : vector<2x128xf32> to vector<2x32xf32>
    %464 = arith.negf %463 : vector<2x32xf32>
    %465 = math.exp %464 : vector<2x32xf32>
    %cst_113 = arith.constant 1.000000e+00 : f32
    %466 = vector.broadcast %cst_113 : f32 to vector<2x32xf32>
    %467 = arith.addf %466, %465 : vector<2x32xf32>
    %468 = arith.divf %466, %467 : vector<2x32xf32>
    %469 = vector.extract_strided_slice %462 {offsets = [0, 32], sizes = [2, 32], strides = [1, 1]} : vector<2x128xf32> to vector<2x32xf32>
    %470 = arith.negf %469 : vector<2x32xf32>
    %471 = math.exp %470 : vector<2x32xf32>
    %cst_114 = arith.constant 1.000000e+00 : f32
    %472 = vector.broadcast %cst_114 : f32 to vector<2x32xf32>
    %473 = arith.addf %472, %471 : vector<2x32xf32>
    %474 = arith.divf %472, %473 : vector<2x32xf32>
    %475 = vector.extract_strided_slice %462 {offsets = [0, 64], sizes = [2, 32], strides = [1, 1]} : vector<2x128xf32> to vector<2x32xf32>
    %476 = math.tanh %475 : vector<2x32xf32>
    %477 = vector.extract_strided_slice %462 {offsets = [0, 96], sizes = [2, 32], strides = [1, 1]} : vector<2x128xf32> to vector<2x32xf32>
    %478 = arith.negf %477 : vector<2x32xf32>
    %479 = math.exp %478 : vector<2x32xf32>
    %cst_115 = arith.constant 1.000000e+00 : f32
    %480 = vector.broadcast %cst_115 : f32 to vector<2x32xf32>
    %481 = arith.addf %480, %479 : vector<2x32xf32>
    %482 = arith.divf %480, %481 : vector<2x32xf32>
    %483 = arith.mulf %474, %439 : vector<2x32xf32>
    %484 = arith.mulf %468, %476 : vector<2x32xf32>
    %485 = arith.addf %483, %484 : vector<2x32xf32>
    %486 = math.tanh %485 : vector<2x32xf32>
    %487 = arith.mulf %482, %486 : vector<2x32xf32>
    %488 = vector.broadcast %458 : f32 to vector<2x32xf32>
    %489 = arith.mulf %488, %487 : vector<2x32xf32>
    %cst_116 = arith.constant 1.000000e+00 : f32
    %490 = arith.subf %cst_116, %458 : f32
    %491 = vector.broadcast %490 : f32 to vector<2x32xf32>
    %492 = arith.mulf %491, %433 : vector<2x32xf32>
    %493 = arith.addf %489, %492 : vector<2x32xf32>
    %494 = vector.broadcast %458 : f32 to vector<2x32xf32>
    %495 = arith.mulf %494, %485 : vector<2x32xf32>
    %cst_117 = arith.constant 1.000000e+00 : f32
    %496 = arith.subf %cst_117, %458 : f32
    %497 = vector.broadcast %496 : f32 to vector<2x32xf32>
    %498 = arith.mulf %497, %439 : vector<2x32xf32>
    %499 = arith.addf %495, %498 : vector<2x32xf32>
    %cst_118 = arith.constant dense<0.000000e+00> : vector<2x32xf32>
    %500 = tpu.matmul %493, %34, %cst_118 {dimension_numbers = #tpu.dot_dimension_numbers<[1], [0], [0], [1], [0, 0, 1, 1], [], []>} : vector<2x32xf32>, vector<32x32xf32>, vector<2x32xf32> -> vector<2x32xf32>
    %501 = vector.broadcast %35 : vector<1x32xf32> to vector<2x32xf32>
    %502 = arith.addf %500, %501 : vector<2x32xf32>
    %503 = vector.shape_cast %502 : vector<2x32xf32> to vector<2x1x32xf32>
    %504 = vector.broadcast %503 : vector<2x1x32xf32> to vector<2x128x32xf32>
    %505 = arith.addf %32, %504 : vector<2x128x32xf32>
    %506 = math.tanh %505 : vector<2x128x32xf32>
    %507 = vector.shape_cast %36 : vector<1x32xf32> to vector<1x1x32xf32>
    %508 = vector.broadcast %507 : vector<1x1x32xf32> to vector<2x128x32xf32>
    %509 = arith.mulf %506, %508 : vector<2x128x32xf32>
    %cst_119 = arith.constant dense<0.000000e+00> : vector<2x128xf32>
    %510 = vector.multi_reduction <add>, %509, %cst_119 [2] : vector<2x128x32xf32> to vector<2x128xf32>
    %511 = vector.broadcast %37 : vector<1x1xf32> to vector<2x128xf32>
    %512 = arith.addf %510, %511 : vector<2x128xf32>
    %513 = vector.broadcast %458 : f32 to vector<2x128xf32>
    %514 = arith.mulf %513, %512 : vector<2x128xf32>
    %c7_120 = arith.constant 7 : index
    %c0_121 = arith.constant 0 : index
    %c0_122 = arith.constant 0 : index
    %515 = vector.load %arg15[%c7_120, %c0_121, %c0_122] : memref<8x2x128xf32, #tpu.memory_space<vmem>>, vector<1x2x128xf32>
    %516 = vector.shape_cast %515 : vector<1x2x128xf32> to vector<2x128xf32>
    %517 = vector.shape_cast %514 : vector<2x128xf32> to vector<1x2x128xf32>
    tpu.vector_store %arg15[%c7_120, %c0_121, %c0_122], %517 {strides = array<i32>} : memref<8x2x128xf32, #tpu.memory_space<vmem>>, vector<1x2x128xf32>,
    %c0_123 = arith.constant 0 : index
    %c0_124 = arith.constant 0 : index
    %518 = vector.load %arg16[%c0_123, %c0_124] : memref<2x32xf32, #tpu.memory_space<vmem>>, vector<2x32xf32>
    tpu.vector_store %arg16[%c0_123, %c0_124], %493 {strides = array<i32>} : memref<2x32xf32, #tpu.memory_space<vmem>>, vector<2x32xf32>,
    %c0_125 = arith.constant 0 : index
    %c0_126 = arith.constant 0 : index
    %519 = vector.load %arg17[%c0_125, %c0_126] : memref<2x32xf32, #tpu.memory_space<vmem>>, vector<2x32xf32>
    tpu.vector_store %arg17[%c0_125, %c0_126], %499 {strides = array<i32>} : memref<2x32xf32, #tpu.memory_space<vmem>>, vector<2x32xf32>,
    return
  }
}

</mosaic_0001>

<bundles_post_ra>
// kernel: tpu_custom_call.1
= control target key start
LH: loop header
LB: loop body
LE: loop exit
PB: predicated region body
PF: predicated region fallthrough
CT: control target
= control target key end

     0   :  { %s15953_s0 = inlined_call_operand.vmem [shape: f32[8], index: 0, kind: input, shape index: {}]   ;;  %s15954_s1 = inlined_call_operand.vmem [shape: f32[2,8,128], index: 1, kind: input, shape index: {}]   ;;  %s15955_s2 = inlined_call_operand.vmem [shape: f32[2,128,768], index: 2, kind: input, shape index: {}]   ;;  %s15956_s3 = inlined_call_operand.vmem [shape: f32[768,32], index: 3, kind: input, shape index: {}]   ;;  %s15957_s4 = inlined_call_operand.vmem [shape: f32[1,32], index: 4, kind: input, shape index: {}]   ;;  %s15958_s5 = inlined_call_operand.hbm [shape: f32[768,128], index: 5, kind: input, shape index: {}]   ;;  %s15959_s6 = inlined_call_operand.vmem [shape: f32[1,128], index: 6, kind: input, shape index: {}]   ;;  %s15960_s7 = inlined_call_operand.vmem [shape: f32[32,128], index: 7, kind: input, shape index: {}]   ;;  %s15961_s8 = inlined_call_operand.vmem [shape: f32[1,128], index: 8, kind: input, shape index: {}]   ;;  %s15962_s9 = inlined_call_operand.vmem [shape: f32[768,32], index: 9, kind: input, shape index: {}]   ;;  %s15963_s10 = inlined_call_operand.vmem [shape: f32[1,32], index: 10, kind: input, shape index: {}]   ;;  %s15964_s11 = inlined_call_operand.vmem [shape: f32[32,32], index: 11, kind: input, shape index: {}]   ;;  %s15965_s12 = inlined_call_operand.vmem [shape: f32[1,32], index: 12, kind: input, shape index: {}]   ;;  %s15966_s13 = inlined_call_operand.vmem [shape: f32[1,32], index: 13, kind: input, shape index: {}]   ;;  %s15967_s14 = inlined_call_operand.<no memory space> [shape: f32[1,1], index: 14, kind: input, shape index: {}]   ;;  %s15968_s15 = inlined_call_operand.hbm [shape: f32[8,2,128], index: 15, kind: output, shape index: {0}]   ;;  %s15969_s16 = inlined_call_operand.hbm [shape: f32[2,32], index: 16, kind: output, shape index: {1}]   ;;  %s15970_s17 = inlined_call_operand.hbm [shape: f32[2,32], index: 17, kind: output, shape index: {2}]  }
   0x1   :  { %16160 = sst [smem:[#allocation101_spill]] %s15953_s0  ;;  %v23_v0 = vstv %s15967_s14 }
   0x2   :  { %16161 = sst [smem:[#allocation102_spill]] %s15954_s1  ;;  %24 = vst [vmem:[#allocation2] sm:$0x1] %v23_v0 }
   0x3   :  { %25 = vsyncpa [#allocation6], 0 }
   0x4   :  { %26 = vsyncpa [#allocation4], 0 }
   0x5   :  { %27 = vsyncpa [#allocation5], 0 }
   0x6   :  { %28 = vsyncpa [#allocation10], 0  ;;  %s16162_s28 = sld [smem:[#allocation101_spill]] }
   0xc   :  { %s35_s29 = sshll.u32 %s16162_s28, 4  ;;  %s36_s29 = int_to_ptr.vmem [resolvable:$true] %s35_s29 }
   0xd   :  { %s10215_s0 = scalar_lea.vmem %s36_s29, 16  ;;  %p10220_p1 = scmp.lt.s32.totalorder %s36_s29, %s36_s29 }
   0xe   :  { %p10216_p0 = scmp.ne.s32.totalorder %s36_s29, %s10215_s0  ;;  %p10221_p2 = scmp.lt.s32.totalorder %s10215_s0, %s10215_s0 }
  0x10   :  { %p10222_p3 = por %p10221_p2, %p10220_p1 }
  0x12   :  { %p10223_p4 = pnand %p10222_p3, %p10216_p0 }
  0x14   :  { %10226 = shalt.err (!%p10223_p4)
}
  0x15   :  { %s10323_s30 = smov [#allocation3]   ;;  %s10324_s14 = smov [#allocation7]  }
  0x16   :  { %38 = dma.vmem_to_smem %s36_s29, 16, %s10323_s30, [#allocation6]  }
  0x17   :  { %s52_s18 = sshll.u32 %s10324_s14, 4  ;;  %s10227_s20 = scalar_lea.hbm %s15958_s5, 12288  ;;  %s53_s18 = int_to_ptr.vmem [resolvable:$true] %s52_s18 }
  0x18   :  { %p10228_p5 = scmp.ne.s32.totalorder %s15958_s5, %s10227_s20  ;;  %p10231_p6 = scmp.lt.u32.totalorder %s10227_s20, %s15958_s5 }
  0x1a   :  { %p10233_p7 = pnand %p10231_p6, %p10228_p5 }
  0x1c   :  { %10236 = shalt.err (!%p10233_p7)
}
  0x1d   :  { %s10237_s25 = scalar_lea.vmem %s53_s18, 12288  ;;  %p10242_p9 = scmp.lt.s32.totalorder %s53_s18, %s53_s18 }
  0x1e   :  { %p10238_p8 = scmp.ne.s32.totalorder %s53_s18, %s10237_s25  ;;  %p10243_p10 = scmp.lt.s32.totalorder %s10237_s25, %s10237_s25 }
  0x20   :  { %p10244_p11 = por %p10243_p10, %p10242_p9 }
  0x22   :  { %p10245_p12 = pnand %p10244_p11, %p10238_p8 }
  0x24   :  { %10248 = shalt.err (!%p10245_p12)
}
  0x25   :  { %s10325_s26 = smov 128   ;;  %s10326_s27 = smov 8  }
  0x26   :  { %58 = dma.hbm_to_vmem [thread:$0]  %s15958_s5, 12288, %s53_s18, [#allocation4], %s10325_s26, %s10325_s26, %s10326_s27  }
  0x27   :  { %10315 = dma.done.wait [#allocation6], 16  }
  0x28   :  { %10316 = vsyncadd [#allocation6], 4294967280 }
  0x29   :  { %10317 = dma.done.wait [#allocation4], 12288  }
  0x2a   :  { %10318 = vsyncadd [#allocation4], 4294955008 }
  0x2b   :  { %83 = sfence }
  0x2c   :  { %v294_v1 = vld [vmem:[%s15956_s3 + $0x80] sm:$0xff]  ;;  %v295_v2 = vld [vmem:[%s15956_s3 + $0x88] sm:$0xff]  ;;  %v296_v12 = vld [vmem:[%s15956_s3 + $0x90] sm:$0xff]  ;;  %vm16078_vm0 = vcmask 1041409   ;;  %s16163_s26 = sld [smem:[#allocation102_spill]]  ;;  %s11385_s25 = sld [smem:[#allocation3]] }
  0x2d   :  { %v326_v3 = vld [vmem:[%s15956_s3 + $0x180] sm:$0xff]  ;;  %v8602_v4 = vpack.c.bf16 %v295_v2, %v294_v1  ;;  %v327_v5 = vld [vmem:[%s15956_s3 + $0x188] sm:$0xff]  ;;  %v297_v14 = vld [vmem:[%s15956_s3 + $0x98] sm:$0xff]  ;;  %s10329_s27 = smov 32   ;;  %s10330_s28 = smov 96   ;;  %vm10331_vm1 = vmmov 0  }
  0x2e   :  { %v278_v6 = vld [vmem:[%s15956_s3] sm:$0xff]  ;;  %v279_v7 = vld [vmem:[%s15956_s3 + $0x8] sm:$0xff]  ;;  %v8634_v8 = vpack.c.bf16 %v327_v5, %v326_v3  ;;  %v328_v15 = vld [vmem:[%s15956_s3 + $0x190] sm:$0xff]  ;;  %v8606_v17 = vpack.c.bf16 %v297_v14, %v296_v12  ;;  %vm16077_vm2 = vcmask 261120   ;;  %s8102_s5 = sld [smem:[#allocation3 + $0x3]]  ;;  %s8107_s18 = sld [smem:[#allocation3 + $0x4]] }
  0x2f   :  { %v8604_v9 = vpack.c.bf16 %v279_v7, %v278_v6  ;;  %v310_v10 = vld [vmem:[%s15956_s3 + $0x100] sm:$0xff]  ;;  %v311_v11 = vld [vmem:[%s15956_s3 + $0x108] sm:$0xff]  ;;  %8603 = vmatprep.subr.bf16.mxu0 %v8602_v4  ;;  %v329_v16 = vld [vmem:[%s15956_s3 + $0x198] sm:$0xff]  ;;  %s8112_s22 = sld [smem:[#allocation3 + $0x5]]  ;;  %vm2787_vm3 = vcmask 130112   ;;  %vm2794_vm4 = vcmask 195712  }
  0x30   :  { %v8636_v13 = vpack.c.bf16 %v311_v11, %v310_v10  ;;  %8635 = vmatprep.subr.bf16.mxu1 %v8634_v8  ;;  %v8638_v18 = vpack.c.bf16 %v329_v16, %v328_v15  ;;  %v280_v19 = vld [vmem:[%s15956_s3 + $0x10] sm:$0xff]  ;;  %v281_v20 = vld [vmem:[%s15956_s3 + $0x18] sm:$0xff]  ;;  %v298_v24 = vld [vmem:[%s15956_s3 + $0xa0] sm:$0xff]  ;;  %vm2801_vm5 = vcmask 261312   ;;  %vm2808_vm6 = vcmask 326912   ;;  %s8122_s19 = sld [smem:[#allocation3 + $0x7]] }
  0x31   :  { %8605 = vmatpush3.bf16.msra.mxu0 %v8604_v9  ;;  %v312_v21 = vld [vmem:[%s15956_s3 + $0x110] sm:$0xff]  ;;  %v8608_v22 = vpack.c.bf16 %v281_v20, %v280_v19  ;;  %v313_v23 = vld [vmem:[%s15956_s3 + $0x118] sm:$0xff]  ;;  %v299_v25 = vld [vmem:[%s15956_s3 + $0xa8] sm:$0xff]  ;;  %vm2815_vm7 = vcmask 392512   ;;  %vm2822_vm8 = vcmask 458112   ;;  %vm2829_vm9 = vcmask 523712  }
  0x32   :  { %8637 = vmatpush3.bf16.msra.mxu1 %v8636_v13  ;;  %8607 = vmatprep.subr.bf16.mxu0 %v8606_v17  ;;  %v8640_v26 = vpack.c.bf16 %v313_v23, %v312_v21  ;;  %v8610_v27 = vpack.c.bf16 %v299_v25, %v298_v24  ;;  %v330_v28 = vld [vmem:[%s15956_s3 + $0x1a0] sm:$0xff]  ;;  %v331_v29 = vld [vmem:[%s15956_s3 + $0x1a8] sm:$0xff]  ;;  %v300_v36 = vld [vmem:[%s15956_s3 + $0xb0] sm:$0xff]  ;;  %vm2836_vm10 = vcmask 589312   ;;  %vm2843_vm11 = vcmask 654912  }
  0x33   :  { %8639 = vmatprep.subr.bf16.mxu1 %v8638_v18  ;;  %v282_v30 = vld [vmem:[%s15956_s3 + $0x20] sm:$0xff]  ;;  %v8642_v31 = vpack.c.bf16 %v331_v29, %v330_v28  ;;  %v283_v32 = vld [vmem:[%s15956_s3 + $0x28] sm:$0xff]  ;;  %v301_v37 = vld [vmem:[%s15956_s3 + $0xb8] sm:$0xff]  ;;  %vm16149_vm12 = vcmask 720512   ;;  %vm16079_vm13 = vcmask 786112   ;;  %vm16148_vm14 = vcmask 851712  }
  0x34   :  { %v314_v33 = vld [vmem:[%s15956_s3 + $0x120] sm:$0xff]  ;;  %v315_v34 = vld [vmem:[%s15956_s3 + $0x128] sm:$0xff]  ;;  %v8612_v35 = vpack.c.bf16 %v283_v32, %v282_v30  ;;  %v332_v38 = vld [vmem:[%s15956_s3 + $0x1b0] sm:$0xff]  ;;  %v8614_v40 = vpack.c.bf16 %v301_v37, %v300_v36  ;;  %vm16082_vm15 = vcmask 917312  }
  0x35   :  { %8609 = vmatpush3.bf16.msra.mxu0 %v8608_v22  ;;  %v8644_v39 = vpack.c.bf16 %v315_v34, %v314_v33  ;;  %v333_v41 = vld [vmem:[%s15956_s3 + $0x1b8] sm:$0xff]  ;;  %v284_v42 = vld [vmem:[%s15956_s3 + $0x30] sm:$0xff]  ;;  %v302_v47 = vld [vmem:[%s15956_s3 + $0xc0] sm:$0xff]  ;;  %s5986_s23 = ssub.f32 1.0, %s8112_s22 }
  0x36   :  { %8641 = vmatpush3.bf16.msra.mxu1 %v8640_v26  ;;  %8611 = vmatprep.subr.bf16.mxu0 %v8610_v27  ;;  %v285_v43 = vld [vmem:[%s15956_s3 + $0x38] sm:$0xff]  ;;  %v8646_v44 = vpack.c.bf16 %v333_v41, %v332_v38  ;;  %v316_v45 = vld [vmem:[%s15956_s3 + $0x130] sm:$0xff]  ;;  %v303_v48 = vld [vmem:[%s15956_s3 + $0xc8] sm:$0xff]  ;;  %s7428_s1 = ssub.f32 1.0, %s8122_s19 }
  0x37   :  { %8643 = vmatprep.subr.bf16.mxu1 %v8642_v31  ;;  %v317_v46 = vld [vmem:[%s15956_s3 + $0x138] sm:$0xff]  ;;  %v334_v49 = vld [vmem:[%s15956_s3 + $0x1c0] sm:$0xff]  ;;  %v335_v50 = vld [vmem:[%s15956_s3 + $0x1c8] sm:$0xff]  ;;  %v8616_v51 = vpack.c.bf16 %v285_v43, %v284_v42  ;;  %v8618_v53 = vpack.c.bf16 %v303_v48, %v302_v47 }
  0x38   :  { %v8648_v52 = vpack.c.bf16 %v317_v46, %v316_v45  ;;  %v286_v54 = vld [vmem:[%s15956_s3 + $0x40] sm:$0xff]  ;;  %v287_v55 = vld [vmem:[%s15956_s3 + $0x48] sm:$0xff]  ;;  %v8650_v57 = vpack.c.bf16 %v335_v50, %v334_v49  ;;  %v304_v59 = vld [vmem:[%s15956_s3 + $0xd0] sm:$0xff] }
  0x39   :  { %8613 = vmatpush3.bf16.msra.mxu0 %v8612_v35  ;;  %v318_v56 = vld [vmem:[%s15956_s3 + $0x140] sm:$0xff]  ;;  %v319_v58 = vld [vmem:[%s15956_s3 + $0x148] sm:$0xff]  ;;  %v305_v60 = vld [vmem:[%s15956_s3 + $0xd8] sm:$0xff]  ;;  %v8620_v63 = vpack.c.bf16 %v287_v55, %v286_v54 }
  0x3a   :  { %8645 = vmatpush3.bf16.msra.mxu1 %v8644_v39  ;;  %8615 = vmatprep.subr.bf16.mxu0 %v8614_v40  ;;  %v336_v61 = vld [vmem:[%s15956_s3 + $0x1d0] sm:$0xff]  ;;  %v337_v62 = vld [vmem:[%s15956_s3 + $0x1d8] sm:$0xff]  ;;  %v8652_v0 = vpack.c.bf16 %v319_v58, %v318_v56  ;;  %v8622_v1 = vpack.c.bf16 %v305_v60, %v304_v59  ;;  %v306_v7 = vld [vmem:[%s15956_s3 + $0xe0] sm:$0xff] }
  0x3b   :  { %8647 = vmatprep.subr.bf16.mxu1 %v8646_v44  ;;  %v288_v2 = vld [vmem:[%s15956_s3 + $0x50] sm:$0xff]  ;;  %v289_v3 = vld [vmem:[%s15956_s3 + $0x58] sm:$0xff]  ;;  %v8654_v5 = vpack.c.bf16 %v337_v62, %v336_v61  ;;  %v307_v8 = vld [vmem:[%s15956_s3 + $0xe8] sm:$0xff] }
  0x3c   :  { %v320_v4 = vld [vmem:[%s15956_s3 + $0x150] sm:$0xff]  ;;  %v321_v6 = vld [vmem:[%s15956_s3 + $0x158] sm:$0xff]  ;;  %v338_v9 = vld [vmem:[%s15956_s3 + $0x1e0] sm:$0xff]  ;;  %v8624_v11 = vpack.c.bf16 %v289_v3, %v288_v2  ;;  %v8626_v16 = vpack.c.bf16 %v307_v8, %v306_v7 }
  0x3d   :  { %8617 = vmatpush3.bf16.msra.mxu0 %v8616_v51  ;;  %v339_v10 = vld [vmem:[%s15956_s3 + $0x1e8] sm:$0xff]  ;;  %v290_v12 = vld [vmem:[%s15956_s3 + $0x60] sm:$0xff]  ;;  %v8656_v15 = vpack.c.bf16 %v321_v6, %v320_v4  ;;  %v308_v21 = vld [vmem:[%s15956_s3 + $0xf0] sm:$0xff] }
  0x3e   :  { %8649 = vmatpush3.bf16.msra.mxu1 %v8648_v52  ;;  %8619 = vmatprep.subr.bf16.mxu0 %v8618_v53  ;;  %v291_v13 = vld [vmem:[%s15956_s3 + $0x68] sm:$0xff]  ;;  %v322_v14 = vld [vmem:[%s15956_s3 + $0x160] sm:$0xff]  ;;  %v8658_v20 = vpack.c.bf16 %v339_v10, %v338_v9  ;;  %v309_v22 = vld [vmem:[%s15956_s3 + $0xf8] sm:$0xff] }
  0x3f   :  { %8651 = vmatprep.subr.bf16.mxu1 %v8650_v57  ;;  %v323_v17 = vld [vmem:[%s15956_s3 + $0x168] sm:$0xff]  ;;  %v340_v23 = vld [vmem:[%s15956_s3 + $0x1f0] sm:$0xff]  ;;  %v341_v25 = vld [vmem:[%s15956_s3 + $0x1f8] sm:$0xff]  ;;  %v8628_v28 = vpack.c.bf16 %v291_v13, %v290_v12  ;;  %v8630_v34 = vpack.c.bf16 %v309_v22, %v308_v21 }
  0x40   :  { %v10618_v18 = vld [vmem:[%s15955_s2 + $0x8] sm:$0xff]  ;;  %v10641_v26 = vld [vmem:[%s15955_s2 + $0x18] sm:$0xff]  ;;  %v292_v29 = vld [vmem:[%s15956_s3 + $0x70] sm:$0xff]  ;;  %v8660_v33 = vpack.c.bf16 %v323_v17, %v322_v14  ;;  %v8662_v38 = vpack.c.bf16 %v341_v25, %v340_v23 }
  0x41   :  { %8621 = vmatpush3.bf16.msra.mxu0 %v8620_v63  ;;  %v10623_v19 = vld [vmem:[%s15955_s2 + $0x308] sm:$0xff]  ;;  %v10646_v27 = vld [vmem:[%s15955_s2 + $0x318] sm:$0xff]  ;;  %v324_v35 = vld [vmem:[%s15956_s3 + $0x170] sm:$0xff] }
  0x42   :  { %8653 = vmatpush3.bf16.msra.mxu1 %v8652_v0  ;;  %8623 = vmatprep.subr.bf16.mxu0 %v8622_v1  ;;  %v396_v24 = vrot.slane %v10623_v19, 7  ;;  %v293_v30 = vld [vmem:[%s15956_s3 + $0x78] sm:$0xff]  ;;  %v400_v32 = vrot.slane %v10646_v27, 7  ;;  %v10666_v37 = vld [vmem:[%s15955_s2 + $0x300] sm:$0xff]  ;;  %v359_v41 = vld [vmem:[%s15956_s3 + $0x288] sm:$0xff] }
  0x43   :  { %8655 = vmatprep.subr.bf16.mxu1 %v8654_v5  ;;  %v325_v36 = vld [vmem:[%s15956_s3 + $0x178] sm:$0xff]  ;;  %v358_v40 = vld [vmem:[%s15956_s3 + $0x280] sm:$0xff]  ;;  %v10679_v42 = vld [vmem:[%s15955_s2 + $0x310] sm:$0xff]  ;;  %v8632_v44 = vpack.c.bf16 %v293_v30, %v292_v29  ;;  %v393_v46 = vrot.slane %v10666_v37, 7 }
  0x44   :  { %v397_v31 = vsel %vm16078_vm0, %v396_v24, %v10618_v18  ;;  %v401_v39 = vsel %vm16078_vm0, %v400_v32, %v10641_v26  ;;  %v91_v43 = vld [vmem:[%s15955_s2 + $0x38] sm:$0xff]  ;;  %v84_v45 = vld [vmem:[%s15955_s2] sm:$0xff]  ;;  %v8664_v47 = vpack.c.bf16 %v325_v36, %v324_v35  ;;  %v90_v48 = vld [vmem:[%s15955_s2 + $0x30] sm:$0xff]  ;;  %v8666_v49 = vpack.c.bf16 %v359_v41, %v358_v40 }
  0x45   :  { %8625 = vmatpush3.bf16.msra.mxu0 %v8624_v11  ;;  %476 = vmatprep.mubr.f32.mxu0 %v397_v31  ;;  %v398_v50 = vrot.slane %v10679_v42, 7  ;;  %v342_v51 = vld [vmem:[%s15956_s3 + $0x200] sm:$0xff]  ;;  %v343_v52 = vld [vmem:[%s15956_s3 + $0x208] sm:$0xff]  ;;  %v8698_v53 = vpack.c.bf16 %v91_v43, %v10618_v18  ;;  %v10702_v54 = vld [vmem:[%s15955_s2 + $0x10] sm:$0xff]  ;;  %v395_v59 = vsel %vm16078_vm0, %v393_v46, %v84_v45  ;;  %v8700_v61 = vpack.c.bf16 %v90_v48, %v84_v45 }
  0x46   :  { %8657 = vmatpush3.bf16.msra.mxu1 %v8656_v15  ;;  %8627 = vmatprep.subr.bf16.mxu0 %v8626_v16  ;;  %v360_v55 = vld [vmem:[%s15956_s3 + $0x290] sm:$0xff]  ;;  %v361_v56 = vld [vmem:[%s15956_s3 + $0x298] sm:$0xff]  ;;  %v97_v57 = vld [vmem:[%s15955_s2 + $0x68] sm:$0xff]  ;;  %v8668_v60 = vpack.c.bf16 %v343_v52, %v342_v51 }
  0x47   :  { %8659 = vmatprep.subr.bf16.mxu1 %v8658_v20  ;;  %546 = vmatprep.mubr.f32.mxu1 %v401_v39  ;;  %v103_v58 = vld [vmem:[%s15955_s2 + $0x98] sm:$0xff]  ;;  %v399_v62 = vsel %vm16078_vm0, %v398_v50, %v10702_v54  ;;  %v8670_v63 = vpack.c.bf16 %v361_v56, %v360_v55  ;;  %v344_v0 = vld [vmem:[%s15956_s3 + $0x210] sm:$0xff]  ;;  %v96_v2 = vld [vmem:[%s15955_s2 + $0x60] sm:$0xff]  ;;  %v15974_v20 = vmov 0.0  }
  0x48   :  { %v345_v1 = vld [vmem:[%s15956_s3 + $0x218] sm:$0xff]  ;;  %v8702_v3 = vpack.c.bf16 %v103_v58, %v97_v57  ;;  %v102_v4 = vld [vmem:[%s15955_s2 + $0x90] sm:$0xff]  ;;  %v362_v5 = vld [vmem:[%s15956_s3 + $0x2a0] sm:$0xff] }
  0x49   :  { %8629 = vmatpush3.bf16.msra.mxu0 %v8628_v28  ;;  %v363_v6 = vld [vmem:[%s15956_s3 + $0x2a8] sm:$0xff]  ;;  %v115_v8 = vld [vmem:[%s15955_s2 + $0xf8] sm:$0xff]  ;;  %v8672_v9 = vpack.c.bf16 %v345_v1, %v344_v0  ;;  %v8704_v10 = vpack.c.bf16 %v102_v4, %v96_v2  ;;  %v346_v12 = vld [vmem:[%s15956_s3 + $0x220] sm:$0xff] }
  0x4a   :  { %8661 = vmatpush3.bf16.msra.mxu1 %v8660_v33  ;;  %8631 = vmatprep.subr.bf16.mxu0 %v8630_v34  ;;  %v109_v7 = vld [vmem:[%s15955_s2 + $0xc8] sm:$0xff]  ;;  %v8674_v11 = vpack.c.bf16 %v363_v6, %v362_v5  ;;  %v108_v14 = vld [vmem:[%s15955_s2 + $0xc0] sm:$0xff]  ;;  %v114_v16 = vld [vmem:[%s15955_s2 + $0xf0] sm:$0xff] }
  0x4b   :  { %8663 = vmatprep.subr.bf16.mxu1 %v8662_v38  ;;  %v347_v13 = vld [vmem:[%s15956_s3 + $0x228] sm:$0xff]  ;;  %v8706_v15 = vpack.c.bf16 %v115_v8, %v109_v7  ;;  %v364_v17 = vld [vmem:[%s15956_s3 + $0x2b0] sm:$0xff]  ;;  %v365_v18 = vld [vmem:[%s15956_s3 + $0x2b8] sm:$0xff]  ;;  %v8708_v24 = vpack.c.bf16 %v114_v16, %v108_v14 }
  0x4c   :  { %v121_v21 = vld [vmem:[%s15955_s2 + $0x128] sm:$0xff]  ;;  %v127_v22 = vld [vmem:[%s15955_s2 + $0x158] sm:$0xff]  ;;  %v8676_v23 = vpack.c.bf16 %v347_v13, %v346_v12  ;;  %v8678_v25 = vpack.c.bf16 %v365_v18, %v364_v17  ;;  %v348_v28 = vld [vmem:[%s15956_s3 + $0x230] sm:$0xff] }
  0x4d   :  { %8633 = vmatpush3.bf16.msra.mxu0 %v8632_v44  ;;  %v349_v29 = vld [vmem:[%s15956_s3 + $0x238] sm:$0xff]  ;;  %v120_v30 = vld [vmem:[%s15955_s2 + $0x120] sm:$0xff]  ;;  %v8710_v31 = vpack.c.bf16 %v127_v22, %v121_v21  ;;  %v126_v32 = vld [vmem:[%s15955_s2 + $0x150] sm:$0xff] }
  0x4e   :  { %8665 = vmatpush3.bf16.msra.mxu1 %v8664_v47  ;;  %8667 = vmatprep.subr.bf16.mxu0 %v8666_v49  ;;  %v366_v33 = vld [vmem:[%s15956_s3 + $0x2c0] sm:$0xff]  ;;  %v367_v34 = vld [vmem:[%s15956_s3 + $0x2c8] sm:$0xff]  ;;  %v139_v36 = vld [vmem:[%s15955_s2 + $0x1b8] sm:$0xff]  ;;  %v8680_v38 = vpack.c.bf16 %v349_v29, %v348_v28  ;;  %v8712_v41 = vpack.c.bf16 %v126_v32, %v120_v30 }
  0x4f   :  { %8699 = vmatprep.subr.bf16.mxu1 %v8698_v53  ;;  %v133_v35 = vld [vmem:[%s15955_s2 + $0x188] sm:$0xff]  ;;  %v350_v39 = vld [vmem:[%s15956_s3 + $0x240] sm:$0xff]  ;;  %v8682_v43 = vpack.c.bf16 %v367_v34, %v366_v33  ;;  %v138_v48 = vld [vmem:[%s15955_s2 + $0x1b0] sm:$0xff] }
  0x50   :  { %477 = vmatmul.mubr.f32.vlgmr.msra.gmra.mrb[0].mxu0 %v395_v59  ;;  %v351_v40 = vld [vmem:[%s15956_s3 + $0x248] sm:$0xff]  ;;  %v132_v44 = vld [vmem:[%s15955_s2 + $0x180] sm:$0xff]  ;;  %v8714_v47 = vpack.c.bf16 %v139_v36, %v133_v35  ;;  %v368_v49 = vld [vmem:[%s15956_s3 + $0x2d0] sm:$0xff] }
  0x51   :  { %547 = vmatmul.mubr.f32.vlgmr.msra.gmra.mrb[0].mxu1 %v399_v62  ;;  %8669 = vmatpush3.bf16.msra.mxu0 %v8668_v60  ;;  %v10804_v45 = vld [vmem:[%s15955_s2 + $0x28] sm:$0xff]  ;;  %v369_v50 = vld [vmem:[%s15956_s3 + $0x2d8] sm:$0xff]  ;;  %v10830_v55 = vld [vmem:[%s16163_s26] sm:$0xff]  ;;  %v8684_v56 = vpack.c.bf16 %v351_v40, %v350_v39  ;;  %v8716_v58 = vpack.c.bf16 %v138_v48, %v132_v44 }
  0x52   :  { %8701 = vmatpush1.bf16.msra.mxu1 %v8700_v61  ;;  %8671 = vmatprep.subr.bf16.mxu0 %v8670_v63  ;;  %v10809_v46 = vld [vmem:[%s15955_s2 + $0x328] sm:$0xff]  ;;  %v151_v53 = vld [vmem:[%s15955_s2 + $0x218] sm:$0xff]  ;;  %v8686_v59 = vpack.c.bf16 %v369_v50, %v368_v49  ;;  %v352_v60 = vld [vmem:[%s15956_s3 + $0x250] sm:$0xff] }
  0x53   :  { %8703 = vmatprep.subr.bf16.mxu1 %v8702_v3  ;;  %690 = vmatprep.mubr.f32.mxu1 %v15974_v20  ;;  %v404_v51 = vrot.slane %v10809_v46, 7  ;;  %v145_v52 = vld [vmem:[%s15955_s2 + $0x1e8] sm:$0xff]  ;;  %v353_v61 = vld [vmem:[%s15956_s3 + $0x258] sm:$0xff]  ;;  %v144_v62 = vld [vmem:[%s15955_s2 + $0x1e0] sm:$0xff] }
  0x54   :  { %622 = vadd.xlane.f32.xlu0 %v10830_v55  ;;  %v8718_v63 = vpack.c.bf16 %v151_v53, %v145_v52  ;;  %v150_v0 = vld [vmem:[%s15955_s2 + $0x210] sm:$0xff]  ;;  %v370_v1 = vld [vmem:[%s15956_s3 + $0x2e0] sm:$0xff]  ;;  %v371_v2 = vld [vmem:[%s15956_s3 + $0x2e8] sm:$0xff]  ;;  %v8688_v5 = vpack.c.bf16 %v353_v61, %v352_v60 }
  0x55   :  { %8673 = vmatpush3.bf16.msra.mxu0 %v8672_v9  ;;  %v405_v57 = vsel %vm16078_vm0, %v404_v51, %v10804_v45  ;;  %v157_v3 = vld [vmem:[%s15955_s2 + $0x248] sm:$0xff]  ;;  %v163_v4 = vld [vmem:[%s15955_s2 + $0x278] sm:$0xff]  ;;  %v8720_v6 = vpack.c.bf16 %v150_v0, %v144_v62  ;;  %v8690_v7 = vpack.c.bf16 %v371_v2, %v370_v1  ;;  %v354_v8 = vld [vmem:[%s15956_s3 + $0x260] sm:$0xff] }
  0x56   :  { %8705 = vmatpush1.bf16.msra.mxu1 %v8704_v10  ;;  %8675 = vmatprep.subr.bf16.mxu0 %v8674_v11  ;;  %v355_v9 = vld [vmem:[%s15956_s3 + $0x268] sm:$0xff]  ;;  %v156_v10 = vld [vmem:[%s15955_s2 + $0x240] sm:$0xff]  ;;  %v8722_v11 = vpack.c.bf16 %v163_v4, %v157_v3  ;;  %v162_v12 = vld [vmem:[%s15955_s2 + $0x270] sm:$0xff] }
  0x57   :  { %8707 = vmatprep.subr.bf16.mxu1 %v8706_v15  ;;  %616 = vmatprep.mubr.f32.mxu0 %v405_v57  ;;  %v372_v13 = vld [vmem:[%s15956_s3 + $0x2f0] sm:$0xff]  ;;  %v373_v14 = vld [vmem:[%s15956_s3 + $0x2f8] sm:$0xff]  ;;  %v169_v15 = vld [vmem:[%s15955_s2 + $0x2a8] sm:$0xff]  ;;  %v8692_v17 = vpack.c.bf16 %v355_v9, %v354_v8  ;;  %v8724_v18 = vpack.c.bf16 %v162_v12, %v156_v10 }
  0x58   :  { %v175_v16 = vld [vmem:[%s15955_s2 + $0x2d8] sm:$0xff]  ;;  %v8694_v21 = vpack.c.bf16 %v373_v14, %v372_v13  ;;  %v356_v22 = vld [vmem:[%s15956_s3 + $0x270] sm:$0xff]  ;;  %v168_v28 = vld [vmem:[%s15955_s2 + $0x2a0] sm:$0xff] }
  0x59   :  { %8677 = vmatpush3.bf16.msra.mxu0 %v8676_v23  ;;  %v357_v23 = vld [vmem:[%s15956_s3 + $0x278] sm:$0xff]  ;;  %v174_v29 = vld [vmem:[%s15955_s2 + $0x2d0] sm:$0xff]  ;;  %v93_v30 = vld [vmem:[%s15955_s2 + $0x48] sm:$0xff]  ;;  %s5265_s3 = ssub.f32 1.0, %s8107_s18 }
  0x5a   :  { %8709 = vmatpush1.bf16.msra.mxu1 %v8708_v24  ;;  %8679 = vmatprep.subr.bf16.mxu0 %v8678_v25  ;;  %v10892_v24 = vld [vmem:[%s15955_s2 + $0x320] sm:$0xff]  ;;  %v8726_v25 = vpack.c.bf16 %v175_v16, %v169_v15  ;;  %v8696_v32 = vpack.c.bf16 %v357_v23, %v356_v22  ;;  %v8728_v35 = vpack.c.bf16 %v174_v29, %v168_v28  ;;  %v94_v40 = vld [vmem:[%s15955_s2 + $0x50] sm:$0xff]  ;;  %v101_v44 = vld [vmem:[%s15955_s2 + $0x88] sm:$0xff] }
  0x5b   :  { %8711 = vmatprep.subr.bf16.mxu1 %v8710_v31  ;;  %v95_v31 = vld [vmem:[%s15955_s2 + $0x58] sm:$0xff]  ;;  %v402_v33 = vrot.slane %v10892_v24, 7  ;;  %v92_v34 = vld [vmem:[%s15955_s2 + $0x40] sm:$0xff]  ;;  %v98_v50 = vld [vmem:[%s15955_s2 + $0x70] sm:$0xff] }
  0x5c   :  { %v88_v36 = vld [vmem:[%s15955_s2 + $0x20] sm:$0xff]  ;;  %v8762_v39 = vpack.c.bf16 %v95_v31, %v10804_v45  ;;  %v8732_v45 = vpack.c.bf16 %v92_v34, %v10702_v54  ;;  %v106_v53 = vld [vmem:[%s15955_s2 + $0xb0] sm:$0xff]  ;;  %v117_v57 = vld [vmem:[%s15955_s2 + $0x108] sm:$0xff] }
  0x5d   :  { %8681 = vmatpush3.bf16.msra.mxu0 %v8680_v38  ;;  %v8730_v38 = vpack.c.bf16 %v93_v30, %v10641_v26  ;;  %v107_v26 = vld [vmem:[%s15955_s2 + $0xb8] sm:$0xff]  ;;  %v8764_v48 = vpack.c.bf16 %v94_v40, %v88_v36  ;;  %v104_v51 = vld [vmem:[%s15955_s2 + $0xa0] sm:$0xff]  ;;  %v118_v3 = vld [vmem:[%s15955_s2 + $0x110] sm:$0xff] }
  0x5e   :  { %8713 = vmatpush1.bf16.msra.mxu1 %v8712_v41  ;;  %8683 = vmatprep.subr.bf16.mxu0 %v8682_v43  ;;  %v99_v41 = vld [vmem:[%s15955_s2 + $0x78] sm:$0xff]  ;;  %v105_v43 = vld [vmem:[%s15955_s2 + $0xa8] sm:$0xff]  ;;  %v100_v52 = vld [vmem:[%s15955_s2 + $0x80] sm:$0xff]  ;;  %v8766_v54 = vpack.c.bf16 %v107_v26, %v101_v44  ;;  %v8736_v60 = vpack.c.bf16 %v104_v51, %v98_v50 }
  0x5f   :  { %8715 = vmatprep.subr.bf16.mxu1 %v8714_v47  ;;  %v403_v47 = vsel %vm16078_vm0, %v402_v33, %v88_v36  ;;  %v8734_v49 = vpack.c.bf16 %v105_v43, %v99_v41  ;;  %v8768_v61 = vpack.c.bf16 %v106_v53, %v100_v52  ;;  %v116_v0 = vld [vmem:[%s15955_s2 + $0x100] sm:$0xff]  ;;  %v123_v4 = vld [vmem:[%s15955_s2 + $0x138] sm:$0xff]  ;;  %v130_v15 = vld [vmem:[%s15955_s2 + $0x170] sm:$0xff] }
  0x60   :  { %v112_v1 = vld [vmem:[%s15955_s2 + $0xe0] sm:$0xff]  ;;  %v135_v16 = vld [vmem:[%s15955_s2 + $0x198] sm:$0xff]  ;;  %v134_v28 = vld [vmem:[%s15955_s2 + $0x190] sm:$0xff] }
  0x61   :  { %8685 = vmatpush3.bf16.msra.mxu0 %v8684_v56  ;;  %v111_v56 = vld [vmem:[%s15955_s2 + $0xd8] sm:$0xff]  ;;  %v8772_v9 = vpack.c.bf16 %v118_v3, %v112_v1  ;;  %v128_v12 = vld [vmem:[%s15955_s2 + $0x160] sm:$0xff]  ;;  %v153_v34 = vld [vmem:[%s15955_s2 + $0x228] sm:$0xff] }
  0x62   :  { %8717 = vmatpush1.bf16.msra.mxu1 %v8716_v58  ;;  %8687 = vmatprep.subr.bf16.mxu0 %v8686_v59  ;;  %v113_v58 = vld [vmem:[%s15955_s2 + $0xe8] sm:$0xff]  ;;  %v119_v59 = vld [vmem:[%s15955_s2 + $0x118] sm:$0xff]  ;;  %v8738_v62 = vpack.c.bf16 %v117_v57, %v111_v56  ;;  %v124_v13 = vld [vmem:[%s15955_s2 + $0x140] sm:$0xff] }
  0x63   :  { %8719 = vmatprep.subr.bf16.mxu1 %v8718_v63  ;;  %v110_v63 = vld [vmem:[%s15955_s2 + $0xd0] sm:$0xff]  ;;  %v8770_v2 = vpack.c.bf16 %v119_v59, %v113_v58  ;;  %v8776_v23 = vpack.c.bf16 %v130_v15, %v124_v13  ;;  %v140_v29 = vld [vmem:[%s15955_s2 + $0x1c0] sm:$0xff]  ;;  %v147_v33 = vld [vmem:[%s15955_s2 + $0x1f8] sm:$0xff] }
  0x64   :  { %v8740_v8 = vpack.c.bf16 %v116_v0, %v110_v63  ;;  %v136_v30 = vld [vmem:[%s15955_s2 + $0x1a0] sm:$0xff]  ;;  %v155_v36 = vld [vmem:[%s15955_s2 + $0x238] sm:$0xff]  ;;  %v8750_v40 = vpack.c.bf16 %v153_v34, %v147_v33  ;;  %v146_v41 = vld [vmem:[%s15955_s2 + $0x1f0] sm:$0xff] }
  0x65   :  { %8689 = vmatpush3.bf16.msra.mxu0 %v8688_v5  ;;  %v129_v5 = vld [vmem:[%s15955_s2 + $0x168] sm:$0xff]  ;;  %v152_v43 = vld [vmem:[%s15955_s2 + $0x220] sm:$0xff]  ;;  %v167_v50 = vld [vmem:[%s15955_s2 + $0x298] sm:$0xff] }
  0x66   :  { %8721 = vmatpush1.bf16.msra.mxu1 %v8720_v6  ;;  %8691 = vmatprep.subr.bf16.mxu0 %v8690_v7  ;;  %v125_v6 = vld [vmem:[%s15955_s2 + $0x148] sm:$0xff]  ;;  %v131_v7 = vld [vmem:[%s15955_s2 + $0x178] sm:$0xff]  ;;  %v8742_v10 = vpack.c.bf16 %v129_v5, %v123_v4  ;;  %v148_v44 = vld [vmem:[%s15955_s2 + $0x200] sm:$0xff]  ;;  %v8752_v51 = vpack.c.bf16 %v152_v43, %v146_v41 }
  0x67   :  { %8723 = vmatprep.subr.bf16.mxu1 %v8722_v11  ;;  %v122_v11 = vld [vmem:[%s15955_s2 + $0x130] sm:$0xff]  ;;  %v8774_v14 = vpack.c.bf16 %v131_v7, %v125_v6  ;;  %v164_v56 = vld [vmem:[%s15955_s2 + $0x280] sm:$0xff]  ;;  %v173_v63 = vld [vmem:[%s15955_s2 + $0x2c8] sm:$0xff] }
  0x68   :  { %v8744_v22 = vpack.c.bf16 %v128_v12, %v122_v11  ;;  %v158_v52 = vld [vmem:[%s15955_s2 + $0x250] sm:$0xff]  ;;  %v160_v57 = vld [vmem:[%s15955_s2 + $0x260] sm:$0xff]  ;;  %v179_v0 = vld [vmem:[%s15955_s2 + $0x2f8] sm:$0xff] }
  0x69   :  { %8693 = vmatpush3.bf16.msra.mxu0 %v8692_v17  ;;  %v141_v17 = vld [vmem:[%s15955_s2 + $0x1c8] sm:$0xff]  ;;  %v166_v58 = vld [vmem:[%s15955_s2 + $0x290] sm:$0xff]  ;;  %v8756_v1 = vpack.c.bf16 %v164_v56, %v158_v52  ;;  %v176_v5 = vld [vmem:[%s15955_s2 + $0x2e0] sm:$0xff]  ;;  %v8790_v6 = vpack.c.bf16 %v179_v0, %v173_v63 }
  0x6a   :  { %8725 = vmatpush1.bf16.msra.mxu1 %v8724_v18  ;;  %8695 = vmatprep.subr.bf16.mxu0 %v8694_v21  ;;  %v137_v18 = vld [vmem:[%s15955_s2 + $0x1a8] sm:$0xff]  ;;  %v143_v21 = vld [vmem:[%s15955_s2 + $0x1d8] sm:$0xff]  ;;  %v170_v4 = vld [vmem:[%s15955_s2 + $0x2b0] sm:$0xff] }
  0x6b   :  { %8727 = vmatprep.subr.bf16.mxu1 %v8726_v25  ;;  %v8746_v25 = vpack.c.bf16 %v141_v17, %v135_v16  ;;  %v8778_v31 = vpack.c.bf16 %v143_v21, %v137_v18  ;;  %v172_v7 = vld [vmem:[%s15955_s2 + $0x2c0] sm:$0xff]  ;;  %v8760_v11 = vpack.c.bf16 %v176_v5, %v170_v4  ;;  %v193_v17 = vld [vmem:[%s15955_s2 + $0x368] sm:$0xff]  ;;  %v199_v18 = vld [vmem:[%s15955_s2 + $0x398] sm:$0xff] }
  0x6c   :  { %v188_v16 = vld [vmem:[%s15955_s2 + $0x340] sm:$0xff]  ;;  %v213_v33 = vld [vmem:[%s15955_s2 + $0x408] sm:$0xff]  ;;  %v218_v52 = vld [vmem:[%s15955_s2 + $0x430] sm:$0xff] }
  0x6d   :  { %8697 = vmatpush3.bf16.msra.mxu0 %v8696_v32  ;;  %v142_v32 = vld [vmem:[%s15955_s2 + $0x1d0] sm:$0xff]  ;;  %v212_v41 = vld [vmem:[%s15955_s2 + $0x400] sm:$0xff]  ;;  %v217_v43 = vld [vmem:[%s15955_s2 + $0x428] sm:$0xff] }
  0x6e   :  { %8729 = vmatpush1.bf16.msra.mxu1 %v8728_v35  ;;  %8731 = vmatprep.subr.bf16.mxu0 %v8730_v38  ;;  %v149_v35 = vld [vmem:[%s15955_s2 + $0x208] sm:$0xff]  ;;  %v8748_v38 = vpack.c.bf16 %v140_v29, %v134_v28  ;;  %v198_v28 = vld [vmem:[%s15955_s2 + $0x390] sm:$0xff]  ;;  %v228_v0 = vld [vmem:[%s15955_s2 + $0x480] sm:$0xff] }
  0x6f   :  { %8763 = vmatprep.subr.bf16.mxu1 %v8762_v39  ;;  %v8780_v39 = vpack.c.bf16 %v142_v32, %v136_v30  ;;  %v8782_v26 = vpack.c.bf16 %v155_v36, %v149_v35  ;;  %v194_v29 = vld [vmem:[%s15955_s2 + $0x370] sm:$0xff]  ;;  %v207_v32 = vld [vmem:[%s15955_s2 + $0x3d8] sm:$0xff]  ;;  %v229_v56 = vld [vmem:[%s15955_s2 + $0x488] sm:$0xff] }
  0x70   :  { %617 = vmatmul.mubr.f32.vlgmr.msra.gmra.mrb[2].mxu0 %v403_v47  ;;  %v159_v47 = vld [vmem:[%s15955_s2 + $0x258] sm:$0xff]  ;;  %v236_v4 = vld [vmem:[%s15955_s2 + $0x4c0] sm:$0xff]  ;;  %v241_v5 = vld [vmem:[%s15955_s2 + $0x4e8] sm:$0xff] }
  0x71   :  { %691 = vmatmul.mubr.f32.vlgmr.msra.gmra.mrb[2].mxu1 %v10830_v55  ;;  %8733 = vmatpush1.bf16.msra.mxu0 %v8732_v45  ;;  %v154_v45 = vld [vmem:[%s15955_s2 + $0x230] sm:$0xff] }
  0x72   :  { %8765 = vmatpush1.bf16.msra.mxu1 %v8764_v48  ;;  %8735 = vmatprep.subr.bf16.mxu0 %v8734_v49  ;;  %v165_v48 = vld [vmem:[%s15955_s2 + $0x288] sm:$0xff] }
  0x73   :  { %8767 = vmatprep.subr.bf16.mxu1 %v8766_v54  ;;  %761 = vmatprep.mubr.f32.mxu0 %v15974_v20  ;;  %v161_v49 = vld [vmem:[%s15955_s2 + $0x268] sm:$0xff]  ;;  %v8784_v54 = vpack.c.bf16 %v154_v45, %v148_v44  ;;  %v8754_v53 = vpack.c.bf16 %v165_v48, %v159_v47  ;;  %v223_v44 = vld [vmem:[%s15955_s2 + $0x458] sm:$0xff] }
  0x74   :  { %832 = vmatprep.mubr.f32.mxu1 %v15974_v20  ;;  %v8786_v59 = vpack.c.bf16 %v167_v50, %v161_v49  ;;  %v225_v45 = vld [vmem:[%s15955_s2 + $0x468] sm:$0xff]  ;;  %v8806_v49 = vpack.c.bf16 %v223_v44, %v217_v43  ;;  %v216_v50 = vld [vmem:[%s15955_s2 + $0x420] sm:$0xff]  ;;  %v191_v43 = vld [vmem:[%s15955_s2 + $0x358] sm:$0xff] }
  0x75   :  { %8737 = vmatpush1.bf16.msra.mxu0 %v8736_v60  ;;  %v171_v60 = vld [vmem:[%s15955_s2 + $0x2b8] sm:$0xff] }
  0x76   :  { %8769 = vmatpush1.bf16.msra.mxu1 %v8768_v61  ;;  %8739 = vmatprep.subr.bf16.mxu0 %v8738_v62  ;;  %v177_v61 = vld [vmem:[%s15955_s2 + $0x2e8] sm:$0xff] }
  0x77   :  { %8771 = vmatprep.subr.bf16.mxu1 %v8770_v2  ;;  %v11076_v62 = vld [vmem:[%s16163_s26 + $0x8] sm:$0xff]  ;;  %v8788_v2 = vpack.c.bf16 %v166_v58, %v160_v57  ;;  %v8758_v3 = vpack.c.bf16 %v177_v61, %v171_v60  ;;  %v235_v57 = vld [vmem:[%s15955_s2 + $0x4b8] sm:$0xff]  ;;  %s8097_s26 = sld [smem:[#allocation3 + $0x2]] }
  0x78   :  { %624 = vadd.xlane.f32.xlu0 %v11076_v62  ;;  %v231_v58 = vld [vmem:[%s15955_s2 + $0x498] sm:$0xff]  ;;  %v8810_v63 = vpack.c.bf16 %v235_v57, %v229_v56  ;;  %v208_v57 = vld [vmem:[%s15955_s2 + $0x3e0] sm:$0xff] }
  0x79   :  { %8741 = vmatpush1.bf16.msra.mxu0 %v8740_v8  ;;  %v178_v8 = vld [vmem:[%s15955_s2 + $0x2f0] sm:$0xff] }
  0x7a   :  { %8773 = vmatpush1.bf16.msra.mxu1 %v8772_v9  ;;  %8743 = vmatprep.subr.bf16.mxu0 %v8742_v10  ;;  %v187_v9 = vld [vmem:[%s15955_s2 + $0x338] sm:$0xff]  ;;  %v189_v10 = vld [vmem:[%s15955_s2 + $0x348] sm:$0xff]  ;;  %v8792_v12 = vpack.c.bf16 %v178_v8, %v172_v7 }
  0x7b   :  { %8775 = vmatprep.subr.bf16.mxu1 %v8774_v14  ;;  %v8794_v13 = vpack.c.bf16 %v187_v9, %v10623_v19  ;;  %v186_v14 = vld [vmem:[%s15955_s2 + $0x330] sm:$0xff]  ;;  %v8826_v15 = vpack.c.bf16 %v189_v10, %v10646_v27  ;;  %v195_v19 = vld [vmem:[%s15955_s2 + $0x378] sm:$0xff]  ;;  %v201_v27 = vld [vmem:[%s15955_s2 + $0x3a8] sm:$0xff] }
  0x7c   :  { %v8796_v21 = vpack.c.bf16 %v186_v14, %v10666_v37  ;;  %v8830_v30 = vpack.c.bf16 %v201_v27, %v195_v19  ;;  %v200_v37 = vld [vmem:[%s15955_s2 + $0x3a0] sm:$0xff]  ;;  %v243_v7 = vld [vmem:[%s15955_s2 + $0x4f8] sm:$0xff]  ;;  %v249_v8 = vld [vmem:[%s15955_s2 + $0x528] sm:$0xff] }
  0x7d   :  { %8745 = vmatpush1.bf16.msra.mxu0 %v8744_v22  ;;  %v8828_v22 = vpack.c.bf16 %v188_v16, %v10679_v42  ;;  %v205_v42 = vld [vmem:[%s15955_s2 + $0x3c8] sm:$0xff]  ;;  %v8832_v35 = vpack.c.bf16 %v200_v37, %v194_v29  ;;  %v242_v14 = vld [vmem:[%s15955_s2 + $0x4f0] sm:$0xff]  ;;  %v248_v16 = vld [vmem:[%s15955_s2 + $0x520] sm:$0xff]  ;;  %s3823_s21 = ssub.f32 1.0, %s8097_s26 }
  0x7e   :  { %8777 = vmatpush1.bf16.msra.mxu1 %v8776_v23  ;;  %8747 = vmatprep.subr.bf16.mxu0 %v8746_v25  ;;  %v8798_v23 = vpack.c.bf16 %v199_v18, %v193_v17  ;;  %v192_v25 = vld [vmem:[%s15955_s2 + $0x360] sm:$0xff]  ;;  %v253_v17 = vld [vmem:[%s15955_s2 + $0x548] sm:$0xff]  ;;  %v259_v18 = vld [vmem:[%s15955_s2 + $0x578] sm:$0xff] }
  0x7f   :  { %8779 = vmatprep.subr.bf16.mxu1 %v8778_v31  ;;  %v211_v31 = vld [vmem:[%s15955_s2 + $0x3f8] sm:$0xff]  ;;  %v8800_v34 = vpack.c.bf16 %v198_v28, %v192_v25  ;;  %v261_v27 = vld [vmem:[%s15955_s2 + $0x588] sm:$0xff]  ;;  %v252_v25 = vld [vmem:[%s15955_s2 + $0x540] sm:$0xff] }
  0x80   :  { %v8802_v36 = vpack.c.bf16 %v211_v31, %v205_v42  ;;  %v255_v19 = vld [vmem:[%s15955_s2 + $0x558] sm:$0xff]  ;;  %v258_v28 = vld [vmem:[%s15955_s2 + $0x570] sm:$0xff]  ;;  %v260_v37 = vld [vmem:[%s15955_s2 + $0x580] sm:$0xff] }
  0x81   :  { %8749 = vmatpush1.bf16.msra.mxu0 %v8748_v38  ;;  %v204_v38 = vld [vmem:[%s15955_s2 + $0x3c0] sm:$0xff]  ;;  %v254_v29 = vld [vmem:[%s15955_s2 + $0x550] sm:$0xff]  ;;  %v265_v42 = vld [vmem:[%s15955_s2 + $0x5a8] sm:$0xff] }
  0x82   :  { %8781 = vmatpush1.bf16.msra.mxu1 %v8780_v39  ;;  %8751 = vmatprep.subr.bf16.mxu0 %v8750_v40  ;;  %v210_v39 = vld [vmem:[%s15955_s2 + $0x3f0] sm:$0xff]  ;;  %v271_v31 = vld [vmem:[%s15955_s2 + $0x5d8] sm:$0xff] }
  0x83   :  { %8783 = vmatprep.subr.bf16.mxu1 %v8782_v26  ;;  %v206_v40 = vld [vmem:[%s15955_s2 + $0x3d0] sm:$0xff]  ;;  %v219_v26 = vld [vmem:[%s15955_s2 + $0x438] sm:$0xff]  ;;  %v8804_v47 = vpack.c.bf16 %v210_v39, %v204_v38  ;;  %v264_v38 = vld [vmem:[%s15955_s2 + $0x5a0] sm:$0xff] }
  0x84   :  { %v8836_v48 = vpack.c.bf16 %v212_v41, %v206_v40  ;;  %v270_v39 = vld [vmem:[%s15955_s2 + $0x5d0] sm:$0xff]  ;;  %v272_v41 = vld [vmem:[%s15955_s2 + $0x5e0] sm:$0xff] }
  0x85   :  { %8753 = vmatpush1.bf16.msra.mxu0 %v8752_v51  ;;  %v222_v51 = vld [vmem:[%s15955_s2 + $0x450] sm:$0xff]  ;;  %v8824_v44 = vpack.c.bf16 %v270_v39, %v264_v38 }
  0x86   :  { %8785 = vmatpush1.bf16.msra.mxu1 %v8784_v54  ;;  %8755 = vmatprep.subr.bf16.mxu0 %v8754_v53  ;;  %v8838_v54 = vpack.c.bf16 %v225_v45, %v219_v26  ;;  %v224_v53 = vld [vmem:[%s15955_s2 + $0x460] sm:$0xff]  ;;  %v8808_v60 = vpack.c.bf16 %v222_v51, %v216_v50  ;;  %v8858_v45 = vpack.c.bf16 %v191_v43, %v10809_v46  ;;  %v1070_v38 = vld [vmem:[#allocation7 + $0x10] sm:$0xff] }
  0x87   :  { %8787 = vmatprep.subr.bf16.mxu1 %v8786_v59  ;;  %v237_v59 = vld [vmem:[%s15955_s2 + $0x4c8] sm:$0xff]  ;;  %v8840_v61 = vpack.c.bf16 %v224_v53, %v218_v52  ;;  %v196_v46 = vld [vmem:[%s15955_s2 + $0x380] sm:$0xff]  ;;  %v202_v52 = vld [vmem:[%s15955_s2 + $0x3b0] sm:$0xff] }
  0x88   :  { %v215_v53 = vld [vmem:[%s15955_s2 + $0x418] sm:$0xff] }
  0x89   :  { %8757 = vmatpush1.bf16.msra.mxu0 %v8756_v1  ;;  %v234_v1 = vld [vmem:[%s15955_s2 + $0x4b0] sm:$0xff] }
  0x8a   :  { %8789 = vmatpush1.bf16.msra.mxu1 %v8788_v2  ;;  %8759 = vmatprep.subr.bf16.mxu0 %v8758_v3  ;;  %v230_v2 = vld [vmem:[%s15955_s2 + $0x490] sm:$0xff]  ;;  %v8842_v3 = vpack.c.bf16 %v237_v59, %v231_v58  ;;  %v8812_v9 = vpack.c.bf16 %v234_v1, %v228_v0  ;;  %v221_v59 = vld [vmem:[%s15955_s2 + $0x448] sm:$0xff]  ;;  %v220_v0 = vld [vmem:[%s15955_s2 + $0x440] sm:$0xff] }
  0x8b   :  { %8791 = vmatprep.subr.bf16.mxu1 %v8790_v6  ;;  %v247_v6 = vld [vmem:[%s15955_s2 + $0x518] sm:$0xff]  ;;  %v8844_v10 = vpack.c.bf16 %v236_v4, %v230_v2  ;;  %v214_v58 = vld [vmem:[%s15955_s2 + $0x410] sm:$0xff]  ;;  %v233_v2 = vld [vmem:[%s15955_s2 + $0x4a8] sm:$0xff] }
  0x8c   :  { %v226_v1 = vld [vmem:[%s15955_s2 + $0x470] sm:$0xff] }
  0x8d   :  { %8761 = vmatpush1.bf16.msra.mxu0 %v8760_v11  ;;  %v8814_v11 = vpack.c.bf16 %v247_v6, %v241_v5  ;;  %v8872_v4 = vpack.c.bf16 %v226_v1, %v220_v0  ;;  %v232_v6 = vld [vmem:[%s15955_s2 + $0x4a0] sm:$0xff] }
  0x8e   :  { %8793 = vmatpush1.bf16.msra.mxu1 %v8792_v12  ;;  %8795 = vmatprep.subr.bf16.mxu0 %v8794_v13  ;;  %v240_v12 = vld [vmem:[%s15955_s2 + $0x4e0] sm:$0xff]  ;;  %v246_v13 = vld [vmem:[%s15955_s2 + $0x510] sm:$0xff] }
  0x8f   :  { %8827 = vmatprep.subr.bf16.mxu1 %v8826_v15  ;;  %v8846_v15 = vpack.c.bf16 %v249_v8, %v243_v7  ;;  %v238_v7 = vld [vmem:[%s15955_s2 + $0x4d0] sm:$0xff]  ;;  %v245_v8 = vld [vmem:[%s15955_s2 + $0x508] sm:$0xff]  ;;  %v1075_v0 = vld [vmem:[#allocation7 + $0x38] sm:$0xff] }
  0x90   :  { %762 = vmatmul.mubr.f32.vlgmr.msra.gmra.mrb[4].mxu0 %v10830_v55 }
  0x91   :  { %833 = vmatmul.mubr.f32.vlgmr.msra.gmra.mrb[4].mxu1 %v10830_v55  ;;  %8797 = vmatpush1.bf16.msra.mxu0 %v8796_v21  ;;  %v8834_v55 = vpack.c.bf16 %v213_v33, %v207_v32  ;;  %v8816_v21 = vpack.c.bf16 %v246_v13, %v240_v12  ;;  %v267_v32 = vld [vmem:[%s15955_s2 + $0x5b8] sm:$0xff]  ;;  %v273_v33 = vld [vmem:[%s15955_s2 + $0x5e8] sm:$0xff]  ;;  %v244_v12 = vld [vmem:[%s15955_s2 + $0x500] sm:$0xff] }
  0x92   :  { %8829 = vmatpush1.bf16.msra.mxu1 %v8828_v22  ;;  %8799 = vmatprep.subr.bf16.mxu0 %v8798_v23  ;;  %v8848_v22 = vpack.c.bf16 %v248_v16, %v242_v14  ;;  %v8818_v23 = vpack.c.bf16 %v259_v18, %v253_v17  ;;  %v8854_v40 = vpack.c.bf16 %v273_v33, %v267_v32  ;;  %v250_v13 = vld [vmem:[%s15955_s2 + $0x530] sm:$0xff]  ;;  %v257_v14 = vld [vmem:[%s15955_s2 + $0x568] sm:$0xff]  ;;  %v256_v18 = vld [vmem:[%s15955_s2 + $0x560] sm:$0xff] }
  0x93   :  { %8831 = vmatprep.subr.bf16.mxu1 %v8830_v30  ;;  %903 = vmatprep.mubr.f32.mxu0 %v15974_v20  ;;  %v8850_v30 = vpack.c.bf16 %v261_v27, %v255_v19  ;;  %v8880_v16 = vpack.c.bf16 %v250_v13, %v244_v12  ;;  %v262_v19 = vld [vmem:[%s15955_s2 + $0x590] sm:$0xff]  ;;  %v269_v27 = vld [vmem:[%s15955_s2 + $0x5c8] sm:$0xff] }
  0x94   :  { %974 = vmatprep.mubr.f32.mxu1 %v15974_v20  ;;  %v1116_v33 = vld [vmem:[#allocation7 + $0x180] sm:$0xff]  ;;  %v1094_v13 = vld [vmem:[#allocation7 + $0xd0] sm:$0xff] }
  0x95   :  { %8801 = vmatpush1.bf16.msra.mxu0 %v8800_v34  ;;  %v8820_v34 = vpack.c.bf16 %v258_v28, %v252_v25  ;;  %v8884_v25 = vpack.c.bf16 %v262_v19, %v256_v18  ;;  %v268_v28 = vld [vmem:[%s15955_s2 + $0x5c0] sm:$0xff] }
  0x96   :  { %8833 = vmatpush1.bf16.msra.mxu1 %v8832_v35  ;;  %8803 = vmatprep.subr.bf16.mxu0 %v8802_v36  ;;  %v8852_v35 = vpack.c.bf16 %v260_v37, %v254_v29  ;;  %v8822_v36 = vpack.c.bf16 %v271_v31, %v265_v42  ;;  %v1069_v37 = vld [vmem:[#allocation7 + $0x8] sm:$0xff]  ;;  %v1079_v18 = vld [vmem:[#allocation7 + $0x58] sm:$0xff] }
  0x97   :  { %8835 = vmatprep.subr.bf16.mxu1 %v8834_v55  ;;  %v266_v55 = vld [vmem:[%s15955_s2 + $0x5b0] sm:$0xff] }
  0x98   :  { %v8856_v26 = vpack.c.bf16 %v272_v41, %v266_v55  ;;  %v274_v31 = vld [vmem:[%s15955_s2 + $0x5f0] sm:$0xff]  ;;  %v1100_v41 = vld [vmem:[#allocation7 + $0x100] sm:$0xff] }
  0x99   :  { %8805 = vmatpush1.bf16.msra.mxu0 %v8804_v47  ;;  %v190_v47 = vld [vmem:[%s15955_s2 + $0x350] sm:$0xff]  ;;  %v8888_v55 = vpack.c.bf16 %v274_v31, %v268_v28  ;;  %v1080_v31 = vld [vmem:[#allocation7 + $0x60] sm:$0xff] }
  0x9a   :  { %8837 = vmatpush1.bf16.msra.mxu1 %v8836_v48  ;;  %8807 = vmatprep.subr.bf16.mxu0 %v8806_v49  ;;  %v197_v48 = vld [vmem:[%s15955_s2 + $0x388] sm:$0xff]  ;;  %v203_v49 = vld [vmem:[%s15955_s2 + $0x3b8] sm:$0xff]  ;;  %v8860_v50 = vpack.c.bf16 %v190_v47, %v10892_v24  ;;  %v8864_v24 = vpack.c.bf16 %v202_v52, %v196_v46 }
  0x9b   :  { %8839 = vmatprep.subr.bf16.mxu1 %v8838_v54  ;;  %v8862_v51 = vpack.c.bf16 %v203_v49, %v197_v48  ;;  %v209_v54 = vld [vmem:[%s15955_s2 + $0x3e8] sm:$0xff]  ;;  %v1119_v47 = vld [vmem:[#allocation7 + $0x198] sm:$0xff] }
  0x9c   :  { %v8866_v56 = vpack.c.bf16 %v215_v53, %v209_v54  ;;  %v1088_v48 = vld [vmem:[#allocation7 + $0xa0] sm:$0xff]  ;;  %v1089_v49 = vld [vmem:[#allocation7 + $0xa8] sm:$0xff]  ;;  %v1102_v54 = vld [vmem:[#allocation7 + $0x110] sm:$0xff] }
  0x9d   :  { %8809 = vmatpush1.bf16.msra.mxu0 %v8808_v60  ;;  %v227_v60 = vld [vmem:[%s15955_s2 + $0x478] sm:$0xff]  ;;  %v1073_v46 = vld [vmem:[#allocation7 + $0x28] sm:$0xff] }
  0x9e   :  { %8841 = vmatpush1.bf16.msra.mxu1 %v8840_v61  ;;  %8811 = vmatprep.subr.bf16.mxu0 %v8810_v63  ;;  %v8868_v61 = vpack.c.bf16 %v214_v58, %v208_v57  ;;  %v8870_v63 = vpack.c.bf16 %v227_v60, %v221_v59  ;;  %v1120_v57 = vld [vmem:[#allocation7 + $0x1a0] sm:$0xff]  ;;  %v1121_v58 = vld [vmem:[#allocation7 + $0x1a8] sm:$0xff]  ;;  %v1090_v59 = vld [vmem:[#allocation7 + $0xb0] sm:$0xff] }
  0x9f   :  { %8843 = vmatprep.subr.bf16.mxu1 %v8842_v3  ;;  %v239_v3 = vld [vmem:[%s15955_s2 + $0x4d8] sm:$0xff]  ;;  %v1097_v28 = vld [vmem:[#allocation7 + $0xe8] sm:$0xff] }
  0xa0   :  { %v8874_v5 = vpack.c.bf16 %v239_v3, %v233_v2  ;;  %v1091_v60 = vld [vmem:[#allocation7 + $0xb8] sm:$0xff]  ;;  %v1104_v2 = vld [vmem:[#allocation7 + $0x120] sm:$0xff]  ;;  %v1105_v3 = vld [vmem:[#allocation7 + $0x128] sm:$0xff] }
  0xa1   :  { %8813 = vmatpush1.bf16.msra.mxu0 %v8812_v9  ;;  %v251_v9 = vld [vmem:[%s15955_s2 + $0x538] sm:$0xff] }
  0xa2   :  { %8845 = vmatpush1.bf16.msra.mxu1 %v8844_v10  ;;  %8815 = vmatprep.subr.bf16.mxu0 %v8814_v11  ;;  %v8876_v10 = vpack.c.bf16 %v238_v7, %v232_v6  ;;  %v8878_v11 = vpack.c.bf16 %v251_v9, %v245_v8  ;;  %v8930_v6 = vpack.c.bf16 %v1121_v58, %v1120_v57  ;;  %v1093_v7 = vld [vmem:[#allocation7 + $0xc8] sm:$0xff]  ;;  %v1076_v8 = vld [vmem:[#allocation7 + $0x40] sm:$0xff]  ;;  %v1114_v58 = vld [vmem:[#allocation7 + $0x170] sm:$0xff] }
  0xa3   :  { %8847 = vmatprep.subr.bf16.mxu1 %v8846_v15  ;;  %v263_v15 = vld [vmem:[%s15955_s2 + $0x598] sm:$0xff]  ;;  %v1077_v9 = vld [vmem:[#allocation7 + $0x48] sm:$0xff] }
  0xa4   :  { %v8882_v17 = vpack.c.bf16 %v263_v15, %v257_v14  ;;  %v1095_v14 = vld [vmem:[#allocation7 + $0xd8] sm:$0xff]  ;;  %v8932_v15 = vpack.c.bf16 %v1105_v3, %v1104_v2 }
  0xa5   :  { %8817 = vmatpush1.bf16.msra.mxu0 %v8816_v21  ;;  %v275_v21 = vld [vmem:[%s15955_s2 + $0x5f8] sm:$0xff]  ;;  %v8081_v3 = vld [vmem:[%s15957_s4] ss:$0 sm:$0xff]  ;;  %s2333_s4 = ssub.f32 1.0, %s11385_s25 }
  0xa6   :  { %8849 = vmatpush1.bf16.msra.mxu1 %v8848_v22  ;;  %8819 = vmatprep.subr.bf16.mxu0 %v8818_v23  ;;  %v1084_v22 = vld [vmem:[#allocation7 + $0x80] sm:$0xff]  ;;  %v1085_v23 = vld [vmem:[#allocation7 + $0x88] sm:$0xff]  ;;  %v8886_v42 = vpack.c.bf16 %v275_v21, %v269_v27  ;;  %v1106_v27 = vld [vmem:[#allocation7 + $0x130] sm:$0xff] }
  0xa7   :  { %8851 = vmatprep.subr.bf16.mxu1 %v8850_v30  ;;  %v8890_v29 = vpack.c.bf16 %v1085_v23, %v1084_v22  ;;  %v1068_v30 = vld [vmem:[#allocation7] sm:$0xff]  ;;  %v1107_v21 = vld [vmem:[#allocation7 + $0x138] sm:$0xff]  ;;  %v1125_v23 = vld [vmem:[#allocation7 + $0x1c8] sm:$0xff] }
  0xa8   :  { %v8892_v32 = vpack.c.bf16 %v1069_v37, %v1068_v30  ;;  %v1124_v22 = vld [vmem:[#allocation7 + $0x1c0] sm:$0xff]  ;;  %v8936_v30 = vpack.c.bf16 %v1107_v21, %v1106_v27 }
  0xa9   :  { %8821 = vmatpush1.bf16.msra.mxu0 %v8820_v34  ;;  %v1117_v34 = vld [vmem:[#allocation7 + $0x188] sm:$0xff]  ;;  %v1108_v37 = vld [vmem:[#allocation7 + $0x140] sm:$0xff] }
  0xaa   :  { %8853 = vmatpush1.bf16.msra.mxu1 %v8852_v35  ;;  %8823 = vmatprep.subr.bf16.mxu0 %v8822_v36  ;;  %v1086_v35 = vld [vmem:[#allocation7 + $0x90] sm:$0xff]  ;;  %v1087_v36 = vld [vmem:[#allocation7 + $0x98] sm:$0xff] }
  0xab   :  { %8855 = vmatprep.subr.bf16.mxu1 %v8854_v40  ;;  %v8894_v39 = vpack.c.bf16 %v1087_v36, %v1086_v35  ;;  %v1071_v40 = vld [vmem:[#allocation7 + $0x18] sm:$0xff]  ;;  %v1098_v35 = vld [vmem:[#allocation7 + $0xf0] sm:$0xff] }
  0xac   :  { %v8896_v43 = vpack.c.bf16 %v1071_v40, %v1070_v38  ;;  %v1099_v36 = vld [vmem:[#allocation7 + $0xf8] sm:$0xff]  ;;  %v1126_v38 = vld [vmem:[#allocation7 + $0x1d0] sm:$0xff] }
  0xad   :  { %8825 = vmatpush1.bf16.msra.mxu0 %v8824_v44  ;;  %v8922_v44 = vpack.c.bf16 %v1117_v34, %v1116_v33  ;;  %v8938_v33 = vpack.c.bf16 %v1125_v23, %v1124_v22  ;;  %v1109_v34 = vld [vmem:[#allocation7 + $0x148] sm:$0xff] }
  0xae   :  { %8857 = vmatpush1.bf16.msra.mxu1 %v8856_v26  ;;  %8859 = vmatprep.subr.bf16.mxu0 %v8858_v45  ;;  %v1101_v26 = vld [vmem:[#allocation7 + $0x108] sm:$0xff]  ;;  %v1118_v45 = vld [vmem:[#allocation7 + $0x190] sm:$0xff] }
  0xaf   :  { %8891 = vmatprep.subr.bf16.mxu1 %v8890_v29  ;;  %v8924_v52 = vpack.c.bf16 %v1101_v26, %v1100_v41  ;;  %v8918_v41 = vpack.c.bf16 %v1099_v36, %v1098_v35  ;;  %v1111_v26 = vld [vmem:[#allocation7 + $0x158] sm:$0xff]  ;;  %v1136_v36 = vld [vmem:[#allocation7 + $0x220] sm:$0xff] }
  0xb0   :  { %904 = vmatmul.mubr.f32.vlgmr.msra.gmra.mrb[6].mxu0 %v11076_v62 }
  0xb1   :  { %975 = vmatmul.mubr.f32.vlgmr.msra.gmra.mrb[6].mxu1 %v11076_v62  ;;  %8861 = vmatpush1.bf16.msra.mxu0 %v8860_v50  ;;  %v1072_v50 = vld [vmem:[#allocation7 + $0x20] sm:$0xff] }
  0xb2   :  { %8863 = vmatprep.subr.bf16.mxu0 %v8862_v51  ;;  %1045 = vmatprep.mubr.f32.mxu0 %v15974_v20  ;;  %v8898_v51 = vpack.c.bf16 %v1089_v49, %v1088_v48  ;;  %v8900_v53 = vpack.c.bf16 %v1073_v46, %v1072_v50  ;;  %v1082_v49 = vld [vmem:[#allocation7 + $0x70] sm:$0xff]  ;;  %v1083_v50 = vld [vmem:[#allocation7 + $0x78] sm:$0xff]  ;;  %v1112_v46 = vld [vmem:[#allocation7 + $0x160] sm:$0xff] }
  0xb3   :  { %8893 = vmatpush3.bf16.msra.mxu1 %v8892_v32  ;;  %v1081_v32 = vld [vmem:[#allocation7 + $0x68] sm:$0xff] }
  0xb4   :  { %8895 = vmatprep.subr.bf16.mxu1 %v8894_v39  ;;  %v1127_v39 = vld [vmem:[#allocation7 + $0x1d8] sm:$0xff]  ;;  %v8916_v40 = vpack.c.bf16 %v1081_v32, %v1080_v31  ;;  %v1153_v31 = vld [vmem:[#allocation7 + $0x2a8] sm:$0xff] }
  0xb5   :  { %8865 = vmatpush1.bf16.msra.mxu0 %v8864_v24  ;;  %v8926_v24 = vpack.c.bf16 %v1119_v47, %v1118_v45  ;;  %v1128_v45 = vld [vmem:[#allocation7 + $0x1e0] sm:$0xff]  ;;  %v1129_v47 = vld [vmem:[#allocation7 + $0x1e8] sm:$0xff] }
  0xb6   :  { %8867 = vmatprep.subr.bf16.mxu0 %v8866_v56  ;;  %v1103_v56 = vld [vmem:[#allocation7 + $0x118] sm:$0xff] }
  0xb7   :  { %8897 = vmatpush3.bf16.msra.mxu1 %v8896_v43  ;;  %v8928_v1 = vpack.c.bf16 %v1103_v56, %v1102_v54  ;;  %v8942_v43 = vpack.c.bf16 %v1127_v39, %v1126_v38  ;;  %v8920_v54 = vpack.c.bf16 %v1083_v50, %v1082_v49  ;;  %v1137_v38 = vld [vmem:[#allocation7 + $0x228] sm:$0xff]  ;;  %v1154_v39 = vld [vmem:[#allocation7 + $0x2b0] sm:$0xff]  ;;  %v1140_v50 = vld [vmem:[#allocation7 + $0x240] sm:$0xff] }
  0xb8   :  { %8899 = vmatprep.subr.bf16.mxu1 %v8898_v51  ;;  %v8946_v51 = vpack.c.bf16 %v1129_v47, %v1128_v45  ;;  %v1156_v45 = vld [vmem:[#allocation7 + $0x2c0] sm:$0xff]  ;;  %v1157_v47 = vld [vmem:[#allocation7 + $0x2c8] sm:$0xff] }
  0xb9   :  { %8869 = vmatpush1.bf16.msra.mxu0 %v8868_v61  ;;  %v1074_v61 = vld [vmem:[#allocation7 + $0x30] sm:$0xff]  ;;  %v8970_v49 = vpack.c.bf16 %v1157_v47, %v1156_v45  ;;  %v1453_v47 = vld [vmem:[%s15962_s9 + $0x180] sm:$0xff] }
  0xba   :  { %8871 = vmatprep.subr.bf16.mxu0 %v8870_v63  ;;  %v8902_v63 = vpack.c.bf16 %v1091_v60, %v1090_v59  ;;  %v1115_v59 = vld [vmem:[#allocation7 + $0x178] sm:$0xff] }
  0xbb   :  { %8901 = vmatpush3.bf16.msra.mxu1 %v8900_v53  ;;  %v1130_v53 = vld [vmem:[#allocation7 + $0x1f0] sm:$0xff]  ;;  %v8952_v60 = vpack.c.bf16 %v1115_v59, %v1114_v58  ;;  %v1161_v58 = vld [vmem:[#allocation7 + $0x2e8] sm:$0xff] }
  0xbc   :  { %8903 = vmatprep.subr.bf16.mxu1 %v8902_v63  ;;  %v1149_v63 = vld [vmem:[#allocation7 + $0x288] sm:$0xff] }
  0xbd   :  { %8873 = vmatpush1.bf16.msra.mxu0 %v8872_v4  ;;  %v8904_v4 = vpack.c.bf16 %v1075_v0, %v1074_v61  ;;  %v1148_v61 = vld [vmem:[#allocation7 + $0x280] sm:$0xff] }
  0xbe   :  { %8875 = vmatprep.subr.bf16.mxu0 %v8874_v5  ;;  %v1092_v5 = vld [vmem:[#allocation7 + $0xc0] sm:$0xff]  ;;  %v8954_v0 = vpack.c.bf16 %v1149_v63, %v1148_v61  ;;  %v1145_v63 = vld [vmem:[#allocation7 + $0x268] sm:$0xff] }
  0xbf   :  { %v8906_v12 = vpack.c.bf16 %v1093_v7, %v1092_v5  ;;  %8905 = vmatpush3.bf16.msra.mxu1 %v8904_v4  ;;  %v1144_v61 = vld [vmem:[#allocation7 + $0x260] sm:$0xff] }
  0xc1   :  { %8877 = vmatpush1.bf16.msra.mxu0 %v8876_v10  ;;  %v1122_v10 = vld [vmem:[#allocation7 + $0x1b0] sm:$0xff]  ;;  %8907 = vmatprep.subr.bf16.mxu1 %v8906_v12 }
  0xc2   :  { %8879 = vmatprep.subr.bf16.mxu0 %v8878_v11  ;;  %v1123_v11 = vld [vmem:[#allocation7 + $0x1b8] sm:$0xff] }
  0xc3   :  { %v8934_v19 = vpack.c.bf16 %v1123_v11, %v1122_v10 }
  0xc5   :  { %8881 = vmatpush1.bf16.msra.mxu0 %v8880_v16  ;;  %v8910_v16 = vpack.c.bf16 %v1095_v14, %v1094_v13  ;;  %v1132_v14 = vld [vmem:[#allocation7 + $0x200] sm:$0xff] }
  0xc6   :  { %8883 = vmatprep.subr.bf16.mxu0 %v8882_v17  ;;  %v1078_v17 = vld [vmem:[#allocation7 + $0x50] sm:$0xff] }
  0xc7   :  { %v8912_v29 = vpack.c.bf16 %v1079_v18, %v1078_v17  ;;  %v1150_v18 = vld [vmem:[#allocation7 + $0x290] sm:$0xff] }
  0xc9   :  { %8885 = vmatpush1.bf16.msra.mxu0 %v8884_v25  ;;  %v1096_v25 = vld [vmem:[#allocation7 + $0xe0] sm:$0xff] }
  0xca   :  { %8887 = vmatprep.subr.bf16.mxu0 %v8886_v42  ;;  %v8914_v42 = vpack.c.bf16 %v1097_v28, %v1096_v25 }
  0xcd   :  { %8889 = vmatpush1.bf16.msra.mxu0 %v8888_v55  ;;  %v8940_v55 = vpack.c.bf16 %v1109_v34, %v1108_v37  ;;  %v1135_v37 = vld [vmem:[#allocation7 + $0x218] sm:$0xff] }
  0xce   :  { %8923 = vmatprep.subr.bf16.mxu0 %v8922_v44  ;;  %v1110_v44 = vld [vmem:[#allocation7 + $0x150] sm:$0xff] }
  0xcf   :  { %v8944_v48 = vpack.c.bf16 %v1111_v26, %v1110_v44  ;;  %v1138_v44 = vld [vmem:[#allocation7 + $0x230] sm:$0xff]  ;;  %v1139_v26 = vld [vmem:[#allocation7 + $0x238] sm:$0xff] }
  0xd0   :  { %1046 = vmatmul.mubr.f32.vlgmr.msra.gmra.mrb[8].mxu0 %v11076_v62  ;;  %v8908_v62 = vpack.c.bf16 %v1077_v9, %v1076_v8 }
  0xd1   :  { %8925 = vmatpush3.bf16.msra.mxu0 %v8924_v52  ;;  %v1113_v52 = vld [vmem:[#allocation7 + $0x168] sm:$0xff] }
  0xd2   :  { %8927 = vmatprep.subr.bf16.mxu0 %v8926_v24  ;;  %8909 = vmatpush3.bf16.msra.mxu1 %v8908_v62  ;;  %v1131_v24 = vld [vmem:[#allocation7 + $0x1f8] sm:$0xff]  ;;  %v8948_v56 = vpack.c.bf16 %v1113_v52, %v1112_v46  ;;  %v1158_v46 = vld [vmem:[#allocation7 + $0x2d0] sm:$0xff] }
  0xd3   :  { %8911 = vmatprep.subr.bf16.mxu1 %v8910_v16  ;;  %v8950_v57 = vpack.c.bf16 %v1131_v24, %v1130_v53  ;;  %v1159_v52 = vld [vmem:[#allocation7 + $0x2d8] sm:$0xff]  ;;  %v1142_v24 = vld [vmem:[#allocation7 + $0x250] sm:$0xff] }
  0xd4   :  { %v8974_v53 = vpack.c.bf16 %v1159_v52, %v1158_v46 }
  0xd5   :  { %8929 = vmatpush3.bf16.msra.mxu0 %v8928_v1  ;;  %v15972_v1 = vmov 0.0|0.0  }
  0xd6   :  { %8931 = vmatprep.subr.bf16.mxu0 %v8930_v6  ;;  %8913 = vmatpush3.bf16.msra.mxu1 %v8912_v29 }
  0xd7   :  { %8915 = vmatprep.subr.bf16.mxu1 %v8914_v42  ;;  %v1152_v42 = vld [vmem:[#allocation7 + $0x2a0] sm:$0xff] }
  0xd8   :  { %v8962_v35 = vpack.c.bf16 %v1153_v31, %v1152_v42  ;;  %v1445_v42 = vld [vmem:[%s15962_s9 + $0x140] sm:$0xff]  ;;  %v1446_v31 = vld [vmem:[%s15962_s9 + $0x148] sm:$0xff] }
  0xd9   :  { %8933 = vmatpush3.bf16.msra.mxu0 %v8932_v15  ;;  %v1133_v15 = vld [vmem:[#allocation7 + $0x208] sm:$0xff] }
  0xda   :  { %8935 = vmatprep.subr.bf16.mxu0 %v8934_v19  ;;  %8917 = vmatpush3.bf16.msra.mxu1 %v8916_v40  ;;  %v1151_v19 = vld [vmem:[#allocation7 + $0x298] sm:$0xff]  ;;  %v8956_v25 = vpack.c.bf16 %v1133_v15, %v1132_v14 }
  0xdb   :  { %8919 = vmatprep.subr.bf16.mxu1 %v8918_v41  ;;  %v8958_v29 = vpack.c.bf16 %v1151_v19, %v1150_v18  ;;  %v1155_v40 = vld [vmem:[#allocation7 + $0x2b8] sm:$0xff]  ;;  %v8964_v41 = vpack.c.bf16 %v1137_v38, %v1136_v36  ;;  %v1439_v19 = vld [vmem:[%s15962_s9 + $0x110] sm:$0xff] }
  0xdc   :  { %v1449_v38 = vld [vmem:[%s15962_s9 + $0x160] sm:$0xff] }
  0xdd   :  { %8937 = vmatpush3.bf16.msra.mxu0 %v8936_v30  ;;  %v1134_v30 = vld [vmem:[#allocation7 + $0x210] sm:$0xff] }
  0xde   :  { %8939 = vmatprep.subr.bf16.mxu0 %v8938_v33  ;;  %8921 = vmatpush3.bf16.msra.mxu1 %v8920_v54  ;;  %v2334_v33 = vstv %s2333_s4  ;;  %v8960_v34 = vpack.c.bf16 %v1135_v37, %v1134_v30 }
  0xdf   :  { %8955 = vmatprep.subr.bf16.mxu1 %v8954_v0  ;;  %v1162_v0 = vld [vmem:[#allocation7 + $0x2f0] sm:$0xff] }
  0xe1   :  { %8941 = vmatpush3.bf16.msra.mxu0 %v8940_v55  ;;  %v623_v11 = vpop.xlane.xlu0 %622 }
  0xe2   :  { %8943 = vmatprep.subr.bf16.mxu0 %v8942_v43  ;;  %v1052_v12 = vadd.f32 1e-30, %v623_v11  ;;  %v8966_v43 = vpack.c.bf16 %v1155_v40, %v1154_v39  ;;  %v1450_v39 = vld [vmem:[%s15962_s9 + $0x168] sm:$0xff] }
  0xe3   :  { %v9053_v40 = vpack.c.bf16 %v1450_v39, %v1449_v38  ;;  %v1419_v39 = vld [vmem:[%s15962_s9 + $0x70] sm:$0xff] }
  0xe4   :  { %9372 = vrcp.f32 %v1052_v12 }
  0xe5   :  { %8945 = vmatpush3.bf16.msra.mxu0 %v8944_v48  ;;  %v8968_v48 = vpack.c.bf16 %v1139_v26, %v1138_v44 }
  0xe6   :  { %8947 = vmatprep.subr.bf16.mxu0 %v8946_v51  ;;  %v1141_v51 = vld [vmem:[#allocation7 + $0x248] sm:$0xff] }
  0xe7   :  { %v8972_v54 = vpack.c.bf16 %v1141_v51, %v1140_v50 }
  0xe9   :  { %8949 = vmatpush3.bf16.msra.mxu0 %v8948_v56  ;;  %v1143_v56 = vld [vmem:[#allocation7 + $0x258] sm:$0xff] }
  0xea   :  { %8951 = vmatprep.subr.bf16.mxu0 %v8950_v57  ;;  %v1160_v57 = vld [vmem:[#allocation7 + $0x2e0] sm:$0xff]  ;;  %v8976_v59 = vpack.c.bf16 %v1143_v56, %v1142_v24 }
  0xeb   :  { %v1405_v56 = vld [vmem:[%s15962_s9] sm:$0xff] }
  0xed   :  { %8953 = vmatpush3.bf16.msra.mxu0 %v8952_v60  ;;  %v8978_v60 = vpack.c.bf16 %v1161_v58, %v1160_v57  ;;  %v1406_v57 = vld [vmem:[%s15962_s9 + $0x8] sm:$0xff]  ;;  %v1455_v58 = vld [vmem:[%s15962_s9 + $0x190] sm:$0xff] }
  0xee   :  { %9034 = vmatprep.subr.bf16.mxu0 %v15972_v1  ;;  %v11387_v62 = vpop.eup %9372 }
 0x105   :  { %v625_v37 = vpop.xlane.xlu0 %624 }
 0x123   :  { %v8159_v2 = vpop.f32.mrb[0].mxu0 }
 0x124   :  { %v8160_v4 = vpop.f32.mrb[1].mxu0  ;;  %v8194_v5 = vpop.f32.mrb[0].mxu1 }
 0x125   :  { %v8161_v6 = vadd.f32 %v8160_v4, %v8159_v2  ;;  %v8195_v7 = vpop.f32.mrb[1].mxu1  ;;  %v1163_v2 = vld [vmem:[#allocation7 + $0x2f8] sm:$0xff] }
 0x126   :  { %v8196_v8 = vadd.f32 %v8195_v7, %v8194_v5  ;;  %v8982_v4 = vpack.c.bf16 %v1163_v2, %v1162_v0  ;;  %v1146_v5 = vld [vmem:[#allocation7 + $0x270] sm:$0xff]  ;;  %v1437_v7 = vld [vmem:[%s15962_s9 + $0x100] sm:$0xff] }
 0x127   :  { %v479_v9 = vadd.f32 %v8161_v6, %v8081_v3  ;;  %v8980_v3 = vpack.c.bf16 %v1145_v63, %v1144_v61  ;;  %v1147_v6 = vld [vmem:[#allocation7 + $0x278] sm:$0xff]  ;;  %v1407_v63 = vld [vmem:[%s15962_s9 + $0x10] sm:$0xff] }
 0x128   :  { %v1408_v0 = vld [vmem:[%s15962_s9 + $0x18] sm:$0xff] }
 0x129   :  { %v549_v10 = vadd.f32 %v8196_v8, %v479_v9  ;;  %v1438_v8 = vld [vmem:[%s15962_s9 + $0x108] sm:$0xff]  ;;  %v8984_v9 = vpack.c.bf16 %v1147_v6, %v1146_v5  ;;  %v10016_v2 = vld [vmem:[%s15955_s2 + $0x18] sm:$0xff]  ;;  %v8990_v5 = vpack.c.bf16 %v1408_v0, %v1407_v63  ;;  %v10020_v63 = vld [vmem:[%s15955_s2 + $0x40] sm:$0xff] }
 0x143   :  { %v8229_v13 = vpop.f32.mrb[2].mxu0 }
 0x144   :  { %v8230_v16 = vpop.f32.mrb[3].mxu0  ;;  %v692_v17 = vpop.f32.mrb[2].mxu1 }
 0x145   :  { %v8231_v27 = vadd.f32 %v8230_v16, %v8229_v13  ;;  %v1055_v21 = vmul.f32 %v11387_v62, %v692_v17  ;;  %v694_v22 = vpop.f32.mrb[3].mxu1  ;;  %v9035_v17 = vpack.c.bf16 %v1438_v8, %v1437_v7  ;;  %v1409_v7 = vld [vmem:[%s15962_s9 + $0x20] sm:$0xff]  ;;  %v1410_v8 = vld [vmem:[%s15962_s9 + $0x28] sm:$0xff] }
 0x146   :  { %v1056_v23 = vmul.f32 %v11387_v62, %v694_v22  ;;  %v1442_v22 = vld [vmem:[%s15962_s9 + $0x128] sm:$0xff] }
 0x147   :  { %v11392_v28 = vadd.f32 %v8231_v27, %v549_v10  ;;  %v1440_v27 = vld [vmem:[%s15962_s9 + $0x118] sm:$0xff] }
 0x148   :  { %1235 = vmatprep.mubr.f32.mxu1 %v1056_v23 }
 0x149   :  { %v2289_v32 = vrot.slane %v11392_v28, 1  ;;  %1236 = vmatmul.mubr.f32.vlgmr.msra.gmra.mrb[8].mxu1 %v1055_v21  ;;  %v11397_v55 = vmul.f32 %v2334_v33, %v11392_v28  ;;  %v9038_v21 = vpack.c.bf16 %v1440_v27, %v1439_v19  ;;  %v9047_v33 = vpack.c.bf16 %v1446_v31, %v1445_v42  ;;  %v1413_v19 = vld [vmem:[%s15962_s9 + $0x40] sm:$0xff]  ;;  %v1414_v27 = vld [vmem:[%s15962_s9 + $0x48] sm:$0xff] }
 0x14a   :  { %8957 = vmatpush3.bf16.msra.mxu1 %v8956_v25  ;;  %v1443_v25 = vld [vmem:[%s15962_s9 + $0x130] sm:$0xff] }
 0x14b   :  { %2292 = vrot.lane.b32.xlu0 %v2289_v32, %s10329_s27  ;;  %8959 = vmatprep.subr.bf16.mxu1 %v8958_v29  ;;  %v1444_v29 = vld [vmem:[%s15962_s9 + $0x138] sm:$0xff]  ;;  %v1053_v32 = vadd.f32 1e-30, %v625_v37  ;;  %v1466_v37 = vld [vmem:[%s15962_s9 + $0x1e8] sm:$0xff] }
 0x14c   :  { %v9044_v30 = vpack.c.bf16 %v1444_v29, %v1443_v25  ;;  %v1415_v25 = vld [vmem:[%s15962_s9 + $0x50] sm:$0xff]  ;;  %v1416_v29 = vld [vmem:[%s15962_s9 + $0x58] sm:$0xff] }
 0x14d   :  { %9374 = vrcp.f32 %v1053_v32  ;;  %v9002_v42 = vpack.c.bf16 %v1416_v29, %v1415_v25  ;;  %v1417_v32 = vld [vmem:[%s15962_s9 + $0x60] sm:$0xff]  ;;  %v10027_v29 = vld [vmem:[%s15955_s2 + $0x108] sm:$0xff] }
 0x14e   :  { %8961 = vmatpush3.bf16.msra.mxu1 %v8960_v34  ;;  %v1447_v34 = vld [vmem:[%s15962_s9 + $0x150] sm:$0xff] }
 0x14f   :  { %2338 = vrot.lane.b32.xlu0 %v11397_v55, %s10330_s28  ;;  %8963 = vmatprep.subr.bf16.mxu1 %v8962_v35  ;;  %v1448_v35 = vld [vmem:[%s15962_s9 + $0x158] sm:$0xff] }
 0x150   :  { %v9050_v36 = vpack.c.bf16 %v1448_v35, %v1447_v34  ;;  %v1467_v34 = vld [vmem:[%s15962_s9 + $0x1f0] sm:$0xff]  ;;  %v1468_v35 = vld [vmem:[%s15962_s9 + $0x1f8] sm:$0xff] }
 0x151   :  { %v9080_v38 = vpack.c.bf16 %v1468_v35, %v1467_v34  ;;  %v10029_v35 = vld [vmem:[%s15955_s2 + $0x138] sm:$0xff] }
 0x152   :  { %8965 = vmatpush3.bf16.msra.mxu1 %v8964_v41  ;;  %v1451_v41 = vld [vmem:[%s15962_s9 + $0x170] sm:$0xff] }
 0x153   :  { %8967 = vmatprep.subr.bf16.mxu1 %v8966_v43  ;;  %v1452_v43 = vld [vmem:[%s15962_s9 + $0x178] sm:$0xff] }
 0x154   :  { %v9056_v44 = vpack.c.bf16 %v1452_v43, %v1451_v41 }
 0x156   :  { %8969 = vmatpush3.bf16.msra.mxu1 %v8968_v48  ;;  %v1454_v48 = vld [vmem:[%s15962_s9 + $0x188] sm:$0xff] }
 0x157   :  { %8971 = vmatprep.subr.bf16.mxu1 %v8970_v49  ;;  %v11464_v26 = vpop.eup %9374  ;;  %v9059_v24 = vpack.c.bf16 %v1454_v48, %v1453_v47 }
 0x15a   :  { %8973 = vmatpush3.bf16.msra.mxu1 %v8972_v54 }
 0x15b   :  { %8975 = vmatprep.subr.bf16.mxu1 %v8974_v53 }
 0x15e   :  { %8977 = vmatpush3.bf16.msra.mxu1 %v8976_v59  ;;  %v1456_v59 = vld [vmem:[%s15962_s9 + $0x198] sm:$0xff] }
 0x15f   :  { %8979 = vmatprep.subr.bf16.mxu1 %v8978_v60  ;;  %v8987_v60 = vpack.c.bf16 %v1406_v57, %v1405_v56  ;;  %v9062_v61 = vpack.c.bf16 %v1456_v59, %v1455_v58  ;;  %v1423_v56 = vld [vmem:[%s15962_s9 + $0x90] sm:$0xff]  ;;  %v1424_v57 = vld [vmem:[%s15962_s9 + $0x98] sm:$0xff]  ;;  %v10019_v58 = vld [vmem:[%s15955_s2 + $0x8] sm:$0xff] }
 0x160   :  { %v9014_v0 = vpack.c.bf16 %v1424_v57, %v1423_v56  ;;  %v1487_v56 = vld [vmem:[%s15962_s9 + $0x290] sm:$0xff]  ;;  %v1488_v57 = vld [vmem:[%s15962_s9 + $0x298] sm:$0xff] }
 0x162   :  { %8981 = vmatpush3.bf16.msra.mxu1 %v8980_v3  ;;  %v1457_v3 = vld [vmem:[%s15962_s9 + $0x1a0] sm:$0xff] }
 0x163   :  { %v763_v10 = vpop.f32.mrb[4].mxu0  ;;  %8983 = vmatprep.subr.bf16.mxu1 %v8982_v4  ;;  %v1458_v4 = vld [vmem:[%s15962_s9 + $0x1a8] sm:$0xff] }
 0x164   :  { %v1057_v11 = vmul.f32 %v11387_v62, %v763_v10  ;;  %v765_v12 = vpop.f32.mrb[5].mxu0  ;;  %v834_v13 = vpop.f32.mrb[4].mxu1  ;;  %v9065_v6 = vpack.c.bf16 %v1458_v4, %v1457_v3  ;;  %v1460_v10 = vld [vmem:[%s15962_s9 + $0x1b8] sm:$0xff]  ;;  %v1425_v3 = vld [vmem:[%s15962_s9 + $0xa0] sm:$0xff]  ;;  %v1426_v4 = vld [vmem:[%s15962_s9 + $0xa8] sm:$0xff] }
 0x165   :  { %v1058_v14 = vmul.f32 %v11387_v62, %v765_v12  ;;  %v11410_v15 = vmul.f32 %v11387_v62, %v834_v13  ;;  %v836_v16 = vpop.f32.mrb[5].mxu1  ;;  %v1411_v13 = vld [vmem:[%s15962_s9 + $0x30] sm:$0xff] }
 0x166   :  { %v11413_v18 = vmul.f32 %v11387_v62, %v836_v16  ;;  %8985 = vmatpush3.bf16.msra.mxu1 %v8984_v9  ;;  %v1441_v62 = vld [vmem:[%s15962_s9 + $0x120] sm:$0xff]  ;;  %v1459_v9 = vld [vmem:[%s15962_s9 + $0x1b0] sm:$0xff]  ;;  %v1462_v16 = vld [vmem:[%s15962_s9 + $0x1c8] sm:$0xff] }
 0x167   :  { %1310 = vmatprep.mubr.f32.mxu0 %v1058_v14  ;;  %8986 = vmatprep.subr.bf16.mxu1 %v15972_v1  ;;  %v9041_v23 = vpack.c.bf16 %v1442_v22, %v1441_v62  ;;  %v9068_v12 = vpack.c.bf16 %v1460_v10, %v1459_v9  ;;  %v1412_v14 = vld [vmem:[%s15962_s9 + $0x38] sm:$0xff]  ;;  %v8999_v22 = vpack.c.bf16 %v1414_v27, %v1413_v19  ;;  %v10023_v10 = vld [vmem:[%s15955_s2 + $0xa8] sm:$0xff]  ;;  %v1429_v19 = vld [vmem:[%s15962_s9 + $0xc0] sm:$0xff] }
 0x168   :  { %1311 = vmatmul.mubr.f32.vlgmr.msra.gmra.mrb[10].mxu0 %v1057_v11  ;;  %v8993_v11 = vpack.c.bf16 %v1410_v8, %v1409_v7  ;;  %v1464_v62 = vld [vmem:[%s15962_s9 + $0x1d8] sm:$0xff]  ;;  %v10022_v8 = vld [vmem:[%s15955_s2 + $0x70] sm:$0xff]  ;;  %v9017_v9 = vpack.c.bf16 %v1426_v4, %v1425_v3  ;;  %v1430_v27 = vld [vmem:[%s15962_s9 + $0xc8] sm:$0xff] }
 0x169   :  { %9036 = vmatpush1.bf16.msra.mxu0 %v9035_v17  ;;  %v8996_v17 = vpack.c.bf16 %v1412_v14, %v1411_v13  ;;  %v1476_v7 = vld [vmem:[%s15962_s9 + $0x238] sm:$0xff]  ;;  %v1477_v14 = vld [vmem:[%s15962_s9 + $0x240] sm:$0xff]  ;;  %v9023_v25 = vpack.c.bf16 %v1430_v27, %v1429_v19  ;;  %v1490_v4 = vld [vmem:[%s15962_s9 + $0x2a8] sm:$0xff] }
 0x16a   :  { %9037 = vmatprep.subr.bf16.mxu0 %v15972_v1  ;;  %v1489_v3 = vld [vmem:[%s15962_s9 + $0x2a0] sm:$0xff]  ;;  %v1494_v19 = vld [vmem:[%s15962_s9 + $0x2c8] sm:$0xff] }
 0x16b   :  { %v10045_v27 = vld [vmem:[%s15955_s2 + $0x220] sm:$0xff] }
 0x16d   :  { %9039 = vmatpush1.bf16.msra.mxu0 %v9038_v21  ;;  %v1463_v21 = vld [vmem:[%s15962_s9 + $0x1d0] sm:$0xff] }
 0x16e   :  { %9040 = vmatprep.subr.bf16.mxu0 %v15972_v1 }
 0x171   :  { %9042 = vmatpush1.bf16.msra.mxu0 %v9041_v23  ;;  %v9074_v23 = vpack.c.bf16 %v1464_v62, %v1463_v21  ;;  %v1479_v62 = vld [vmem:[%s15962_s9 + $0x250] sm:$0xff] }
 0x172   :  { %9043 = vmatprep.subr.bf16.mxu0 %v15972_v1 }
 0x175   :  { %9045 = vmatpush1.bf16.msra.mxu0 %v9044_v30  ;;  %v1465_v30 = vld [vmem:[%s15962_s9 + $0x1e0] sm:$0xff] }
 0x176   :  { %9046 = vmatprep.subr.bf16.mxu0 %v15972_v1  ;;  %v9077_v31 = vpack.c.bf16 %v1466_v37, %v1465_v30  ;;  %v1431_v30 = vld [vmem:[%s15962_s9 + $0xd0] sm:$0xff]  ;;  %v1432_v37 = vld [vmem:[%s15962_s9 + $0xd8] sm:$0xff] }
 0x177   :  { %v9026_v34 = vpack.c.bf16 %v1432_v37, %v1431_v30  ;;  %v10049_v30 = vld [vmem:[%s15955_s2 + $0x250] sm:$0xff]  ;;  %v10050_v37 = vld [vmem:[%s15955_s2 + $0xc8] sm:$0xff] }
 0x179   :  { %9048 = vmatpush1.bf16.msra.mxu0 %v9047_v33  ;;  %v1418_v33 = vld [vmem:[%s15962_s9 + $0x68] sm:$0xff] }
 0x17a   :  { %9049 = vmatprep.subr.bf16.mxu0 %v15972_v1 }
 0x17d   :  { %9051 = vmatpush1.bf16.msra.mxu0 %v9050_v36  ;;  %v9005_v36 = vpack.c.bf16 %v1418_v33, %v1417_v32  ;;  %v1482_v32 = vld [vmem:[%s15962_s9 + $0x268] sm:$0xff]  ;;  %v10028_v33 = vld [vmem:[%s15955_s2 + $0x100] sm:$0xff] }
 0x17e   :  { %9052 = vmatprep.subr.bf16.mxu0 %v15972_v1 }
 0x181   :  { %9054 = vmatpush1.bf16.msra.mxu0 %v9053_v40  ;;  %v1420_v40 = vld [vmem:[%s15962_s9 + $0x78] sm:$0xff] }
 0x182   :  { %9055 = vmatprep.subr.bf16.mxu0 %v15972_v1  ;;  %v9008_v48 = vpack.c.bf16 %v1420_v40, %v1419_v39  ;;  %v1483_v40 = vld [vmem:[%s15962_s9 + $0x270] sm:$0xff] }
 0x183   :  { %v905_v45 = vpop.f32.mrb[6].mxu0 }
 0x184   :  { %v976_v49 = vpop.f32.mrb[6].mxu1  ;;  %v907_v50 = vpop.f32.mrb[7].mxu0  ;;  %v1062_v54 = vmul.f32 %v11464_v26, %v905_v45  ;;  %v1470_v45 = vld [vmem:[%s15962_s9 + $0x208] sm:$0xff] }
 0x185   :  { %v1064_v51 = vmul.f32 %v11464_v26, %v976_v49  ;;  %v1063_v46 = vmul.f32 %v11464_v26, %v907_v50  ;;  %v978_v52 = vpop.f32.mrb[7].mxu1  ;;  %9057 = vmatpush1.bf16.msra.mxu0 %v9056_v44  ;;  %v1469_v44 = vld [vmem:[%s15962_s9 + $0x200] sm:$0xff] }
 0x186   :  { %v1065_v53 = vmul.f32 %v11464_v26, %v978_v52  ;;  %9058 = vmatprep.subr.bf16.mxu0 %v15972_v1  ;;  %v1421_v50 = vld [vmem:[%s15962_s9 + $0x80] sm:$0xff]  ;;  %v1472_v52 = vld [vmem:[%s15962_s9 + $0x218] sm:$0xff] }
 0x187   :  { %1240 = vmatprep.mubr.f32.mxu1 %v1063_v46  ;;  %v9083_v46 = vpack.c.bf16 %v1470_v45, %v1469_v44  ;;  %v10031_v45 = vld [vmem:[%s15955_s2 + $0x168] sm:$0xff] }
 0x188   :  { %1315 = vmatprep.mubr.f32.mxu0 %v1065_v53  ;;  %1241 = vmatmul.mubr.f32.gmra.mrb[10].mxu1 %v1062_v54  ;;  %v10017_v54 = vld [vmem:[%s15955_s2 + $0x10] sm:$0xff] }
 0x189   :  { %1316 = vmatmul.mubr.f32.gmra.mrb[12].mxu0 %v1064_v51  ;;  %1385 = vmatprep.mubr.f32.mxu1 %v11413_v18  ;;  %v1422_v51 = vld [vmem:[%s15962_s9 + $0x88] sm:$0xff] }
 0x18a   :  { %9060 = vmatpush1.bf16.msra.mxu0 %v9059_v24  ;;  %1797 = vmatprep.mubr.f32.mxu0 %v10016_v2  ;;  %v9011_v53 = vpack.c.bf16 %v1422_v51, %v1421_v50  ;;  %v10018_v24 = vld [vmem:[%s15955_s2 + $0x48] sm:$0xff]  ;;  %v10021_v2 = vld [vmem:[%s15955_s2 + $0x78] sm:$0xff]  ;;  %v1485_v50 = vld [vmem:[%s15962_s9 + $0x280] sm:$0xff] }
 0x18b   :  { %9061 = vmatprep.subr.bf16.mxu0 %v15972_v1  ;;  %v1486_v51 = vld [vmem:[%s15962_s9 + $0x288] sm:$0xff] }
 0x18c   :  { %1386 = vmatmul.mubr.f32.vlgmr.msra.gmra.mrb[12].mxu1 %v11410_v15  ;;  %v1461_v15 = vld [vmem:[%s15962_s9 + $0x1c0] sm:$0xff] }
 0x18d   :  { %8988 = vmatpush1.bf16.msra.mxu1 %v8987_v60  ;;  %v9071_v18 = vpack.c.bf16 %v1462_v16, %v1461_v15  ;;  %v1473_v60 = vld [vmem:[%s15962_s9 + $0x220] sm:$0xff]  ;;  %v1478_v15 = vld [vmem:[%s15962_s9 + $0x248] sm:$0xff] }
 0x18e   :  { %9063 = vmatpush1.bf16.msra.mxu0 %v9062_v61  ;;  %8989 = vmatprep.subr.bf16.mxu1 %v15972_v1  ;;  %v1474_v61 = vld [vmem:[%s15962_s9 + $0x228] sm:$0xff]  ;;  %v10024_v16 = vld [vmem:[%s15955_s2 + $0xa0] sm:$0xff]  ;;  %v9095_v21 = vpack.c.bf16 %v1478_v15, %v1477_v14 }
 0x18f   :  { %9064 = vmatprep.subr.bf16.mxu0 %v15972_v1  ;;  %v10042_v14 = vld [vmem:[%s15955_s2 + $0x68] sm:$0xff] }
 0x190   :  { %v10043_v15 = vld [vmem:[%s15955_s2 + $0x228] sm:$0xff] }
 0x191   :  { %8991 = vmatpush1.bf16.msra.mxu1 %v8990_v5  ;;  %v9089_v5 = vpack.c.bf16 %v1474_v61, %v1473_v60  ;;  %v10035_v60 = vld [vmem:[%s15955_s2 + $0x1c8] sm:$0xff]  ;;  %v9110_v61 = vpack.c.bf16 %v1488_v57, %v1487_v56  ;;  %v10069_v56 = vld [vmem:[%s15955_s2 + $0x340] sm:$0xff]  ;;  %v10070_v57 = vld [vmem:[%s15955_s2 + $0x1b8] sm:$0xff] }
 0x192   :  { %9066 = vmatpush1.bf16.msra.mxu0 %v9065_v6  ;;  %8992 = vmatprep.subr.bf16.mxu1 %v15972_v1  ;;  %v1475_v6 = vld [vmem:[%s15962_s9 + $0x230] sm:$0xff] }
 0x193   :  { %9067 = vmatprep.subr.bf16.mxu0 %v15972_v1  ;;  %v9092_v13 = vpack.c.bf16 %v1476_v7, %v1475_v6  ;;  %v10038_v6 = vld [vmem:[%s15955_s2 + $0x38] sm:$0xff] }
 0x194   :  { %v10039_v7 = vld [vmem:[%s15955_s2 + $0x1f8] sm:$0xff] }
 0x195   :  { %8994 = vmatpush1.bf16.msra.mxu1 %v8993_v11  ;;  %v1427_v11 = vld [vmem:[%s15962_s9 + $0xb0] sm:$0xff] }
 0x196   :  { %9069 = vmatpush1.bf16.msra.mxu0 %v9068_v12  ;;  %8995 = vmatprep.subr.bf16.mxu1 %v15972_v1  ;;  %v1428_v12 = vld [vmem:[%s15962_s9 + $0xb8] sm:$0xff] }
 0x197   :  { %9070 = vmatprep.subr.bf16.mxu0 %v15972_v1 }
 0x199   :  { %8997 = vmatpush1.bf16.msra.mxu1 %v8996_v17  ;;  %v9020_v17 = vpack.c.bf16 %v1428_v12, %v1427_v11  ;;  %v1491_v11 = vld [vmem:[%s15962_s9 + $0x2b0] sm:$0xff]  ;;  %v1492_v12 = vld [vmem:[%s15962_s9 + $0x2b8] sm:$0xff] }
 0x19a   :  { %9072 = vmatpush1.bf16.msra.mxu0 %v9071_v18  ;;  %8998 = vmatprep.subr.bf16.mxu1 %v15972_v1  ;;  %v10025_v18 = vld [vmem:[%s15955_s2 + $0xd8] sm:$0xff] }
 0x19b   :  { %9073 = vmatprep.subr.bf16.mxu0 %v15972_v1 }
 0x19d   :  { %9000 = vmatpush1.bf16.msra.mxu1 %v8999_v22  ;;  %v1480_v22 = vld [vmem:[%s15962_s9 + $0x258] sm:$0xff] }
 0x19e   :  { %9075 = vmatpush1.bf16.msra.mxu0 %v9074_v23  ;;  %9001 = vmatprep.subr.bf16.mxu1 %v15972_v1  ;;  %v10026_v23 = vld [vmem:[%s15955_s2 + $0xd0] sm:$0xff] }
 0x19f   :  { %9076 = vmatprep.subr.bf16.mxu0 %v15972_v1 }
 0x1a1   :  { %9003 = vmatpush1.bf16.msra.mxu1 %v9002_v42  ;;  %v9098_v42 = vpack.c.bf16 %v1480_v22, %v1479_v62  ;;  %v10047_v62 = vld [vmem:[%s15955_s2 + $0x258] sm:$0xff] }
 0x1a2   :  { %9078 = vmatpush1.bf16.msra.mxu0 %v9077_v31  ;;  %9004 = vmatprep.subr.bf16.mxu1 %v15972_v1  ;;  %v1481_v31 = vld [vmem:[%s15962_s9 + $0x260] sm:$0xff] }
 0x1a3   :  { %v1047_v41 = vpop.f32.mrb[8].mxu0  ;;  %9079 = vmatprep.subr.bf16.mxu0 %v15972_v1  ;;  %v9101_v39 = vpack.c.bf16 %v1482_v32, %v1481_v31  ;;  %v10052_v32 = vld [vmem:[%s15955_s2 + $0xc0] sm:$0xff] }
 0x1a4   :  { %v1049_v43 = vpop.f32.mrb[9].mxu0  ;;  %v1066_v49 = vmul.f32 %v11464_v26, %v1047_v41  ;;  %v1484_v41 = vld [vmem:[%s15962_s9 + $0x278] sm:$0xff] }
 0x1a5   :  { %v1067_v47 = vmul.f32 %v11464_v26, %v1049_v43  ;;  %9006 = vmatpush1.bf16.msra.mxu1 %v9005_v36  ;;  %v1471_v26 = vld [vmem:[%s15962_s9 + $0x210] sm:$0xff]  ;;  %v1433_v36 = vld [vmem:[%s15962_s9 + $0xe0] sm:$0xff] }
 0x1a6   :  { %9081 = vmatpush1.bf16.msra.mxu0 %v9080_v38  ;;  %9007 = vmatprep.subr.bf16.mxu1 %v15972_v1  ;;  %v9086_v59 = vpack.c.bf16 %v1472_v52, %v1471_v26  ;;  %v1434_v38 = vld [vmem:[%s15962_s9 + $0xe8] sm:$0xff]  ;;  %v10030_v43 = vld [vmem:[%s15955_s2 + $0x130] sm:$0xff]  ;;  %v10033_v52 = vld [vmem:[%s15955_s2 + $0x198] sm:$0xff] }
 0x1a7   :  { %1390 = vmatprep.mubr.f32.mxu1 %v1067_v47  ;;  %9082 = vmatprep.subr.bf16.mxu0 %v15972_v1  ;;  %v9029_v44 = vpack.c.bf16 %v1434_v38, %v1433_v36  ;;  %v1435_v47 = vld [vmem:[%s15962_s9 + $0xf0] sm:$0xff]  ;;  %v10054_v36 = vld [vmem:[%s15955_s2 + $0xf8] sm:$0xff] }
 0x1a8   :  { %1391 = vmatmul.mubr.f32.gmra.mrb[14].mxu1 %v1066_v49  ;;  %v9104_v49 = vpack.c.bf16 %v1484_v41, %v1483_v40  ;;  %v10055_v38 = vld [vmem:[%s15955_s2 + $0x2b8] sm:$0xff]  ;;  %v10056_v40 = vld [vmem:[%s15955_s2 + $0xf0] sm:$0xff] }
 0x1a9   :  { %1798 = vmatmul.mubr.f32.vlgmr.msra.gmra.mrb[14].mxu0 %v10017_v54  ;;  %9009 = vmatpush1.bf16.msra.mxu1 %v9008_v48  ;;  %v1436_v48 = vld [vmem:[%s15962_s9 + $0xf8] sm:$0xff]  ;;  %v2183_v54 = vld [vmem:[%s15960_s7] sm:$0xff]  ;;  %v1499_v41 = vld [vmem:[%s15962_s9 + $0x2f0] sm:$0xff] }
 0x1aa   :  { %1802 = vmatprep.mubr.f32.mxu0 %v10018_v24  ;;  %9010 = vmatprep.subr.bf16.mxu1 %v15972_v1  ;;  %v9032_v26 = vpack.c.bf16 %v1436_v48, %v1435_v47  ;;  %v9107_v24 = vpack.c.bf16 %v1486_v51, %v1485_v50  ;;  %v10059_v47 = vld [vmem:[%s15955_s2 + $0x2e8] sm:$0xff]  ;;  %v10061_v50 = vld [vmem:[%s15955_s2 + $0x2e0] sm:$0xff]  ;;  %v10062_v51 = vld [vmem:[%s15955_s2 + $0x158] sm:$0xff] }
 0x1ab   :  { %1572 = vmatprep.mubr.f32.mxu1 %v10019_v58  ;;  %9084 = vmatpush1.bf16.msra.mxu0 %v9083_v46  ;;  %v10032_v46 = vld [vmem:[%s15955_s2 + $0x160] sm:$0xff]  ;;  %v10034_v58 = vld [vmem:[%s15955_s2 + $0x190] sm:$0xff] }
 0x1ac   :  { %9085 = vmatprep.subr.bf16.mxu0 %v15972_v1 }
 0x1ad   :  { %1803 = vmatmul.mubr.f32.gmra.mrb[16].mxu0 %v10020_v63  ;;  %9012 = vmatpush1.bf16.msra.mxu1 %v9011_v53  ;;  %v2184_v53 = vld [vmem:[%s15960_s7 + $0x8] sm:$0xff]  ;;  %v2185_v63 = vld [vmem:[%s15960_s7 + $0x10] sm:$0xff] }
 0x1ae   :  { %1807 = vmatprep.mubr.f32.mxu0 %v10021_v2  ;;  %9013 = vmatprep.subr.bf16.mxu1 %v15972_v1  ;;  %v10036_v2 = vld [vmem:[%s15955_s2] sm:$0xff] }
 0x1af   :  { %9087 = vmatpush1.bf16.msra.mxu0 %v9086_v59  ;;  %v11774_v59 = vpack.c.bf16 %v2184_v53, %v2183_v54  ;;  %v10066_v54 = vld [vmem:[%s15955_s2 + $0x188] sm:$0xff] }
 0x1b0   :  { %9088 = vmatprep.subr.bf16.mxu0 %v15972_v1  ;;  %v10067_v53 = vld [vmem:[%s15955_s2 + $0x348] sm:$0xff] }
 0x1b1   :  { %1808 = vmatmul.mubr.f32.gmra.mrb[18].mxu0 %v10022_v8  ;;  %9015 = vmatpush1.bf16.msra.mxu1 %v9014_v0  ;;  %v2186_v0 = vld [vmem:[%s15960_s7 + $0x18] sm:$0xff] }
 0x1b2   :  { %1812 = vmatprep.mubr.f32.mxu0 %v10023_v10  ;;  %9016 = vmatprep.subr.bf16.mxu1 %v15972_v1  ;;  %v11806_v8 = vpack.c.bf16 %v2186_v0, %v2185_v63  ;;  %v10040_v10 = vld [vmem:[%s15955_s2 + $0x30] sm:$0xff]  ;;  %v10074_v63 = vld [vmem:[%s15955_s2 + $0x1e8] sm:$0xff] }
 0x1b3   :  { %9090 = vmatpush1.bf16.msra.mxu0 %v9089_v5  ;;  %v10037_v5 = vld [vmem:[%s15955_s2 + $0x1c0] sm:$0xff]  ;;  %v10075_v0 = vld [vmem:[%s15955_s2 + $0x3a8] sm:$0xff] }
 0x1b4   :  { %9091 = vmatprep.subr.bf16.mxu0 %v15972_v1 }
 0x1b5   :  { %1813 = vmatmul.mubr.f32.gmra.mrb[20].mxu0 %v10024_v16  ;;  %9018 = vmatpush1.bf16.msra.mxu1 %v9017_v9  ;;  %v9113_v9 = vpack.c.bf16 %v1490_v4, %v1489_v3  ;;  %v9116_v16 = vpack.c.bf16 %v1492_v12, %v1491_v11  ;;  %v10077_v3 = vld [vmem:[%s15955_s2 + $0x3a0] sm:$0xff]  ;;  %v10078_v4 = vld [vmem:[%s15955_s2 + $0x218] sm:$0xff] }
 0x1b6   :  { %1817 = vmatprep.mubr.f32.mxu0 %v10025_v18  ;;  %9019 = vmatprep.subr.bf16.mxu1 %v15972_v1  ;;  %v1493_v18 = vld [vmem:[%s15962_s9 + $0x2c0] sm:$0xff] }
 0x1b7   :  { %9093 = vmatpush1.bf16.msra.mxu0 %v9092_v13  ;;  %v10041_v13 = vld [vmem:[%s15955_s2 + $0x1f0] sm:$0xff]  ;;  %v9119_v22 = vpack.c.bf16 %v1494_v19, %v1493_v18  ;;  %v10084_v11 = vld [vmem:[%s15955_s2 + $0x240] sm:$0xff]  ;;  %v10091_v18 = vld [vmem:[%s15955_s2 + $0x468] sm:$0xff] }
 0x1b8   :  { %9094 = vmatprep.subr.bf16.mxu0 %v15972_v1  ;;  %v10085_v12 = vld [vmem:[%s15955_s2 + $0x400] sm:$0xff] }
 0x1b9   :  { %1818 = vmatmul.mubr.f32.gmra.mrb[22].mxu0 %v10026_v23  ;;  %9021 = vmatpush1.bf16.msra.mxu1 %v9020_v17  ;;  %v10044_v17 = vld [vmem:[%s15955_s2 + $0x60] sm:$0xff]  ;;  %v10048_v23 = vld [vmem:[%s15955_s2 + $0x90] sm:$0xff] }
 0x1ba   :  { %1822 = vmatprep.mubr.f32.mxu0 %v10027_v29  ;;  %9022 = vmatprep.subr.bf16.mxu1 %v15972_v1  ;;  %v1496_v29 = vld [vmem:[%s15962_s9 + $0x2d8] sm:$0xff]  ;;  %v10092_v19 = vld [vmem:[%s15955_s2 + $0x2a0] sm:$0xff] }
 0x1bb   :  { %9096 = vmatpush1.bf16.msra.mxu0 %v9095_v21  ;;  %v10046_v21 = vld [vmem:[%s15955_s2 + $0x98] sm:$0xff] }
 0x1bc   :  { %9097 = vmatprep.subr.bf16.mxu0 %v15972_v1 }
 0x1bd   :  { %1823 = vmatmul.mubr.f32.gmra.mrb[24].mxu0 %v10028_v33  ;;  %9024 = vmatpush1.bf16.msra.mxu1 %v9023_v25  ;;  %v1495_v25 = vld [vmem:[%s15962_s9 + $0x2d0] sm:$0xff]  ;;  %v1497_v33 = vld [vmem:[%s15962_s9 + $0x2e0] sm:$0xff] }
 0x1be   :  { %1827 = vmatprep.mubr.f32.mxu0 %v10029_v35  ;;  %9025 = vmatprep.subr.bf16.mxu1 %v15972_v1  ;;  %v9122_v31 = vpack.c.bf16 %v1496_v29, %v1495_v25  ;;  %v10053_v35 = vld [vmem:[%s15955_s2 + $0x280] sm:$0xff]  ;;  %v10098_v25 = vld [vmem:[%s15955_s2 + $0x308] sm:$0xff] }
 0x1bf   :  { %9099 = vmatpush1.bf16.msra.mxu0 %v9098_v42  ;;  %v10051_v42 = vld [vmem:[%s15955_s2 + $0x288] sm:$0xff] }
 0x1c0   :  { %9100 = vmatprep.subr.bf16.mxu0 %v15972_v1  ;;  %v10099_v29 = vld [vmem:[%s15955_s2 + $0x4c8] sm:$0xff] }
 0x1c1   :  { %1828 = vmatmul.mubr.f32.gmra.mrb[26].mxu0 %v10030_v43  ;;  %9027 = vmatpush1.bf16.msra.mxu1 %v9026_v34  ;;  %v1498_v34 = vld [vmem:[%s15962_s9 + $0x2e8] sm:$0xff]  ;;  %v1500_v43 = vld [vmem:[%s15962_s9 + $0x2f8] sm:$0xff]  ;;  %s8117_s9 = sld [smem:[#allocation3 + $0x6]] }
 0x1c2   :  { %1832 = vmatprep.mubr.f32.mxu0 %v10031_v45  ;;  %9028 = vmatprep.subr.bf16.mxu1 %v15972_v1  ;;  %v10058_v45 = vld [vmem:[%s15955_s2 + $0x128] sm:$0xff]  ;;  %v9128_v48 = vpack.c.bf16 %v1500_v43, %v1499_v41  ;;  %v10112_v41 = vld [vmem:[%s15955_s2 + $0x390] sm:$0xff] }
 0x1c3   :  { %9102 = vmatpush1.bf16.msra.mxu0 %v9101_v39  ;;  %v9125_v39 = vpack.c.bf16 %v1498_v34, %v1497_v33  ;;  %v10105_v33 = vld [vmem:[%s15955_s2 + $0x4f0] sm:$0xff]  ;;  %v10106_v34 = vld [vmem:[%s15955_s2 + $0x368] sm:$0xff] }
 0x1c4   :  { %9103 = vmatprep.subr.bf16.mxu0 %v15972_v1  ;;  %v10113_v43 = vld [vmem:[%s15955_s2 + $0x550] sm:$0xff] }
 0x1c5   :  { %1833 = vmatmul.mubr.f32.gmra.mrb[28].mxu0 %v10032_v46  ;;  %9030 = vmatpush1.bf16.msra.mxu1 %v9029_v44  ;;  %v10057_v44 = vld [vmem:[%s15955_s2 + $0x2b0] sm:$0xff]  ;;  %v10063_v46 = vld [vmem:[%s15955_s2 + $0x318] sm:$0xff] }
 0x1c6   :  { %1837 = vmatprep.mubr.f32.mxu0 %v10033_v52  ;;  %9031 = vmatprep.subr.bf16.mxu1 %v15972_v1  ;;  %v10065_v52 = vld [vmem:[%s15955_s2 + $0x310] sm:$0xff] }
 0x1c7   :  { %9105 = vmatpush1.bf16.msra.mxu0 %v9104_v49  ;;  %v10060_v49 = vld [vmem:[%s15955_s2 + $0x120] sm:$0xff] }
 0x1c8   :  { %9106 = vmatprep.subr.bf16.mxu0 %v15972_v1 }
 0x1c9   :  { %1838 = vmatmul.mubr.f32.gmra.mrb[30].mxu0 %v10034_v58  ;;  %9033 = vmatpush1.bf16.msra.mxu1 %v9032_v26  ;;  %v10064_v26 = vld [vmem:[%s15955_s2 + $0x150] sm:$0xff]  ;;  %v10071_v58 = vld [vmem:[%s15955_s2 + $0x378] sm:$0xff] }
 0x1ca   :  { %1842 = vmatprep.mubr.f32.mxu0 %v10035_v60  ;;  %9130 = vmatprep.subr.bf16.mxu1 %v15972_v1  ;;  %v10072_v60 = vld [vmem:[%s15955_s2 + $0x1b0] sm:$0xff] }
 0x1cb   :  { %9108 = vmatpush1.bf16.msra.mxu0 %v9107_v24  ;;  %v10068_v24 = vld [vmem:[%s15955_s2 + $0x180] sm:$0xff] }
 0x1cc   :  { %1573 = vmatmul.mubr.f32.vlgmr.msra.gmra.mrb[16].mxu1 %v10036_v2  ;;  %9109 = vmatprep.subr.bf16.mxu0 %v15972_v1  ;;  %v10076_v2 = vld [vmem:[%s15955_s2 + $0x1e0] sm:$0xff] }
 0x1cd   :  { %1843 = vmatmul.mubr.f32.gmra.mrb[32].mxu0 %v10037_v5  ;;  %9132 = vmatpush3.bf16.msra.mxu1 %v11774_v59  ;;  %v10079_v5 = vld [vmem:[%s15955_s2 + $0x3d8] sm:$0xff] }
 0x1ce   :  { %1577 = vmatprep.mubr.f32.mxu1 %v10038_v6  ;;  %1847 = vmatprep.mubr.f32.mxu0 %v10039_v7  ;;  %v10080_v6 = vld [vmem:[%s15955_s2 + $0x210] sm:$0xff] }
 0x1cf   :  { %9133 = vmatprep.subr.bf16.mxu1 %v15972_v1  ;;  %9111 = vmatpush1.bf16.msra.mxu0 %v9110_v61  ;;  %v10073_v61 = vld [vmem:[%s15955_s2 + $0x370] sm:$0xff] }
 0x1d0   :  { %1578 = vmatmul.mubr.f32.gmra.mrb[18].mxu1 %v10040_v10  ;;  %9112 = vmatprep.subr.bf16.mxu0 %v15972_v1  ;;  %v10081_v7 = vld [vmem:[%s15955_s2 + $0x3d0] sm:$0xff]  ;;  %v10083_v10 = vld [vmem:[%s15955_s2 + $0x408] sm:$0xff] }
 0x1d1   :  { %1848 = vmatmul.mubr.f32.gmra.mrb[34].mxu0 %v10041_v13  ;;  %1582 = vmatprep.mubr.f32.mxu1 %v10042_v14  ;;  %v10086_v13 = vld [vmem:[%s15955_s2 + $0x278] sm:$0xff] }
 0x1d2   :  { %1852 = vmatprep.mubr.f32.mxu0 %v10043_v15  ;;  %9135 = vmatpush3.bf16.msra.mxu1 %v11806_v8  ;;  %v10087_v14 = vld [vmem:[%s15955_s2 + $0x438] sm:$0xff]  ;;  %v10088_v15 = vld [vmem:[%s15955_s2 + $0x270] sm:$0xff] }
 0x1d3   :  { %9114 = vmatpush1.bf16.msra.mxu0 %v9113_v9  ;;  %9136 = vmatprep.subr.bf16.mxu1 %v15972_v1  ;;  %v10082_v9 = vld [vmem:[%s15955_s2 + $0x248] sm:$0xff] }
 0x1d4   :  { %1583 = vmatmul.mubr.f32.gmra.mrb[20].mxu1 %v10044_v17  ;;  %9115 = vmatprep.subr.bf16.mxu0 %v15972_v1  ;;  %v10090_v17 = vld [vmem:[%s15955_s2 + $0x2a8] sm:$0xff] }
 0x1d5   :  { %1853 = vmatmul.mubr.f32.gmra.mrb[36].mxu0 %v10045_v27  ;;  %1587 = vmatprep.mubr.f32.mxu1 %v10046_v21  ;;  %v10093_v27 = vld [vmem:[%s15955_s2 + $0x460] sm:$0xff]  ;;  %v10094_v21 = vld [vmem:[%s15955_s2 + $0x2d8] sm:$0xff] }
 0x1d6   :  { %1857 = vmatprep.mubr.f32.mxu0 %v10047_v62  ;;  %v10095_v62 = vld [vmem:[%s15955_s2 + $0x498] sm:$0xff] }
 0x1d7   :  { %9117 = vmatpush1.bf16.msra.mxu0 %v9116_v16  ;;  %v10089_v16 = vld [vmem:[%s15955_s2 + $0x430] sm:$0xff] }
 0x1d8   :  { %1588 = vmatmul.mubr.f32.gmra.mrb[22].mxu1 %v10048_v23  ;;  %9118 = vmatprep.subr.bf16.mxu0 %v15972_v1  ;;  %v10097_v23 = vld [vmem:[%s15955_s2 + $0x490] sm:$0xff] }
 0x1d9   :  { %1858 = vmatmul.mubr.f32.gmra.mrb[38].mxu0 %v10049_v30  ;;  %1592 = vmatprep.mubr.f32.mxu1 %v10050_v37  ;;  %v10100_v30 = vld [vmem:[%s15955_s2 + $0x300] sm:$0xff] }
 0x1da   :  { %1862 = vmatprep.mubr.f32.mxu0 %v10051_v42  ;;  %v10101_v37 = vld [vmem:[%s15955_s2 + $0x4c0] sm:$0xff]  ;;  %v10102_v42 = vld [vmem:[%s15955_s2 + $0x338] sm:$0xff] }
 0x1db   :  { %9120 = vmatpush1.bf16.msra.mxu0 %v9119_v22  ;;  %v10096_v22 = vld [vmem:[%s15955_s2 + $0x2d0] sm:$0xff] }
 0x1dc   :  { %1593 = vmatmul.mubr.f32.gmra.mrb[24].mxu1 %v10052_v32  ;;  %9121 = vmatprep.subr.bf16.mxu0 %v15972_v1  ;;  %v10104_v32 = vld [vmem:[%s15955_s2 + $0x330] sm:$0xff] }
 0x1dd   :  { %1863 = vmatmul.mubr.f32.gmra.mrb[40].mxu0 %v10053_v35  ;;  %1597 = vmatprep.mubr.f32.mxu1 %v10054_v36  ;;  %v10107_v35 = vld [vmem:[%s15955_s2 + $0x528] sm:$0xff]  ;;  %v10108_v36 = vld [vmem:[%s15955_s2 + $0x360] sm:$0xff] }
 0x1de   :  { %1867 = vmatprep.mubr.f32.mxu0 %v10055_v38  ;;  %v10109_v38 = vld [vmem:[%s15955_s2 + $0x520] sm:$0xff] }
 0x1df   :  { %9123 = vmatpush1.bf16.msra.mxu0 %v9122_v31  ;;  %v10103_v31 = vld [vmem:[%s15955_s2 + $0x4f8] sm:$0xff] }
 0x1e0   :  { %1598 = vmatmul.mubr.f32.gmra.mrb[26].mxu1 %v10056_v40  ;;  %9124 = vmatprep.subr.bf16.mxu0 %v15972_v1  ;;  %v10111_v40 = vld [vmem:[%s15955_s2 + $0x558] sm:$0xff] }
 0x1e1   :  { %1868 = vmatmul.mubr.f32.gmra.mrb[42].mxu0 %v10057_v44  ;;  %1602 = vmatprep.mubr.f32.mxu1 %v10058_v45  ;;  %v10114_v44 = vld [vmem:[%s15955_s2 + $0x3c8] sm:$0xff] }
 0x1e2   :  { %1872 = vmatprep.mubr.f32.mxu0 %v10059_v47  ;;  %v10115_v45 = vld [vmem:[%s15955_s2 + $0x588] sm:$0xff]  ;;  %v10116_v47 = vld [vmem:[%s15955_s2 + $0x3c0] sm:$0xff] }
 0x1e3   :  { %9126 = vmatpush1.bf16.msra.mxu0 %v9125_v39  ;;  %v10110_v39 = vld [vmem:[%s15955_s2 + $0x398] sm:$0xff] }
 0x1e4   :  { %1603 = vmatmul.mubr.f32.gmra.mrb[28].mxu1 %v10060_v49  ;;  %9127 = vmatprep.subr.bf16.mxu0 %v15972_v1  ;;  %v10117_v49 = vld [vmem:[%s15955_s2 + $0x580] sm:$0xff] }
 0x1e5   :  { %1873 = vmatmul.mubr.f32.gmra.mrb[44].mxu0 %v10061_v50  ;;  %1607 = vmatprep.mubr.f32.mxu1 %v10062_v51  ;;  %v10118_v50 = vld [vmem:[%s15955_s2 + $0x3f8] sm:$0xff] }
 0x1e6   :  { %1877 = vmatprep.mubr.f32.mxu0 %v10063_v46  ;;  %v10119_v46 = vld [vmem:[%s15955_s2 + $0x5b8] sm:$0xff] }
 0x1e7   :  { %9129 = vmatpush1.bf16.msra.mxu0 %v9128_v48 }
 0x1e8   :  { %1608 = vmatmul.mubr.f32.gmra.mrb[30].mxu1 %v10064_v26 }
 0x1e9   :  { %1878 = vmatmul.mubr.f32.gmra.mrb[46].mxu0 %v10065_v52  ;;  %1612 = vmatprep.mubr.f32.mxu1 %v10066_v54  ;;  %v10120_v52 = vld [vmem:[%s15955_s2 + $0x3f0] sm:$0xff] }
 0x1ea   :  { %1882 = vmatprep.mubr.f32.mxu0 %v10067_v53  ;;  %v10121_v54 = vld [vmem:[%s15955_s2 + $0x5b0] sm:$0xff]  ;;  %v10122_v53 = vld [vmem:[%s15955_s2 + $0x428] sm:$0xff] }
 0x1ec   :  { %1613 = vmatmul.mubr.f32.gmra.mrb[32].mxu1 %v10068_v24  ;;  %v10123_v24 = vld [vmem:[%s15955_s2 + $0x5e8] sm:$0xff] }
 0x1ed   :  { %1883 = vmatmul.mubr.f32.gmra.mrb[48].mxu0 %v10069_v56  ;;  %1617 = vmatprep.mubr.f32.mxu1 %v10070_v57  ;;  %v10124_v56 = vld [vmem:[%s15955_s2 + $0x420] sm:$0xff] }
 0x1ee   :  { %1887 = vmatprep.mubr.f32.mxu0 %v10071_v58  ;;  %v10125_v57 = vld [vmem:[%s15955_s2 + $0x5e0] sm:$0xff]  ;;  %v10126_v58 = vld [vmem:[%s15955_s2 + $0x458] sm:$0xff] }
 0x1f0   :  { %1618 = vmatmul.mubr.f32.gmra.mrb[34].mxu1 %v10072_v60  ;;  %v10127_v60 = vld [vmem:[%s15955_s2 + $0x28] sm:$0xff] }
 0x1f1   :  { %1888 = vmatmul.mubr.f32.gmra.mrb[50].mxu0 %v10073_v61  ;;  %1622 = vmatprep.mubr.f32.mxu1 %v10074_v63  ;;  %v10128_v61 = vld [vmem:[%s15955_s2 + $0x450] sm:$0xff]  ;;  %v10129_v63 = vld [vmem:[%s15955_s2 + $0x20] sm:$0xff] }
 0x1f2   :  { %1892 = vmatprep.mubr.f32.mxu0 %v10075_v0  ;;  %v10130_v0 = vld [vmem:[%s15955_s2 + $0x488] sm:$0xff] }
 0x1f4   :  { %1623 = vmatmul.mubr.f32.gmra.mrb[36].mxu1 %v10076_v2  ;;  %v10131_v2 = vld [vmem:[%s15955_s2 + $0x58] sm:$0xff] }
 0x1f5   :  { %1893 = vmatmul.mubr.f32.gmra.mrb[52].mxu0 %v10077_v3  ;;  %1627 = vmatprep.mubr.f32.mxu1 %v10078_v4  ;;  %v10132_v3 = vld [vmem:[%s15955_s2 + $0x480] sm:$0xff]  ;;  %v10133_v4 = vld [vmem:[%s15955_s2 + $0x50] sm:$0xff] }
 0x1f6   :  { %1897 = vmatprep.mubr.f32.mxu0 %v10079_v5  ;;  %v10134_v5 = vld [vmem:[%s15955_s2 + $0x4b8] sm:$0xff] }
 0x1f8   :  { %1628 = vmatmul.mubr.f32.gmra.mrb[38].mxu1 %v10080_v6  ;;  %v10135_v6 = vld [vmem:[%s15955_s2 + $0x88] sm:$0xff] }
 0x1f9   :  { %1898 = vmatmul.mubr.f32.gmra.mrb[54].mxu0 %v10081_v7  ;;  %1632 = vmatprep.mubr.f32.mxu1 %v10082_v9  ;;  %v10136_v7 = vld [vmem:[%s15955_s2 + $0x4b0] sm:$0xff]  ;;  %v10137_v9 = vld [vmem:[%s15955_s2 + $0x80] sm:$0xff] }
 0x1fa   :  { %1902 = vmatprep.mubr.f32.mxu0 %v10083_v10  ;;  %v10138_v10 = vld [vmem:[%s15955_s2 + $0x4e8] sm:$0xff] }
 0x1fc   :  { %1633 = vmatmul.mubr.f32.gmra.mrb[40].mxu1 %v10084_v11  ;;  %v10139_v11 = vld [vmem:[%s15955_s2 + $0xb8] sm:$0xff] }
 0x1fd   :  { %1903 = vmatmul.mubr.f32.gmra.mrb[56].mxu0 %v10085_v12  ;;  %1637 = vmatprep.mubr.f32.mxu1 %v10086_v13  ;;  %v10140_v12 = vld [vmem:[%s15955_s2 + $0x4e0] sm:$0xff]  ;;  %v10141_v13 = vld [vmem:[%s15955_s2 + $0xb0] sm:$0xff] }
 0x1fe   :  { %1907 = vmatprep.mubr.f32.mxu0 %v10087_v14  ;;  %v10142_v14 = vld [vmem:[%s15955_s2 + $0x518] sm:$0xff] }
 0x200   :  { %1638 = vmatmul.mubr.f32.gmra.mrb[42].mxu1 %v10088_v15  ;;  %v10143_v15 = vld [vmem:[%s15955_s2 + $0xe8] sm:$0xff] }
 0x201   :  { %1908 = vmatmul.mubr.f32.gmra.mrb[58].mxu0 %v10089_v16  ;;  %1642 = vmatprep.mubr.f32.mxu1 %v10090_v17  ;;  %v10144_v16 = vld [vmem:[%s15955_s2 + $0x510] sm:$0xff]  ;;  %v12165_v17 = vld [vmem:[%s15959_s6] ss:$0 sm:$0xff]  ;;  %s4544_s6 = ssub.f32 1.0, %s8102_s5 }
 0x202   :  { %1912 = vmatprep.mubr.f32.mxu0 %v10091_v18  ;;  %v10145_v18 = vld [vmem:[%s15955_s2 + $0xe0] sm:$0xff] }
 0x204   :  { %1643 = vmatmul.mubr.f32.gmra.mrb[44].mxu1 %v10092_v19  ;;  %v10146_v19 = vld [vmem:[%s15955_s2 + $0x548] sm:$0xff] }
 0x205   :  { %1913 = vmatmul.mubr.f32.gmra.mrb[60].mxu0 %v10093_v27  ;;  %1647 = vmatprep.mubr.f32.mxu1 %v10094_v21  ;;  %v10147_v27 = vld [vmem:[%s15955_s2 + $0x118] sm:$0xff] }
 0x206   :  { %1917 = vmatprep.mubr.f32.mxu0 %v10095_v62 }
 0x208   :  { %1648 = vmatmul.mubr.f32.gmra.mrb[46].mxu1 %v10096_v22  ;;  %v10148_v22 = vld [vmem:[%s15955_s2 + $0x540] sm:$0xff] }
 0x209   :  { %1918 = vmatmul.mubr.f32.gmra.mrb[62].mxu0 %v10097_v23  ;;  %1652 = vmatprep.mubr.f32.mxu1 %v10098_v25  ;;  %v10149_v25 = vld [vmem:[%s15955_s2 + $0x110] sm:$0xff] }
 0x20a   :  { %1922 = vmatprep.mubr.f32.mxu0 %v10099_v29 }
 0x20c   :  { %1653 = vmatmul.mubr.f32.gmra.mrb[48].mxu1 %v10100_v30  ;;  %v10150_v30 = vld [vmem:[%s15955_s2 + $0x578] sm:$0xff] }
 0x20d   :  { %1923 = vmatmul.mubr.f32.gmra.mrb[64].mxu0 %v10101_v37  ;;  %1657 = vmatprep.mubr.f32.mxu1 %v10102_v42  ;;  %v10151_v37 = vld [vmem:[%s15955_s2 + $0x148] sm:$0xff] }
 0x20e   :  { %1927 = vmatprep.mubr.f32.mxu0 %v10103_v31  ;;  %v10152_v31 = vld [vmem:[%s15955_s2 + $0x570] sm:$0xff] }
 0x210   :  { %1658 = vmatmul.mubr.f32.gmra.mrb[50].mxu1 %v10104_v32  ;;  %v10153_v32 = vld [vmem:[%s15955_s2 + $0x140] sm:$0xff] }
 0x211   :  { %1928 = vmatmul.mubr.f32.gmra.mrb[66].mxu0 %v10105_v33  ;;  %1662 = vmatprep.mubr.f32.mxu1 %v10106_v34  ;;  %v10154_v33 = vld [vmem:[%s15955_s2 + $0x5a8] sm:$0xff]  ;;  %v10155_v34 = vld [vmem:[%s15955_s2 + $0x178] sm:$0xff] }
 0x212   :  { %1932 = vmatprep.mubr.f32.mxu0 %v10107_v35  ;;  %v10156_v35 = vld [vmem:[%s15955_s2 + $0x5a0] sm:$0xff] }
 0x214   :  { %1663 = vmatmul.mubr.f32.gmra.mrb[52].mxu1 %v10108_v36  ;;  %v10157_v36 = vld [vmem:[%s15955_s2 + $0x170] sm:$0xff] }
 0x215   :  { %1933 = vmatmul.mubr.f32.gmra.mrb[68].mxu0 %v10109_v38  ;;  %1667 = vmatprep.mubr.f32.mxu1 %v10110_v39  ;;  %v10158_v38 = vld [vmem:[%s15955_s2 + $0x5d8] sm:$0xff]  ;;  %v10159_v39 = vld [vmem:[%s15955_s2 + $0x1a8] sm:$0xff] }
 0x216   :  { %1937 = vmatprep.mubr.f32.mxu0 %v10111_v40  ;;  %v10160_v40 = vld [vmem:[%s15955_s2 + $0x5d0] sm:$0xff] }
 0x218   :  { %1668 = vmatmul.mubr.f32.gmra.mrb[54].mxu1 %v10112_v41  ;;  %v10161_v41 = vld [vmem:[%s15955_s2 + $0x1a0] sm:$0xff] }
 0x219   :  { %1938 = vmatmul.mubr.f32.gmra.mrb[70].mxu0 %v10113_v43  ;;  %1672 = vmatprep.mubr.f32.mxu1 %v10114_v44  ;;  %v10162_v43 = vld [vmem:[%s15955_s2 + $0x1d8] sm:$0xff]  ;;  %v10163_v44 = vld [vmem:[%s15955_s2 + $0x1d0] sm:$0xff] }
 0x21a   :  { %1942 = vmatprep.mubr.f32.mxu0 %v10115_v45  ;;  %v10164_v45 = vld [vmem:[%s15955_s2 + $0x208] sm:$0xff] }
 0x21c   :  { %1673 = vmatmul.mubr.f32.gmra.mrb[56].mxu1 %v10116_v47  ;;  %v8264_v48 = vpop.f32.mrb[8].mxu1  ;;  %v10165_v47 = vld [vmem:[%s15955_s2 + $0x200] sm:$0xff] }
 0x21d   :  { %1943 = vmatmul.mubr.f32.gmra.mrb[72].mxu0 %v10117_v49  ;;  %1677 = vmatprep.mubr.f32.mxu1 %v10118_v50  ;;  %v8265_v51 = vpop.f32.mrb[9].mxu1  ;;  %v10167_v49 = vld [vmem:[%s15955_s2 + $0x230] sm:$0xff]  ;;  %v10168_v50 = vld [vmem:[%s15955_s2 + $0x268] sm:$0xff] }
 0x21e   :  { %1947 = vmatprep.mubr.f32.mxu0 %v10119_v46  ;;  %v8266_v26 = vadd.f32 %v8265_v51, %v8264_v48  ;;  %v10166_v48 = vld [vmem:[%s15955_s2 + $0x238] sm:$0xff]  ;;  %v10169_v51 = vld [vmem:[%s15955_s2 + $0x260] sm:$0xff] }
 0x21f   :  { %v10170_v46 = vld [vmem:[%s15955_s2 + $0x298] sm:$0xff] }
 0x220   :  { %1678 = vmatmul.mubr.f32.gmra.mrb[58].mxu1 %v10120_v52  ;;  %v1238_v21 = vadd.f32 %v8266_v26, %v12165_v17 }
 0x221   :  { %1948 = vmatmul.mubr.f32.gmra.mrb[74].mxu0 %v10121_v54  ;;  %1682 = vmatprep.mubr.f32.mxu1 %v10122_v53  ;;  %v10171_v53 = vld [vmem:[%s15955_s2 + $0x290] sm:$0xff] }
 0x222   :  { %1952 = vmatprep.mubr.f32.mxu0 %v10123_v24 }
 0x224   :  { %1683 = vmatmul.mubr.f32.gmra.mrb[60].mxu1 %v10124_v56 }
 0x225   :  { %1953 = vmatmul.mubr.f32.gmra.mrb[76].mxu0 %v10125_v57  ;;  %1687 = vmatprep.mubr.f32.mxu1 %v10126_v58  ;;  %v10172_v58 = vld [vmem:[%s15955_s2 + $0x2c8] sm:$0xff] }
 0x226   :  { %2022 = vmatprep.mubr.f32.mxu0 %v10127_v60 }
 0x228   :  { %1688 = vmatmul.mubr.f32.gmra.mrb[62].mxu1 %v10128_v61 }
 0x229   :  { %2023 = vmatmul.mubr.f32.vlgmr.msra.gmra.mrb[14].mxu0 %v10129_v63  ;;  %1692 = vmatprep.mubr.f32.mxu1 %v10130_v0 }
 0x22a   :  { %2027 = vmatprep.mubr.f32.mxu0 %v10131_v2  ;;  %v10173_v2 = vld [vmem:[%s15955_s2 + $0x2c0] sm:$0xff] }
 0x22c   :  { %1693 = vmatmul.mubr.f32.gmra.mrb[64].mxu1 %v10132_v3 }
 0x22d   :  { %2028 = vmatmul.mubr.f32.gmra.mrb[16].mxu0 %v10133_v4  ;;  %1697 = vmatprep.mubr.f32.mxu1 %v10134_v5  ;;  %v10174_v4 = vld [vmem:[%s15955_s2 + $0x2f8] sm:$0xff] }
 0x22e   :  { %2032 = vmatprep.mubr.f32.mxu0 %v10135_v6  ;;  %v10175_v6 = vld [vmem:[%s15955_s2 + $0x2f0] sm:$0xff] }
 0x230   :  { %1698 = vmatmul.mubr.f32.gmra.mrb[66].mxu1 %v10136_v7  ;;  %v10176_v7 = vld [vmem:[%s15955_s2 + $0x328] sm:$0xff] }
 0x231   :  { %2033 = vmatmul.mubr.f32.gmra.mrb[18].mxu0 %v10137_v9  ;;  %1702 = vmatprep.mubr.f32.mxu1 %v10138_v10  ;;  %v10177_v9 = vld [vmem:[%s15955_s2 + $0x320] sm:$0xff]  ;;  %v10178_v10 = vld [vmem:[%s15955_s2 + $0x358] sm:$0xff] }
 0x232   :  { %2037 = vmatprep.mubr.f32.mxu0 %v10139_v11  ;;  %v10179_v11 = vld [vmem:[%s15955_s2 + $0x350] sm:$0xff] }
 0x234   :  { %1703 = vmatmul.mubr.f32.gmra.mrb[68].mxu1 %v10140_v12  ;;  %v10180_v12 = vld [vmem:[%s15955_s2 + $0x388] sm:$0xff] }
 0x235   :  { %2038 = vmatmul.mubr.f32.gmra.mrb[20].mxu0 %v10141_v13  ;;  %1707 = vmatprep.mubr.f32.mxu1 %v10142_v14  ;;  %v10181_v13 = vld [vmem:[%s15955_s2 + $0x380] sm:$0xff]  ;;  %v10182_v14 = vld [vmem:[%s15955_s2 + $0x3b8] sm:$0xff] }
 0x236   :  { %2042 = vmatprep.mubr.f32.mxu0 %v10143_v15  ;;  %v10183_v15 = vld [vmem:[%s15955_s2 + $0x3b0] sm:$0xff] }
 0x238   :  { %1708 = vmatmul.mubr.f32.gmra.mrb[70].mxu1 %v10144_v16  ;;  %v10184_v16 = vld [vmem:[%s15955_s2 + $0x3e8] sm:$0xff] }
 0x239   :  { %2043 = vmatmul.mubr.f32.gmra.mrb[22].mxu0 %v10145_v18  ;;  %1712 = vmatprep.mubr.f32.mxu1 %v10146_v19  ;;  %v10186_v18 = vld [vmem:[%s15955_s2 + $0x418] sm:$0xff] }
 0x23a   :  { %2047 = vmatprep.mubr.f32.mxu0 %v10147_v27 }
 0x23b   :  { %v8302_v62 = vpop.f32.mrb[10].mxu0 }
 0x23c   :  { %1713 = vmatmul.mubr.f32.gmra.mrb[72].mxu1 %v10148_v22  ;;  %v8303_v23 = vpop.f32.mrb[11].mxu0  ;;  %v10188_v22 = vld [vmem:[%s15955_s2 + $0x448] sm:$0xff] }
 0x23d   :  { %2048 = vmatmul.mubr.f32.gmra.mrb[24].mxu0 %v10149_v25  ;;  %v8304_v29 = vadd.f32 %v8303_v23, %v8302_v62  ;;  %1717 = vmatprep.mubr.f32.mxu1 %v10150_v30  ;;  %v10189_v25 = vld [vmem:[%s15955_s2 + $0x440] sm:$0xff]  ;;  %v10191_v30 = vld [vmem:[%s15955_s2 + $0x470] sm:$0xff] }
 0x23e   :  { %2052 = vmatprep.mubr.f32.mxu0 %v10151_v37  ;;  %v10192_v37 = vld [vmem:[%s15955_s2 + $0x4a8] sm:$0xff] }
 0x23f   :  { %v12189_v42 = vadd.f32 %v8304_v29, %v1238_v21  ;;  %v10187_v21 = vld [vmem:[%s15955_s2 + $0x410] sm:$0xff]  ;;  %v10190_v29 = vld [vmem:[%s15955_s2 + $0x478] sm:$0xff] }
 0x240   :  { %1718 = vmatmul.mubr.f32.gmra.mrb[74].mxu1 %v10152_v31  ;;  %v10194_v31 = vld [vmem:[%s15955_s2 + $0x4d8] sm:$0xff] }
 0x241   :  { %2053 = vmatmul.mubr.f32.gmra.mrb[26].mxu0 %v10153_v32  ;;  %1722 = vmatprep.mubr.f32.mxu1 %v10154_v33  ;;  %v10195_v32 = vld [vmem:[%s15955_s2 + $0x4d0] sm:$0xff]  ;;  %v10196_v33 = vld [vmem:[%s15955_s2 + $0x508] sm:$0xff] }
 0x242   :  { %2057 = vmatprep.mubr.f32.mxu0 %v10155_v34  ;;  %v10197_v34 = vld [vmem:[%s15955_s2 + $0x500] sm:$0xff] }
 0x244   :  { %1723 = vmatmul.mubr.f32.gmra.mrb[76].mxu1 %v10156_v35  ;;  %v10198_v35 = vld [vmem:[%s15955_s2 + $0x538] sm:$0xff] }
 0x245   :  { %2058 = vmatmul.mubr.f32.gmra.mrb[28].mxu0 %v10157_v36  ;;  %1727 = vmatprep.mubr.f32.mxu1 %v10158_v38  ;;  %v10199_v36 = vld [vmem:[%s15955_s2 + $0x530] sm:$0xff]  ;;  %v10200_v38 = vld [vmem:[%s15955_s2 + $0x568] sm:$0xff] }
 0x246   :  { %2062 = vmatprep.mubr.f32.mxu0 %v10159_v39  ;;  %v10201_v39 = vld [vmem:[%s15955_s2 + $0x560] sm:$0xff] }
 0x248   :  { %1728 = vmatmul.mubr.f32.gmra.mrb[78].mxu1 %v10160_v40  ;;  %v10202_v40 = vld [vmem:[%s15955_s2 + $0x598] sm:$0xff] }
 0x249   :  { %2063 = vmatmul.mubr.f32.gmra.mrb[30].mxu0 %v10161_v41  ;;  %8434 = vmatprep.mubr.msk.f32.mxu1 %vm10331_vm1, %v15974_v20  ;;  %v10203_v41 = vld [vmem:[%s15955_s2 + $0x590] sm:$0xff] }
 0x24a   :  { %2067 = vmatprep.mubr.f32.mxu0 %v10162_v43  ;;  %v10204_v43 = vld [vmem:[%s15955_s2 + $0x5c8] sm:$0xff] }
 0x24c   :  { %8435 = vmatmul.mubr.msk.f32.vlgmr.msra.gmra.mrb[80].mxu1 %vm16077_vm2, %v11392_v28 }
 0x24d   :  { %2068 = vmatmul.mubr.f32.gmra.mrb[32].mxu0 %v10163_v44  ;;  %8445 = vmatprep.mubr.msk.f32.mxu1 %vm10331_vm1, %v15974_v20 }
 0x24e   :  { %2072 = vmatprep.mubr.f32.mxu0 %v10164_v45 }
 0x251   :  { %2073 = vmatmul.mubr.f32.gmra.mrb[34].mxu0 %v10165_v47  ;;  %v10205_v47 = vld [vmem:[%s15955_s2 + $0x5c0] sm:$0xff] }
 0x252   :  { %2077 = vmatprep.mubr.f32.mxu0 %v10166_v48  ;;  %v10206_v48 = vld [vmem:[%s15955_s2 + $0x5f8] sm:$0xff] }
 0x255   :  { %2078 = vmatmul.mubr.f32.gmra.mrb[36].mxu0 %v10167_v49 }
 0x256   :  { %2082 = vmatprep.mubr.f32.mxu0 %v10168_v50 }
 0x259   :  { %2083 = vmatmul.mubr.f32.gmra.mrb[38].mxu0 %v10169_v51  ;;  %v10207_v51 = vld [vmem:[%s15955_s2 + $0x5f0] sm:$0xff] }
 0x25a   :  { %2087 = vmatprep.mubr.f32.mxu0 %v10170_v46 }
 0x25b   :  { %v8267_v26 = vpop.f32.mrb[10].mxu1 }
 0x25c   :  { %v8305_v52 = vpop.f32.mrb[12].mxu0  ;;  %v8268_v54 = vpop.f32.mrb[11].mxu1 }
 0x25d   :  { %2088 = vmatmul.mubr.f32.gmra.mrb[40].mxu0 %v10171_v53  ;;  %v8269_v24 = vadd.f32 %v8268_v54, %v8267_v26  ;;  %v8306_v56 = vpop.f32.mrb[13].mxu0 }
 0x25e   :  { %v8307_v57 = vadd.f32 %v8306_v56, %v8305_v52  ;;  %2092 = vmatprep.mubr.f32.mxu0 %v10172_v58 }
 0x25f   :  { %v1243_v60 = vadd.f32 %v8269_v24, %v12165_v17  ;;  %v8340_v61 = vpop.f32.mrb[12].mxu1  ;;  %v10185_v17 = vld [vmem:[%s15955_s2 + $0x3e0] sm:$0xff] }
 0x260   :  { %v8341_v63 = vpop.f32.mrb[13].mxu1 }
 0x261   :  { %v1318_v0 = vadd.f32 %v8307_v57, %v1243_v60  ;;  %2093 = vmatmul.mubr.f32.gmra.mrb[42].mxu0 %v10173_v2  ;;  %v8342_v3 = vadd.f32 %v8341_v63, %v8340_v61 }
 0x262   :  { %2097 = vmatprep.mubr.f32.mxu0 %v10174_v4 }
 0x263   :  { %v12268_v5 = vadd.f32 %v8342_v3, %v12189_v42  ;;  %v10193_v42 = vld [vmem:[%s15955_s2 + $0x4a0] sm:$0xff]  ;;  %s6707_s2 = ssub.f32 1.0, %s8117_s9 }
 0x265   :  { %2098 = vmatmul.mubr.f32.gmra.mrb[44].mxu0 %v10175_v6 }
 0x266   :  { %2102 = vmatprep.mubr.f32.mxu0 %v10176_v7 }
 0x269   :  { %2103 = vmatmul.mubr.f32.gmra.mrb[46].mxu0 %v10177_v9 }
 0x26a   :  { %2107 = vmatprep.mubr.f32.mxu0 %v10178_v10 }
 0x26d   :  { %2108 = vmatmul.mubr.f32.gmra.mrb[48].mxu0 %v10179_v11 }
 0x26e   :  { %2112 = vmatprep.mubr.f32.mxu0 %v10180_v12 }
 0x271   :  { %2113 = vmatmul.mubr.f32.gmra.mrb[50].mxu0 %v10181_v13 }
 0x272   :  { %2117 = vmatprep.mubr.f32.mxu0 %v10182_v14 }
 0x275   :  { %2118 = vmatmul.mubr.f32.gmra.mrb[52].mxu0 %v10183_v15 }
 0x276   :  { %2122 = vmatprep.mubr.f32.mxu0 %v10184_v16 }
 0x279   :  { %2123 = vmatmul.mubr.f32.gmra.mrb[54].mxu0 %v10185_v17 }
 0x27a   :  { %2127 = vmatprep.mubr.f32.mxu0 %v10186_v18 }
 0x27b   :  { %v8343_v19 = vpop.f32.mrb[14].mxu1 }
 0x27c   :  { %v8344_v27 = vpop.f32.mrb[15].mxu1 }
 0x27d   :  { %2128 = vmatmul.mubr.f32.gmra.mrb[56].mxu0 %v10187_v21  ;;  %v8345_v62 = vadd.f32 %v8344_v27, %v8343_v19 }
 0x27e   :  { %2132 = vmatprep.mubr.f32.mxu0 %v10188_v22 }
 0x27f   :  { %v12312_v23 = vadd.f32 %v8345_v62, %v1318_v0 }
 0x281   :  { %2133 = vmatmul.mubr.f32.gmra.mrb[58].mxu0 %v10189_v25 }
 0x282   :  { %2137 = vmatprep.mubr.f32.mxu0 %v10190_v29 }
 0x285   :  { %2138 = vmatmul.mubr.f32.gmra.mrb[60].mxu0 %v10191_v30 }
 0x286   :  { %2142 = vmatprep.mubr.f32.mxu0 %v10192_v37 }
 0x289   :  { %2143 = vmatmul.mubr.f32.gmra.mrb[62].mxu0 %v10193_v42 }
 0x28a   :  { %2147 = vmatprep.mubr.f32.mxu0 %v10194_v31 }
 0x28d   :  { %2148 = vmatmul.mubr.f32.gmra.mrb[64].mxu0 %v10195_v32 }
 0x28e   :  { %2152 = vmatprep.mubr.f32.mxu0 %v10196_v33 }
 0x291   :  { %2153 = vmatmul.mubr.f32.gmra.mrb[66].mxu0 %v10197_v34  ;;  %v12412_v34 = vld [vmem:[%s15963_s10] ss:$0 sm:$0xff] }
 0x292   :  { %2157 = vmatprep.mubr.f32.mxu0 %v10198_v35 }
 0x295   :  { %2158 = vmatmul.mubr.f32.gmra.mrb[68].mxu0 %v10199_v36 }
 0x296   :  { %2162 = vmatprep.mubr.f32.mxu0 %v10200_v38 }
 0x299   :  { %2163 = vmatmul.mubr.f32.gmra.mrb[70].mxu0 %v10201_v39 }
 0x29a   :  { %2167 = vmatprep.mubr.f32.mxu0 %v10202_v40 }
 0x29d   :  { %2168 = vmatmul.mubr.f32.gmra.mrb[72].mxu0 %v10203_v41 }
 0x29e   :  { %2172 = vmatprep.mubr.f32.mxu0 %v10204_v43 }
 0x29f   :  { %v1574_v44 = vpop.f32.mrb[16].mxu1 }
 0x2a0   :  { %v1576_v45 = vpop.f32.mrb[17].mxu1  ;;  %v1575_v36 = vadd.f32 %v12412_v34, %v1574_v44 }
 0x2a1   :  { %2173 = vmatmul.mubr.f32.gmra.mrb[74].mxu0 %v10205_v47 }
 0x2a2   :  { %2177 = vmatprep.mubr.f32.mxu0 %v10206_v48 }
 0x2a3   :  { %v1579_v49 = vpop.f32.mrb[18].mxu1 }
 0x2a4   :  { %v1581_v50 = vpop.f32.mrb[19].mxu1  ;;  %v1580_v45 = vadd.f32 %v12412_v34, %v1579_v49 }
 0x2a5   :  { %2178 = vmatmul.mubr.f32.gmra.mrb[76].mxu0 %v10207_v51 }
 0x2a7   :  { %v1584_v46 = vpop.f32.mrb[20].mxu1 }
 0x2a8   :  { %v1586_v26 = vpop.f32.mrb[21].mxu1 }
 0x2ab   :  { %v1589_v52 = vpop.f32.mrb[22].mxu1 }
 0x2ac   :  { %v1591_v54 = vpop.f32.mrb[23].mxu1 }
 0x2ad   :  { %v1585_v54 = vadd.f32 %v12412_v34, %v1584_v46 }
 0x2af   :  { %v12371_v53 = vpop.f32.mrb[24].mxu1 }
 0x2b0   :  { %v1596_v24 = vpop.f32.mrb[25].mxu1 }
 0x2b3   :  { %v12373_v56 = vpop.f32.mrb[26].mxu1 }
 0x2b4   :  { %v1601_v57 = vpop.f32.mrb[27].mxu1 }
 0x2b7   :  { %v12375_v58 = vpop.f32.mrb[28].mxu1 }
 0x2b8   :  { %v1606_v60 = vpop.f32.mrb[29].mxu1 }
 0x2bb   :  { %v12377_v61 = vpop.f32.mrb[30].mxu1 }
 0x2bc   :  { %v1611_v63 = vpop.f32.mrb[31].mxu1 }
 0x2bf   :  { %v12379_v0 = vpop.f32.mrb[32].mxu1 }
 0x2c0   :  { %v1616_v2 = vpop.f32.mrb[33].mxu1 }
 0x2c1   :  { %v1590_v2 = vadd.f32 %v12412_v34, %v1589_v52  ;;  %v1600_v52 = vadd.f32 %v12412_v34, %v12373_v56  ;;  %v1610_v56 = vadd.f32 %v12412_v34, %v12377_v61  ;;  %v8083_v61 = vld [vmem:[%s15961_s8] ss:$0 sm:$0xff]  ;;  %s10332_s8 = smov 64  }
 0x2c3   :  { %v12381_v3 = vpop.f32.mrb[34].mxu1 }
 0x2c4   :  { %v1621_v4 = vpop.f32.mrb[35].mxu1 }
 0x2c7   :  { %v12383_v6 = vpop.f32.mrb[36].mxu1 }
 0x2c8   :  { %v1626_v7 = vpop.f32.mrb[37].mxu1 }
 0x2cb   :  { %v12385_v9 = vpop.f32.mrb[38].mxu1 }
 0x2cc   :  { %v1631_v10 = vpop.f32.mrb[39].mxu1 }
 0x2cf   :  { %v12387_v11 = vpop.f32.mrb[40].mxu1 }
 0x2d0   :  { %v1636_v12 = vpop.f32.mrb[41].mxu1 }
 0x2d3   :  { %v12389_v13 = vpop.f32.mrb[42].mxu1 }
 0x2d4   :  { %v1641_v14 = vpop.f32.mrb[43].mxu1 }
 0x2d5   :  { %v1595_v14 = vadd.f32 %v12412_v34, %v12371_v53  ;;  %v1605_v53 = vadd.f32 %v12412_v34, %v12375_v58  ;;  %v1615_v58 = vadd.f32 %v12412_v34, %v12379_v0 }
 0x2d7   :  { %v12391_v15 = vpop.f32.mrb[44].mxu1 }
 0x2d8   :  { %v1646_v16 = vpop.f32.mrb[45].mxu1 }
 0x2db   :  { %v12393_v17 = vpop.f32.mrb[46].mxu1 }
 0x2dc   :  { %v1651_v18 = vpop.f32.mrb[47].mxu1 }
 0x2df   :  { %v12395_v19 = vpop.f32.mrb[48].mxu1 }
 0x2e0   :  { %v1656_v27 = vpop.f32.mrb[49].mxu1 }
 0x2e3   :  { %v12397_v21 = vpop.f32.mrb[50].mxu1 }
 0x2e4   :  { %v1661_v62 = vpop.f32.mrb[51].mxu1 }
 0x2e7   :  { %v12399_v22 = vpop.f32.mrb[52].mxu1 }
 0x2e8   :  { %v1666_v25 = vpop.f32.mrb[53].mxu1 }
 0x2eb   :  { %v12401_v29 = vpop.f32.mrb[54].mxu1 }
 0x2ec   :  { %v1671_v30 = vpop.f32.mrb[55].mxu1 }
 0x2ef   :  { %v12403_v37 = vpop.f32.mrb[56].mxu1 }
 0x2f0   :  { %v1676_v42 = vpop.f32.mrb[57].mxu1 }
 0x2f3   :  { %v12405_v31 = vpop.f32.mrb[58].mxu1 }
 0x2f4   :  { %v1681_v32 = vpop.f32.mrb[59].mxu1 }
 0x2f7   :  { %v12407_v33 = vpop.f32.mrb[60].mxu1 }
 0x2f8   :  { %v1686_v35 = vpop.f32.mrb[61].mxu1 }
 0x2fb   :  { %v12415_v38 = vpop.f32.mrb[62].mxu1 }
 0x2fc   :  { %v2024_v39 = vpop.f32.mrb[14].mxu0  ;;  %v1691_v40 = vpop.f32.mrb[63].mxu1 }
 0x2fd   :  { %v12417_v41 = vadd.f32 %v2024_v39, %v1575_v36  ;;  %v2026_v43 = vpop.f32.mrb[15].mxu0 }
 0x2ff   :  { %16164 = vst [vmem:[#allocation16_spill] sm:$0xff] %v12417_v41  ;;  %v12420_v47 = vpop.f32.mrb[64].mxu1 }
 0x300   :  { %v2029_v48 = vpop.f32.mrb[16].mxu0  ;;  %v1696_v50 = vpop.f32.mrb[65].mxu1 }
 0x301   :  { %v12422_v51 = vadd.f32 %v2029_v48, %v1580_v45  ;;  %v2031_v26 = vpop.f32.mrb[17].mxu0 }
 0x303   :  { %16165 = vst [vmem:[#allocation17_spill] sm:$0xff] %v12422_v51  ;;  %v12425_v24 = vpop.f32.mrb[66].mxu1 }
 0x304   :  { %v2034_v44 = vpop.f32.mrb[18].mxu0  ;;  %v1701_v57 = vpop.f32.mrb[67].mxu1 }
 0x305   :  { %v12427_v60 = vadd.f32 %v2034_v44, %v1585_v54  ;;  %v2036_v63 = vpop.f32.mrb[19].mxu0 }
 0x307   :  { %16166 = vst [vmem:[#allocation18_spill] sm:$0xff] %v12427_v60  ;;  %v12430_v4 = vpop.f32.mrb[68].mxu1 }
 0x308   :  { %v2039_v49 = vpop.f32.mrb[20].mxu0  ;;  %v1706_v7 = vpop.f32.mrb[69].mxu1 }
 0x309   :  { %v12432_v10 = vadd.f32 %v2039_v49, %v1590_v2  ;;  %v2041_v12 = vpop.f32.mrb[21].mxu0 }
 0x30a   :  { %v1620_v12 = vadd.f32 %v12412_v34, %v12381_v3 }
 0x30b   :  { %16167 = vst [vmem:[#allocation19_spill] sm:$0xff] %v12432_v10  ;;  %v12436_v46 = vpop.f32.mrb[70].mxu1 }
 0x30c   :  { %v2044_v16 = vpop.f32.mrb[22].mxu0  ;;  %v1711_v18 = vpop.f32.mrb[71].mxu1 }
 0x30d   :  { %v12438_v27 = vadd.f32 %v2044_v16, %v1595_v14  ;;  %v2046_v62 = vpop.f32.mrb[23].mxu0  ;;  %v12470_v16 = vadd.f32 %v8083_v61, %v12312_v23 }
 0x30f   :  { %16168 = vst [vmem:[#allocation20_spill] sm:$0xff] %v12438_v27  ;;  %v12442_v25 = vpop.f32.mrb[72].mxu1  ;;  %16173 = vst [vmem:[#allocation25_spill] sm:$0xff] %v12470_v16 }
 0x310   :  { %v2049_v30 = vpop.f32.mrb[24].mxu0  ;;  %v1716_v42 = vpop.f32.mrb[73].mxu1 }
 0x311   :  { %v12444_v32 = vadd.f32 %v2049_v30, %v1600_v52  ;;  %v2051_v35 = vpop.f32.mrb[25].mxu0 }
 0x312   :  { %v12478_v35 = vadd.f32 %v8083_v61, %v12268_v5 }
 0x313   :  { %16169 = vst [vmem:[#allocation21_spill] sm:$0xff] %v12444_v32  ;;  %v12448_v36 = vpop.f32.mrb[74].mxu1 }
 0x314   :  { %v2054_v39 = vpop.f32.mrb[26].mxu0  ;;  %v1721_v40 = vpop.f32.mrb[75].mxu1  ;;  %16175 = vst [vmem:[#allocation27_spill] sm:$0xff] %v12478_v35 }
 0x315   :  { %v12450_v43 = vadd.f32 %v2054_v39, %v1605_v53  ;;  %v2056_v45 = vpop.f32.mrb[27].mxu0  ;;  %v1625_v53 = vadd.f32 %v12412_v34, %v12383_v6  ;;  %v1635_v6 = vadd.f32 %v12412_v34, %v12387_v11 }
 0x316   :  { %v1630_v45 = vadd.f32 %v12412_v34, %v12385_v9 }
 0x317   :  { %16170 = vst [vmem:[#allocation22_spill] sm:$0xff] %v12450_v43  ;;  %v12454_v48 = vpop.f32.mrb[76].mxu1 }
 0x318   :  { %v2059_v50 = vpop.f32.mrb[28].mxu0  ;;  %v1726_v26 = vpop.f32.mrb[77].mxu1 }
 0x319   :  { %v12456_v54 = vadd.f32 %v2059_v50, %v1610_v56  ;;  %v2061_v44 = vpop.f32.mrb[29].mxu0 }
 0x31b   :  { %16171 = vst [vmem:[#allocation23_spill] sm:$0xff] %v12456_v54  ;;  %v12460_v57 = vpop.f32.mrb[78].mxu1 }
 0x31c   :  { %v2064_v63 = vpop.f32.mrb[30].mxu0  ;;  %v1731_v2 = vpop.f32.mrb[79].mxu1 }
 0x31d   :  { %v12462_v49 = vadd.f32 %v2064_v63, %v1615_v58  ;;  %v2066_v7 = vpop.f32.mrb[31].mxu0  ;;  %v1640_v2 = vadd.f32 %v12412_v34, %v12389_v13  ;;  %v1650_v13 = vadd.f32 %v12412_v34, %v12393_v17 }
 0x31f   :  { %16172 = vst [vmem:[#allocation24_spill] sm:$0xff] %v12462_v49  ;;  %v2265_v14 = vpop.f32.mrb[80].mxu1 }
 0x320   :  { %v2069_v18 = vpop.f32.mrb[32].mxu0  ;;  %v2270_v0 = vrot.slane %v2265_v14, 1  ;;  %v8436_v62 = vpop.f32.mrb[81].mxu1  ;;  %v12483_v39 = vadd.f32 %v2265_v14, %v12478_v35  ;;  %v1645_v14 = vadd.f32 %v12412_v34, %v12391_v15 }
 0x321   :  { %v12472_v52 = vadd.f32 %v2069_v18, %v1620_v12  ;;  %v2071_v30 = vpop.f32.mrb[33].mxu0 }
 0x322   :  { %v12475_v42 = vadd.f32 %v2270_v0, %v12470_v16 }
 0x323   :  { %16174 = vst [vmem:[#allocation26_spill] sm:$0xff] %v12472_v52 }
 0x324   :  { %v2074_v3 = vpop.f32.mrb[34].mxu0  ;;  %9376 = vtanh.f32 %v12475_v42 }
 0x325   :  { %v12486_v23 = vadd.f32 %v2074_v3, %v1625_v53  ;;  %v2076_v40 = vpop.f32.mrb[35].mxu0  ;;  %9378 = vtanh.f32 %v12483_v39  ;;  %v1655_v3 = vadd.f32 %v12412_v34, %v12395_v19  ;;  %v1670_v19 = vadd.f32 %v12412_v34, %v12401_v29 }
 0x326   :  { %v1685_v29 = vadd.f32 %v12412_v34, %v12407_v33  ;;  %v1700_v33 = vadd.f32 %v12412_v34, %v12425_v24  ;;  %v1715_v24 = vadd.f32 %v12412_v34, %v12442_v25  ;;  %v1730_v25 = vadd.f32 %v12412_v34, %v12460_v57 }
 0x327   :  { %16176 = vst [vmem:[#allocation28_spill] sm:$0xff] %v12486_v23 }
 0x328   :  { %v2079_v56 = vpop.f32.mrb[36].mxu0 }
 0x329   :  { %v12491_v5 = vadd.f32 %v2079_v56, %v1630_v45  ;;  %v2081_v50 = vpop.f32.mrb[37].mxu0  ;;  %v1660_v56 = vadd.f32 %v12412_v34, %v12397_v21  ;;  %v1675_v21 = vadd.f32 %v12412_v34, %v12403_v37  ;;  %v1690_v37 = vadd.f32 %v12412_v34, %v12415_v38 }
 0x32a   :  { %v1705_v38 = vadd.f32 %v12412_v34, %v12430_v4  ;;  %v1720_v4 = vadd.f32 %v12412_v34, %v12448_v36  ;;  %v8087_v36 = vmul.f32 -1.442695, %v12475_v42 }
 0x32b   :  { %16177 = vst [vmem:[#allocation29_spill] sm:$0xff] %v12491_v5 }
 0x32c   :  { %v2084_v26 = vpop.f32.mrb[38].mxu0  ;;  %9380 = vpow2.f32 %v8087_v36  ;;  %v2190_v36 = vld [vmem:[%s15964_s11 + $0x18] sm:$0xff] }
 0x32d   :  { %v12495_v44 = vadd.f32 %v2084_v26, %v1635_v6  ;;  %v2086_v58 = vpop.f32.mrb[39].mxu0 }
 0x32e   :  { %v9377_v63 = vpop.eup %9376 }
 0x32f   :  { %16178 = vst [vmem:[#allocation30_spill] sm:$0xff] %v12495_v44  ;;  %2302 = vrot.lane.b32.xlu1 %v9377_v63, %s10332_s8  ;;  %v9379_v12 = vpop.eup %9378 }
 0x330   :  { %v2089_v7 = vpop.f32.mrb[40].mxu0 }
 0x331   :  { %v12500_v9 = vadd.f32 %v2089_v7, %v1640_v2  ;;  %v2091_v61 = vpop.f32.mrb[41].mxu0 }
 0x333   :  { %16179 = vst [vmem:[#allocation31_spill] sm:$0xff] %v12500_v9  ;;  %2300 = vrot.lane.b32.xlu1 %v9379_v12, %s10332_s8 }
 0x334   :  { %v2094_v11 = vpop.f32.mrb[42].mxu0 }
 0x335   :  { %v12505_v18 = vadd.f32 %v2094_v11, %v1645_v14  ;;  %v2096_v0 = vpop.f32.mrb[43].mxu0 }
 0x337   :  { %16180 = vst [vmem:[#allocation32_spill] sm:$0xff] %v12505_v18  ;;  %2290 = vrot.lane.b32.xlu1 %v11392_v28, %s10329_s27  ;;  %v1665_v28 = vadd.f32 %v12412_v34, %v12399_v22  ;;  %v1680_v22 = vadd.f32 %v12412_v34, %v12405_v31  ;;  %v1695_v31 = vadd.f32 %v12412_v34, %v12420_v47 }
 0x338   :  { %v2099_v62 = vpop.f32.mrb[44].mxu0  ;;  %v1710_v47 = vadd.f32 %v12412_v34, %v12436_v46  ;;  %v1725_v46 = vadd.f32 %v12412_v34, %v12454_v48 }
 0x339   :  { %v12511_v30 = vadd.f32 %v2099_v62, %v1650_v13  ;;  %v2101_v53 = vpop.f32.mrb[45].mxu0 }
 0x33b   :  { %16181 = vst [vmem:[#allocation33_spill] sm:$0xff] %v12511_v30 }
 0x33c   :  { %v2104_v15 = vpop.f32.mrb[46].mxu0 }
 0x33d   :  { %v12515_v40 = vadd.f32 %v2104_v15, %v1655_v3  ;;  %v2106_v45 = vpop.f32.mrb[47].mxu0 }
 0x33f   :  { %16182 = vst [vmem:[#allocation34_spill] sm:$0xff] %v12515_v40 }
 0x340   :  { %v2109_v50 = vpop.f32.mrb[48].mxu0 }
 0x341   :  { %v12519_v6 = vadd.f32 %v2109_v50, %v1660_v56  ;;  %v2111_v17 = vpop.f32.mrb[49].mxu0 }
 0x343   :  { %16183 = vst [vmem:[#allocation35_spill] sm:$0xff] %v12519_v6 }
 0x344   :  { %v2114_v26 = vpop.f32.mrb[50].mxu0 }
 0x345   :  { %v12523_v58 = vadd.f32 %v2114_v26, %v1665_v28  ;;  %v2116_v63 = vpop.f32.mrb[51].mxu0 }
 0x347   :  { %16184 = vst [vmem:[#allocation36_spill] sm:$0xff] %v12523_v58 }
 0x348   :  { %v2119_v2 = vpop.f32.mrb[52].mxu0 }
 0x349   :  { %v12527_v7 = vadd.f32 %v2119_v2, %v1670_v19  ;;  %v2121_v61 = vpop.f32.mrb[53].mxu0 }
 0x34b   :  { %16185 = vst [vmem:[#allocation37_spill] sm:$0xff] %v12527_v7 }
 0x34c   :  { %v2124_v12 = vpop.f32.mrb[54].mxu0 }
 0x34d   :  { %v12531_v14 = vadd.f32 %v2124_v12, %v1675_v21  ;;  %v2126_v11 = vpop.f32.mrb[55].mxu0 }
 0x34f   :  { %16186 = vst [vmem:[#allocation38_spill] sm:$0xff] %v12531_v14 }
 0x350   :  { %v2129_v0 = vpop.f32.mrb[56].mxu0 }
 0x351   :  { %v12535_v13 = vadd.f32 %v2129_v0, %v1680_v22  ;;  %v2131_v62 = vpop.f32.mrb[57].mxu0 }
 0x353   :  { %16187 = vst [vmem:[#allocation39_spill] sm:$0xff] %v12535_v13 }
 0x354   :  { %v2134_v53 = vpop.f32.mrb[58].mxu0 }
 0x355   :  { %v12539_v3 = vadd.f32 %v2134_v53, %v1685_v29  ;;  %v2136_v15 = vpop.f32.mrb[59].mxu0 }
 0x357   :  { %16188 = vst [vmem:[#allocation40_spill] sm:$0xff] %v12539_v3 }
 0x358   :  { %v2139_v45 = vpop.f32.mrb[60].mxu0 }
 0x359   :  { %v12543_v56 = vadd.f32 %v2139_v45, %v1690_v37  ;;  %v2141_v50 = vpop.f32.mrb[61].mxu0 }
 0x35b   :  { %16189 = vst [vmem:[#allocation41_spill] sm:$0xff] %v12543_v56 }
 0x35c   :  { %v2144_v17 = vpop.f32.mrb[62].mxu0 }
 0x35d   :  { %v12547_v28 = vadd.f32 %v2144_v17, %v1695_v31  ;;  %v2146_v26 = vpop.f32.mrb[63].mxu0 }
 0x35f   :  { %16190 = vst [vmem:[#allocation42_spill] sm:$0xff] %v12547_v28 }
 0x360   :  { %v2149_v63 = vpop.f32.mrb[64].mxu0 }
 0x361   :  { %v12551_v19 = vadd.f32 %v2149_v63, %v1700_v33  ;;  %v2151_v2 = vpop.f32.mrb[65].mxu0 }
 0x362   :  { %v8086_v2 = vmul.f32 -1.442695, %v12483_v39 }
 0x363   :  { %16191 = vst [vmem:[#allocation43_spill] sm:$0xff] %v12551_v19 }
 0x364   :  { %v2154_v61 = vpop.f32.mrb[66].mxu0  ;;  %9382 = vpow2.f32 %v8086_v2 }
 0x365   :  { %v12555_v21 = vadd.f32 %v2154_v61, %v1705_v38  ;;  %v2156_v12 = vpop.f32.mrb[67].mxu0  ;;  %v9381_v38 = vpop.eup %9380 }
 0x366   :  { %v2282_v61 = vadd.f32 1.0, %v9381_v38 }
 0x367   :  { %16192 = vst [vmem:[#allocation44_spill] sm:$0xff] %v12555_v21 }
 0x368   :  { %v2159_v11 = vpop.f32.mrb[68].mxu0  ;;  %9384 = vrcp.f32 %v2282_v61  ;;  %v2337_v61 = vrot.slane %v11397_v55, 1 }
 0x369   :  { %v12559_v22 = vadd.f32 %v2159_v11, %v1710_v47  ;;  %v2161_v0 = vpop.f32.mrb[69].mxu0 }
 0x36b   :  { %16193 = vst [vmem:[#allocation45_spill] sm:$0xff] %v12559_v22 }
 0x36c   :  { %v2164_v62 = vpop.f32.mrb[70].mxu0 }
 0x36d   :  { %v12563_v29 = vadd.f32 %v2164_v62, %v1715_v24  ;;  %v2166_v53 = vpop.f32.mrb[71].mxu0 }
 0x36e   :  { %v9383_v48 = vpop.eup %9382  ;;  %v2293_v53 = vpop.permute.xlu0 %2292 }
 0x36f   :  { %16194 = vst [vmem:[#allocation46_spill] sm:$0xff] %v12563_v29  ;;  %v2281_v12 = vadd.f32 1.0, %v9383_v48 }
 0x370   :  { %v2169_v15 = vpop.f32.mrb[72].mxu0 }
 0x371   :  { %v12567_v37 = vadd.f32 %v2169_v15, %v1720_v4  ;;  %v2171_v45 = vpop.f32.mrb[73].mxu0  ;;  %9386 = vrcp.f32 %v2281_v12 }
 0x372   :  { %v9385_v47 = vpop.eup %9384 }
 0x373   :  { %16195 = vst [vmem:[#allocation47_spill] sm:$0xff] %v12567_v37  ;;  %v2297_v15 = vmul.f32 %v9385_v47, %v2293_v53  ;;  %v2339_v53 = vpop.permute.xlu0 %2338 }
 0x374   :  { %v2174_v50 = vpop.f32.mrb[74].mxu0 }
 0x375   :  { %v12571_v31 = vadd.f32 %v2174_v50, %v1725_v46  ;;  %v2176_v17 = vpop.f32.mrb[75].mxu0 }
 0x376   :  { %v2187_v17 = vld [vmem:[%s15964_s11] sm:$0xff] }
 0x377   :  { %16196 = vst [vmem:[#allocation48_spill] sm:$0xff] %v12571_v31 }
 0x378   :  { %v2179_v26 = vpop.f32.mrb[76].mxu0 }
 0x379   :  { %v12575_v33 = vadd.f32 %v2179_v26, %v1730_v25  ;;  %v2181_v63 = vpop.f32.mrb[77].mxu0  ;;  %v2188_v25 = vld [vmem:[%s15964_s11 + $0x8] sm:$0xff]  ;;  %v2189_v26 = vld [vmem:[%s15964_s11 + $0x10] sm:$0xff]  ;;  %s8092_s11 = sld [smem:[#allocation3 + $0x1]] }
 0x37a   :  { %v12597_v63 = vpack.c.bf16 %v2188_v25, %v2187_v17  ;;  %v12603_v38 = vpack.c.bf16 %v2190_v36, %v2189_v26 }
 0x37b   :  { %16197 = vst [vmem:[#allocation49_spill] sm:$0xff] %v12575_v33  ;;  %v9387_v34 = vpop.eup %9386 }
 0x37c   :  { %9138 = vmatpush3.bf16.msra.mxu1 %v12597_v63 }
 0x37d   :  { %9139 = vmatprep.subr.bf16.mxu1 %v15972_v1 }
 0x380   :  { %9141 = vmatpush3.bf16.msra.mxu1 %v12603_v38 }
 0x381   :  { %9142 = vmatprep.subr.bf16.mxu1 %v15972_v1 }
 0x3a1   :  { %v2303_v11 = vpop.permute.xlu1 %2302 }
 0x3a2   :  { %v2307_v0 = vmul.f32 %v9385_v47, %v2303_v11 }
 0x3a4   :  { %2312 = vrot.lane.b32.xlu1 %v2307_v0, %s10329_s27 }
 0x3a5   :  { %v2301_v57 = vpop.permute.xlu1 %2300 }
 0x3a6   :  { %v2306_v24 = vmul.f32 %v9387_v34, %v2301_v57  ;;  %v12612_v57 = vstv %s11385_s25  ;;  %s3103_s25 = ssub.f32 1.0, %s8092_s11 }
 0x3a7   :  { %16198 = vst [vmem:[#allocation50_spill] sm:$0xff] %v12612_v57 }
 0x3a8   :  { %2310 = vrot.lane.b32.xlu1 %v2306_v24, %s10329_s27 }
 0x3a9   :  { %v2291_v42 = vpop.permute.xlu1 %2290 }
 0x3aa   :  { %v2296_v62 = vmul.f32 %v9387_v34, %v2291_v42 }
 0x416   :  { %v2313_v39 = vpop.permute.xlu1 %2312 }
 0x417   :  { %v12583_v46 = vadd.f32 %v2313_v39, %v2297_v15 }
 0x41a   :  { %v2311_v4 = vpop.permute.xlu1 %2310 }
 0x41b   :  { %v12581_v45 = vadd.f32 %v2311_v4, %v2296_v62 }
 0x41d   :  { %9388 = vtanh.f32 %v12581_v45 }
 0x41e   :  { %9390 = vtanh.f32 %v12583_v46 }
 0x427   :  { %v9389_v50 = vpop.eup %9388 }
 0x428   :  { %2322 = vrot.lane.b32.xlu1 %v9389_v50, %s10332_s8  ;;  %v9391_v2 = vpop.eup %9390 }
 0x42c   :  { %2324 = vrot.lane.b32.xlu1 %v9391_v2, %s10332_s8 }
 0x430   :  { %2340 = vrot.lane.b32.xlu1 %v2337_v61, %s10330_s28 }
 0x49a   :  { %v2323_v48 = vpop.permute.xlu1 %2322 }
 0x49b   :  { %v2328_v12 = vmul.f32 %v9387_v34, %v2323_v48 }
 0x49d   :  { %v2331_v24 = vmul.f32 %v12612_v57, %v2328_v12 }
 0x49e   :  { %v2325_v11 = vpop.permute.xlu1 %2324 }
 0x49f   :  { %v2329_v0 = vmul.f32 %v9385_v47, %v2325_v11  ;;  %v12618_v4 = vadd.f32 %v2339_v53, %v2331_v24 }
 0x4a1   :  { %v2332_v42 = vmul.f32 %v12612_v57, %v2329_v0 }
 0x4a2   :  { %v2341_v39 = vpop.permute.xlu1 %2340 }
 0x4a3   :  { %v12616_v62 = vadd.f32 %v2341_v39, %v2332_v42 }
 0x4a5   :  { %v2364_v15 = vrot.slane %v12616_v62, 7 }
 0x4a7   :  { %v2365_v50 = vsel %vm16078_vm0, %v2364_v15, %v12618_v4 }
 0x4a8   :  { %2366 = vrot.lane.b32.xlu1 %v2365_v50, %s10329_s27 }
 0x51a   :  { %v2367_v47 = vpop.permute.xlu1 %2366 }
 0x51b   :  { %8446 = vmatmul.mubr.msk.f32.vlgmr.msra.gmra.mrb[82].mxu1 %vm16077_vm2, %v2367_v47 }
 0x51c   :  { %9144 = vmatpush3.bf16.msra.mxu1 %v11774_v59  ;;  %8456 = vmatprep.mubr.msk.f32.mxu1 %vm10331_vm1, %v15974_v20 }
 0x51d   :  { %9145 = vmatprep.subr.bf16.mxu1 %v15972_v1 }
 0x520   :  { %9147 = vmatpush3.bf16.msra.mxu1 %v11806_v8 }
 0x521   :  { %9148 = vmatprep.subr.bf16.mxu1 %v15972_v1 }
 0x523   :  { %8457 = vmatmul.mubr.msk.f32.vlgmr.msra.gmra.mrb[84].mxu1 %vm16077_vm2, %v2367_v47 }
 0x524   :  { %9150 = vmatpush3.bf16.msra.mxu1 %v12597_v63  ;;  %8467 = vmatprep.mubr.msk.f32.mxu1 %vm10331_vm1, %v15974_v20 }
 0x525   :  { %9151 = vmatprep.subr.bf16.mxu1 %v15972_v1 }
 0x528   :  { %9153 = vmatpush3.bf16.msra.mxu1 %v12603_v38 }
 0x529   :  { %9154 = vmatprep.subr.bf16.mxu1 %v15972_v1 }
 0x5ee   :  { %v12638_v34 = vpop.f32.mrb[82].mxu1 }
 0x5ef   :  { %v8447_v17 = vpop.f32.mrb[83].mxu1 }
 0x5f6   :  { %v3036_v25 = vpop.f32.mrb[84].mxu1 }
 0x5f7   :  { %v3041_v26 = vrot.slane %v3036_v25, 7  ;;  %v3045_v36 = vadd.f32 %v3036_v25, %v12470_v16  ;;  %v8458_v2 = vpop.f32.mrb[85].mxu1 }
 0x5f9   :  { %v3044_v48 = vadd.f32 %v3041_v26, %v12478_v35  ;;  %9392 = vtanh.f32 %v3045_v36  ;;  %v8095_v0 = vmul.f32 -1.442695, %v3045_v36  ;;  %v2347_v36 = vmul.f32 %v12612_v57, %v12583_v46 }
 0x5fb   :  { %9394 = vtanh.f32 %v3044_v48  ;;  %v8094_v24 = vmul.f32 -1.442695, %v3044_v48 }
 0x5fc   :  { %9396 = vpow2.f32 %v8095_v0 }
 0x5fd   :  { %9398 = vpow2.f32 %v8094_v24  ;;  %v3104_v24 = vstv %s3103_s25 }
 0x603   :  { %v9393_v12 = vpop.eup %9392 }
 0x604   :  { %3072 = vrot.lane.b32.xlu1 %v9393_v12, %s10332_s8  ;;  %v2346_v12 = vmul.f32 %v12612_v57, %v12581_v45 }
 0x605   :  { %v9395_v11 = vpop.eup %9394 }
 0x606   :  { %3070 = vrot.lane.b32.xlu0 %v9395_v11, %s10332_s8  ;;  %v9397_v42 = vpop.eup %9396 }
 0x607   :  { %v9399_v39 = vpop.eup %9398  ;;  %v3053_v53 = vadd.f32 1.0, %v9397_v42 }
 0x608   :  { %2350 = vrot.lane.b32.xlu1 %v2337_v61, %s10329_s27  ;;  %v3052_v15 = vadd.f32 1.0, %v9399_v39 }
 0x609   :  { %9400 = vrcp.f32 %v3053_v53 }
 0x60a   :  { %2348 = vrot.lane.b32.xlu0 %v11397_v55, %s10329_s27  ;;  %9402 = vrcp.f32 %v3052_v15  ;;  %v12653_v15 = vstv %s8092_s11 }
 0x60b   :  { %16199 = vst [vmem:[#allocation51_spill] sm:$0xff] %v12653_v15 }
 0x613   :  { %v9401_v50 = vpop.eup %9400 }
 0x614   :  { %v9403_v25 = vpop.eup %9402 }
 0x676   :  { %v3073_v47 = vpop.permute.xlu1 %3072 }
 0x677   :  { %v3077_v17 = vmul.f32 %v9401_v50, %v3073_v47 }
 0x678   :  { %v3071_v26 = vpop.permute.xlu0 %3070 }
 0x679   :  { %3082 = vrot.lane.b32.xlu1 %v3077_v17, %s10329_s27  ;;  %v3076_v61 = vmul.f32 %v9403_v25, %v3071_v26 }
 0x67a   :  { %v2351_v55 = vpop.permute.xlu1 %2350 }
 0x67b   :  { %3080 = vrot.lane.b32.xlu0 %v3076_v61, %s10329_s27  ;;  %v2355_v2 = vadd.f32 %v2351_v55, %v2347_v36 }
 0x67c   :  { %v2349_v48 = vpop.permute.xlu0 %2348 }
 0x67d   :  { %v2354_v11 = vadd.f32 %v2349_v48, %v2346_v12  ;;  %v3063_v0 = vrot.slane %v2355_v2, 7  ;;  %v3118_v39 = vmul.f32 %v3104_v24, %v2355_v2 }
 0x67f   :  { %v3062_v42 = vrot.slane %v2354_v11, 7  ;;  %v3067_v53 = vmul.f32 %v9401_v50, %v3063_v0  ;;  %v3117_v26 = vmul.f32 %v3104_v24, %v2354_v11  ;;  %v3122_v1 = vrot.slane %v3118_v39, 7 }
 0x681   :  { %v3066_v61 = vmul.f32 %v9403_v25, %v3062_v42  ;;  %v3121_v48 = vrot.slane %v3117_v26, 7  ;;  %v3105_v42 = vmul.f32 %v3104_v24, %v12618_v4 }
 0x6eb   :  { %v3083_v47 = vpop.permute.xlu1 %3082 }
 0x6ec   :  { %v3087_v17 = vadd.f32 %v3083_v47, %v3067_v53 }
 0x6ed   :  { %v3081_v55 = vpop.permute.xlu0 %3080 }
 0x6ee   :  { %9404 = vtanh.f32 %v3087_v17  ;;  %v3116_v46 = vmul.f32 %v12653_v15, %v3087_v17  ;;  %v3086_v36 = vadd.f32 %v3081_v55, %v3066_v61  ;;  %v3109_v61 = vrot.slane %v3105_v42, 7 }
 0x6f0   :  { %v12656_v45 = vadd.f32 %v3122_v1, %v3116_v46  ;;  %9406 = vtanh.f32 %v3086_v36  ;;  %v3115_v12 = vmul.f32 %v12653_v15, %v3086_v36  ;;  %v3106_v1 = vmul.f32 %v3104_v24, %v12616_v62 }
 0x6f1   :  { %v16200_v62 = vmov 0.0|0.0  }
 0x6f2   :  { %v12659_v2 = vadd.f32 %v3121_v48, %v3115_v12  ;;  %v3110_v55 = vrot.slane %v3106_v1, 7 }
 0x6f8   :  { %v9405_v0 = vpop.eup %9404 }
 0x6f9   :  { %3094 = vrot.lane.b32.xlu1 %v9405_v0, %s10332_s8 }
 0x6fa   :  { %v9407_v53 = vpop.eup %9406 }
 0x6fb   :  { %3092 = vrot.lane.b32.xlu0 %v9407_v53, %s10332_s8 }
 0x76b   :  { %v3095_v11 = vpop.permute.xlu1 %3094 }
 0x76c   :  { %v3099_v39 = vmul.f32 %v9401_v50, %v3095_v11 }
 0x76d   :  { %v3093_v47 = vpop.permute.xlu0 %3092 }
 0x76e   :  { %v3098_v17 = vmul.f32 %v9403_v25, %v3093_v47  ;;  %v3102_v26 = vmul.f32 %v12653_v15, %v3099_v39 }
 0x770   :  { %v3101_v46 = vmul.f32 %v12653_v15, %v3098_v17  ;;  %v12669_v48 = vadd.f32 %v3110_v55, %v3102_v26 }
 0x772   :  { %v12667_v36 = vadd.f32 %v3109_v61, %v3101_v46 }
 0x774   :  { %v3129_v12 = vrot.slane %v12667_v36, 1 }
 0x776   :  { %v3130_v4 = vsel %vm16078_vm0, %v12669_v48, %v3129_v12 }
 0x777   :  { %3131 = vrot.lane.b32.xlu0 %v3130_v4, %s10329_s27 }
 0x7e9   :  { %v3132_v50 = vpop.permute.xlu0 %3131 }
 0x7ea   :  { %8468 = vmatmul.mubr.msk.f32.vlgmr.msra.gmra.mrb[86].mxu1 %vm16077_vm2, %v3132_v50 }
 0x7eb   :  { %9156 = vmatpush3.bf16.msra.mxu1 %v11774_v59  ;;  %8478 = vmatprep.mubr.msk.f32.mxu1 %vm10331_vm1, %v15974_v20 }
 0x7ec   :  { %9157 = vmatprep.subr.bf16.mxu1 %v16200_v62 }
 0x7ef   :  { %9159 = vmatpush3.bf16.msra.mxu1 %v11806_v8 }
 0x7f0   :  { %9160 = vmatprep.subr.bf16.mxu1 %v16200_v62 }
 0x7f2   :  { %8479 = vmatmul.mubr.msk.f32.vlgmr.msra.gmra.mrb[88].mxu1 %vm16077_vm2, %v3132_v50 }
 0x7f3   :  { %9162 = vmatpush3.bf16.msra.mxu1 %v12597_v63  ;;  %8489 = vmatprep.mubr.msk.f32.mxu1 %vm10331_vm1, %v15974_v20 }
 0x7f4   :  { %9163 = vmatprep.subr.bf16.mxu1 %v16200_v62 }
 0x7f7   :  { %9165 = vmatpush3.bf16.msra.mxu1 %v12603_v38 }
 0x7f8   :  { %9166 = vmatprep.subr.bf16.mxu1 %v16200_v62 }
 0x8bd   :  { %v12689_v25 = vpop.f32.mrb[86].mxu1 }
 0x8be   :  { %v8469_v24 = vpop.f32.mrb[87].mxu1 }
 0x8c5   :  { %v3755_v0 = vpop.f32.mrb[88].mxu1 }
 0x8c6   :  { %v3760_v53 = vrot.slane %v3755_v0, 6  ;;  %v3761_v11 = vrot.slane %v3755_v0, 7  ;;  %v8480_v42 = vpop.f32.mrb[89].mxu1 }
 0x8c8   :  { %v3764_v39 = vadd.f32 %v3760_v53, %v12478_v35  ;;  %v3765_v47 = vadd.f32 %v3761_v11, %v12470_v16 }
 0x8ca   :  { %9408 = vtanh.f32 %v3764_v39  ;;  %v8099_v26 = vmul.f32 -1.442695, %v3764_v39  ;;  %v8100_v61 = vmul.f32 -1.442695, %v3765_v47  ;;  %v3824_v39 = vstv %s3823_s21 }
 0x8cb   :  { %9410 = vtanh.f32 %v3765_v47  ;;  %v3782_v47 = vrot.slane %v12659_v2, 7 }
 0x8cc   :  { %9412 = vpow2.f32 %v8099_v26 }
 0x8cd   :  { %9414 = vpow2.f32 %v8100_v61  ;;  %v12700_v61 = vstv %s8097_s26 }
 0x8ce   :  { %16201 = vst [vmem:[#allocation52_spill] sm:$0xff] %v12700_v61 }
 0x8d4   :  { %v9409_v1 = vpop.eup %9408 }
 0x8d5   :  { %v9411_v17 = vpop.eup %9410  ;;  %3790 = vrot.lane.b32.xlu1 %v9409_v1, %s10332_s8  ;;  %v3783_v1 = vrot.slane %v12656_v45, 7 }
 0x8d6   :  { %3792 = vrot.lane.b32.xlu0 %v9411_v17, %s10332_s8  ;;  %v9413_v46 = vpop.eup %9412  ;;  %v3837_v17 = vmul.f32 %v3824_v39, %v12659_v2 }
 0x8d7   :  { %v9415_v55 = vpop.eup %9414  ;;  %v3772_v12 = vadd.f32 1.0, %v9413_v46  ;;  %v3838_v46 = vmul.f32 %v3824_v39, %v12656_v45  ;;  %v3825_v45 = vmul.f32 %v3824_v39, %v12667_v36 }
 0x8d8   :  { %v3773_v4 = vadd.f32 1.0, %v9415_v55 }
 0x8d9   :  { %9416 = vrcp.f32 %v3772_v12  ;;  %v3842_v20 = vrot.slane %v3838_v46, 7 }
 0x8da   :  { %9418 = vrcp.f32 %v3773_v4 }
 0x8e3   :  { %v9417_v50 = vpop.eup %9416 }
 0x8e4   :  { %v9419_v0 = vpop.eup %9418  ;;  %v3786_v26 = vmul.f32 %v9417_v50, %v3782_v47 }
 0x8e5   :  { %v3787_v55 = vmul.f32 %v9419_v0, %v3783_v1  ;;  %v3826_v1 = vmul.f32 %v3824_v39, %v12669_v48 }
 0x947   :  { %v3791_v24 = vpop.permute.xlu1 %3790 }
 0x948   :  { %v3793_v53 = vpop.permute.xlu0 %3792  ;;  %v3796_v11 = vmul.f32 %v9417_v50, %v3791_v24 }
 0x949   :  { %v3797_v42 = vmul.f32 %v9419_v0, %v3793_v53 }
 0x94a   :  { %3800 = vrot.lane.b32.xlu1 %v3796_v11, %s10329_s27  ;;  %v3841_v11 = vrot.slane %v3837_v17, 7 }
 0x94b   :  { %3802 = vrot.lane.b32.xlu0 %v3797_v42, %s10329_s27 }
 0x9bc   :  { %v3801_v12 = vpop.permute.xlu1 %3800 }
 0x9bd   :  { %v3803_v4 = vpop.permute.xlu0 %3802  ;;  %v3806_v24 = vadd.f32 %v3801_v12, %v3786_v26  ;;  %v3829_v12 = vrot.slane %v3825_v45, 7 }
 0x9be   :  { %v3807_v53 = vadd.f32 %v3803_v4, %v3787_v55 }
 0x9bf   :  { %9420 = vtanh.f32 %v3806_v24  ;;  %v3835_v42 = vmul.f32 %v12700_v61, %v3806_v24  ;;  %v3830_v24 = vrot.slane %v3826_v1, 7 }
 0x9c0   :  { %9422 = vtanh.f32 %v3807_v53  ;;  %v3836_v57 = vmul.f32 %v12700_v61, %v3807_v53 }
 0x9c1   :  { %v12705_v15 = vadd.f32 %v3841_v11, %v3835_v42 }
 0x9c2   :  { %v12707_v2 = vadd.f32 %v3842_v20, %v3836_v57 }
 0x9c9   :  { %v9421_v47 = vpop.eup %9420 }
 0x9ca   :  { %v9423_v18 = vpop.eup %9422  ;;  %3812 = vrot.lane.b32.xlu1 %v9421_v47, %s10332_s8 }
 0x9cb   :  { %3814 = vrot.lane.b32.xlu0 %v9423_v18, %s10332_s8 }
 0xa3c   :  { %v3813_v17 = vpop.permute.xlu1 %3812 }
 0xa3d   :  { %v3815_v26 = vpop.permute.xlu0 %3814  ;;  %v3818_v46 = vmul.f32 %v9417_v50, %v3813_v17 }
 0xa3e   :  { %v3819_v55 = vmul.f32 %v9419_v0, %v3815_v26  ;;  %v16202_v0 = vmov 0.0  }
 0xa3f   :  { %v3821_v4 = vmul.f32 %v12700_v61, %v3818_v46 }
 0xa40   :  { %v3822_v20 = vmul.f32 %v12700_v61, %v3819_v55 }
 0xa41   :  { %v12715_v57 = vadd.f32 %v3829_v12, %v3821_v4 }
 0xa42   :  { %v12717_v53 = vadd.f32 %v3830_v24, %v3822_v20 }
 0xa43   :  { %v3849_v18 = vrot.slane %v12715_v57, 2 }
 0xa44   :  { %v3850_v36 = vrot.slane %v12717_v53, 1 }
 0xa46   :  { %v3851_v48 = vsel %vm16078_vm0, %v3850_v36, %v3849_v18 }
 0xa47   :  { %3852 = vrot.lane.b32.xlu1 %v3851_v48, %s10329_s27 }
 0xab9   :  { %v3853_v50 = vpop.permute.xlu1 %3852 }
 0xaba   :  { %8490 = vmatmul.mubr.msk.f32.vlgmr.msra.gmra.mrb[90].mxu1 %vm16077_vm2, %v3853_v50 }
 0xabb   :  { %9168 = vmatpush3.bf16.msra.mxu1 %v11774_v59  ;;  %8500 = vmatprep.mubr.msk.f32.mxu1 %vm10331_vm1, %v16202_v0 }
 0xabc   :  { %9169 = vmatprep.subr.bf16.mxu1 %v16200_v62 }
 0xabf   :  { %9171 = vmatpush3.bf16.msra.mxu1 %v11806_v8 }
 0xac0   :  { %9172 = vmatprep.subr.bf16.mxu1 %v16200_v62 }
 0xac2   :  { %8501 = vmatmul.mubr.msk.f32.vlgmr.msra.gmra.mrb[92].mxu1 %vm16077_vm2, %v3853_v50 }
 0xac3   :  { %9174 = vmatpush3.bf16.msra.mxu1 %v12597_v63  ;;  %8511 = vmatprep.mubr.msk.f32.mxu1 %vm10331_vm1, %v16202_v0 }
 0xac4   :  { %9175 = vmatprep.subr.bf16.mxu1 %v16200_v62 }
 0xac7   :  { %9177 = vmatpush3.bf16.msra.mxu1 %v12603_v38 }
 0xac8   :  { %9178 = vmatprep.subr.bf16.mxu1 %v16200_v62 }
 0xb8d   :  { %v12737_v39 = vpop.f32.mrb[90].mxu1 }
 0xb8e   :  { %v8491_v11 = vpop.f32.mrb[91].mxu1 }
 0xb95   :  { %v4476_v42 = vpop.f32.mrb[92].mxu1 }
 0xb96   :  { %v4481_v47 = vrot.slane %v4476_v42, 5  ;;  %v4482_v45 = vrot.slane %v4476_v42, 6  ;;  %v8502_v1 = vpop.f32.mrb[93].mxu1 }
 0xb97   :  { %v4545_v1 = vstv %s4544_s6 }
 0xb98   :  { %v4485_v17 = vadd.f32 %v4481_v47, %v12478_v35  ;;  %v4486_v26 = vadd.f32 %v4482_v45, %v12470_v16 }
 0xb9a   :  { %9424 = vtanh.f32 %v4485_v17  ;;  %v8104_v12 = vmul.f32 -1.442695, %v4485_v17  ;;  %v8105_v4 = vmul.f32 -1.442695, %v4486_v26  ;;  %v4503_v17 = vrot.slane %v12705_v15, 7 }
 0xb9b   :  { %9426 = vtanh.f32 %v4486_v26  ;;  %v4504_v26 = vrot.slane %v12707_v2, 7 }
 0xb9c   :  { %9428 = vpow2.f32 %v8104_v12  ;;  %v12748_v12 = vstv %s8102_s5 }
 0xb9d   :  { %9430 = vpow2.f32 %v8105_v4  ;;  %16203 = vst [vmem:[#allocation53_spill] sm:$0xff] %v12748_v12  ;;  %v4559_v4 = vmul.f32 %v4545_v1, %v12707_v2  ;;  %v4546_v2 = vmul.f32 %v4545_v1, %v12715_v57 }
 0xba4   :  { %v9425_v46 = vpop.eup %9424 }
 0xba5   :  { %v9427_v55 = vpop.eup %9426  ;;  %4511 = vrot.lane.b32.xlu0 %v9425_v46, %s10332_s8  ;;  %v4558_v46 = vmul.f32 %v4545_v1, %v12705_v15 }
 0xba6   :  { %4513 = vrot.lane.b32.xlu1 %v9427_v55, %s10332_s8  ;;  %v9429_v24 = vpop.eup %9428 }
 0xba7   :  { %v9431_v20 = vpop.eup %9430  ;;  %v4493_v18 = vadd.f32 1.0, %v9429_v24 }
 0xba8   :  { %v4494_v36 = vadd.f32 1.0, %v9431_v20 }
 0xba9   :  { %9432 = vrcp.f32 %v4493_v18 }
 0xbaa   :  { %9434 = vrcp.f32 %v4494_v36 }
 0xbb3   :  { %v9433_v48 = vpop.eup %9432 }
 0xbb4   :  { %v9435_v11 = vpop.eup %9434  ;;  %v4507_v55 = vmul.f32 %v9433_v48, %v4503_v17 }
 0xbb5   :  { %v4508_v24 = vmul.f32 %v9435_v11, %v4504_v26  ;;  %v4547_v26 = vmul.f32 %v4545_v1, %v12717_v53 }
 0xc17   :  { %v4512_v50 = vpop.permute.xlu0 %4511 }
 0xc18   :  { %v4514_v42 = vpop.permute.xlu1 %4513  ;;  %v4517_v47 = vmul.f32 %v9433_v48, %v4512_v50 }
 0xc19   :  { %v4518_v45 = vmul.f32 %v9435_v11, %v4514_v42  ;;  %v4562_v42 = vrot.slane %v4558_v46, 7 }
 0xc1a   :  { %4521 = vrot.lane.b32.xlu0 %v4517_v47, %s10329_s27 }
 0xc1b   :  { %4523 = vrot.lane.b32.xlu1 %v4518_v45, %s10329_s27  ;;  %v4563_v45 = vrot.slane %v4559_v4, 7 }
 0xc8c   :  { %v4522_v20 = vpop.permute.xlu0 %4521 }
 0xc8d   :  { %v4524_v18 = vpop.permute.xlu1 %4523  ;;  %v4527_v36 = vadd.f32 %v4522_v20, %v4507_v55  ;;  %v4550_v20 = vrot.slane %v4546_v2, 7 }
 0xc8e   :  { %v4528_v50 = vadd.f32 %v4524_v18, %v4508_v24 }
 0xc8f   :  { %9436 = vtanh.f32 %v4527_v36  ;;  %v4556_v47 = vmul.f32 %v12748_v12, %v4527_v36  ;;  %v4551_v36 = vrot.slane %v4547_v26, 7 }
 0xc90   :  { %9438 = vtanh.f32 %v4528_v50  ;;  %v4557_v61 = vmul.f32 %v12748_v12, %v4528_v50 }
 0xc91   :  { %v12753_v31 = vadd.f32 %v4562_v42, %v4556_v47 }
 0xc92   :  { %v12755_v15 = vadd.f32 %v4563_v45, %v4557_v61 }
 0xc99   :  { %v9437_v17 = vpop.eup %9436 }
 0xc9a   :  { %v9439_v29 = vpop.eup %9438  ;;  %4533 = vrot.lane.b32.xlu0 %v9437_v17, %s10332_s8 }
 0xc9b   :  { %4535 = vrot.lane.b32.xlu1 %v9439_v29, %s10332_s8 }
 0xd0c   :  { %v4534_v46 = vpop.permute.xlu0 %4533 }
 0xd0d   :  { %v4536_v55 = vpop.permute.xlu1 %4535  ;;  %v4539_v4 = vmul.f32 %v9433_v48, %v4534_v46 }
 0xd0e   :  { %v4540_v24 = vmul.f32 %v9435_v11, %v4536_v55 }
 0xd0f   :  { %v4542_v18 = vmul.f32 %v12748_v12, %v4539_v4 }
 0xd10   :  { %v4543_v61 = vmul.f32 %v12748_v12, %v4540_v24 }
 0xd11   :  { %v12763_v50 = vadd.f32 %v4550_v20, %v4542_v18 }
 0xd12   :  { %v12765_v42 = vadd.f32 %v4551_v36, %v4543_v61 }
 0xd13   :  { %v4570_v29 = vrot.slane %v12763_v50, 3 }
 0xd14   :  { %v4571_v57 = vrot.slane %v12765_v42, 2 }
 0xd16   :  { %v4572_v53 = vsel %vm16078_vm0, %v4571_v57, %v4570_v29 }
 0xd17   :  { %4573 = vrot.lane.b32.xlu0 %v4572_v53, %s10329_s27 }
 0xd89   :  { %v4574_v48 = vpop.permute.xlu0 %4573 }
 0xd8a   :  { %8512 = vmatmul.mubr.msk.f32.vlgmr.msra.gmra.mrb[94].mxu1 %vm16077_vm2, %v4574_v48 }
 0xd8b   :  { %9180 = vmatpush3.bf16.msra.mxu1 %v11774_v59  ;;  %8522 = vmatprep.mubr.msk.f32.mxu1 %vm10331_vm1, %v16202_v0 }
 0xd8c   :  { %9181 = vmatprep.subr.bf16.mxu1 %v16200_v62 }
 0xd8f   :  { %9183 = vmatpush3.bf16.msra.mxu1 %v11806_v8 }
 0xd90   :  { %9184 = vmatprep.subr.bf16.mxu1 %v16200_v62 }
 0xd92   :  { %8523 = vmatmul.mubr.msk.f32.vlgmr.msra.gmra.mrb[96].mxu1 %vm16077_vm2, %v4574_v48 }
 0xd93   :  { %9186 = vmatpush3.bf16.msra.mxu1 %v12597_v63  ;;  %8533 = vmatprep.mubr.msk.f32.mxu1 %vm10331_vm1, %v16202_v0 }
 0xd94   :  { %9187 = vmatprep.subr.bf16.mxu1 %v16200_v62 }
 0xd97   :  { %9189 = vmatpush3.bf16.msra.mxu1 %v12603_v38 }
 0xd98   :  { %9190 = vmatprep.subr.bf16.mxu1 %v16200_v62 }
 0xe5d   :  { %v12785_v11 = vpop.f32.mrb[94].mxu1 }
 0xe5e   :  { %16204 = vst [vmem:[#allocation54_spill] sm:$0xff] %v12785_v11  ;;  %v8513_v1 = vpop.f32.mrb[95].mxu1 }
 0xe65   :  { %v5197_v47 = vpop.f32.mrb[96].mxu1 }
 0xe66   :  { %v5202_v45 = vrot.slane %v5197_v47, 4  ;;  %v5203_v17 = vrot.slane %v5197_v47, 5  ;;  %v8524_v2 = vpop.f32.mrb[97].mxu1 }
 0xe67   :  { %v5224_v2 = vrot.slane %v12753_v31, 7 }
 0xe68   :  { %v5206_v26 = vadd.f32 %v5202_v45, %v12478_v35  ;;  %v5207_v46 = vadd.f32 %v5203_v17, %v12470_v16  ;;  %v5266_v17 = vstv %s5265_s3 }
 0xe6a   :  { %9440 = vtanh.f32 %v5206_v26  ;;  %v8109_v24 = vmul.f32 -1.442695, %v5206_v26  ;;  %v8110_v20 = vmul.f32 -1.442695, %v5207_v46  ;;  %v5225_v26 = vrot.slane %v12755_v15, 7 }
 0xe6b   :  { %9442 = vtanh.f32 %v5207_v46  ;;  %v5279_v46 = vmul.f32 %v5266_v17, %v12753_v31 }
 0xe6c   :  { %9444 = vpow2.f32 %v8109_v24  ;;  %v5280_v24 = vmul.f32 %v5266_v17, %v12755_v15  ;;  %v5267_v15 = vmul.f32 %v5266_v17, %v12763_v50 }
 0xe6d   :  { %9446 = vpow2.f32 %v8110_v20 }
 0xe74   :  { %v9441_v55 = vpop.eup %9440 }
 0xe75   :  { %v9443_v4 = vpop.eup %9442  ;;  %5232 = vrot.lane.b32.xlu1 %v9441_v55, %s10332_s8 }
 0xe76   :  { %5234 = vrot.lane.b32.xlu0 %v9443_v4, %s10332_s8  ;;  %v9445_v18 = vpop.eup %9444  ;;  %v12796_v4 = vstv %s8107_s18 }
 0xe77   :  { %v9447_v36 = vpop.eup %9446  ;;  %v5214_v61 = vadd.f32 1.0, %v9445_v18  ;;  %16205 = vst [vmem:[#allocation55_spill] sm:$0xff] %v12796_v4 }
 0xe78   :  { %v5215_v29 = vadd.f32 1.0, %v9447_v36 }
 0xe79   :  { %9448 = vrcp.f32 %v5214_v61 }
 0xe7a   :  { %9450 = vrcp.f32 %v5215_v29 }
 0xe83   :  { %v9449_v57 = vpop.eup %9448 }
 0xe84   :  { %v9451_v48 = vpop.eup %9450  ;;  %v5228_v55 = vmul.f32 %v9449_v57, %v5224_v2 }
 0xe85   :  { %v5229_v20 = vmul.f32 %v9451_v48, %v5225_v26  ;;  %v5268_v26 = vmul.f32 %v5266_v17, %v12765_v42 }
 0xee7   :  { %v5233_v53 = vpop.permute.xlu1 %5232 }
 0xee8   :  { %v5235_v1 = vpop.permute.xlu0 %5234  ;;  %v5238_v47 = vmul.f32 %v9449_v57, %v5233_v53  ;;  %v5283_v53 = vrot.slane %v5279_v46, 7 }
 0xee9   :  { %v5239_v45 = vmul.f32 %v9451_v48, %v5235_v1 }
 0xeea   :  { %5242 = vrot.lane.b32.xlu1 %v5238_v47, %s10329_s27  ;;  %v5284_v47 = vrot.slane %v5280_v24, 7 }
 0xeeb   :  { %5244 = vrot.lane.b32.xlu0 %v5239_v45, %s10329_s27 }
 0xf5c   :  { %v5243_v18 = vpop.permute.xlu1 %5242 }
 0xf5d   :  { %v5245_v36 = vpop.permute.xlu0 %5244  ;;  %v5248_v61 = vadd.f32 %v5243_v18, %v5228_v55  ;;  %v5271_v18 = vrot.slane %v5267_v15, 7 }
 0xf5e   :  { %v5249_v29 = vadd.f32 %v5245_v36, %v5229_v20 }
 0xf5f   :  { %9452 = vtanh.f32 %v5248_v61  ;;  %v5277_v1 = vmul.f32 %v12796_v4, %v5248_v61  ;;  %v5272_v61 = vrot.slane %v5268_v26, 7 }
 0xf60   :  { %9454 = vtanh.f32 %v5249_v29  ;;  %v5278_v45 = vmul.f32 %v12796_v4, %v5249_v29 }
 0xf61   :  { %v12801_v12 = vadd.f32 %v5283_v53, %v5277_v1 }
 0xf62   :  { %v12803_v31 = vadd.f32 %v5284_v47, %v5278_v45 }
 0xf69   :  { %v9453_v2 = vpop.eup %9452 }
 0xf6a   :  { %v9455_v11 = vpop.eup %9454  ;;  %5254 = vrot.lane.b32.xlu1 %v9453_v2, %s10332_s8 }
 0xf6b   :  { %5256 = vrot.lane.b32.xlu0 %v9455_v11, %s10332_s8 }
 0xfdc   :  { %v5255_v46 = vpop.permute.xlu1 %5254 }
 0xfdd   :  { %v5257_v55 = vpop.permute.xlu0 %5256  ;;  %v5260_v24 = vmul.f32 %v9449_v57, %v5255_v46 }
 0xfde   :  { %v5261_v20 = vmul.f32 %v9451_v48, %v5257_v55 }
 0xfdf   :  { %v5263_v36 = vmul.f32 %v12796_v4, %v5260_v24 }
 0xfe0   :  { %v5264_v29 = vmul.f32 %v12796_v4, %v5261_v20 }
 0xfe1   :  { %v12811_v53 = vadd.f32 %v5271_v18, %v5263_v36 }
 0xfe2   :  { %v12813_v1 = vadd.f32 %v5272_v61, %v5264_v29 }
 0xfe3   :  { %v5291_v11 = vrot.slane %v12811_v53, 4 }
 0xfe4   :  { %v5292_v50 = vrot.slane %v12813_v1, 3 }
 0xfe6   :  { %v5293_v42 = vsel %vm16078_vm0, %v5292_v50, %v5291_v11 }
 0xfe7   :  { %5294 = vrot.lane.b32.xlu1 %v5293_v42, %s10329_s27 }
0x1059   :  { %v5295_v57 = vpop.permute.xlu1 %5294 }
0x105a   :  { %8534 = vmatmul.mubr.msk.f32.vlgmr.msra.gmra.mrb[98].mxu1 %vm16077_vm2, %v5295_v57 }
0x105b   :  { %9192 = vmatpush3.bf16.msra.mxu1 %v11774_v59  ;;  %8544 = vmatprep.mubr.msk.f32.mxu1 %vm10331_vm1, %v16202_v0 }
0x105c   :  { %9193 = vmatprep.subr.bf16.mxu1 %v16200_v62 }
0x105f   :  { %9195 = vmatpush3.bf16.msra.mxu1 %v11806_v8 }
0x1060   :  { %9196 = vmatprep.subr.bf16.mxu1 %v16200_v62 }
0x1062   :  { %8545 = vmatmul.mubr.msk.f32.vlgmr.msra.gmra.mrb[100].mxu1 %vm16077_vm2, %v5295_v57 }
0x1063   :  { %9198 = vmatpush3.bf16.msra.mxu1 %v12597_v63  ;;  %8555 = vmatprep.mubr.msk.f32.mxu1 %vm10331_vm1, %v16202_v0 }
0x1064   :  { %9199 = vmatprep.subr.bf16.mxu1 %v16200_v62 }
0x1067   :  { %9201 = vmatpush3.bf16.msra.mxu1 %v12603_v38 }
0x1068   :  { %9202 = vmatprep.subr.bf16.mxu1 %v16200_v62 }
0x112d   :  { %v12833_v48 = vpop.f32.mrb[98].mxu1 }
0x112e   :  { %16206 = vst [vmem:[#allocation56_spill] sm:$0xff] %v12833_v48  ;;  %v8535_v17 = vpop.f32.mrb[99].mxu1 }
0x1135   :  { %v5918_v47 = vpop.f32.mrb[100].mxu1 }
0x1136   :  { %v5923_v45 = vrot.slane %v5918_v47, 3  ;;  %v5924_v2 = vrot.slane %v5918_v47, 4  ;;  %v8546_v15 = vpop.f32.mrb[101].mxu1 }
0x1137   :  { %v5945_v15 = vrot.slane %v12801_v12, 7 }
0x1138   :  { %v5927_v26 = vadd.f32 %v5923_v45, %v12478_v35  ;;  %v5928_v46 = vadd.f32 %v5924_v2, %v12470_v16  ;;  %v5987_v2 = vstv %s5986_s23 }
0x113a   :  { %9456 = vtanh.f32 %v5927_v26  ;;  %v8114_v20 = vmul.f32 -1.442695, %v5927_v26  ;;  %v8115_v18 = vmul.f32 -1.442695, %v5928_v46  ;;  %v5946_v26 = vrot.slane %v12803_v31, 7 }
0x113b   :  { %9458 = vtanh.f32 %v5928_v46  ;;  %v6000_v46 = vmul.f32 %v5987_v2, %v12801_v12 }
0x113c   :  { %9460 = vpow2.f32 %v8114_v20  ;;  %v6001_v20 = vmul.f32 %v5987_v2, %v12803_v31  ;;  %v5988_v31 = vmul.f32 %v5987_v2, %v12811_v53 }
0x113d   :  { %9462 = vpow2.f32 %v8115_v18 }
0x1144   :  { %v9457_v55 = vpop.eup %9456 }
0x1145   :  { %v9459_v24 = vpop.eup %9458  ;;  %5953 = vrot.lane.b32.xlu0 %v9457_v55, %s10332_s8 }
0x1146   :  { %5955 = vrot.lane.b32.xlu1 %v9459_v24, %s10332_s8  ;;  %v9461_v36 = vpop.eup %9460  ;;  %v12844_v24 = vstv %s8112_s22 }
0x1147   :  { %v9463_v61 = vpop.eup %9462  ;;  %v5935_v29 = vadd.f32 1.0, %v9461_v36  ;;  %16207 = vst [vmem:[#allocation57_spill] sm:$0xff] %v12844_v24 }
0x1148   :  { %v5936_v11 = vadd.f32 1.0, %v9463_v61 }
0x1149   :  { %9464 = vrcp.f32 %v5935_v29 }
0x114a   :  { %9466 = vrcp.f32 %v5936_v11 }
0x1153   :  { %v9465_v50 = vpop.eup %9464 }
0x1154   :  { %v9467_v57 = vpop.eup %9466  ;;  %v5949_v55 = vmul.f32 %v9465_v50, %v5945_v15 }
0x1155   :  { %v5950_v18 = vmul.f32 %v9467_v57, %v5946_v26  ;;  %v5989_v26 = vmul.f32 %v5987_v2, %v12813_v1 }
0x11b7   :  { %v5954_v42 = vpop.permute.xlu0 %5953 }
0x11b8   :  { %v5956_v17 = vpop.permute.xlu1 %5955  ;;  %v5959_v47 = vmul.f32 %v9465_v50, %v5954_v42  ;;  %v6004_v42 = vrot.slane %v6000_v46, 7 }
0x11b9   :  { %v5960_v45 = vmul.f32 %v9467_v57, %v5956_v17 }
0x11ba   :  { %5963 = vrot.lane.b32.xlu0 %v5959_v47, %s10329_s27  ;;  %v6005_v47 = vrot.slane %v6001_v20, 7 }
0x11bb   :  { %5965 = vrot.lane.b32.xlu1 %v5960_v45, %s10329_s27 }
0x122c   :  { %v5964_v36 = vpop.permute.xlu0 %5963 }
0x122d   :  { %v5966_v61 = vpop.permute.xlu1 %5965  ;;  %v5969_v29 = vadd.f32 %v5964_v36, %v5949_v55  ;;  %v5992_v36 = vrot.slane %v5988_v31, 7 }
0x122e   :  { %v5970_v11 = vadd.f32 %v5966_v61, %v5950_v18 }
0x122f   :  { %9468 = vtanh.f32 %v5969_v29  ;;  %v5998_v17 = vmul.f32 %v12844_v24, %v5969_v29  ;;  %v5993_v29 = vrot.slane %v5989_v26, 7 }
0x1230   :  { %9470 = vtanh.f32 %v5970_v11  ;;  %v5999_v45 = vmul.f32 %v12844_v24, %v5970_v11 }
0x1231   :  { %v12849_v4 = vadd.f32 %v6004_v42, %v5998_v17 }
0x1232   :  { %v12851_v12 = vadd.f32 %v6005_v47, %v5999_v45 }
0x1239   :  { %v9469_v15 = vpop.eup %9468 }
0x123a   :  { %v9471_v48 = vpop.eup %9470  ;;  %5975 = vrot.lane.b32.xlu0 %v9469_v15, %s10332_s8 }
0x123b   :  { %5977 = vrot.lane.b32.xlu1 %v9471_v48, %s10332_s8 }
0x12ac   :  { %v5976_v46 = vpop.permute.xlu0 %5975 }
0x12ad   :  { %v5978_v55 = vpop.permute.xlu1 %5977  ;;  %v5981_v20 = vmul.f32 %v9465_v50, %v5976_v46 }
0x12ae   :  { %v5982_v18 = vmul.f32 %v9467_v57, %v5978_v55 }
0x12af   :  { %v5984_v61 = vmul.f32 %v12844_v24, %v5981_v20 }
0x12b0   :  { %v5985_v11 = vmul.f32 %v12844_v24, %v5982_v18 }
0x12b1   :  { %v12859_v42 = vadd.f32 %v5992_v36, %v5984_v61 }
0x12b2   :  { %v12861_v17 = vadd.f32 %v5993_v29, %v5985_v11 }
0x12b3   :  { %v6012_v48 = vrot.slane %v12859_v42, 5 }
0x12b4   :  { %v6013_v53 = vrot.slane %v12861_v17, 4 }
0x12b6   :  { %v6014_v1 = vsel %vm16078_vm0, %v6013_v53, %v6012_v48 }
0x12b7   :  { %6015 = vrot.lane.b32.xlu0 %v6014_v1, %s10329_s27 }
0x1329   :  { %v6016_v50 = vpop.permute.xlu0 %6015 }
0x132a   :  { %8556 = vmatmul.mubr.msk.f32.vlgmr.msra.gmra.mrb[102].mxu1 %vm16077_vm2, %v6016_v50 }
0x132b   :  { %9204 = vmatpush3.bf16.msra.mxu1 %v11774_v59  ;;  %8566 = vmatprep.mubr.msk.f32.mxu1 %vm10331_vm1, %v16202_v0 }
0x132c   :  { %9205 = vmatprep.subr.bf16.mxu1 %v16200_v62 }
0x132f   :  { %9207 = vmatpush3.bf16.msra.mxu1 %v11806_v8 }
0x1330   :  { %9208 = vmatprep.subr.bf16.mxu1 %v16200_v62 }
0x1332   :  { %8567 = vmatmul.mubr.msk.f32.vlgmr.msra.gmra.mrb[104].mxu1 %vm16077_vm2, %v6016_v50 }
0x1333   :  { %9210 = vmatpush3.bf16.msra.mxu1 %v12597_v63  ;;  %8577 = vmatprep.mubr.msk.f32.mxu1 %vm10331_vm1, %v16202_v0 }
0x1334   :  { %9211 = vmatprep.subr.bf16.mxu1 %v16200_v62 }
0x1337   :  { %9213 = vmatpush3.bf16.msra.mxu1 %v12603_v38 }
0x1338   :  { %9214 = vmatprep.subr.bf16.mxu1 %v16200_v62 }
0x13fd   :  { %v12881_v57 = vpop.f32.mrb[102].mxu1 }
0x13fe   :  { %16208 = vst [vmem:[#allocation58_spill] sm:$0xff] %v12881_v57  ;;  %v8557_v2 = vpop.f32.mrb[103].mxu1 }
0x1405   :  { %v6639_v47 = vpop.f32.mrb[104].mxu1 }
0x1406   :  { %v6644_v45 = vrot.slane %v6639_v47, 2  ;;  %v6645_v15 = vrot.slane %v6639_v47, 3  ;;  %v8568_v31 = vpop.f32.mrb[105].mxu1 }
0x1407   :  { %v6666_v31 = vrot.slane %v12849_v4, 7 }
0x1408   :  { %v6648_v26 = vadd.f32 %v6644_v45, %v12478_v35  ;;  %v6649_v46 = vadd.f32 %v6645_v15, %v12470_v16  ;;  %v12895_v15 = vstv %s6707_s2 }
0x140a   :  { %9472 = vtanh.f32 %v6648_v26  ;;  %v8119_v18 = vmul.f32 -1.442695, %v6648_v26  ;;  %v8120_v36 = vmul.f32 -1.442695, %v6649_v46  ;;  %v6667_v26 = vrot.slane %v12851_v12, 7 }
0x140b   :  { %9474 = vtanh.f32 %v6649_v46  ;;  %v10333_v46 = vmov 1966171168  }
0x140c   :  { %9476 = vpow2.f32 %v8119_v18 }
0x140d   :  { %9478 = vpow2.f32 %v8120_v36  ;;  %v15991_v36 = vlaneseq }
0x1414   :  { %v9473_v55 = vpop.eup %9472 }
0x1415   :  { %v9475_v20 = vpop.eup %9474  ;;  %6674 = vrot.lane.b32.xlu1 %v9473_v55, %s10332_s8  ;;  %v2442_v55 = vunpack.c.l.s4 %v10333_v46 }
0x1416   :  { %6676 = vrot.lane.b32.xlu0 %v9475_v20, %s10332_s8  ;;  %v9477_v61 = vpop.eup %9476  ;;  %v6721_v20 = vmul.f32 %v12895_v15, %v12849_v4  ;;  %v12909_v4 = vshrl.u32 %v15991_v36, 7 }
0x1417   :  { %v9479_v29 = vpop.eup %9478  ;;  %v6656_v11 = vadd.f32 1.0, %v9477_v61  ;;  %v12902_v61 = vstv %s8117_s9 }
0x1418   :  { %v6657_v48 = vadd.f32 1.0, %v9479_v29  ;;  %16209 = vst [vmem:[#allocation59_spill] sm:$0xff] %v12902_v61  ;;  %v6722_v29 = vmul.f32 %v12895_v15, %v12851_v12  ;;  %v6725_v24 = vrot.slane %v6721_v20, 7  ;;  %16210 = vst [vmem:[#allocation60_spill] sm:$0xff] %v12909_v4  ;;  %v12915_v12 = vld [vmem:[%s15965_s12] ss:$0 sm:$0xff] }
0x1419   :  { %9480 = vrcp.f32 %v6656_v11 }
0x141a   :  { %9482 = vrcp.f32 %v6657_v48 }
0x1423   :  { %v12887_v53 = vpop.eup %9480 }
0x1424   :  { %v12889_v50 = vpop.eup %9482  ;;  %v6670_v18 = vmul.f32 %v12887_v53, %v6666_v31  ;;  %v6726_v31 = vrot.slane %v6722_v29, 7 }
0x1425   :  { %v6671_v11 = vmul.f32 %v12889_v50, %v6667_v26 }
0x1487   :  { %v6675_v1 = vpop.permute.xlu1 %6674 }
0x1488   :  { %v6677_v2 = vpop.permute.xlu0 %6676  ;;  %v6680_v47 = vmul.f32 %v12887_v53, %v6675_v1 }
0x1489   :  { %v6681_v45 = vmul.f32 %v12889_v50, %v6677_v2 }
0x148a   :  { %6684 = vrot.lane.b32.xlu1 %v6680_v47, %s10329_s27 }
0x148b   :  { %6686 = vrot.lane.b32.xlu0 %v6681_v45, %s10329_s27  ;;  %v2443_v45 = vunpack.c.0.s8 %v2442_v55  ;;  %v2437_v55 = vadd.f32 %v12915_v12, %v12638_v34 }
0x148d   :  { %v12924_v20 = vsub.s32 %v2443_v45, %v12909_v4 }
0x148f   :  { %16213 = vst [vmem:[#allocation63_spill] sm:$0xff] %v12924_v20  ;;  %v2447_v29 = vrot.slane %v2437_v55, %v12924_v20 }
0x1491   :  { %v2448_v36 = vcombine.high %v2447_v29, %v2447_v29 }
0x14fc   :  { %v6685_v48 = vpop.permute.xlu1 %6684 }
0x14fd   :  { %v6687_v1 = vpop.permute.xlu0 %6686  ;;  %v6690_v2 = vadd.f32 %v6685_v48, %v6670_v18 }
0x14fe   :  { %v6691_v47 = vadd.f32 %v6687_v1, %v6671_v11  ;;  %v2455_v1 = vrot.slane %v2447_v29, %v12924_v20 }
0x14ff   :  { %9484 = vtanh.f32 %v6690_v2  ;;  %v6719_v46 = vmul.f32 %v12902_v61, %v6690_v2 }
0x1500   :  { %9486 = vtanh.f32 %v6691_v47  ;;  %v6720_v57 = vmul.f32 %v12902_v61, %v6691_v47 }
0x1501   :  { %v12917_v26 = vadd.f32 %v6725_v24, %v6719_v46  ;;  %v12931_v24 = vsub.s32 0, %v12909_v4 }
0x1502   :  { %v12919_v18 = vadd.f32 %v6726_v31, %v6720_v57  ;;  %v12947_v31 = vld [vmem:[%s15966_s13] ss:$0 sm:$0xff] }
0x1503   :  { %16211 = vst [vmem:[#allocation61_spill] sm:$0xff] %v12917_v26  ;;  %16214 = vst [vmem:[#allocation64_spill] sm:$0xff] %v12931_v24  ;;  %v12934_v57 = vrot.slane %v2455_v1, %v12931_v24 }
0x1504   :  { %16212 = vst [vmem:[#allocation62_spill] sm:$0xff] %v12919_v18 }
0x1505   :  { %v2473_v34 = vadd.f32 %v12417_v41, %v12934_v57  ;;  %v2475_v2 = vadd.f32 %v12427_v60, %v12934_v57  ;;  %v2476_v47 = vadd.f32 %v12432_v10, %v12934_v57  ;;  %v2478_v45 = vadd.f32 %v12444_v32, %v12934_v57 }
0x1506   :  { %v2480_v55 = vadd.f32 %v12456_v54, %v12934_v57  ;;  %v2482_v1 = vadd.f32 %v12472_v52, %v12934_v57 }
0x1507   :  { %9488 = vtanh.f32 %v2473_v34 }
0x1508   :  { %9490 = vtanh.f32 %v2475_v2 }
0x1509   :  { %v9485_v11 = vpop.eup %9484  ;;  %9492 = vtanh.f32 %v2476_v47 }
0x150a   :  { %v9487_v48 = vpop.eup %9486  ;;  %6696 = vrot.lane.b32.xlu1 %v9485_v11, %s10332_s8  ;;  %9494 = vtanh.f32 %v2478_v45  ;;  %v2484_v45 = vadd.f32 %v12491_v5, %v12934_v57 }
0x150b   :  { %6698 = vrot.lane.b32.xlu0 %v9487_v48, %s10332_s8  ;;  %9496 = vtanh.f32 %v2480_v55  ;;  %v2462_v55 = vrot.slane %v2448_v36, %v12924_v20 }
0x150c   :  { %9498 = vtanh.f32 %v2482_v1 }
0x150d   :  { %9500 = vtanh.f32 %v2484_v45 }
0x1511   :  { %v9489_v46 = vpop.eup %9488 }
0x1512   :  { %v2543_v11 = vmul.f32 %v9489_v46, %v12947_v31  ;;  %v9491_v48 = vpop.eup %9490 }
0x1513   :  { %v2545_v2 = vmul.f32 %v9491_v48, %v12947_v31  ;;  %v9493_v47 = vpop.eup %9492 }
0x1514   :  { %v2575_v34 = vsel %vm16077_vm2, %v2543_v11, 0.0  ;;  %v2546_v46 = vmul.f32 %v9493_v47, %v12947_v31  ;;  %v9495_v26 = vpop.eup %9494  ;;  %v2486_v11 = vadd.f32 %v12500_v9, %v12934_v57 }
0x1515   :  { %v2581_v18 = vsel %vm16077_vm2, %v2545_v2, 0.0  ;;  %v2548_v29 = vmul.f32 %v9495_v26, %v12947_v31  ;;  %v9497_v1 = vpop.eup %9496  ;;  %v2488_v2 = vadd.f32 %v12511_v30, %v12934_v57 }
0x1516   :  { %v2584_v48 = vsel %vm16077_vm2, %v2546_v46, 0.0  ;;  %9502 = vtanh.f32 %v2486_v11  ;;  %v2550_v36 = vmul.f32 %v9497_v1, %v12947_v31  ;;  %v9499_v47 = vpop.eup %9498 }
0x1517   :  { %9504 = vtanh.f32 %v2488_v2  ;;  %v2552_v46 = vmul.f32 %v9499_v47, %v12947_v31 }
0x1518   :  { %v2596_v26 = vsel %vm16077_vm2, %v2550_v36, 0.0 }
0x152a   :  { %2576 = vadd.xlane.f32.xlu0 %v2575_v34  ;;  %v12966_v34 = vrot.slane %v2462_v55, %v12931_v24  ;;  %v9501_v55 = vpop.eup %9500 }
0x152b   :  { %v9503_v1 = vpop.eup %9502 }
0x152c   :  { %v2490_v45 = vadd.f32 %v12519_v6, %v12966_v34  ;;  %v2492_v11 = vadd.f32 %v12527_v7, %v12966_v34  ;;  %v2494_v2 = vadd.f32 %v12535_v13, %v12966_v34  ;;  %v2556_v36 = vmul.f32 %v9503_v1, %v12947_v31  ;;  %v9505_v47 = vpop.eup %9504 }
0x152e   :  { %2582 = vadd.xlane.f32.xlu0 %v2581_v18  ;;  %v2590_v18 = vsel %vm16077_vm2, %v2548_v29, 0.0  ;;  %9506 = vtanh.f32 %v2490_v45  ;;  %v2554_v29 = vmul.f32 %v9501_v55, %v12947_v31  ;;  %v2496_v45 = vadd.f32 %v12543_v56, %v12966_v34 }
0x152f   :  { %9508 = vtanh.f32 %v2492_v11  ;;  %v3202_v11 = vadd.f32 %v12915_v12, %v12689_v25 }
0x1530   :  { %9510 = vtanh.f32 %v2494_v2 }
0x1531   :  { %9512 = vtanh.f32 %v2496_v45 }
0x1532   :  { %2585 = vadd.xlane.f32.xlu0 %v2584_v48  ;;  %v2602_v48 = vsel %vm16077_vm2, %v2552_v46, 0.0  ;;  %v2558_v46 = vmul.f32 %v9505_v47, %v12947_v31 }
0x1536   :  { %2591 = vadd.xlane.f32.xlu0 %v2590_v18  ;;  %v2608_v18 = vsel %vm16077_vm2, %v2554_v29, 0.0  ;;  %v2620_v29 = vsel %vm16077_vm2, %v2558_v46, 0.0  ;;  %v2502_v46 = vadd.f32 %v12567_v37, %v12966_v34 }
0x1538   :  { %v9507_v55 = vpop.eup %9506 }
0x1539   :  { %v2560_v1 = vmul.f32 %v9507_v55, %v12947_v31  ;;  %v9509_v2 = vpop.eup %9508 }
0x153a   :  { %2597 = vadd.xlane.f32.xlu0 %v2596_v26  ;;  %v2614_v26 = vsel %vm16077_vm2, %v2556_v36, 0.0  ;;  %v2500_v36 = vadd.f32 %v12559_v22, %v12966_v34  ;;  %v2562_v25 = vmul.f32 %v9509_v2, %v12947_v31  ;;  %v9511_v45 = vpop.eup %9510 }
0x153b   :  { %v2626_v47 = vsel %vm16077_vm2, %v2560_v1, 0.0  ;;  %v2504_v1 = vadd.f32 %v12575_v33, %v12966_v34 }
0x153c   :  { %v2632_v55 = vsel %vm16077_vm2, %v2562_v25, 0.0 }
0x153e   :  { %2603 = vadd.xlane.f32.xlu0 %v2602_v48  ;;  %v2498_v48 = vadd.f32 %v12551_v19, %v12966_v34 }
0x1540   :  { %9514 = vtanh.f32 %v2498_v48  ;;  %v9513_v48 = vpop.eup %9512 }
0x1541   :  { %9516 = vtanh.f32 %v2500_v36  ;;  %v2566_v36 = vmul.f32 %v9513_v48, %v12947_v31 }
0x1542   :  { %2609 = vadd.xlane.f32.xlu0 %v2608_v18  ;;  %v12995_v18 = vrot.slane %v3202_v11, %v12924_v20  ;;  %v2564_v11 = vmul.f32 %v9511_v45, %v12947_v31  ;;  %9518 = vtanh.f32 %v2502_v46 }
0x1543   :  { %9520 = vtanh.f32 %v2504_v1  ;;  %v2644_v45 = vsel %vm16077_vm2, %v2566_v36, 0.0 }
0x1544   :  { %v2638_v2 = vsel %vm16077_vm2, %v2564_v11, 0.0 }
0x1546   :  { %2615 = vadd.xlane.f32.xlu0 %v2614_v26  ;;  %v3220_v26 = vrot.slane %v12995_v18, %v12924_v20 }
0x154a   :  { %2621 = vadd.xlane.f32.xlu0 %v2620_v29  ;;  %v13008_v29 = vrot.slane %v3220_v26, %v12931_v24 }
0x154c   :  { %v3238_v25 = vadd.f32 %v12417_v41, %v13008_v29  ;;  %v3239_v46 = vadd.f32 %v12422_v51, %v13008_v29  ;;  %v3240_v1 = vadd.f32 %v12427_v60, %v13008_v29 }
0x154e   :  { %2627 = vadd.xlane.f32.xlu0 %v2626_v47  ;;  %v9515_v47 = vpop.eup %9514  ;;  %9522 = vtanh.f32 %v3238_v25  ;;  %v3241_v25 = vadd.f32 %v12432_v10, %v13008_v29 }
0x154f   :  { %v9517_v26 = vpop.eup %9516  ;;  %9524 = vtanh.f32 %v3239_v46  ;;  %v3242_v46 = vadd.f32 %v12438_v27, %v13008_v29 }
0x1550   :  { %v2570_v48 = vmul.f32 %v9517_v26, %v12947_v31  ;;  %v9519_v16 = vpop.eup %9518  ;;  %9526 = vtanh.f32 %v3240_v1  ;;  %v3244_v1 = vadd.f32 %v12450_v43, %v13008_v29 }
0x1551   :  { %v2572_v36 = vmul.f32 %v9519_v16, %v12947_v31  ;;  %9528 = vtanh.f32 %v3241_v25  ;;  %v3245_v25 = vadd.f32 %v12456_v54, %v13008_v29 }
0x1552   :  { %2633 = vadd.xlane.f32.xlu0 %v2632_v55  ;;  %v2568_v55 = vmul.f32 %v9515_v47, %v12947_v31  ;;  %v9521_v47 = vpop.eup %9520  ;;  %9530 = vtanh.f32 %v3242_v46  ;;  %v10334_v46 = vmov 0  }
0x1553   :  { %9532 = vtanh.f32 %v3244_v1  ;;  %9370 = vset.pattern.permute.xlu1 %v10334_v46  ;;  %9371 = vset.pattern.permute.xlu0 %v10334_v46 }
0x1554   :  { %v2650_v11 = vsel %vm16077_vm2, %v2568_v55, 0.0  ;;  %v2574_v55 = vmul.f32 %v9521_v47, %v12947_v31  ;;  %9534 = vtanh.f32 %v3245_v25  ;;  %v6709_v25 = vmul.f32 %v12895_v15, %v12859_v42 }
0x1556   :  { %2639 = vadd.xlane.f32.xlu0 %v2638_v2  ;;  %v2656_v2 = vsel %vm16077_vm2, %v2570_v48, 0.0  ;;  %v6713_v42 = vrot.slane %v6709_v25, 7  ;;  %v3213_v25 = vcombine.high %v12995_v18, %v12995_v18  ;;  %v3251_v18 = vadd.f32 %v12500_v9, %v13008_v29 }
0x1558   :  { %v9523_v26 = vpop.eup %9522 }
0x1559   :  { %v3302_v16 = vmul.f32 %v9523_v26, %v12947_v31  ;;  %v9525_v48 = vpop.eup %9524 }
0x155a   :  { %2645 = vadd.xlane.f32.xlu0 %v2644_v45  ;;  %v2662_v45 = vsel %vm16077_vm2, %v2572_v36, 0.0  ;;  %v3303_v36 = vmul.f32 %v9525_v48, %v12947_v31  ;;  %v9527_v47 = vpop.eup %9526 }
0x155b   :  { %v9529_v26 = vpop.eup %9528 }
0x155c   :  { %v3305_v48 = vmul.f32 %v9529_v26, %v12947_v31  ;;  %v9531_v1 = vpop.eup %9530  ;;  %v3248_v26 = vadd.f32 %v12486_v23, %v13008_v29 }
0x155e   :  { %2651 = vadd.xlane.f32.xlu0 %v2650_v11  ;;  %v2668_v11 = vsel %vm16077_vm2, %v2574_v55, 0.0  ;;  %v3304_v55 = vmul.f32 %v9527_v47, %v12947_v31  ;;  %v3306_v47 = vmul.f32 %v9531_v1, %v12947_v31 }
0x1562   :  { %2657 = vadd.xlane.f32.xlu0 %v2656_v2  ;;  %v3334_v2 = vsel %vm16077_vm2, %v3302_v16, 0.0  ;;  %v3340_v16 = vsel %vm16077_vm2, %v3304_v55, 0.0  ;;  %v6710_v55 = vmul.f32 %v12895_v15, %v12861_v17 }
0x1564   :  { %v6714_v17 = vrot.slane %v6710_v55, 7 }
0x1566   :  { %2663 = vadd.xlane.f32.xlu0 %v2662_v45  ;;  %v3337_v45 = vsel %vm16077_vm2, %v3303_v36, 0.0  ;;  %v3343_v36 = vsel %vm16077_vm2, %v3305_v48, 0.0  ;;  %v3346_v48 = vsel %vm16077_vm2, %v3306_v47, 0.0 }
0x156a   :  { %2669 = vadd.xlane.f32.xlu0 %v2668_v11  ;;  %v3246_v11 = vadd.f32 %v12462_v49, %v13008_v29 }
0x156c   :  { %9536 = vtanh.f32 %v3246_v11 }
0x156e   :  { %3335 = vadd.xlane.f32.xlu0 %v3334_v2  ;;  %v3247_v2 = vadd.f32 %v12472_v52, %v13008_v29 }
0x1570   :  { %9538 = vtanh.f32 %v3247_v2  ;;  %v3249_v2 = vadd.f32 %v12491_v5, %v13008_v29 }
0x1571   :  { %9540 = vtanh.f32 %v3248_v26 }
0x1572   :  { %3338 = vadd.xlane.f32.xlu0 %v3337_v45  ;;  %v9533_v45 = vpop.eup %9532  ;;  %9542 = vtanh.f32 %v3249_v2 }
0x1573   :  { %v3308_v1 = vmul.f32 %v9533_v45, %v12947_v31  ;;  %v9535_v35 = vpop.eup %9534 }
0x1574   :  { %v3309_v47 = vmul.f32 %v9535_v35, %v12947_v31 }
0x1576   :  { %3341 = vadd.xlane.f32.xlu0 %v3340_v16  ;;  %v9537_v45 = vpop.eup %9536  ;;  %v3355_v26 = vsel %vm16077_vm2, %v3309_v47, 0.0 }
0x157a   :  { %3344 = vadd.xlane.f32.xlu0 %v3343_v36  ;;  %v9539_v35 = vpop.eup %9538 }
0x157c   :  { %v6697_v46 = vpop.permute.xlu1 %6696 }
0x157d   :  { %v6699_v11 = vpop.permute.xlu0 %6698  ;;  %v6702_v16 = vmul.f32 %v12887_v53, %v6697_v46  ;;  %v3352_v53 = vsel %vm16077_vm2, %v3308_v1, 0.0 }
0x157e   :  { %v6703_v36 = vmul.f32 %v12889_v50, %v6699_v11  ;;  %3347 = vadd.xlane.f32.xlu0 %v3346_v48  ;;  %v3310_v11 = vmul.f32 %v9537_v45, %v12947_v31  ;;  %v3227_v48 = vrot.slane %v3213_v25, %v12924_v20 }
0x157f   :  { %v6705_v4 = vmul.f32 %v12902_v61, %v6702_v16 }
0x1580   :  { %v6706_v15 = vmul.f32 %v12902_v61, %v6703_v36  ;;  %v3358_v1 = vsel %vm16077_vm2, %v3310_v11, 0.0  ;;  %v3311_v36 = vmul.f32 %v9539_v35, %v12947_v31  ;;  %v2474_v35 = vadd.f32 %v12422_v51, %v12934_v57 }
0x1581   :  { %v13064_v52 = vadd.f32 %v6713_v42, %v6705_v4  ;;  %v3250_v4 = vadd.f32 %v12495_v44, %v13008_v29  ;;  %v9541_v42 = vpop.eup %9540 }
0x1582   :  { %v13068_v46 = vadd.f32 %v6714_v17, %v6706_v15  ;;  %3353 = vadd.xlane.f32.xlu0 %v3352_v53  ;;  %v13086_v17 = vrot.slane %v3227_v48, %v12931_v24  ;;  %v3253_v15 = vadd.f32 %v12511_v30, %v13008_v29  ;;  %v3361_v2 = vsel %vm16077_vm2, %v3311_v36, 0.0  ;;  %v9543_v47 = vpop.eup %9542 }
0x1583   :  { %16215 = vst [vmem:[#allocation65_spill] sm:$0xff] %v13064_v52  ;;  %v6733_v50 = vrot.slane %v13064_v52, 6  ;;  %9544 = vtanh.f32 %v3250_v4  ;;  %v3312_v53 = vmul.f32 %v9541_v42, %v12947_v31  ;;  %v3313_v25 = vmul.f32 %v9543_v47, %v12947_v31 }
0x1584   :  { %16216 = vst [vmem:[#allocation66_spill] sm:$0xff] %v13068_v46  ;;  %v6734_v55 = vrot.slane %v13068_v46, 5  ;;  %9546 = vtanh.f32 %v3251_v18  ;;  %v3254_v45 = vadd.f32 %v12515_v40, %v13086_v17  ;;  %v3256_v4 = vadd.f32 %v12523_v58, %v13086_v17 }
0x1585   :  { %9548 = vtanh.f32 %v3253_v15  ;;  %v3258_v48 = vadd.f32 %v12531_v14, %v13086_v17  ;;  %v2477_v36 = vadd.f32 %v12438_v27, %v12934_v57  ;;  %v3260_v15 = vadd.f32 %v12539_v3, %v13086_v17 }
0x1586   :  { %3356 = vadd.xlane.f32.xlu0 %v3355_v26  ;;  %v6735_v16 = vsel %vm16078_vm0, %v6734_v55, %v6733_v50  ;;  %v3364_v50 = vsel %vm16077_vm2, %v3312_v53, 0.0  ;;  %9550 = vtanh.f32 %v3254_v45  ;;  %v3367_v26 = vsel %vm16077_vm2, %v3313_v25, 0.0 }
0x1587   :  { %6736 = vrot.lane.b32.xlu1 %v6735_v16, %s10329_s27  ;;  %9552 = vtanh.f32 %v3256_v4  ;;  %v2479_v47 = vadd.f32 %v12450_v43, %v12934_v57  ;;  %v3262_v25 = vadd.f32 %v12547_v28, %v13086_v17 }
0x1588   :  { %9554 = vtanh.f32 %v2474_v35 }
0x1589   :  { %9556 = vtanh.f32 %v3258_v48 }
0x158a   :  { %3359 = vadd.xlane.f32.xlu0 %v3358_v1  ;;  %9558 = vtanh.f32 %v2477_v36 }
0x158b   :  { %9560 = vtanh.f32 %v3260_v15 }
0x158c   :  { %9562 = vtanh.f32 %v2479_v47 }
0x158d   :  { %v9545_v55 = vpop.eup %9544  ;;  %9564 = vtanh.f32 %v3262_v25  ;;  %v2485_v25 = vadd.f32 %v12495_v44, %v12934_v57 }
0x158e   :  { %3362 = vadd.xlane.f32.xlu0 %v3361_v2  ;;  %v3314_v11 = vmul.f32 %v9545_v55, %v12947_v31  ;;  %v9547_v16 = vpop.eup %9546 }
0x158f   :  { %v3315_v1 = vmul.f32 %v9547_v16, %v12947_v31  ;;  %v9549_v42 = vpop.eup %9548 }
0x1590   :  { %v3370_v18 = vsel %vm16077_vm2, %v3314_v11, 0.0  ;;  %v3317_v53 = vmul.f32 %v9549_v42, %v12947_v31  ;;  %v9551_v45 = vpop.eup %9550 }
0x1591   :  { %v3373_v2 = vsel %vm16077_vm2, %v3315_v1, 0.0  ;;  %v3318_v4 = vmul.f32 %v9551_v45, %v12947_v31  ;;  %v9553_v11 = vpop.eup %9552  ;;  %v2483_v1 = vadd.f32 %v12486_v23, %v12934_v57 }
0x1592   :  { %3365 = vadd.xlane.f32.xlu0 %v3364_v50  ;;  %v3923_v50 = vadd.f32 %v12915_v12, %v12737_v39  ;;  %v3379_v55 = vsel %vm16077_vm2, %v3317_v53, 0.0  ;;  %v9555_v35 = vpop.eup %9554  ;;  %v3264_v39 = vadd.f32 %v12555_v21, %v13086_v17  ;;  %v16217_v53 = vld [vmem:[#allocation46_spill] sm:$0xff] }
0x1593   :  { %v3382_v48 = vsel %vm16077_vm2, %v3318_v4, 0.0  ;;  %v9557_v36 = vpop.eup %9556  ;;  %v2544_v42 = vmul.f32 %v9555_v35, %v12947_v31  ;;  %v3266_v47 = vadd.f32 %v16217_v53, %v13086_v17 }
0x1594   :  { %v13123_v16 = vrot.slane %v3923_v50, %v12924_v20  ;;  %v9559_v15 = vpop.eup %9558  ;;  %v3322_v50 = vmul.f32 %v9557_v36, %v12947_v31  ;;  %v16219_v36 = vld [vmem:[#allocation32_spill] sm:$0xff] }
0x1595   :  { %v2578_v4 = vsel %vm16077_vm2, %v2544_v42, 0.0 }
0x1596   :  { %3368 = vadd.xlane.f32.xlu0 %v3367_v26  ;;  %v2481_v26 = vadd.f32 %v12462_v49, %v12934_v57 }
0x1598   :  { %9566 = vtanh.f32 %v2481_v26  ;;  %v2547_v26 = vmul.f32 %v9559_v15, %v12947_v31 }
0x1599   :  { %9568 = vtanh.f32 %v3264_v39  ;;  %v16218_v39 = vld [vmem:[#allocation48_spill] sm:$0xff] }
0x159a   :  { %3371 = vadd.xlane.f32.xlu0 %v3370_v18  ;;  %v3320_v18 = vmul.f32 %v9553_v11, %v12947_v31  ;;  %9570 = vtanh.f32 %v2483_v1  ;;  %v2587_v15 = vsel %vm16077_vm2, %v2547_v26, 0.0 }
0x159b   :  { %9572 = vtanh.f32 %v3266_v47 }
0x159c   :  { %v3388_v45 = vsel %vm16077_vm2, %v3320_v18, 0.0  ;;  %v3394_v18 = vsel %vm16077_vm2, %v3322_v50, 0.0  ;;  %9574 = vtanh.f32 %v2485_v25 }
0x159e   :  { %3374 = vadd.xlane.f32.xlu0 %v3373_v2  ;;  %v3941_v2 = vrot.slane %v13123_v16, %v12924_v20 }
0x15a0   :  { %v13143_v35 = vrot.slane %v3941_v2, %v12931_v24 }
0x15a2   :  { %3380 = vadd.xlane.f32.xlu0 %v3379_v55  ;;  %v9561_v55 = vpop.eup %9560  ;;  %v3959_v47 = vadd.f32 %v12417_v41, %v13143_v35 }
0x15a3   :  { %v9563_v11 = vpop.eup %9562  ;;  %v3324_v1 = vmul.f32 %v9561_v55, %v12947_v31 }
0x15a4   :  { %v9565_v42 = vpop.eup %9564 }
0x15a5   :  { %v9567_v2 = vpop.eup %9566  ;;  %v3400_v50 = vsel %vm16077_vm2, %v3324_v1, 0.0  ;;  %v3326_v55 = vmul.f32 %v9565_v42, %v12947_v31 }
0x15a6   :  { %3383 = vadd.xlane.f32.xlu0 %v3382_v48  ;;  %v3268_v48 = vadd.f32 %v16218_v39, %v13086_v17  ;;  %v9569_v25 = vpop.eup %9568 }
0x15a7   :  { %v3406_v1 = vsel %vm16077_vm2, %v3326_v55, 0.0  ;;  %v3328_v42 = vmul.f32 %v9569_v25, %v12947_v31 }
0x15a8   :  { %9576 = vtanh.f32 %v3268_v48  ;;  %v3961_v48 = vadd.f32 %v12427_v60, %v13143_v35 }
0x15a9   :  { %v3412_v55 = vsel %vm16077_vm2, %v3328_v42, 0.0 }
0x15aa   :  { %3389 = vadd.xlane.f32.xlu0 %v3388_v45  ;;  %v2487_v45 = vadd.f32 %v16219_v36, %v12934_v57  ;;  %v2489_v57 = vadd.f32 %v12515_v40, %v12966_v34 }
0x15ab   :  { %2579 = vadd.xlane.f32.xlu1 %v2578_v4  ;;  %v2549_v4 = vmul.f32 %v9563_v11, %v12947_v31  ;;  %v2551_v11 = vmul.f32 %v9567_v2, %v12947_v31 }
0x15ac   :  { %9578 = vtanh.f32 %v2487_v45  ;;  %v2491_v45 = vadd.f32 %v12523_v58, %v12966_v34 }
0x15ad   :  { %v2593_v26 = vsel %vm16077_vm2, %v2549_v4, 0.0  ;;  %9580 = vtanh.f32 %v3959_v47  ;;  %v2599_v4 = vsel %vm16077_vm2, %v2551_v11, 0.0  ;;  %v3963_v47 = vadd.f32 %v12438_v27, %v13143_v35 }
0x15ae   :  { %3395 = vadd.xlane.f32.xlu0 %v3394_v18  ;;  %v9571_v18 = vpop.eup %9570  ;;  %9582 = vtanh.f32 %v2489_v57  ;;  %v2493_v57 = vadd.f32 %v12531_v14, %v12966_v34 }
0x15af   :  { %2588 = vadd.xlane.f32.xlu1 %v2587_v15  ;;  %v9573_v15 = vpop.eup %9572  ;;  %v2553_v2 = vmul.f32 %v9571_v18, %v12947_v31  ;;  %9584 = vtanh.f32 %v3961_v48  ;;  %v3965_v48 = vadd.f32 %v12450_v43, %v13143_v35 }
0x15b0   :  { %v3330_v25 = vmul.f32 %v9573_v15, %v12947_v31  ;;  %9586 = vtanh.f32 %v2491_v45  ;;  %v2495_v45 = vadd.f32 %v12539_v3, %v12966_v34 }
0x15b1   :  { %v2605_v11 = vsel %vm16077_vm2, %v2553_v2, 0.0  ;;  %9588 = vtanh.f32 %v3963_v47 }
0x15b2   :  { %3401 = vadd.xlane.f32.xlu0 %v3400_v50  ;;  %v9575_v50 = vpop.eup %9574  ;;  %v3418_v42 = vsel %vm16077_vm2, %v3330_v25, 0.0  ;;  %9590 = vtanh.f32 %v2493_v57  ;;  %v3967_v25 = vadd.f32 %v12462_v49, %v13143_v35 }
0x15b3   :  { %2594 = vadd.xlane.f32.xlu1 %v2593_v26  ;;  %v9577_v26 = vpop.eup %9576  ;;  %v2555_v18 = vmul.f32 %v9575_v50, %v12947_v31  ;;  %9592 = vtanh.f32 %v3965_v48  ;;  %v3934_v48 = vcombine.high %v13123_v16, %v13123_v16 }
0x15b4   :  { %v3332_v15 = vmul.f32 %v9577_v26, %v12947_v31  ;;  %9594 = vtanh.f32 %v2495_v45 }
0x15b5   :  { %v2611_v2 = vsel %vm16077_vm2, %v2555_v18, 0.0  ;;  %9596 = vtanh.f32 %v3967_v25  ;;  %v3948_v25 = vrot.slane %v3934_v48, %v12924_v20 }
0x15b6   :  { %3407 = vadd.xlane.f32.xlu0 %v3406_v1  ;;  %v9579_v1 = vpop.eup %9578  ;;  %v3424_v26 = vsel %vm16077_vm2, %v3332_v15, 0.0  ;;  %v3969_v15 = vadd.f32 %v12486_v23, %v13143_v35 }
0x15b7   :  { %2600 = vadd.xlane.f32.xlu1 %v2599_v4  ;;  %v9581_v4 = vpop.eup %9580  ;;  %v2557_v50 = vmul.f32 %v9579_v1, %v12947_v31 }
0x15b8   :  { %v9583_v47 = vpop.eup %9582  ;;  %v4023_v57 = vmul.f32 %v9581_v4, %v12947_v31 }
0x15b9   :  { %v9585_v61 = vpop.eup %9584  ;;  %v2617_v18 = vsel %vm16077_vm2, %v2557_v50, 0.0  ;;  %v2559_v1 = vmul.f32 %v9583_v47, %v12947_v31  ;;  %v2499_v50 = vadd.f32 %v12555_v21, %v12966_v34 }
0x15ba   :  { %3413 = vadd.xlane.f32.xlu0 %v3412_v55  ;;  %v13183_v55 = vpop.xlane.xlu0 %2576  ;;  %v4055_v45 = vsel %vm16077_vm2, %v4023_v57, 0.0  ;;  %v4025_v4 = vmul.f32 %v9585_v61, %v12947_v31  ;;  %v3971_v57 = vadd.f32 %v12495_v44, %v13143_v35 }
0x15bb   :  { %2606 = vadd.xlane.f32.xlu1 %v2605_v11  ;;  %v2497_v11 = vadd.f32 %v12547_v28, %v12966_v34 }
0x15bc   :  { %v4061_v61 = vsel %vm16077_vm2, %v4025_v4, 0.0  ;;  %v3973_v4 = vadd.f32 %v16219_v36, %v13143_v35 }
0x15bd   :  { %9598 = vtanh.f32 %v2497_v11 }
0x15be   :  { %3419 = vadd.xlane.f32.xlu0 %v3418_v42  ;;  %v9587_v42 = vpop.eup %9586  ;;  %9600 = vtanh.f32 %v3969_v15 }
0x15bf   :  { %2612 = vadd.xlane.f32.xlu1 %v2611_v2  ;;  %v13197_v2 = vpop.xlane.xlu0 %2582  ;;  %v9589_v47 = vpop.eup %9588  ;;  %v2561_v16 = vmul.f32 %v9587_v42, %v12947_v31  ;;  %9602 = vtanh.f32 %v2499_v50 }
0x15c0   :  { %v4027_v11 = vmul.f32 %v9589_v47, %v12947_v31  ;;  %9604 = vtanh.f32 %v3971_v57 }
0x15c1   :  { %v2629_v42 = vsel %vm16077_vm2, %v2561_v16, 0.0 }
0x15c2   :  { %3425 = vadd.xlane.f32.xlu0 %v3424_v26  ;;  %v2623_v26 = vsel %vm16077_vm2, %v2559_v1, 0.0  ;;  %v4067_v50 = vsel %vm16077_vm2, %v4027_v11, 0.0 }
0x15c3   :  { %2618 = vadd.xlane.f32.xlu1 %v2617_v18  ;;  %v9591_v18 = vpop.eup %9590  ;;  %v13214_v1 = vpop.xlane.xlu0 %2585 }
0x15c4   :  { %v9593_v46 = vpop.eup %9592  ;;  %v2563_v48 = vmul.f32 %v9591_v18, %v12947_v31 }
0x15c5   :  { %v9595_v15 = vpop.eup %9594  ;;  %v4029_v47 = vmul.f32 %v9593_v46, %v12947_v31 }
0x15c6   :  { %4056 = vadd.xlane.f32.xlu0 %v4055_v45  ;;  %v2501_v45 = vadd.f32 %v16217_v53, %v12966_v34  ;;  %v9597_v16 = vpop.eup %9596  ;;  %v2635_v18 = vsel %vm16077_vm2, %v2563_v48, 0.0 }
0x15c7   :  { %2624 = vadd.xlane.f32.xlu1 %v2623_v26  ;;  %v13219_v26 = vrot.slane %v3948_v25, %v12931_v24  ;;  %v9599_v25 = vpop.eup %9598  ;;  %v13229_v57 = vpop.xlane.xlu0 %2591  ;;  %v4073_v46 = vsel %vm16077_vm2, %v4029_v47, 0.0 }
0x15c8   :  { %9606 = vtanh.f32 %v2501_v45  ;;  %v4031_v45 = vmul.f32 %v9597_v16, %v12947_v31  ;;  %v2567_v48 = vmul.f32 %v9599_v25, %v12947_v31 }
0x15c9   :  { %9608 = vtanh.f32 %v3973_v4  ;;  %v3975_v11 = vadd.f32 %v12515_v40, %v13219_v26  ;;  %v3977_v4 = vadd.f32 %v12523_v58, %v13219_v26  ;;  %v3979_v25 = vadd.f32 %v12531_v14, %v13219_v26 }
0x15ca   :  { %4062 = vadd.xlane.f32.xlu0 %v4061_v61  ;;  %v2503_v61 = vadd.f32 %v16218_v39, %v12966_v34  ;;  %v9601_v34 = vpop.eup %9600 }
0x15cb   :  { %2630 = vadd.xlane.f32.xlu1 %v2629_v42  ;;  %v2565_v42 = vmul.f32 %v9595_v15, %v12947_v31  ;;  %v9603_v15 = vpop.eup %9602  ;;  %v4033_v52 = vmul.f32 %v9601_v34, %v12947_v31  ;;  %v13241_v40 = vpop.xlane.xlu0 %2597 }
0x15cc   :  { %9610 = vtanh.f32 %v2503_v61  ;;  %v9605_v47 = vpop.eup %9604  ;;  %v2647_v61 = vsel %vm16077_vm2, %v2567_v48, 0.0  ;;  %v2569_v16 = vmul.f32 %v9603_v15, %v12947_v31  ;;  %v3981_v15 = vadd.f32 %v12539_v3, %v13219_v26 }
0x15cd   :  { %9612 = vtanh.f32 %v3975_v11  ;;  %v4085_v11 = vsel %vm16077_vm2, %v4033_v52, 0.0 }
0x15ce   :  { %4068 = vadd.xlane.f32.xlu0 %v4067_v50  ;;  %v2641_v50 = vsel %vm16077_vm2, %v2565_v42, 0.0  ;;  %9614 = vtanh.f32 %v3977_v4  ;;  %v2653_v34 = vsel %vm16077_vm2, %v2569_v16, 0.0 }
0x15cf   :  { %2636 = vadd.xlane.f32.xlu1 %v2635_v18  ;;  %v4079_v18 = vsel %vm16077_vm2, %v4031_v45, 0.0  ;;  %v13251_v48 = vpop.xlane.xlu0 %2603  ;;  %9616 = vtanh.f32 %v3979_v25  ;;  %v3983_v25 = vadd.f32 %v12547_v28, %v13219_v26 }
0x15d0   :  { %9618 = vtanh.f32 %v3981_v15 }
0x15d1   :  { %9620 = vtanh.f32 %v3983_v25 }
0x15d2   :  { %4074 = vadd.xlane.f32.xlu0 %v4073_v46  ;;  %v9607_v42 = vpop.eup %9606  ;;  %v4035_v46 = vmul.f32 %v9605_v47, %v12947_v31 }
0x15d3   :  { %2642 = vadd.xlane.f32.xlu1 %v2641_v50  ;;  %v9609_v45 = vpop.eup %9608  ;;  %v2571_v50 = vmul.f32 %v9607_v42, %v12947_v31  ;;  %v16220_v42 = vld [vmem:[#allocation54_spill] sm:$0xff] }
0x15d4   :  { %v4091_v4 = vsel %vm16077_vm2, %v4035_v46, 0.0  ;;  %v4037_v52 = vmul.f32 %v9609_v45, %v12947_v31  ;;  %v13265_v45 = vpop.xlane.xlu0 %2609 }
0x15d5   :  { %v2659_v47 = vsel %vm16077_vm2, %v2571_v50, 0.0 }
0x15d6   :  { %4080 = vadd.xlane.f32.xlu0 %v4079_v18  ;;  %v9611_v18 = vpop.eup %9610 }
0x15d7   :  { %2648 = vadd.xlane.f32.xlu1 %v2647_v61  ;;  %v9613_v61 = vpop.eup %9612  ;;  %v2573_v16 = vmul.f32 %v9611_v18, %v12947_v31 }
0x15d8   :  { %v4039_v46 = vmul.f32 %v9613_v61, %v12947_v31  ;;  %v9615_v3 = vpop.eup %9614 }
0x15d9   :  { %v2665_v50 = vsel %vm16077_vm2, %v2573_v16, 0.0  ;;  %v3987_v16 = vadd.f32 %v16217_v53, %v13219_v26 }
0x15da   :  { %4086 = vadd.xlane.f32.xlu0 %v4085_v11  ;;  %v4644_v11 = vadd.f32 %v12915_v12, %v16220_v42  ;;  %v3985_v12 = vadd.f32 %v12555_v21, %v13219_v26  ;;  %v4103_v15 = vsel %vm16077_vm2, %v4039_v46, 0.0 }
0x15db   :  { %2654 = vadd.xlane.f32.xlu1 %v2653_v34  ;;  %v4097_v34 = vsel %vm16077_vm2, %v4037_v52, 0.0  ;;  %v9617_v52 = vpop.eup %9616 }
0x15dc   :  { %v13269_v18 = vrot.slane %v4644_v11, %v12924_v20  ;;  %9622 = vtanh.f32 %v3985_v12  ;;  %v4043_v11 = vmul.f32 %v9617_v52, %v12947_v31  ;;  %v9619_v25 = vpop.eup %9618 }
0x15dd   :  { %9624 = vtanh.f32 %v3987_v16  ;;  %v9621_v12 = vpop.eup %9620 }
0x15de   :  { %4092 = vadd.xlane.f32.xlu0 %v4091_v4  ;;  %16221 = vst [vmem:[#allocation54_spill] sm:$0xff] %v13269_v18  ;;  %v4041_v4 = vmul.f32 %v9615_v3, %v12947_v31  ;;  %v4662_v61 = vrot.slane %v13269_v18, %v12924_v20  ;;  %v3989_v3 = vadd.f32 %v16218_v39, %v13219_v26  ;;  %v4115_v46 = vsel %vm16077_vm2, %v4043_v11, 0.0 }
0x15df   :  { %2660 = vadd.xlane.f32.xlu1 %v2659_v47  ;;  %v13277_v47 = vpop.xlane.xlu0 %2615  ;;  %v4047_v16 = vmul.f32 %v9621_v12, %v12947_v31 }
0x15e0   :  { %v4109_v42 = vsel %vm16077_vm2, %v4041_v4, 0.0  ;;  %9626 = vtanh.f32 %v3989_v3 }
0x15e2   :  { %4098 = vadd.xlane.f32.xlu0 %v4097_v34  ;;  %v13284_v34 = vrot.slane %v4662_v61, %v12931_v24  ;;  %v8091_v61 = vld [vmem:[#allocation2] ss:$0 sm:$0xff] }
0x15e3   :  { %2666 = vadd.xlane.f32.xlu1 %v2665_v50  ;;  %v4045_v50 = vmul.f32 %v9619_v25, %v12947_v31  ;;  %v4127_v25 = vsel %vm16077_vm2, %v4047_v16, 0.0 }
0x15e4   :  { %16222 = vst [vmem:[#allocation67_spill] sm:$0xff] %v13284_v34  ;;  %v4680_v4 = vadd.f32 %v12417_v41, %v13284_v34  ;;  %v4682_v11 = vadd.f32 %v12427_v60, %v13284_v34 }
0x15e5   :  { %v4121_v52 = vsel %vm16077_vm2, %v4045_v50, 0.0 }
0x15e6   :  { %4104 = vadd.xlane.f32.xlu0 %v4103_v15  ;;  %v13290_v15 = vpop.xlane.xlu0 %2621  ;;  %9628 = vtanh.f32 %v4680_v4 }
0x15e7   :  { %9630 = vtanh.f32 %v4682_v11 }
0x15ea   :  { %4110 = vadd.xlane.f32.xlu0 %v4109_v42  ;;  %v9623_v42 = vpop.eup %9622  ;;  %v13296_v39 = vpop.xlane.xlu0 %2627 }
0x15eb   :  { %v4049_v3 = vmul.f32 %v9623_v42, %v12947_v31 }
0x15ed   :  { %v4133_v41 = vsel %vm16077_vm2, %v4049_v3, 0.0 }
0x15ee   :  { %4116 = vadd.xlane.f32.xlu0 %v4115_v46  ;;  %v9625_v46 = vpop.eup %9624  ;;  %v13304_v53 = vpop.xlane.xlu0 %2633 }
0x15ef   :  { %v4051_v12 = vmul.f32 %v9625_v46, %v12947_v31 }
0x15f1   :  { %v4139_v4 = vsel %vm16077_vm2, %v4051_v12, 0.0  ;;  %v3257_v12 = vadd.f32 %v12527_v7, %v13086_v17 }
0x15f2   :  { %4122 = vadd.xlane.f32.xlu0 %v4121_v52  ;;  %v9627_v52 = vpop.eup %9626  ;;  %v13314_v42 = vpop.xlane.xlu0 %2639 }
0x15f3   :  { %v9629_v16 = vpop.eup %9628 }
0x15f4   :  { %2677 = vperm.xlu1 %9370, %v8091_v61   ;;  %v4053_v61 = vmul.f32 %v9627_v52, %v12947_v31  ;;  %v9631_v11 = vpop.eup %9630 }
0x15f5   :  { %v4746_v3 = vmul.f32 %v9631_v11, %v12947_v31 }
0x15f6   :  { %4128 = vadd.xlane.f32.xlu0 %v4127_v25  ;;  %v3243_v25 = vadd.f32 %v12444_v32, %v13008_v29  ;;  %v13328_v46 = vpop.xlane.xlu0 %2645 }
0x15f8   :  { %9632 = vtanh.f32 %v3243_v25 }
0x15f9   :  { %v6737_v50 = vpop.permute.xlu1 %6736 }
0x15fa   :  { %4134 = vadd.xlane.f32.xlu0 %v4133_v41  ;;  %8578 = vmatmul.mubr.msk.f32.vlgmr.msra.gmra.mrb[106].mxu1 %vm16077_vm2, %v6737_v50  ;;  %v4145_v41 = vsel %vm16077_vm2, %v4053_v61, 0.0 }
0x15fb   :  { %9216 = vmatpush3.bf16.msra.mxu1 %v11774_v59  ;;  %8588 = vmatprep.mubr.msk.f32.mxu1 %vm10331_vm1, %v16202_v0  ;;  %v4744_v59 = vmul.f32 %v9629_v16, %v12947_v31  ;;  %v3261_v16 = vadd.f32 %v12543_v56, %v13086_v17 }
0x15fc   :  { %9217 = vmatprep.subr.bf16.mxu1 %v16200_v62 }
0x15fe   :  { %4140 = vadd.xlane.f32.xlu0 %v4139_v4 }
0x15ff   :  { %9219 = vmatpush3.bf16.msra.mxu1 %v11806_v8  ;;  %v4776_v8 = vsel %vm16077_vm2, %v4744_v59, 0.0 }
0x1600   :  { %9220 = vmatprep.subr.bf16.mxu1 %v16200_v62 }
0x1602   :  { %8589 = vmatmul.mubr.msk.f32.vlgmr.msra.gmra.mrb[108].mxu1 %vm16077_vm2, %v6737_v50  ;;  %4146 = vadd.xlane.f32.xlu0 %v4145_v41  ;;  %v3252_v50 = vadd.f32 %v16219_v36, %v13008_v29  ;;  %v9633_v52 = vpop.eup %9632 }
0x1603   :  { %9222 = vmatpush3.bf16.msra.mxu1 %v12597_v63  ;;  %8599 = vmatprep.mubr.msk.f32.mxu1 %vm10331_vm1, %v16202_v0  ;;  %v4782_v63 = vsel %vm16077_vm2, %v4746_v3, 0.0  ;;  %v13336_v0 = vpop.xlane.xlu0 %2651  ;;  %v3307_v29 = vmul.f32 %v9633_v52, %v12947_v31  ;;  %vm16081_vm1 = vcmask 982912  }
0x1604   :  { %9223 = vmatprep.subr.bf16.mxu1 %v16200_v62  ;;  %9634 = vtanh.f32 %v3252_v50  ;;  %v3255_v62 = vadd.f32 %v12519_v6, %v13086_v17  ;;  %16223 = vst [vmem:[#allocation68_spill] sm:$0xff] %v13336_v0  ;;  %v13357_v50 = vld [vmem:[%s15966_s13] ss:$0 sm:$0xff] }
0x1605   :  { %v3349_v41 = vsel %vm16077_vm2, %v3307_v29, 0.0 }
0x1606   :  { %4777 = vadd.xlane.f32.xlu0 %v4776_v8  ;;  %9636 = vtanh.f32 %v3255_v62  ;;  %v3263_v8 = vadd.f32 %v12551_v19, %v13086_v17 }
0x1607   :  { %9225 = vmatpush3.bf16.msra.mxu1 %v12603_v38  ;;  %v13340_v4 = vpop.xlane.xlu0 %2657  ;;  %9638 = vtanh.f32 %v3257_v12  ;;  %v3259_v38 = vadd.f32 %v12535_v13, %v13086_v17  ;;  %v3265_v12 = vadd.f32 %v12559_v22, %v13086_v17 }
0x1608   :  { %16224 = vst [vmem:[#allocation69_spill] sm:$0xff] %v13340_v4 }
0x1609   :  { %9640 = vtanh.f32 %v3259_v38 }
0x160a   :  { %4783 = vadd.xlane.f32.xlu0 %v4782_v63  ;;  %9642 = vtanh.f32 %v3261_v16 }
0x160b   :  { %v13349_v25 = vpop.xlane.xlu0 %2663  ;;  %9644 = vtanh.f32 %v3263_v8  ;;  %v3269_v8 = vadd.f32 %v12575_v33, %v13086_v17 }
0x160c   :  { %16225 = vst [vmem:[#allocation70_spill] sm:$0xff] %v13349_v25  ;;  %9646 = vtanh.f32 %v3265_v12 }
0x160e   :  { %v9635_v61 = vpop.eup %9634 }
0x160f   :  { %v3316_v59 = vmul.f32 %v9635_v61, %v12947_v31  ;;  %v13360_v31 = vpop.xlane.xlu0 %2669  ;;  %v3267_v61 = vadd.f32 %v12567_v37, %v13086_v17  ;;  %v3962_v17 = vadd.f32 %v12432_v10, %v13143_v35 }
0x1610   :  { %v9637_v11 = vpop.eup %9636  ;;  %16226 = vst [vmem:[#allocation71_spill] sm:$0xff] %v13360_v31 }
0x1611   :  { %v3376_v3 = vsel %vm16077_vm2, %v3316_v59, 0.0  ;;  %v3319_v63 = vmul.f32 %v13357_v50, %v9637_v11  ;;  %v9639_v62 = vpop.eup %9638  ;;  %9648 = vtanh.f32 %v3267_v61 }
0x1612   :  { %v3321_v38 = vmul.f32 %v13357_v50, %v9639_v62  ;;  %9650 = vtanh.f32 %v3269_v8  ;;  %v3964_v8 = vadd.f32 %v12444_v32, %v13143_v35 }
0x1613   :  { %v3385_v52 = vsel %vm16077_vm2, %v3319_v63, 0.0  ;;  %v9641_v29 = vpop.eup %9640  ;;  %v13370_v11 = vpop.xlane.xlu0 %3335 }
0x1614   :  { %v3391_v16 = vsel %vm16077_vm2, %v3321_v38, 0.0  ;;  %v9643_v59 = vpop.eup %9642 }
0x1615   :  { %v3325_v63 = vmul.f32 %v13357_v50, %v9643_v59  ;;  %v9645_v62 = vpop.eup %9644 }
0x1616   :  { %v9647_v61 = vpop.eup %9646 }
0x1617   :  { %v13376_v12 = vpop.xlane.xlu0 %3338  ;;  %v3403_v38 = vsel %vm16077_vm2, %v3325_v63, 0.0 }
0x1618   :  { %3350 = vadd.xlane.f32.xlu1 %v3349_v41  ;;  %v3323_v41 = vmul.f32 %v13357_v50, %v9641_v29  ;;  %v3327_v29 = vmul.f32 %v13357_v50, %v9645_v62 }
0x161b   :  { %v9649_v59 = vpop.eup %9648 }
0x161c   :  { %3377 = vadd.xlane.f32.xlu1 %v3376_v3  ;;  %v3397_v3 = vsel %vm16077_vm2, %v3323_v41, 0.0  ;;  %v3329_v41 = vmul.f32 %v13357_v50, %v9647_v61  ;;  %v3331_v62 = vmul.f32 %v13357_v50, %v9649_v59 }
0x161e   :  { %v3415_v63 = vsel %vm16077_vm2, %v3329_v41, 0.0  ;;  %v3421_v61 = vsel %vm16077_vm2, %v3331_v62, 0.0  ;;  %v16227_v41 = vld [vmem:[#allocation26_spill] sm:$0xff]  ;;  %v3970_v62 = vadd.f32 %v12491_v5, %v13143_v35 }
0x161f   :  { %v3968_v59 = vadd.f32 %v16227_v41, %v13143_v35 }
0x1620   :  { %3386 = vadd.xlane.f32.xlu1 %v3385_v52  ;;  %v3960_v52 = vadd.f32 %v12422_v51, %v13143_v35 }
0x1622   :  { %9652 = vtanh.f32 %v3960_v52  ;;  %v9651_v52 = vpop.eup %9650 }
0x1623   :  { %9654 = vtanh.f32 %v3962_v17 }
0x1624   :  { %3392 = vadd.xlane.f32.xlu1 %v3391_v16  ;;  %v3409_v16 = vsel %vm16077_vm2, %v3327_v29, 0.0  ;;  %9656 = vtanh.f32 %v3964_v8  ;;  %v3966_v29 = vadd.f32 %v12456_v54, %v13143_v35 }
0x1626   :  { %9658 = vtanh.f32 %v3966_v29 }
0x1627   :  { %9660 = vtanh.f32 %v3968_v59 }
0x1628   :  { %3398 = vadd.xlane.f32.xlu1 %v3397_v3  ;;  %v13386_v3 = vpop.xlane.xlu0 %3341  ;;  %9662 = vtanh.f32 %v3970_v62 }
0x162c   :  { %3404 = vadd.xlane.f32.xlu1 %v3403_v38  ;;  %v13392_v38 = vpop.xlane.xlu0 %3344  ;;  %v9653_v17 = vpop.eup %9652 }
0x162d   :  { %v4024_v21 = vmul.f32 %v13357_v50, %v9653_v17  ;;  %v9655_v8 = vpop.eup %9654  ;;  %v3972_v17 = vadd.f32 %v12500_v9, %v13143_v35 }
0x162e   :  { %v4026_v29 = vmul.f32 %v13357_v50, %v9655_v8 }
0x162f   :  { %9664 = vtanh.f32 %v3972_v17 }
0x1630   :  { %3410 = vadd.xlane.f32.xlu1 %v3409_v16  ;;  %v3333_v16 = vmul.f32 %v13357_v50, %v9651_v52  ;;  %v13404_v28 = vpop.xlane.xlu0 %3347  ;;  %v4058_v52 = vsel %vm16077_vm2, %v4024_v21, 0.0  ;;  %v3974_v21 = vadd.f32 %v12511_v30, %v13143_v35 }
0x1632   :  { %9666 = vtanh.f32 %v3974_v21 }
0x1634   :  { %3416 = vadd.xlane.f32.xlu1 %v3415_v63  ;;  %v3427_v63 = vsel %vm16077_vm2, %v3333_v16, 0.0  ;;  %v13414_v16 = vpop.xlane.xlu0 %3353 }
0x1638   :  { %3422 = vadd.xlane.f32.xlu1 %v3421_v61  ;;  %v13398_v60 = vpop.xlane.xlu1 %2579  ;;  %v9657_v61 = vpop.eup %9656 }
0x1639   :  { %v4028_v59 = vmul.f32 %v13357_v50, %v9657_v61  ;;  %v9659_v24 = vpop.eup %9658  ;;  %v13426_v18 = vpop.xlane.xlu0 %3356 }
0x163a   :  { %v9661_v62 = vpop.eup %9660 }
0x163b   :  { %v4070_v8 = vsel %vm16077_vm2, %v4028_v59, 0.0  ;;  %v4032_v17 = vmul.f32 %v13357_v50, %v9661_v62 }
0x163c   :  { %3428 = vadd.xlane.f32.xlu1 %v3427_v63  ;;  %v13406_v14 = vpop.xlane.xlu1 %2588  ;;  %v4064_v63 = vsel %vm16077_vm2, %v4026_v29, 0.0  ;;  %v3976_v29 = vadd.f32 %v12519_v6, %v13219_v26 }
0x163d   :  { %v13436_v59 = vpop.xlane.xlu0 %3359 }
0x163e   :  { %9668 = vtanh.f32 %v3976_v29 }
0x1640   :  { %4059 = vadd.xlane.f32.xlu1 %v4058_v52  ;;  %v13412_v58 = vpop.xlane.xlu1 %2594  ;;  %v4030_v52 = vmul.f32 %v13357_v50, %v9659_v24  ;;  %v3978_v24 = vadd.f32 %v12527_v7, %v13219_v26 }
0x1641   :  { %v13448_v44 = vpop.xlane.xlu0 %3362 }
0x1642   :  { %v4076_v61 = vsel %vm16077_vm2, %v4030_v52, 0.0  ;;  %9670 = vtanh.f32 %v3978_v24  ;;  %v3980_v52 = vadd.f32 %v12535_v13, %v13219_v26 }
0x1644   :  { %4065 = vadd.xlane.f32.xlu1 %v4064_v63  ;;  %v13420_v20 = vpop.xlane.xlu1 %2600  ;;  %v9663_v63 = vpop.eup %9662  ;;  %9672 = vtanh.f32 %v3980_v52 }
0x1645   :  { %v4034_v21 = vmul.f32 %v13357_v50, %v9663_v63  ;;  %v9665_v30 = vpop.eup %9664 }
0x1646   :  { %v9667_v29 = vpop.eup %9666 }
0x1647   :  { %v4088_v62 = vsel %vm16077_vm2, %v4034_v21, 0.0  ;;  %v4038_v24 = vmul.f32 %v13357_v50, %v9667_v29  ;;  %v13458_v21 = vpop.xlane.xlu0 %3365 }
0x1648   :  { %4071 = vadd.xlane.f32.xlu1 %v4070_v8  ;;  %v13428_v36 = vpop.xlane.xlu1 %2606  ;;  %v4082_v8 = vsel %vm16077_vm2, %v4032_v17, 0.0  ;;  %v3982_v17 = vadd.f32 %v12543_v56, %v13219_v26 }
0x164a   :  { %9674 = vtanh.f32 %v3982_v17 }
0x164b   :  { %v13470_v9 = vpop.xlane.xlu0 %3368 }
0x164c   :  { %4077 = vadd.xlane.f32.xlu1 %v4076_v61  ;;  %v13434_v35 = vpop.xlane.xlu1 %2612  ;;  %v4036_v61 = vmul.f32 %v13357_v50, %v9665_v30  ;;  %v3984_v30 = vadd.f32 %v12551_v19, %v13219_v26 }
0x164e   :  { %v4094_v63 = vsel %vm16077_vm2, %v4036_v61, 0.0  ;;  %9676 = vtanh.f32 %v3984_v30  ;;  %v3986_v61 = vadd.f32 %v12559_v22, %v13219_v26 }
0x164f   :  { %v13478_v22 = vpop.xlane.xlu0 %3371 }
0x1650   :  { %4083 = vadd.xlane.f32.xlu1 %v4082_v8  ;;  %v13442_v6 = vpop.xlane.xlu1 %2618  ;;  %v9669_v8 = vpop.eup %9668  ;;  %9678 = vtanh.f32 %v3986_v61 }
0x1651   :  { %v4040_v52 = vmul.f32 %v13357_v50, %v9669_v8  ;;  %v9671_v5 = vpop.eup %9670 }
0x1652   :  { %v9673_v17 = vpop.eup %9672 }
0x1653   :  { %v4106_v29 = vsel %vm16077_vm2, %v4040_v52, 0.0  ;;  %v4044_v30 = vmul.f32 %v13357_v50, %v9673_v17  ;;  %v13490_v41 = vpop.xlane.xlu0 %3374 }
0x1654   :  { %4089 = vadd.xlane.f32.xlu1 %v4088_v62  ;;  %v13450_v7 = vpop.xlane.xlu1 %2624  ;;  %v4100_v62 = vsel %vm16077_vm2, %v4038_v24, 0.0  ;;  %v3988_v24 = vadd.f32 %v12567_v37, %v13219_v26  ;;  %16229 = vst [vmem:[#allocation73_spill] sm:$0xff] %v13490_v41 }
0x1656   :  { %9680 = vtanh.f32 %v3988_v24 }
0x1658   :  { %4095 = vadd.xlane.f32.xlu1 %v4094_v63  ;;  %v13456_v13 = vpop.xlane.xlu1 %2630  ;;  %v4042_v63 = vmul.f32 %v13357_v50, %v9671_v5  ;;  %v3990_v5 = vadd.f32 %v12575_v33, %v13219_v26  ;;  %v4683_v26 = vadd.f32 %v12432_v10, %v13284_v34 }
0x165a   :  { %v4112_v8 = vsel %vm16077_vm2, %v4042_v63, 0.0  ;;  %9682 = vtanh.f32 %v3990_v5  ;;  %v4681_v63 = vadd.f32 %v12422_v51, %v13284_v34 }
0x165c   :  { %4101 = vadd.xlane.f32.xlu1 %v4100_v62  ;;  %v13464_v56 = vpop.xlane.xlu1 %2636  ;;  %v9675_v62 = vpop.eup %9674  ;;  %9684 = vtanh.f32 %v4681_v63 }
0x165d   :  { %v4046_v61 = vmul.f32 %v13357_v50, %v9675_v62  ;;  %v9677_v23 = vpop.eup %9676  ;;  %9686 = vtanh.f32 %v4683_v26 }
0x165e   :  { %v9679_v37 = vpop.eup %9678 }
0x165f   :  { %v4124_v17 = vsel %vm16077_vm2, %v4046_v61, 0.0  ;;  %v4050_v62 = vmul.f32 %v13357_v50, %v9679_v37 }
0x1660   :  { %4107 = vadd.xlane.f32.xlu1 %v4106_v29  ;;  %v13472_v19 = vpop.xlane.xlu1 %2642  ;;  %v4118_v29 = vsel %vm16077_vm2, %v4044_v30, 0.0  ;;  %v9681_v5 = vpop.eup %9680 }
0x1661   :  { %v4052_v51 = vmul.f32 %v13357_v50, %v9681_v5 }
0x1663   :  { %v4142_v63 = vsel %vm16077_vm2, %v4052_v51, 0.0 }
0x1664   :  { %4113 = vadd.xlane.f32.xlu1 %v4112_v8  ;;  %v13480_v52 = vpop.xlane.xlu1 %2648  ;;  %v4048_v8 = vmul.f32 %v13357_v50, %v9677_v23  ;;  %v4136_v23 = vsel %vm16077_vm2, %v4050_v62, 0.0  ;;  %v16234_v62 = vlaneseq }
0x1665   :  { %16228 = vst [vmem:[#allocation72_spill] sm:$0xff] %v13480_v52 }
0x1666   :  { %v4130_v30 = vsel %vm16077_vm2, %v4048_v8, 0.0  ;;  %v2777_v5 = vand.u32 127, %v16234_v62 }
0x1668   :  { %4119 = vadd.xlane.f32.xlu1 %v4118_v29  ;;  %v13492_v24 = vpop.xlane.xlu1 %2654  ;;  %v13498_v29 = vpop.xlane.xlu0 %3380  ;;  %v2782_v32 = vadd.s32 4294967288, %v2777_v5  ;;  %v2803_v43 = vadd.s32 4294967264, %v2777_v5  ;;  %v2831_v34 = vadd.s32 4294967232, %v2777_v5  ;;  %v2796_v25 = vadd.s32 4294967272, %v2777_v5 }
0x1669   :  { %16230 = vst [vmem:[#allocation74_spill] sm:$0xff] %v13492_v24  ;;  %16231 = vst [vmem:[#allocation75_spill] sm:$0xff] %v13498_v29  ;;  %v2845_v29 = vadd.s32 4294967216, %v2777_v5  ;;  %v2838_v0 = vadd.s32 4294967224, %v2777_v5  ;;  %v2852_v52 = vadd.s32 4294967208, %v2777_v5 }
0x166c   :  { %4125 = vadd.xlane.f32.xlu1 %v4124_v17  ;;  %v13500_v61 = vpop.xlane.xlu1 %2660  ;;  %v9683_v17 = vpop.eup %9682 }
0x166d   :  { %16232 = vst [vmem:[#allocation76_spill] sm:$0xff] %v13500_v61  ;;  %v4054_v10 = vmul.f32 %v13357_v50, %v9683_v17  ;;  %v9685_v8 = vpop.eup %9684  ;;  %v13506_v33 = vpop.xlane.xlu0 %3383 }
0x166e   :  { %v4745_v26 = vmul.f32 %v13357_v50, %v9685_v8  ;;  %v9687_v54 = vpop.eup %9686  ;;  %v2789_v8 = vadd.s32 4294967280, %v2777_v5 }
0x166f   :  { %v4747_v17 = vmul.f32 %v13357_v50, %v9687_v54  ;;  %v16235_v50 = vld [vmem:[#allocation60_spill] sm:$0xff] }
0x1670   :  { %4131 = vadd.xlane.f32.xlu1 %v4130_v30  ;;  %v13508_v37 = vpop.xlane.xlu1 %2666  ;;  %v4148_v30 = vsel %vm16077_vm2, %v4054_v10, 0.0  ;;  %v4779_v51 = vsel %vm16077_vm2, %v4745_v26, 0.0  ;;  %v2859_v26 = vadd.s32 4294967200, %v2777_v5  ;;  %v13542_v61 = vsub.s32 %v2831_v34, %v16235_v50 }
0x1671   :  { %16233 = vst [vmem:[#allocation77_spill] sm:$0xff] %v13508_v37  ;;  %v3390_v49 = vpop.xlane.xlu0 %3389  ;;  %v4785_v62 = vsel %vm16077_vm2, %v4747_v17, 0.0  ;;  %v13533_v17 = vsub.s32 %v2789_v8, %v16235_v50  ;;  %v2810_v8 = vadd.s32 4294967256, %v2777_v5  ;;  %v2824_v34 = vadd.s32 4294967240, %v2777_v5 }
0x1672   :  { %16242 = vst [vmem:[#allocation81_spill] sm:$0xff] %v13542_v61  ;;  %vm16080_vm2 = vcmask 1048512  }
0x1674   :  { %4137 = vadd.xlane.f32.xlu1 %v4136_v23  ;;  %v13513_v23 = vpop.permute.xlu1 %2677 }
0x1675   :  { %v3431_v10 = vadd.f32 %v13376_v12, %v13513_v23  ;;  %v3396_v27 = vpop.xlane.xlu0 %3395  ;;  %v3432_v54 = vadd.f32 %v13386_v3, %v13513_v23  ;;  %v16238_v12 = vld [vmem:[#allocation51_spill] sm:$0xff]  ;;  %v2873_v3 = vadd.s32 4294967184, %v2777_v5 }
0x1676   :  { %16239 = vst [vmem:[#allocation51_spill] sm:$0xff] %v13533_v17 }
0x1677   :  { %v3463_v31 = vmul.f32 %v3431_v10, %v16238_v12  ;;  %v3464_v10 = vmul.f32 %v3432_v54, %v16238_v12  ;;  %v2866_v54 = vadd.s32 4294967192, %v2777_v5 }
0x1678   :  { %4143 = vadd.xlane.f32.xlu1 %v4142_v63  ;;  %v3430_v63 = vadd.f32 %v13370_v11, %v13513_v23  ;;  %v13528_v11 = vsub.s32 %v2782_v32, %v16235_v50  ;;  %v13545_v32 = vsub.s32 %v2845_v29, %v16235_v50  ;;  %v13556_v29 = vsub.s32 %v2873_v3, %v16235_v50 }
0x1679   :  { %v3402_v24 = vpop.xlane.xlu0 %3401  ;;  %v3438_v3 = vadd.f32 %v13436_v59, %v13513_v23  ;;  %v2880_v59 = vadd.s32 4294967176, %v2777_v5 }
0x167a   :  { %16237 = vst [vmem:[#allocation78_spill] sm:$0xff] %v13528_v11  ;;  %v3462_v41 = vmul.f32 %v3430_v63, %v16238_v12  ;;  %16243 = vst [vmem:[#allocation82_spill] sm:$0xff] %v13545_v32  ;;  %v13548_v63 = vsub.s32 %v2859_v26, %v16235_v50  ;;  %v3533_v4 = vrot.slane %v3463_v31, %v13528_v11 }
0x167b   :  { %16245 = vst [vmem:[#allocation84_spill] sm:$0xff] %v13556_v29  ;;  %v13559_v26 = vsub.s32 %v2796_v25, %v16235_v50  ;;  %v3437_v31 = vadd.f32 %v13426_v18, %v13513_v23  ;;  %v3439_v29 = vadd.f32 %v13448_v44, %v13513_v23  ;;  %v13581_v18 = vsub.s32 %v2838_v0, %v16235_v50 }
0x167c   :  { %4149 = vadd.xlane.f32.xlu1 %v4148_v30  ;;  %v2817_v30 = vadd.s32 4294967248, %v2777_v5  ;;  %16244 = vst [vmem:[#allocation83_spill] sm:$0xff] %v13548_v63  ;;  %v3538_v63 = vrot.slane %v3464_v10, %v13533_v17  ;;  %v3446_v10 = vadd.f32 %v13506_v33, %v13513_v23  ;;  %v3448_v44 = vadd.f32 %v3390_v49, %v13513_v23 }
0x167d   :  { %16246 = vst [vmem:[#allocation85_spill] sm:$0xff] %v13559_v26  ;;  %16249 = vst [vmem:[#allocation88_spill] sm:$0xff] %v13581_v18  ;;  %v3408_v11 = vpop.xlane.xlu0 %3407  ;;  %v13599_v33 = vmul.f32 %v3439_v29, %v16238_v12 }
0x167e   :  { %v13539_v37 = vsub.s32 %v2817_v30, %v16235_v50  ;;  %v13615_v29 = vmul.f32 %v3448_v44, %v16238_v12  ;;  %v13639_v44 = vadd.f32 %v13478_v22, %v13513_v23  ;;  %v2685_v22 = vadd.f32 %v13513_v23, %v13229_v57 }
0x167f   :  { %16250 = vst [vmem:[#allocation89_spill] sm:$0xff] %v13599_v33  ;;  %v2692_v57 = vadd.f32 %v13513_v23, %v13434_v35  ;;  %v2703_v35 = vadd.f32 %v13513_v23, %v13328_v46 }
0x1680   :  { %4780 = vadd.xlane.f32.xlu1 %v4779_v51  ;;  %v13525_v51 = vsub.s32 %v2777_v5, %v16235_v50  ;;  %16241 = vst [vmem:[#allocation80_spill] sm:$0xff] %v13539_v37  ;;  %v13606_v5 = vsub.s32 %v2866_v54, %v16235_v50  ;;  %16256 = vst [vmem:[#allocation95_spill] sm:$0xff] %v13639_v44  ;;  %v16265_v54 = vld [vmem:[#allocation69_spill] sm:$0xff] }
0x1682   :  { %16236 = vst [vmem:[#allocation60_spill] sm:$0xff] %v13525_v51  ;;  %v3529_v30 = vrot.slane %v3462_v41, %v13525_v51  ;;  %v3436_v41 = vadd.f32 %v13414_v16, %v13513_v23  ;;  %v13578_v16 = vsub.s32 %v2824_v34, %v16235_v50  ;;  %v13596_v34 = vmul.f32 %v3438_v3, %v16238_v12 }
0x1683   :  { %16252 = vst [vmem:[#allocation91_spill] sm:$0xff] %v13606_v5  ;;  %v13627_v3 = vsub.s32 %v2880_v59, %v16235_v50  ;;  %v16264_v59 = vld [vmem:[#allocation74_spill] sm:$0xff] }
0x1684   :  { %4786 = vadd.xlane.f32.xlu1 %v4785_v62  ;;  %v13536_v62 = vsub.s32 %v2803_v43, %v16235_v50  ;;  %v3433_v43 = vadd.f32 %v13392_v38, %v13513_v23  ;;  %v3434_v38 = vadd.f32 %v13404_v28, %v13513_v23  ;;  %v3534_v32 = vsel %vm2787_vm3, %v3533_v4, %v3529_v30 }
0x1685   :  { %v13575_v28 = vsub.s32 %v2810_v8, %v16235_v50  ;;  %16248 = vst [vmem:[#allocation87_spill] sm:$0xff] %v13578_v16  ;;  %v13589_v8 = vmul.f32 %v3436_v41, %v16238_v12  ;;  %v13592_v30 = vmul.f32 %v3437_v31, %v16238_v12  ;;  %v3539_v0 = vsel %vm2794_vm4, %v3538_v63, %v3534_v32 }
0x1686   :  { %16240 = vst [vmem:[#allocation79_spill] sm:$0xff] %v13536_v62  ;;  %v3465_v25 = vmul.f32 %v3433_v43, %v16238_v12  ;;  %v3450_v43 = vadd.f32 %v3396_v27, %v13513_v23  ;;  %v3466_v4 = vmul.f32 %v3434_v38, %v16238_v12  ;;  %v13603_v27 = vsub.s32 %v2852_v52, %v16235_v50 }
0x1687   :  { %16247 = vst [vmem:[#allocation86_spill] sm:$0xff] %v13575_v28  ;;  %v3440_v38 = vadd.f32 %v13458_v21, %v13513_v23  ;;  %v13611_v32 = vmul.f32 %v3446_v10, %v16238_v12  ;;  %v3452_v52 = vadd.f32 %v3402_v24, %v13513_v23  ;;  %16254 = vst [vmem:[#allocation93_spill] sm:$0xff] %v13627_v3  ;;  %v16263_v21 = vld [vmem:[#allocation68_spill] sm:$0xff] }
0x1688   :  { %v3543_v49 = vrot.slane %v3465_v25, %v13559_v26  ;;  %16251 = vst [vmem:[#allocation90_spill] sm:$0xff] %v13603_v27  ;;  %v13618_v41 = vmul.f32 %v3450_v43, %v16238_v12  ;;  %v3548_v31 = vrot.slane %v3466_v4, %v13536_v62  ;;  %v13635_v24 = vadd.f32 %v13470_v9, %v13513_v23  ;;  %v13641_v43 = vpop.xlane.xlu0 %3413  ;;  %v16262_v9 = vld [vmem:[#allocation72_spill] sm:$0xff] }
0x1689   :  { %16257 = vst [vmem:[#allocation96_spill] sm:$0xff] %v13641_v43  ;;  %v13647_v50 = vmul.f32 %v3440_v38, %v16238_v12  ;;  %v2681_v38 = vadd.f32 %v13513_v23, %v13398_v60  ;;  %v2684_v10 = vadd.f32 %v13513_v23, %v13406_v14  ;;  %v2688_v60 = vadd.f32 %v13513_v23, %v13420_v20 }
0x168a   :  { %v3544_v63 = vsel %vm2801_vm5, %v3543_v49, %v3539_v0  ;;  %16253 = vst [vmem:[#allocation92_spill] sm:$0xff] %v13618_v41  ;;  %16255 = vst [vmem:[#allocation94_spill] sm:$0xff] %v13635_v24  ;;  %v13652_v0 = vadd.f32 %v3408_v11, %v13513_v23  ;;  %v13659_v49 = vmul.f32 %v3452_v52, %v16238_v12 }
0x168b   :  { %v13644_v4 = vsel %vm2808_vm6, %v3548_v31, %v3544_v63  ;;  %16258 = vst [vmem:[#allocation97_spill] sm:$0xff] %v13647_v50  ;;  %v2680_v63 = vadd.f32 %v13513_v23, %v13183_v55  ;;  %v2682_v31 = vadd.f32 %v13513_v23, %v13197_v2  ;;  %v2683_v11 = vadd.f32 %v13513_v23, %v13214_v1  ;;  %v16270_v50 = vld [vmem:[#allocation50_spill] sm:$0xff] }
0x168c   :  { %16259 = vst [vmem:[#allocation98_spill] sm:$0xff] %v13652_v0  ;;  %16260 = vst [vmem:[#allocation99_spill] sm:$0xff] %v13659_v49  ;;  %v2686_v52 = vadd.f32 %v13513_v23, %v13412_v58  ;;  %v2687_v55 = vadd.f32 %v13513_v23, %v13241_v40  ;;  %v2689_v2 = vadd.f32 %v13513_v23, %v13251_v48  ;;  %v13695_v25 = vpop.xlane.xlu0 %3419 }
0x168d   :  { %v2690_v1 = vadd.f32 %v13513_v23, %v13428_v36  ;;  %v2691_v14 = vadd.f32 %v13513_v23, %v13265_v45  ;;  %v2693_v58 = vadd.f32 %v13513_v23, %v13277_v47  ;;  %v2694_v40 = vadd.f32 %v13513_v23, %v13442_v6  ;;  %16261 = vst [vmem:[#allocation100_spill] sm:$0xff] %v13695_v25 }
0x168e   :  { %v2695_v20 = vadd.f32 %v13513_v23, %v13290_v15  ;;  %v2696_v48 = vadd.f32 %v13513_v23, %v13450_v7  ;;  %v2697_v36 = vadd.f32 %v13513_v23, %v13296_v39  ;;  %v2698_v45 = vadd.f32 %v13513_v23, %v13456_v13 }
0x168f   :  { %v2699_v47 = vadd.f32 %v13513_v23, %v13304_v53  ;;  %v2700_v6 = vadd.f32 %v13513_v23, %v13464_v56  ;;  %v2701_v15 = vadd.f32 %v13513_v23, %v13314_v42  ;;  %v2702_v7 = vadd.f32 %v13513_v23, %v13472_v19  ;;  %v16266_v42 = vld [vmem:[#allocation76_spill] sm:$0xff]  ;;  %v16267_v19 = vld [vmem:[#allocation70_spill] sm:$0xff] }
0x1690   :  { %v2704_v39 = vadd.f32 %v13513_v23, %v16262_v9  ;;  %v2705_v13 = vadd.f32 %v13513_v23, %v16263_v21  ;;  %v2706_v53 = vadd.f32 %v13513_v23, %v16264_v59  ;;  %v13719_v56 = vadd.f32 %v13513_v23, %v16265_v54  ;;  %v16268_v9 = vld [vmem:[#allocation77_spill] sm:$0xff]  ;;  %v16269_v21 = vld [vmem:[#allocation71_spill] sm:$0xff]  ;;  %v13746_v24 = vpop.xlane.xlu0 %3425 }
0x1691   :  { %v13723_v25 = vadd.f32 %v13513_v23, %v16266_v42  ;;  %v13727_v46 = vadd.f32 %v13513_v23, %v16267_v19  ;;  %v13731_v44 = vadd.f32 %v13513_v23, %v16268_v9  ;;  %v13735_v59 = vadd.f32 %v13513_v23, %v16269_v21  ;;  %16271 = vst [vmem:[#allocation72_spill] sm:$0xff] %v13746_v24 }
0x1692   :  { %v2712_v54 = vmul.f32 %v2680_v63, %v16270_v50  ;;  %v2713_v33 = vmul.f32 %v2681_v38, %v16270_v50  ;;  %v2714_v42 = vmul.f32 %v2682_v31, %v16270_v50  ;;  %v2715_v43 = vmul.f32 %v2683_v11, %v16270_v50 }
0x1693   :  { %v2716_v19 = vmul.f32 %v2684_v10, %v16270_v50  ;;  %v2717_v0 = vmul.f32 %v2685_v22, %v16270_v50  ;;  %v2718_v9 = vmul.f32 %v2686_v52, %v16270_v50  ;;  %v2719_v49 = vmul.f32 %v2687_v55, %v16270_v50 }
0x1694   :  { %v2720_v21 = vmul.f32 %v2688_v60, %v16270_v50  ;;  %v2721_v63 = vmul.f32 %v2689_v2, %v16270_v50  ;;  %v13750_v38 = vmul.f32 %v2690_v1, %v16270_v50  ;;  %v13753_v31 = vmul.f32 %v2691_v14, %v16270_v50  ;;  %v16273_v1 = vld [vmem:[#allocation78_spill] sm:$0xff] }
0x1695   :  { %v13756_v10 = vmul.f32 %v2692_v57, %v16270_v50  ;;  %v13759_v22 = vmul.f32 %v2693_v58, %v16270_v50  ;;  %v13762_v11 = vmul.f32 %v2694_v40, %v16270_v50  ;;  %v13765_v52 = vmul.f32 %v2695_v20, %v16270_v50 }
0x1696   :  { %v2728_v55 = vmul.f32 %v2696_v48, %v16270_v50  ;;  %v2729_v60 = vmul.f32 %v2697_v36, %v16270_v50  ;;  %v2781_v2 = vrot.slane %v2712_v54, %v13525_v51  ;;  %v2786_v14 = vrot.slane %v2713_v33, %v16273_v1 }
0x1697   :  { %16272 = vst [vmem:[#allocation68_spill] sm:$0xff] %v13765_v52  ;;  %v2793_v57 = vrot.slane %v2714_v42, %v13533_v17  ;;  %v2730_v58 = vmul.f32 %v2698_v45, %v16270_v50  ;;  %v2731_v40 = vmul.f32 %v2699_v47, %v16270_v50  ;;  %v2732_v20 = vmul.f32 %v2700_v6, %v16270_v50  ;;  %v13786_v6 = vpop.xlane.xlu0 %4056 }
0x1698   :  { %v2733_v41 = vmul.f32 %v2701_v15, %v16270_v50  ;;  %v2734_v36 = vmul.f32 %v2702_v7, %v16270_v50  ;;  %v2788_v54 = vsel %vm2787_vm3, %v2786_v14, %v2781_v2  ;;  %v2800_v33 = vrot.slane %v2715_v43, %v13559_v26 }
0x1699   :  { %v2735_v42 = vmul.f32 %v2703_v35, %v16270_v50  ;;  %v13782_v52 = vmul.f32 %v2704_v39, %v16270_v50  ;;  %v2795_v45 = vsel %vm2794_vm4, %v2793_v57, %v2788_v54  ;;  %v2807_v47 = vrot.slane %v2716_v19, %v13536_v62 }
0x169a   :  { %v13790_v15 = vmul.f32 %v2705_v13, %v16270_v50  ;;  %v2802_v7 = vsel %vm2801_vm5, %v2800_v33, %v2795_v45  ;;  %v2814_v43 = vrot.slane %v2717_v0, %v13575_v28  ;;  %v2821_v2 = vrot.slane %v2718_v9, %v13539_v37 }
0x169b   :  { %v2809_v39 = vsel %vm2808_vm6, %v2807_v47, %v2802_v7  ;;  %v2890_v19 = vrot.slane %v2728_v55, %v13525_v51  ;;  %v2894_v14 = vrot.slane %v2729_v60, %v16273_v1  ;;  %v13801_v57 = vmul.f32 %v2706_v53, %v16270_v50  ;;  %v16274_v7 = vld [vmem:[#allocation82_spill] sm:$0xff] }
0x169c   :  { %v2816_v13 = vsel %vm2815_vm7, %v2814_v43, %v2809_v39  ;;  %v2899_v0 = vrot.slane %v2730_v58, %v13533_v17  ;;  %v2835_v33 = vrot.slane %v2720_v21, %v13542_v61  ;;  %v2904_v9 = vrot.slane %v2731_v40, %v13559_v26  ;;  %v13819_v40 = vpop.xlane.xlu0 %4062 }
0x169d   :  { %v2823_v54 = vsel %vm2822_vm8, %v2821_v2, %v2816_v13  ;;  %v2895_v45 = vsel %vm2787_vm3, %v2894_v14, %v2890_v19  ;;  %v2842_v60 = vrot.slane %v2721_v63, %v13581_v18  ;;  %v2849_v43 = vrot.slane %v13750_v38, %v16274_v7  ;;  %v16275_v13 = vld [vmem:[#allocation83_spill] sm:$0xff] }
0x169e   :  { %v2900_v47 = vsel %vm2794_vm4, %v2899_v0, %v2895_v45  ;;  %v2909_v39 = vrot.slane %v2732_v20, %v13536_v62  ;;  %v2856_v63 = vrot.slane %v13753_v31, %v13603_v27  ;;  %v2914_v19 = vrot.slane %v2733_v41, %v13575_v28 }
0x169f   :  { %v2905_v21 = vsel %vm2801_vm5, %v2904_v9, %v2900_v47  ;;  %v2863_v38 = vrot.slane %v13756_v10, %v16275_v13  ;;  %v2919_v20 = vrot.slane %v2734_v36, %v13539_v37  ;;  %v2739_v45 = vmul.f32 %v13719_v56, %v16270_v50 }
0x16a0   :  { %v2924_v36 = vrot.slane %v2735_v42, %v13578_v16  ;;  %v16276_v47 = vrot.slane %v13589_v8, %v13539_v37  ;;  %v2742_v8 = vmul.f32 %v13731_v44, %v16270_v50 }
0x16a5   :  { %v3351_v24 = vpop.xlane.xlu1 %3350 }
0x16a6   :  { %v3435_v48 = vadd.f32 %v3351_v24, %v13513_v23 }
0x16a8   :  { %v3467_v24 = vmul.f32 %v3435_v48, %v16238_v12  ;;  %v2828_v48 = vrot.slane %v2719_v49, %v13578_v16 }
0x16a9   :  { %v13794_v35 = vpop.xlane.xlu1 %3377 }
0x16aa   :  { %v3553_v55 = vrot.slane %v3467_v24, %v13575_v28  ;;  %v2830_v53 = vsel %vm2829_vm9, %v2828_v48, %v2823_v54  ;;  %v2910_v48 = vsel %vm2808_vm6, %v2909_v39, %v2905_v21 }
0x16ab   :  { %v2837_v58 = vsel %vm2836_vm10, %v2835_v33, %v2830_v53  ;;  %v2915_v31 = vsel %vm2815_vm7, %v2914_v19, %v2910_v48  ;;  %v16279_v19 = vrot.slane %v13592_v30, %v13578_v16  ;;  %v2944_v30 = vrot.slane %v2739_v45, %v13603_v27 }
0x16ac   :  { %v2844_v2 = vsel %vm2843_vm11, %v2842_v60, %v2837_v58  ;;  %v3554_v0 = vsel %vm2815_vm7, %v3553_v55, %v13644_v4  ;;  %v2920_v9 = vsel %vm2822_vm8, %v2919_v20, %v2915_v31  ;;  %v2740_v55 = vmul.f32 %v13723_v25, %v16270_v50 }
0x16ad   :  { %v3387_v49 = vpop.xlane.xlu1 %3386  ;;  %v2851_v14 = vsel %vm16149_vm12, %v2849_v43, %v2844_v2  ;;  %v2870_v60 = vrot.slane %v13759_v22, %v13606_v5  ;;  %v3559_v56 = vsel %vm2822_vm8, %v16276_v47, %v3554_v0  ;;  %v2925_v42 = vsel %vm2829_vm9, %v2924_v36, %v2920_v9  ;;  %v13856_v43 = vpop.xlane.xlu0 %4068  ;;  %v16278_v2 = vld [vmem:[#allocation84_spill] sm:$0xff] }
0x16ae   :  { %v3447_v24 = vadd.f32 %v3387_v49, %v13513_v23  ;;  %v2858_v33 = vsel %vm16079_vm13, %v2856_v63, %v2851_v14  ;;  %v2741_v49 = vmul.f32 %v13727_v46, %v16270_v50  ;;  %v2929_v58 = vrot.slane %v13782_v52, %v13542_v61 }
0x16af   :  { %v2865_v10 = vsel %vm16148_vm14, %v2863_v38, %v2858_v33  ;;  %v16277_v25 = vrot.slane %v13611_v32, %v13525_v51  ;;  %v2877_v52 = vrot.slane %v13762_v11, %v16278_v2  ;;  %v2934_v32 = vrot.slane %v13790_v15, %v13581_v18 }
0x16b0   :  { %v3479_v54 = vmul.f32 %v3447_v24, %v16238_v12  ;;  %v2872_v39 = vsel %vm16082_vm15, %v2870_v60, %v2865_v10  ;;  %v2743_v24 = vmul.f32 %v13735_v59, %v16270_v50  ;;  %v2930_v63 = vsel %vm2836_vm10, %v2929_v58, %v2925_v42  ;;  %v16283_v60 = vld [vmem:[#allocation92_spill] sm:$0xff] }
0x16b1   :  { %v3393_v41 = vpop.xlane.xlu1 %3392  ;;  %v3564_v14 = vsel %vm2829_vm9, %v16279_v19, %v3559_v56  ;;  %v2939_v50 = vrot.slane %v13801_v57, %v16274_v7  ;;  %v16280_v59 = vrot.slane %v13615_v29, %v13533_v17  ;;  %v2879_v48 = vsel %vm16081_vm1, %v2877_v52, %v2872_v39  ;;  %v13900_v36 = vpop.xlane.xlu0 %4074 }
0x16b2   :  { %v3612_v53 = vrot.slane %v3479_v54, %v16273_v1  ;;  %v3449_v4 = vadd.f32 %v3393_v41, %v13513_v23  ;;  %v2935_v15 = vsel %vm2843_vm11, %v2934_v32, %v2930_v63  ;;  %v2949_v33 = vrot.slane %v2740_v55, %v16275_v13  ;;  %v16282_v41 = vld [vmem:[#allocation68_spill] sm:$0xff]  ;;  %v16287_v63 = vld [vmem:[#allocation98_spill] sm:$0xff] }
0x16b3   :  { %v2940_v54 = vsel %vm16149_vm12, %v2939_v50, %v2935_v15  ;;  %v16281_v57 = vrot.slane %v13596_v34, %v13542_v61  ;;  %v2884_v10 = vrot.slane %v16282_v41, %v13627_v3  ;;  %v2954_v45 = vrot.slane %v2741_v49, %v13606_v5 }
0x16b4   :  { %v3613_v22 = vsel %vm2787_vm3, %v3612_v53, %v16277_v25  ;;  %v3481_v21 = vmul.f32 %v3449_v4, %v16238_v12  ;;  %v2945_v9 = vsel %vm16079_vm13, %v2944_v30, %v2940_v54  ;;  %v2959_v34 = vrot.slane %v2742_v8, %v16278_v2  ;;  %v16285_v25 = vld [vmem:[#allocation94_spill] sm:$0xff]  ;;  %v16291_v30 = vld [vmem:[#allocation97_spill] sm:$0xff] }
0x16b5   :  { %v3399_v46 = vpop.xlane.xlu1 %3398  ;;  %v3618_v11 = vsel %vm2794_vm4, %v16280_v59, %v3613_v22  ;;  %v3569_v29 = vsel %vm2836_vm10, %v16281_v57, %v3564_v14  ;;  %v2950_v55 = vsel %vm16148_vm14, %v2949_v33, %v2945_v9  ;;  %v16284_v47 = vrot.slane %v16283_v60, %v13536_v62  ;;  %v16288_v14 = vld [vmem:[#allocation96_spill] sm:$0xff]  ;;  %v13935_v54 = vpop.xlane.xlu0 %4080  ;;  %v16292_v33 = vld [vmem:[#allocation73_spill] sm:$0xff] }
0x16b6   :  { %v3622_v44 = vrot.slane %v3481_v21, %v13559_v26  ;;  %v3451_v38 = vadd.f32 %v3399_v46, %v13513_v23  ;;  %v2886_v42 = vsel %vm16080_vm2, %v2884_v10, %v2879_v48  ;;  %v2955_v58 = vsel %vm16082_vm15, %v2954_v45, %v2950_v55  ;;  %v16286_v46 = vld [vmem:[#allocation99_spill] sm:$0xff]  ;;  %v16294_v55 = vld [vmem:[#allocation100_spill] sm:$0xff] }
0x16b7   :  { %v2964_v49 = vrot.slane %v2743_v24, %v13627_v3  ;;  %v3473_v22 = vmul.f32 %v16285_v25, %v16238_v12  ;;  %v2960_v8 = vsel %vm16081_vm1, %v2959_v34, %v2955_v58  ;;  %v3637_v52 = vrot.slane %v16286_v46, %v13539_v37 }
0x16b8   :  { %v3623_v20 = vsel %vm2801_vm5, %v3622_v44, %v3618_v11  ;;  %v3483_v0 = vmul.f32 %v3451_v38, %v16238_v12  ;;  %v3486_v32 = vmul.f32 %v16287_v63, %v16238_v12  ;;  %v3456_v44 = vadd.f32 %v16288_v14, %v13513_v23  ;;  %v16289_v38 = vld [vmem:[#allocation89_spill] sm:$0xff]  ;;  %v16295_v63 = vld [vmem:[#allocation72_spill] sm:$0xff] }
0x16b9   :  { %v3405_v31 = vpop.xlane.xlu1 %3404  ;;  %v3628_v56 = vsel %vm2808_vm6, %v16284_v47, %v3623_v20  ;;  %v2965_v24 = vsel %vm16080_vm2, %v2964_v49, %v2960_v8  ;;  %v16290_v50 = vrot.slane %v16289_v38, %v13581_v18  ;;  %v3578_v20 = vrot.slane %v16291_v30, %v16274_v7 }
0x16ba   :  { %v3632_v53 = vrot.slane %v3483_v0, %v13575_v28  ;;  %v3453_v4 = vadd.f32 %v3405_v31, %v13513_v23  ;;  %v2966_v15 = vsel %vm16078_vm0, %v2965_v24, %v2886_v42  ;;  %v3443_v57 = vadd.f32 %v16292_v33, %v13513_v23  ;;  %v16293_v31 = vld [vmem:[#allocation95_spill] sm:$0xff] }
0x16bb   :  { %v3574_v59 = vsel %vm2843_vm11, %v16290_v50, %v3569_v29  ;;  %2968 = vst [vmem:[#allocation8] sm:$0x3] %v2966_v15  ;;  %v3474_v29 = vmul.f32 %v16293_v31, %v16238_v12  ;;  %v3647_v45 = vrot.slane %v3486_v32, %v13542_v61  ;;  %v3458_v34 = vadd.f32 %v16294_v55, %v13513_v23  ;;  %v13963_v32 = vpop.xlane.xlu0 %4086 }
0x16bc   :  { %v3633_v21 = vsel %vm2815_vm7, %v3632_v53, %v3628_v56  ;;  %v3485_v39 = vmul.f32 %v3453_v4, %v16238_v12  ;;  %v3579_v9 = vsel %vm16149_vm12, %v3578_v20, %v3574_v59  ;;  %v3488_v53 = vmul.f32 %v3456_v44, %v16238_v12 }
0x16bd   :  { %v3411_v19 = vpop.xlane.xlu1 %3410  ;;  %v3638_v0 = vsel %vm2822_vm8, %v3637_v52, %v3633_v21  ;;  %v3583_v60 = vrot.slane %v3473_v22, %v13603_v27  ;;  %v3444_v42 = vadd.f32 %v13794_v35, %v13513_v23  ;;  %v3475_v49 = vmul.f32 %v3443_v57, %v16238_v12 }
0x16be   :  { %v3642_v11 = vrot.slane %v3485_v39, %v13578_v16  ;;  %v3455_v48 = vadd.f32 %v3411_v19, %v13513_v23  ;;  %v3588_v8 = vrot.slane %v3474_v29, %v16275_v13  ;;  %v3657_v22 = vrot.slane %v3488_v53, %v16274_v7  ;;  %v16296_v19 = vld [vmem:[#allocation75_spill] sm:$0xff] }
0x16bf   :  { %v3584_v25 = vsel %vm16079_vm13, %v3583_v60, %v3579_v9  ;;  %v3490_v46 = vmul.f32 %v3458_v34, %v16238_v12  ;;  %v3460_v35 = vadd.f32 %v16295_v63, %v13513_v23  ;;  %v3445_v14 = vadd.f32 %v16296_v19, %v13513_v23  ;;  %v13983_v9 = vpop.xlane.xlu0 %4092  ;;  %v16297_v19 = vld [vmem:[#allocation27_spill] sm:$0xff] }
0x16c0   :  { %v3643_v41 = vsel %vm2829_vm9, %v3642_v11, %v3638_v0  ;;  %v3487_v10 = vmul.f32 %v3455_v48, %v16238_v12  ;;  %v3589_v38 = vsel %vm16148_vm14, %v3588_v8, %v3584_v25  ;;  %v3476_v50 = vmul.f32 %v3444_v42, %v16238_v12 }
0x16c1   :  { %v3417_v4 = vpop.xlane.xlu1 %3416  ;;  %v3648_v58 = vsel %vm2836_vm10, %v3647_v45, %v3643_v41  ;;  %v3593_v11 = vrot.slane %v3475_v49, %v13606_v5  ;;  %v3667_v30 = vrot.slane %v3490_v46, %v16275_v13  ;;  %v3492_v20 = vmul.f32 %v3460_v35, %v16238_v12 }
0x16c2   :  { %v3652_v47 = vrot.slane %v3487_v10, %v13581_v18  ;;  %v3457_v56 = vadd.f32 %v3417_v4, %v13513_v23  ;;  %v3477_v33 = vmul.f32 %v3445_v14, %v16238_v12  ;;  %v3598_v41 = vrot.slane %v3476_v50, %v16278_v2 }
0x16c3   :  { %v3594_v57 = vsel %vm16082_vm15, %v3593_v11, %v3589_v38  ;;  %v3677_v55 = vrot.slane %v3492_v20, %v16278_v2  ;;  %v16299_v11 = vld [vmem:[#allocation67_spill] sm:$0xff]  ;;  %v16301_v20 = vld [vmem:[#allocation22_spill] sm:$0xff] }
0x16c4   :  { %v3653_v21 = vsel %vm2843_vm11, %v3652_v47, %v3648_v58  ;;  %v3489_v39 = vmul.f32 %v3457_v56, %v16238_v12  ;;  %v3599_v4 = vsel %vm16081_vm1, %v3598_v41, %v3594_v57  ;;  %v3603_v47 = vrot.slane %v3477_v33, %v13627_v3 }
0x16c5   :  { %v3423_v52 = vpop.xlane.xlu1 %3422  ;;  %v3658_v59 = vsel %vm16149_vm12, %v3657_v22, %v3653_v21 }
0x16c6   :  { %v3662_v44 = vrot.slane %v3489_v39, %v13603_v27  ;;  %v3459_v24 = vadd.f32 %v3423_v52, %v13513_v23  ;;  %v3604_v49 = vsel %vm16080_vm2, %v3603_v47, %v3599_v4  ;;  %v13997_v39 = vpop.xlane.xlu0 %4098 }
0x16c8   :  { %v3663_v48 = vsel %vm16079_vm13, %v3662_v44, %v3658_v59  ;;  %v3491_v15 = vmul.f32 %v3459_v24, %v16238_v12  ;;  %v16298_v44 = vld [vmem:[#allocation25_spill] sm:$0xff] }
0x16c9   :  { %v3429_v0 = vpop.xlane.xlu1 %3428  ;;  %v3668_v10 = vsel %vm16148_vm14, %v3667_v30, %v3663_v48  ;;  %v16300_v48 = vld [vmem:[#allocation20_spill] sm:$0xff] }
0x16ca   :  { %v3672_v31 = vrot.slane %v3491_v15, %v13606_v5  ;;  %v3461_v29 = vadd.f32 %v3429_v0, %v13513_v23  ;;  %v4105_v35 = vpop.xlane.xlu0 %4104  ;;  %v4684_v15 = vadd.f32 %v16300_v48, %v16299_v11  ;;  %v4686_v0 = vadd.f32 %v16301_v20, %v16299_v11 }
0x16cc   :  { %v3673_v45 = vsel %vm16082_vm15, %v3672_v31, %v3668_v10  ;;  %v3493_v53 = vmul.f32 %v3461_v29, %v16238_v12  ;;  %v4151_v10 = vadd.f32 %v13786_v6, %v13513_v23 }
0x16cd   :  { %v4060_v34 = vpop.xlane.xlu1 %4059  ;;  %v13989_v60 = vpop.f32.mrb[106].mxu1  ;;  %v3678_v58 = vsel %vm16081_vm1, %v3677_v55, %v3673_v45  ;;  %v16302_v45 = vld [vmem:[#allocation52_spill] sm:$0xff]  ;;  %v4167_v55 = vadd.f32 %v4105_v35, %v13513_v23 }
0x16ce   :  { %v3682_v56 = vrot.slane %v3493_v53, %v13627_v3  ;;  %v8579_v42 = vpop.f32.mrb[107].mxu1  ;;  %v4111_v59 = vpop.xlane.xlu0 %4110  ;;  %v4152_v29 = vadd.f32 %v4060_v34, %v13513_v23  ;;  %v16303_v34 = vld [vmem:[#allocation21_spill] sm:$0xff] }
0x16cf   :  { %v4685_v42 = vadd.f32 %v16303_v34, %v16299_v11  ;;  %v4199_v35 = vmul.f32 %v4167_v55, %v16302_v45 }
0x16d0   :  { %v3683_v25 = vsel %vm16080_vm2, %v3682_v56, %v3678_v58  ;;  %v4184_v53 = vmul.f32 %v4152_v29, %v16302_v45  ;;  %v4183_v58 = vmul.f32 %v4151_v10, %v16302_v45  ;;  %v14051_v10 = vld [vmem:[%s15966_s13] ss:$0 sm:$0xff] }
0x16d1   :  { %v3684_v12 = vsel %vm16078_vm0, %v3683_v25, %v3604_v49  ;;  %v4066_v21 = vpop.xlane.xlu1 %4065  ;;  %v4153_v49 = vadd.f32 %v13819_v40, %v13513_v23  ;;  %v16304_v25 = vld [vmem:[#allocation24_spill] sm:$0xff]  ;;  %vm16306_vm0 = vcmask 261120  }
0x16d2   :  { %3687 = vst [vmem:[#allocation8 + $0x2] sm:$0x3] %v3684_v12  ;;  %v4117_v57 = vpop.xlane.xlu0 %4116  ;;  %v4154_v56 = vadd.f32 %v4066_v21, %v13513_v23  ;;  %v4688_v6 = vadd.f32 %v16304_v25, %v16299_v11  ;;  %v16305_v12 = vld [vmem:[#allocation23_spill] sm:$0xff]  ;;  %v4254_v21 = vrot.slane %v4184_v53, %v16273_v1 }
0x16d5   :  { %v7360_v8 = vpop.f32.mrb[108].mxu1  ;;  %v4072_v22 = vpop.xlane.xlu1 %4071 }
0x16d6   :  { %v7365_v46 = vrot.slane %v7360_v8, 1  ;;  %v7366_v52 = vrot.slane %v7360_v8, 2  ;;  %v8590_v63 = vpop.f32.mrb[109].mxu1  ;;  %v4123_v47 = vpop.xlane.xlu0 %4122  ;;  %v4687_v8 = vadd.f32 %v16305_v12, %v16299_v11  ;;  %v4156_v40 = vadd.f32 %v4072_v22, %v13513_v23 }
0x16d7   :  { %v4171_v63 = vadd.f32 %v4117_v57, %v13513_v23 }
0x16d8   :  { %v14000_v14 = vadd.f32 %v7365_v46, %v16297_v19  ;;  %v14003_v24 = vadd.f32 %v7366_v52, %v16298_v44  ;;  %v4169_v52 = vadd.f32 %v4111_v59, %v13513_v23  ;;  %v4186_v44 = vmul.f32 %v4154_v56, %v16302_v45 }
0x16d9   :  { %v4078_v38 = vpop.xlane.xlu1 %4077  ;;  %v4155_v59 = vadd.f32 %v13856_v43, %v13513_v23  ;;  %v4203_v55 = vmul.f32 %v4171_v63, %v16302_v45  ;;  %v4329_v43 = vrot.slane %v4199_v35, %v13525_v51 }
0x16da   :  { %9688 = vtanh.f32 %v14000_v14  ;;  %v4201_v53 = vmul.f32 %v4169_v52, %v16302_v45  ;;  %v4158_v52 = vadd.f32 %v4078_v38, %v13513_v23 }
0x16db   :  { %9690 = vtanh.f32 %v14003_v24 }
0x16dc   :  { %9692 = vtanh.f32 %v4684_v15 }
0x16dd   :  { %v14007_v50 = vpop.xlane.xlu1 %4083  ;;  %9694 = vtanh.f32 %v4686_v0  ;;  %v4250_v0 = vrot.slane %v4183_v58, %v13525_v51  ;;  %v4264_v58 = vrot.slane %v4186_v44, %v13559_v26 }
0x16de   :  { %9696 = vtanh.f32 %v4685_v42 }
0x16df   :  { %9698 = vtanh.f32 %v4688_v6  ;;  %v4255_v56 = vsel %vm2787_vm3, %v4254_v21, %v4250_v0  ;;  %v4157_v21 = vadd.f32 %v13900_v36, %v13513_v23  ;;  %v4348_v0 = vrot.slane %v4203_v55, %v13536_v62 }
0x16e0   :  { %9700 = vtanh.f32 %v4687_v8  ;;  %v4187_v8 = vmul.f32 %v4155_v59, %v16302_v45  ;;  %v4160_v55 = vadd.f32 %v14007_v50, %v13513_v23 }
0x16e1   :  { %v14011_v30 = vpop.xlane.xlu1 %4089 }
0x16e4   :  { %v9689_v33 = vpop.eup %9688 }
0x16e5   :  { %v9691_v31 = vpop.eup %9690  ;;  %7395 = vrot.lane.b32.xlu0 %v9689_v33, %s10332_s8  ;;  %v14017_v41 = vpop.xlane.xlu1 %4095  ;;  %v4185_v33 = vmul.f32 %v4153_v49, %v16302_v45  ;;  %v4188_v49 = vmul.f32 %v4156_v40, %v16302_v45 }
0x16e6   :  { %7397 = vrot.lane.b32.xlu1 %v9691_v31, %s10332_s8  ;;  %v9693_v46 = vpop.eup %9692  ;;  %v4129_v31 = vpop.xlane.xlu0 %4128 }
0x16e7   :  { %v9695_v57 = vpop.eup %9694  ;;  %v4748_v22 = vmul.f32 %v14051_v10, %v9693_v46  ;;  %v4259_v46 = vrot.slane %v4185_v33, %v13533_v17  ;;  %v4173_v33 = vadd.f32 %v4123_v47, %v13513_v23  ;;  %v4274_v36 = vrot.slane %v4188_v49, %v13575_v28 }
0x16e8   :  { %v14066_v63 = vmul.f32 %v14051_v10, %v9695_v57 }
0x16e9   :  { %v14023_v4 = vpop.xlane.xlu1 %4101  ;;  %v14073_v40 = vsel %vm16306_vm0, %v4748_v22, 0.0  ;;  %v4260_v38 = vsel %vm2794_vm4, %v4259_v46, %v4255_v56  ;;  %v4269_v22 = vrot.slane %v4187_v8, %v13536_v62  ;;  %v9697_v56 = vpop.eup %9696  ;;  %v4205_v8 = vmul.f32 %v4173_v33, %v16302_v45 }
0x16ea   :  { %v4135_v57 = vpop.xlane.xlu0 %4134  ;;  %v14093_v46 = vpop.eup %9698  ;;  %v4192_v33 = vmul.f32 %v4160_v55, %v16302_v45 }
0x16eb   :  { %v4177_v50 = vadd.f32 %v4135_v57, %v13513_v23 }
0x16ed   :  { %v4108_v19 = vpop.xlane.xlu1 %4107  ;;  %v4209_v55 = vmul.f32 %v4177_v50, %v16302_v45 }
0x16ee   :  { %v4168_v15 = vadd.f32 %v4108_v19, %v13513_v23 }
0x16f0   :  { %v4200_v29 = vmul.f32 %v4168_v15, %v16302_v45  ;;  %v4338_v15 = vrot.slane %v4201_v53, %v13533_v17  ;;  %v4190_v53 = vmul.f32 %v4158_v52, %v16302_v45  ;;  %v4175_v52 = vadd.f32 %v4129_v31, %v13513_v23 }
0x16f1   :  { %v4114_v42 = vpop.xlane.xlu1 %4113  ;;  %v4162_v31 = vadd.f32 %v14011_v30, %v13513_v23  ;;  %v4749_v30 = vmul.f32 %v14051_v10, %v9697_v56  ;;  %v4164_v56 = vadd.f32 %v14017_v41, %v13513_v23 }
0x16f2   :  { %v4333_v6 = vrot.slane %v4200_v29, %v16273_v1  ;;  %v4170_v19 = vadd.f32 %v4114_v42, %v13513_v23  ;;  %v4265_v29 = vsel %vm2801_vm5, %v4264_v58, %v4260_v38  ;;  %v4159_v58 = vadd.f32 %v13935_v54, %v13513_v23 }
0x16f3   :  { %v4161_v54 = vadd.f32 %v13963_v32, %v13513_v23 }
0x16f4   :  { %v4334_v35 = vsel %vm2787_vm3, %v4333_v6, %v4329_v43  ;;  %v4202_v44 = vmul.f32 %v4170_v19, %v16302_v45  ;;  %v4189_v6 = vmul.f32 %v4157_v21, %v16302_v45 }
0x16f5   :  { %v4120_v59 = vpop.xlane.xlu1 %4119  ;;  %v4339_v47 = vsel %vm2794_vm4, %v4338_v15, %v4334_v35  ;;  %v4270_v35 = vsel %vm2808_vm6, %v4269_v22, %v4265_v29  ;;  %v9701_v15 = vpop.eup %9700 }
0x16f6   :  { %v4343_v43 = vrot.slane %v4202_v44, %v13559_v26  ;;  %v4172_v42 = vadd.f32 %v4120_v59, %v13513_v23  ;;  %v4275_v21 = vsel %vm2815_vm7, %v4274_v36, %v4270_v35  ;;  %v4141_v29 = vpop.xlane.xlu0 %4140  ;;  %v4191_v36 = vmul.f32 %v4159_v58, %v16302_v45 }
0x16f8   :  { %v4344_v49 = vsel %vm2801_vm5, %v4343_v43, %v4339_v47  ;;  %v4204_v19 = vmul.f32 %v4172_v42, %v16302_v45  ;;  %v4284_v43 = vrot.slane %v4190_v53, %v13578_v16  ;;  %v4279_v42 = vrot.slane %v4189_v6, %v13539_v37 }
0x16f9   :  { %v4126_v44 = vpop.xlane.xlu1 %4125  ;;  %v4349_v57 = vsel %vm2808_vm6, %v4348_v0, %v4344_v49  ;;  %v4358_v47 = vrot.slane %v4205_v8, %v13539_v37  ;;  %v4207_v53 = vmul.f32 %v4175_v52, %v16302_v45  ;;  %v4193_v49 = vmul.f32 %v4161_v54, %v16302_v45 }
0x16fa   :  { %v4353_v38 = vrot.slane %v4204_v19, %v13575_v28  ;;  %v4174_v59 = vadd.f32 %v4126_v44, %v13513_v23  ;;  %v4280_v0 = vsel %vm2822_vm8, %v4279_v42, %v4275_v21  ;;  %v4294_v44 = vrot.slane %v4192_v33, %v13581_v18  ;;  %v4147_v42 = vpop.xlane.xlu0 %4146 }
0x16fb   :  { %v4285_v35 = vsel %vm2829_vm9, %v4284_v43, %v4280_v0  ;;  %v4194_v8 = vmul.f32 %v4162_v31, %v16302_v45  ;;  %v4289_v50 = vrot.slane %v4191_v36, %v13542_v61  ;;  %v4163_v43 = vadd.f32 %v13983_v9, %v13513_v23 }
0x16fc   :  { %v4354_v32 = vsel %vm2815_vm7, %v4353_v38, %v4349_v57  ;;  %v4206_v22 = vmul.f32 %v4174_v59, %v16302_v45  ;;  %v4368_v38 = vrot.slane %v4207_v53, %v13542_v61  ;;  %v4179_v59 = vadd.f32 %v4141_v29, %v13513_v23 }
0x16fd   :  { %v4132_v19 = vpop.xlane.xlu1 %4131  ;;  %v4359_v52 = vsel %vm2822_vm8, %v4358_v47, %v4354_v32  ;;  %v4794_v31 = vsel %vm16306_vm0, %v14066_v63, 0.0  ;;  %v4378_v57 = vrot.slane %v4209_v55, %v16274_v7  ;;  %v4290_v41 = vsel %vm2836_vm10, %v4289_v50, %v4285_v35 }
0x16fe   :  { %v4363_v6 = vrot.slane %v4206_v22, %v13578_v16  ;;  %v4176_v58 = vadd.f32 %v4132_v19, %v13513_v23  ;;  %v4295_v22 = vsel %vm2843_vm11, %v4294_v44, %v4290_v41  ;;  %v4299_v29 = vrot.slane %v4193_v49, %v16274_v7 }
0x16ff   :  { %v4304_v47 = vrot.slane %v4194_v8, %v13603_v27  ;;  %v4196_v53 = vmul.f32 %v4164_v56, %v16302_v45  ;;  %v4166_v63 = vadd.f32 %v14023_v4, %v13513_v23  ;;  %v4211_v0 = vmul.f32 %v4179_v59, %v16302_v45 }
0x1700   :  { %v4364_v21 = vsel %vm2829_vm9, %v4363_v6, %v4359_v52  ;;  %v4208_v54 = vmul.f32 %v4176_v58, %v16302_v45  ;;  %v4181_v6 = vadd.f32 %v4147_v42, %v13513_v23  ;;  %v4195_v49 = vmul.f32 %v4163_v43, %v16302_v45 }
0x1701   :  { %v4138_v33 = vpop.xlane.xlu1 %4137  ;;  %v4369_v9 = vsel %vm2836_vm10, %v4368_v38, %v4364_v21  ;;  %v4165_v58 = vadd.f32 %v13997_v39, %v13513_v23  ;;  %v4300_v44 = vsel %vm16149_vm12, %v4299_v29, %v4295_v22  ;;  %v4752_v52 = vmul.f32 %v14051_v10, %v14093_v46 }
0x1702   :  { %v4373_v36 = vrot.slane %v4208_v54, %v13581_v18  ;;  %v4178_v32 = vadd.f32 %v4138_v33, %v13513_v23  ;;  %v4791_v56 = vsel %vm16306_vm0, %v4749_v30, 0.0  ;;  %v4751_v21 = vmul.f32 %v14051_v10, %v9701_v15 }
0x1703   :  { %v4314_v39 = vrot.slane %v4196_v53, %v13606_v5  ;;  %v4198_v54 = vmul.f32 %v4166_v63, %v16302_v45  ;;  %v4388_v43 = vrot.slane %v4211_v0, %v16275_v13  ;;  %v4213_v46 = vmul.f32 %v4181_v6, %v16302_v45 }
0x1704   :  { %v4374_v55 = vsel %vm2843_vm11, %v4373_v36, %v4369_v9  ;;  %v4210_v19 = vmul.f32 %v4178_v32, %v16302_v45  ;;  %4789 = vadd.xlane.f32.xlu0 %v14073_v40  ;;  %v4305_v40 = vsel %vm16079_vm13, %v4304_v47, %v4300_v44  ;;  %v4309_v33 = vrot.slane %v4195_v49, %v16275_v13 }
0x1705   :  { %v4144_v35 = vpop.xlane.xlu1 %4143  ;;  %v4379_v50 = vsel %vm16149_vm12, %v4378_v57, %v4374_v55  ;;  %v4197_v57 = vmul.f32 %v4165_v58, %v16302_v45  ;;  %v4324_v22 = vrot.slane %v4198_v54, %v13627_v3  ;;  %v4398_v9 = vrot.slane %v4213_v46, %v16278_v2 }
0x1706   :  { %v4383_v4 = vrot.slane %v4210_v19, %v13603_v27  ;;  %v4180_v8 = vadd.f32 %v4144_v35, %v13513_v23  ;;  %v4310_v41 = vsel %vm16148_vm14, %v4309_v33, %v4305_v40  ;;  %v8124_v58 = vmul.f32 -1.442695, %v14000_v14  ;;  %v14192_v40 = vpop.xlane.xlu0 %4777  ;;  %v16312_v33 = vld [vmem:[#allocation28_spill] sm:$0xff]  ;;  %v16346_v27 = vld [vmem:[#allocation49_spill] sm:$0xff] }
0x1707   :  { %v4315_v32 = vsel %vm16082_vm15, %v4314_v39, %v4310_v41  ;;  %v4319_v53 = vrot.slane %v4197_v57, %v16278_v2  ;;  %v8125_v35 = vmul.f32 -1.442695, %v14003_v24  ;;  %v4690_v57 = vadd.f32 %v16312_v33, %v16299_v11 }
0x1708   :  { %v4384_v38 = vsel %vm16079_vm13, %v4383_v4, %v4379_v50  ;;  %v4212_v59 = vmul.f32 %v4180_v8, %v16302_v45  ;;  %4795 = vadd.xlane.f32.xlu0 %v4794_v31  ;;  %v4800_v31 = vsel %vm16306_vm0, %v4752_v52, 0.0  ;;  %vm16307_vm13 = vmmov %vm16306_vm0  ;;  %vm16308_vm0 = vcmask 1041409  }
0x1709   :  { %v4150_v30 = vpop.xlane.xlu1 %4149  ;;  %v4389_v36 = vsel %vm16148_vm14, %v4388_v43, %v4384_v38  ;;  %v4797_v63 = vsel %vm16307_vm13, %v4751_v21, 0.0  ;;  %v4320_v19 = vsel %vm16081_vm1, %v4319_v53, %v4315_v32  ;;  %9702 = vpow2.f32 %v8124_v58  ;;  %v16311_v43 = vld [vmem:[#allocation26_spill] sm:$0xff] }
0x170a   :  { %v4393_v15 = vrot.slane %v4212_v59, %v13606_v5  ;;  %4792 = vadd.xlane.f32.xlu1 %v4791_v56  ;;  %v4182_v42 = vadd.f32 %v4150_v30, %v13513_v23  ;;  %v4325_v6 = vsel %vm16080_vm2, %v4324_v22, %v4320_v19  ;;  %9704 = vpow2.f32 %v8125_v35  ;;  %v14196_v56 = vpop.xlane.xlu0 %4783  ;;  %v16313_v30 = vld [vmem:[#allocation31_spill] sm:$0xff]  ;;  %v16316_v22 = vld [vmem:[#allocation32_spill] sm:$0xff] }
0x170b   :  { %v4689_v46 = vadd.f32 %v16311_v43, %v16299_v11 }
0x170c   :  { %v4394_v29 = vsel %vm16082_vm15, %v4393_v15, %v4389_v36  ;;  %v4214_v47 = vmul.f32 %v4182_v42, %v16302_v45  ;;  %4801 = vadd.xlane.f32.xlu0 %v4800_v31  ;;  %v4693_v15 = vadd.f32 %v16313_v30, %v16299_v11  ;;  %v16314_v42 = vld [vmem:[#allocation29_spill] sm:$0xff]  ;;  %v16315_v36 = vld [vmem:[#allocation30_spill] sm:$0xff] }
0x170d   :  { %v4399_v0 = vsel %vm16081_vm1, %v4398_v9, %v4394_v29  ;;  %v14194_v50 = vpop.xlane.xlu1 %4780  ;;  %v4691_v41 = vadd.f32 %v16314_v42, %v16299_v11  ;;  %v4692_v31 = vadd.f32 %v16315_v36, %v16299_v11  ;;  %v4694_v29 = vadd.f32 %v16316_v22, %v16299_v11 }
0x170e   :  { %v4403_v55 = vrot.slane %v4214_v47, %v13627_v3  ;;  %4798 = vadd.xlane.f32.xlu1 %v4797_v63  ;;  %16309 = vst [vmem:[#allocation74_spill] sm:$0xff] %v14194_v50 }
0x1710   :  { %v4404_v49 = vsel %vm16080_vm2, %v4403_v55, %v4399_v0 }
0x1711   :  { %v4405_v45 = vsel %vm16308_vm0, %v4404_v49, %v4325_v6  ;;  %v14198_v21 = vpop.xlane.xlu1 %4786  ;;  %vm16317_vm0 = vmmov %vm16307_vm13 }
0x1712   :  { %4408 = vst [vmem:[#allocation8 + $0x4] sm:$0x3] %v4405_v45  ;;  %16310 = vst [vmem:[#allocation69_spill] sm:$0xff] %v14198_v21 }
0x1713   :  { %v9703_v44 = vpop.eup %9702  ;;  %vm16318_vm2 = vmmov %vm16317_vm0 }
0x1714   :  { %v9705_v4 = vpop.eup %9704  ;;  %v7377_v8 = vadd.f32 1.0, %v9703_v44  ;;  %vm16319_vm1 = vmmov %vm16317_vm0 }
0x1715   :  { %v7378_v52 = vadd.f32 1.0, %v9705_v4  ;;  %vm16321_vm15 = vmmov %vm16317_vm0 }
0x1716   :  { %9706 = vrcp.f32 %v7377_v8 }
0x1717   :  { %9708 = vrcp.f32 %v7378_v52 }
0x1718   :  { %9710 = vtanh.f32 %v4689_v46  ;;  %v14238_v46 = vstv %s7428_s1 }
0x1719   :  { %9712 = vtanh.f32 %v4690_v57 }
0x171a   :  { %9714 = vtanh.f32 %v4693_v15 }
0x171b   :  { %9716 = vtanh.f32 %v4691_v41  ;;  %v16327_v41 = vld [vmem:[#allocation61_spill] sm:$0xff] }
0x171c   :  { %9718 = vtanh.f32 %v4692_v31  ;;  %v7387_v31 = vrot.slane %v16327_v41, 7 }
0x171d   :  { %9720 = vtanh.f32 %v4694_v29 }
0x1720   :  { %v14200_v39 = vpop.eup %9706 }
0x1721   :  { %v14202_v24 = vpop.eup %9708 }
0x1722   :  { %v9711_v32 = vpop.eup %9710 }
0x1723   :  { %v9713_v47 = vpop.eup %9712  ;;  %v4753_v9 = vmul.f32 %v14051_v10, %v9711_v32  ;;  %v16328_v32 = vld [vmem:[#allocation62_spill] sm:$0xff] }
0x1724   :  { %v9715_v53 = vpop.eup %9714  ;;  %v4754_v55 = vmul.f32 %v14051_v10, %v9713_v47  ;;  %v7388_v29 = vrot.slane %v16328_v32, 7  ;;  %v7442_v47 = vmul.f32 %v14238_v46, %v16327_v41  ;;  %v16332_v41 = vld [vmem:[#allocation54_spill] sm:$0xff] }
0x1725   :  { %v4803_v63 = vsel %vm16307_vm13, %v4753_v9, 0.0  ;;  %v4757_v19 = vmul.f32 %v14051_v10, %v9715_v53  ;;  %v9717_v0 = vpop.eup %9716  ;;  %vm16320_vm13 = vmmov %vm16317_vm0  ;;  %v7391_v9 = vmul.f32 %v14200_v39, %v7387_v31  ;;  %v14249_v53 = vstv %s8122_s19 }
0x1726   :  { %v4806_v6 = vsel %vm16317_vm0, %v4754_v55, 0.0  ;;  %v4755_v45 = vmul.f32 %v14051_v10, %v9717_v0  ;;  %v9719_v58 = vpop.eup %9718  ;;  %16329 = vst [vmem:[#allocation68_spill] sm:$0xff] %v14249_v53  ;;  %v7392_v55 = vmul.f32 %v14202_v24, %v7388_v29  ;;  %v4655_v31 = vcombine.high %v16332_v41, %v16332_v41  ;;  %v16341_v41 = vld [vmem:[#allocation36_spill] sm:$0xff] }
0x1727   :  { %v4815_v49 = vsel %vm16318_vm2, %v4757_v19, 0.0  ;;  %v4756_v44 = vmul.f32 %v14051_v10, %v9719_v58  ;;  %v9721_v4 = vpop.eup %9720  ;;  %vm16347_vm2 = vmmov %vm16317_vm0 }
0x1728   :  { %v4809_v35 = vsel %vm16319_vm1, %v4755_v45, 0.0  ;;  %v4758_v52 = vmul.f32 %v14051_v10, %v9721_v4  ;;  %v7446_v45 = vrot.slane %v7442_v47, 7  ;;  %v16334_v47 = vld [vmem:[#allocation64_spill] sm:$0xff]  ;;  %vm16351_vm1 = vmmov %vm16317_vm0 }
0x1729   :  { %v4812_v8 = vsel %vm16320_vm13, %v4756_v44, 0.0  ;;  %vm16354_vm13 = vmmov %vm16317_vm0 }
0x1757   :  { %v7396_v14 = vpop.permute.xlu0 %7395 }
0x1758   :  { %v7398_v54 = vpop.permute.xlu1 %7397  ;;  %v7401_v38 = vmul.f32 %v14200_v39, %v7396_v14  ;;  %v4818_v14 = vsel %vm16321_vm15, %v4758_v52, 0.0  ;;  %vm16350_vm15 = vmmov %vm16317_vm0 }
0x1759   :  { %v7402_v59 = vmul.f32 %v14202_v24, %v7398_v54 }
0x175a   :  { %7405 = vrot.lane.b32.xlu1 %v7401_v38, %s10329_s27 }
0x175b   :  { %7407 = vrot.lane.b32.xlu0 %v7402_v59, %s10329_s27 }
0x177a   :  { %4804 = vadd.xlane.f32.xlu0 %v4803_v63  ;;  %v7443_v63 = vmul.f32 %v14238_v46, %v16328_v32  ;;  %v16333_v32 = vld [vmem:[#allocation63_spill] sm:$0xff] }
0x177b   :  { %v4669_v29 = vrot.slane %v4655_v31, %v16333_v32 }
0x177e   :  { %4807 = vadd.xlane.f32.xlu0 %v4806_v6  ;;  %4816 = vadd.xlane.f32.xlu1 %v4815_v49 }
0x1782   :  { %4810 = vadd.xlane.f32.xlu0 %v4809_v35  ;;  %v7447_v35 = vrot.slane %v7443_v63, 7  ;;  %v16335_v63 = vld [vmem:[#allocation33_spill] sm:$0xff] }
0x1786   :  { %4813 = vadd.xlane.f32.xlu0 %v4812_v8 }
0x178a   :  { %4819 = vadd.xlane.f32.xlu0 %v4818_v14 }
0x1791   :  { %v14232_v54 = vpop.xlane.xlu0 %4789 }
0x1792   :  { %16322 = vst [vmem:[#allocation76_spill] sm:$0xff] %v14232_v54 }
0x1795   :  { %v14236_v59 = vpop.xlane.xlu0 %4795 }
0x1796   :  { %16324 = vst [vmem:[#allocation77_spill] sm:$0xff] %v14236_v59 }
0x1797   :  { %v14234_v38 = vpop.xlane.xlu1 %4792 }
0x1798   :  { %16323 = vst [vmem:[#allocation70_spill] sm:$0xff] %v14234_v38 }
0x1799   :  { %v14242_v15 = vpop.xlane.xlu0 %4801 }
0x179a   :  { %16326 = vst [vmem:[#allocation50_spill] sm:$0xff] %v14242_v15 }
0x179b   :  { %v14240_v57 = vpop.xlane.xlu1 %4798 }
0x179c   :  { %16325 = vst [vmem:[#allocation71_spill] sm:$0xff] %v14240_v57 }
0x17cc   :  { %v7406_v19 = vpop.permute.xlu1 %7405 }
0x17cd   :  { %v7408_v0 = vpop.permute.xlu0 %7407  ;;  %v7411_v6 = vadd.f32 %v7406_v19, %v7391_v9  ;;  %v14266_v9 = vrot.slane %v4669_v29, %v16334_v47  ;;  %v16336_v19 = vld [vmem:[#allocation34_spill] sm:$0xff] }
0x17ce   :  { %v7412_v49 = vadd.f32 %v7408_v0, %v7392_v55  ;;  %v4695_v55 = vadd.f32 %v16335_v63, %v16299_v11  ;;  %v16340_v11 = vld [vmem:[#allocation43_spill] sm:$0xff] }
0x17cf   :  { %9722 = vtanh.f32 %v7411_v6  ;;  %v7440_v58 = vmul.f32 %v14249_v53, %v7411_v6  ;;  %v4696_v0 = vadd.f32 %v16336_v19, %v14266_v9  ;;  %v16337_v6 = vld [vmem:[#allocation41_spill] sm:$0xff]  ;;  %v4698_v31 = vadd.f32 %v16341_v41, %v14266_v9 }
0x17d0   :  { %9724 = vtanh.f32 %v7412_v49  ;;  %v7441_v44 = vmul.f32 %v14249_v53, %v7412_v49  ;;  %v4703_v49 = vadd.f32 %v16337_v6, %v14266_v9  ;;  %v4711_v7 = vadd.f32 %v16346_v27, %v14266_v9 }
0x17d1   :  { %v14256_v4 = vadd.f32 %v7446_v45, %v7440_v58  ;;  %9726 = vtanh.f32 %v4695_v55  ;;  %v16338_v45 = vld [vmem:[#allocation35_spill] sm:$0xff]  ;;  %v16342_v55 = vld [vmem:[#allocation45_spill] sm:$0xff] }
0x17d2   :  { %v14258_v8 = vadd.f32 %v7447_v35, %v7441_v44  ;;  %9728 = vtanh.f32 %v4696_v0  ;;  %v4697_v58 = vadd.f32 %v16338_v45, %v14266_v9  ;;  %v14279_v35 = vld [vmem:[%s15965_s12] ss:$0 sm:$0xff]  ;;  %v16339_v44 = vld [vmem:[#allocation56_spill] sm:$0xff]  ;;  %v4707_v0 = vadd.f32 %v16342_v55, %v14266_v9 }
0x17d3   :  { %16330 = vst [vmem:[#allocation92_spill] sm:$0xff] %v14256_v4  ;;  %9730 = vtanh.f32 %v4703_v49  ;;  %v16343_v4 = vld [vmem:[#allocation37_spill] sm:$0xff] }
0x17d4   :  { %16331 = vst [vmem:[#allocation94_spill] sm:$0xff] %v14258_v8  ;;  %9732 = vtanh.f32 %v4697_v58  ;;  %v16344_v58 = vld [vmem:[#allocation47_spill] sm:$0xff] }
0x17d5   :  { %v4709_v3 = vadd.f32 %v16344_v58, %v14266_v9 }
0x17d9   :  { %v9723_v52 = vpop.eup %9722 }
0x17da   :  { %v9725_v14 = vpop.eup %9724  ;;  %7417 = vrot.lane.b32.xlu1 %v9723_v52, %s10332_s8  ;;  %v5365_v52 = vadd.f32 %v14279_v35, %v16339_v44  ;;  %v4699_v44 = vadd.f32 %v16343_v4, %v14266_v9 }
0x17db   :  { %7419 = vrot.lane.b32.xlu0 %v9725_v14, %s10332_s8  ;;  %v4705_v14 = vadd.f32 %v16340_v11, %v14266_v9  ;;  %v9727_v8 = vpop.eup %9726 }
0x17dc   :  { %v14288_v29 = vrot.slane %v5365_v52, %v16333_v32  ;;  %v9729_v5 = vpop.eup %9728  ;;  %v4759_v52 = vmul.f32 %v14051_v10, %v9727_v8 }
0x17dd   :  { %9734 = vtanh.f32 %v4705_v14  ;;  %v9731_v2 = vpop.eup %9730  ;;  %v16345_v14 = vld [vmem:[#allocation38_spill] sm:$0xff]  ;;  %v4760_v61 = vmul.f32 %v14051_v10, %v9729_v5 }
0x17de   :  { %9736 = vtanh.f32 %v4698_v31  ;;  %v5383_v49 = vrot.slane %v14288_v29, %v16333_v32  ;;  %v4700_v13 = vadd.f32 %v16345_v14, %v14266_v9  ;;  %v9733_v18 = vpop.eup %9732  ;;  %v4767_v37 = vmul.f32 %v14051_v10, %v9731_v2 }
0x17df   :  { %9738 = vtanh.f32 %v4707_v0  ;;  %v4821_v0 = vsel %vm16347_vm2, %v4759_v52, 0.0  ;;  %v4824_v28 = vsel %vm16350_vm15, %v4760_v61, 0.0  ;;  %v4761_v52 = vmul.f32 %v14051_v10, %v9733_v18  ;;  %vm16356_vm2 = vmmov %vm16317_vm0 }
0x17e0   :  { %9740 = vtanh.f32 %v4699_v44  ;;  %v14302_v31 = vrot.slane %v5383_v49, %v16334_v47  ;;  %v16348_v44 = vld [vmem:[#allocation39_spill] sm:$0xff]  ;;  %v16349_v49 = vld [vmem:[#allocation17_spill] sm:$0xff]  ;;  %v4845_v59 = vsel %vm16351_vm1, %v4767_v37, 0.0  ;;  %vm16357_vm15 = vmmov %vm16317_vm0 }
0x17e1   :  { %9742 = vtanh.f32 %v4709_v3  ;;  %v4701_v16 = vadd.f32 %v16348_v44, %v14266_v9  ;;  %v4827_v61 = vsel %vm16317_vm0, %v4761_v52, 0.0  ;;  %vm16359_vm1 = vmmov %vm16317_vm0 }
0x17e2   :  { %9744 = vtanh.f32 %v4700_v13  ;;  %v5402_v3 = vadd.f32 %v16349_v49, %v14302_v31  ;;  %v16352_v13 = vld [vmem:[#allocation40_spill] sm:$0xff] }
0x17e3   :  { %9746 = vtanh.f32 %v4711_v7  ;;  %v16353_v7 = vld [vmem:[#allocation19_spill] sm:$0xff] }
0x17e4   :  { %9748 = vtanh.f32 %v4701_v16  ;;  %v5404_v62 = vadd.f32 %v16353_v7, %v14302_v31 }
0x17e5   :  { %9750 = vtanh.f32 %v5402_v3 }
0x17e7   :  { %v9735_v8 = vpop.eup %9734 }
0x17e8   :  { %v9737_v15 = vpop.eup %9736  ;;  %v4769_v5 = vmul.f32 %v14051_v10, %v9735_v8 }
0x17e9   :  { %v9739_v2 = vpop.eup %9738  ;;  %v4762_v18 = vmul.f32 %v14051_v10, %v9737_v15 }
0x17ea   :  { %v9741_v57 = vpop.eup %9740  ;;  %v4851_v37 = vsel %vm16354_vm13, %v4769_v5, 0.0  ;;  %v4771_v8 = vmul.f32 %v14051_v10, %v9739_v2  ;;  %vm16361_vm13 = vmmov %vm16317_vm0 }
0x17eb   :  { %v9743_v26 = vpop.eup %9742  ;;  %v4830_v52 = vsel %vm16356_vm2, %v4762_v18, 0.0  ;;  %v4763_v15 = vmul.f32 %v14051_v10, %v9741_v57  ;;  %vm16362_vm2 = vmmov %vm16317_vm0 }
0x17ec   :  { %v9745_v3 = vpop.eup %9744  ;;  %v4857_v5 = vsel %vm16357_vm15, %v4771_v8, 0.0  ;;  %v4773_v2 = vmul.f32 %v14051_v10, %v9743_v26  ;;  %vm16364_vm15 = vmmov %vm16317_vm0 }
0x17ed   :  { %v9747_v38 = vpop.eup %9746  ;;  %v4833_v18 = vsel %vm16359_vm1, %v4763_v15, 0.0  ;;  %v4764_v57 = vmul.f32 %v14051_v10, %v9745_v3  ;;  %vm16365_vm1 = vmmov %vm16317_vm0 }
0x17ee   :  { %v4863_v8 = vsel %vm16317_vm0, %v4773_v2, 0.0  ;;  %v4775_v26 = vmul.f32 %v14051_v10, %v9747_v38 }
0x17ef   :  { %v4836_v15 = vsel %vm16361_vm13, %v4764_v57, 0.0  ;;  %vm16367_vm13 = vmmov %vm16317_vm0 }
0x17f0   :  { %v4869_v2 = vsel %vm16362_vm2, %v4775_v26, 0.0  ;;  %vm16369_vm2 = vmmov %vm16317_vm0 }
0x17fa   :  { %4822 = vadd.xlane.f32.xlu0 %v4821_v0  ;;  %v4702_v0 = vadd.f32 %v16352_v13, %v14266_v9 }
0x17fc   :  { %9752 = vtanh.f32 %v4702_v0  ;;  %v16358_v0 = vld [vmem:[#allocation44_spill] sm:$0xff] }
0x17fd   :  { %9754 = vtanh.f32 %v5404_v62  ;;  %v5408_v62 = vadd.f32 %v16305_v12, %v14302_v31 }
0x17fe   :  { %4825 = vadd.xlane.f32.xlu0 %v4824_v28  ;;  %4846 = vadd.xlane.f32.xlu1 %v4845_v59  ;;  %v16355_v28 = vld [vmem:[#allocation42_spill] sm:$0xff]  ;;  %v5406_v59 = vadd.f32 %v16303_v34, %v14302_v31 }
0x17ff   :  { %v4704_v16 = vadd.f32 %v16355_v28, %v14266_v9 }
0x1801   :  { %9756 = vtanh.f32 %v4704_v16  ;;  %v16360_v16 = vld [vmem:[#allocation46_spill] sm:$0xff] }
0x1802   :  { %4828 = vadd.xlane.f32.xlu0 %v4827_v61  ;;  %4852 = vadd.xlane.f32.xlu1 %v4851_v37  ;;  %v4706_v61 = vadd.f32 %v16358_v0, %v14266_v9  ;;  %9758 = vtanh.f32 %v5406_v59  ;;  %v9749_v37 = vpop.eup %9748  ;;  %v5410_v59 = vadd.f32 %v16311_v43, %v14302_v31 }
0x1803   :  { %v9751_v1 = vpop.eup %9750  ;;  %v4765_v3 = vmul.f32 %v14051_v10, %v9749_v37 }
0x1804   :  { %9760 = vtanh.f32 %v4706_v61  ;;  %v5466_v38 = vmul.f32 %v14051_v10, %v9751_v1  ;;  %v16363_v61 = vld [vmem:[#allocation48_spill] sm:$0xff] }
0x1805   :  { %9762 = vtanh.f32 %v5408_v62  ;;  %v4710_v62 = vadd.f32 %v16363_v61, %v14266_v9  ;;  %v16366_v1 = vld [vmem:[#allocation16_spill] sm:$0xff] }
0x1806   :  { %4831 = vadd.xlane.f32.xlu0 %v4830_v52  ;;  %4858 = vadd.xlane.f32.xlu1 %v4857_v5  ;;  %v4708_v52 = vadd.f32 %v16360_v16, %v14266_v9  ;;  %v9753_v5 = vpop.eup %9752  ;;  %v5500_v17 = vsel %vm16365_vm1, %v5466_v38, 0.0  ;;  %vm16371_vm1 = vmmov %vm16317_vm0 }
0x1807   :  { %v9755_v54 = vpop.eup %9754  ;;  %v4766_v57 = vmul.f32 %v14051_v10, %v9753_v5 }
0x1808   :  { %9764 = vtanh.f32 %v4708_v52  ;;  %v5468_v26 = vmul.f32 %v14051_v10, %v9755_v54  ;;  %v5401_v52 = vadd.f32 %v16366_v1, %v14302_v31  ;;  %v16368_v54 = vld [vmem:[#allocation18_spill] sm:$0xff] }
0x1809   :  { %9766 = vtanh.f32 %v5410_v59 }
0x180a   :  { %4834 = vadd.xlane.f32.xlu0 %v4833_v18  ;;  %4864 = vadd.xlane.f32.xlu1 %v4863_v8  ;;  %v4839_v8 = vsel %vm16364_vm15, %v4765_v3, 0.0  ;;  %9768 = vtanh.f32 %v4710_v62  ;;  %v5506_v9 = vsel %vm16367_vm13, %v5468_v26, 0.0  ;;  %vm16370_vm15 = vmmov %vm16317_vm0 }
0x180b   :  { %v9757_v18 = vpop.eup %9756  ;;  %9770 = vtanh.f32 %v5401_v52  ;;  %vm16372_vm13 = vmmov %vm16317_vm0 }
0x180c   :  { %v9759_v37 = vpop.eup %9758 }
0x180d   :  { %v5470_v3 = vmul.f32 %v14051_v10, %v9759_v37 }
0x180e   :  { %4837 = vadd.xlane.f32.xlu0 %v4836_v15  ;;  %4870 = vadd.xlane.f32.xlu1 %v4869_v2  ;;  %v9761_v59 = vpop.eup %9760  ;;  %v4842_v15 = vsel %vm16317_vm0, %v4766_v57, 0.0  ;;  %v4768_v2 = vmul.f32 %v14051_v10, %v9757_v18  ;;  %v5405_v18 = vadd.f32 %v16300_v48, %v14302_v31 }
0x180f   :  { %v9763_v38 = vpop.eup %9762  ;;  %v4770_v57 = vmul.f32 %v14051_v10, %v9761_v59  ;;  %v5407_v59 = vadd.f32 %v16301_v20, %v14302_v31 }
0x1810   :  { %v4848_v62 = vsel %vm16369_vm2, %v4768_v2, 0.0  ;;  %v5472_v26 = vmul.f32 %v14051_v10, %v9763_v38  ;;  %vm16373_vm2 = vmmov %vm16317_vm0 }
0x1811   :  { %v4854_v37 = vsel %vm16371_vm1, %v4770_v57, 0.0  ;;  %vm16375_vm1 = vmmov %vm16317_vm0 }
0x1812   :  { %4840 = vadd.xlane.f32.xlu0 %v4839_v8  ;;  %5501 = vadd.xlane.f32.xlu1 %v5500_v17  ;;  %v5403_v17 = vadd.f32 %v16368_v54, %v14302_v31  ;;  %v9765_v5 = vpop.eup %9764  ;;  %v5512_v8 = vsel %vm16370_vm15, %v5470_v3, 0.0  ;;  %v5518_v52 = vsel %vm16317_vm0, %v5472_v26, 0.0  ;;  %vm16374_vm15 = vmmov %vm16317_vm0  ;;  %v5376_v26 = vcombine.high %v14288_v29, %v14288_v29 }
0x1813   :  { %v9767_v51 = vpop.eup %9766 }
0x1814   :  { %9772 = vtanh.f32 %v5403_v17  ;;  %v9769_v2 = vpop.eup %9768 }
0x1815   :  { %9774 = vtanh.f32 %v5405_v18  ;;  %v4774_v17 = vmul.f32 %v14051_v10, %v9769_v2  ;;  %v5411_v18 = vadd.f32 %v16312_v33, %v14302_v31  ;;  %v5413_v2 = vadd.f32 %v16315_v36, %v14302_v31 }
0x1816   :  { %4843 = vadd.xlane.f32.xlu0 %v4842_v15  ;;  %5507 = vadd.xlane.f32.xlu1 %v5506_v9  ;;  %v4772_v15 = vmul.f32 %v14051_v10, %v9765_v5  ;;  %v5474_v9 = vmul.f32 %v14051_v10, %v9767_v51  ;;  %9776 = vtanh.f32 %v5407_v59  ;;  %v5409_v51 = vadd.f32 %v16304_v25, %v14302_v31 }
0x1817   :  { %v4866_v5 = vsel %vm16374_vm15, %v4774_v17, 0.0  ;;  %v5415_v17 = vadd.f32 %v16316_v22, %v14302_v31  ;;  %vm16380_vm15 = vmmov %vm16317_vm0 }
0x1818   :  { %v4860_v3 = vsel %vm16372_vm13, %v4772_v15, 0.0  ;;  %v5524_v38 = vsel %vm16373_vm2, %v5474_v9, 0.0  ;;  %9778 = vtanh.f32 %v5409_v51  ;;  %v5390_v9 = vrot.slane %v5376_v26, %v16333_v32  ;;  %vm16377_vm13 = vmmov %vm16317_vm0 }
0x1819   :  { %9780 = vtanh.f32 %v5411_v18  ;;  %vm16378_vm2 = vmmov %vm16317_vm0 }
0x181a   :  { %4849 = vadd.xlane.f32.xlu0 %v4848_v62  ;;  %5513 = vadd.xlane.f32.xlu1 %v5512_v8  ;;  %v9771_v62 = vpop.eup %9770  ;;  %9782 = vtanh.f32 %v5413_v2 }
0x181b   :  { %v5465_v8 = vmul.f32 %v14051_v10, %v9771_v62  ;;  %v14398_v62 = vpop.xlane.xlu0 %4804  ;;  %9784 = vtanh.f32 %v5415_v17 }
0x181c   :  { %16376 = vst [vmem:[#allocation99_spill] sm:$0xff] %v14398_v62 }
0x181e   :  { %4855 = vadd.xlane.f32.xlu0 %v4854_v37  ;;  %5519 = vadd.xlane.f32.xlu1 %v5518_v52  ;;  %v9773_v57 = vpop.eup %9772  ;;  %v5497_v37 = vsel %vm16375_vm1, %v5465_v8, 0.0  ;;  %vm16382_vm1 = vmmov %vm16317_vm0 }
0x181f   :  { %v5467_v52 = vmul.f32 %v14051_v10, %v9773_v57  ;;  %v9775_v15 = vpop.eup %9774 }
0x1820   :  { %v5469_v29 = vmul.f32 %v14051_v10, %v9775_v15 }
0x1821   :  { %v5503_v59 = vsel %vm16317_vm0, %v5467_v52, 0.0  ;;  %v14406_v52 = vpop.xlane.xlu0 %4807 }
0x1822   :  { %4861 = vadd.xlane.f32.xlu0 %v4860_v3  ;;  %5525 = vadd.xlane.f32.xlu1 %v5524_v38  ;;  %v9777_v3 = vpop.eup %9776  ;;  %v14394_v38 = vrot.slane %v5390_v9, %v16334_v47  ;;  %v5509_v51 = vsel %vm16377_vm13, %v5469_v29, 0.0  ;;  %16379 = vst [vmem:[#allocation98_spill] sm:$0xff] %v14406_v52  ;;  %vm16385_vm13 = vmmov %vm16317_vm0 }
0x1823   :  { %v9779_v8 = vpop.eup %9778 }
0x1824   :  { %v5417_v57 = vadd.f32 %v16336_v19, %v14394_v38  ;;  %v5473_v18 = vmul.f32 %v14051_v10, %v9779_v8  ;;  %v5419_v15 = vadd.f32 %v16341_v41, %v14394_v38  ;;  %v5421_v29 = vadd.f32 %v16345_v14, %v14394_v38 }
0x1825   :  { %v5423_v8 = vadd.f32 %v16352_v13, %v14394_v38 }
0x1826   :  { %4867 = vadd.xlane.f32.xlu0 %v4866_v5  ;;  %v5471_v5 = vmul.f32 %v14051_v10, %v9777_v3  ;;  %9786 = vtanh.f32 %v5417_v57  ;;  %v5521_v9 = vsel %vm16380_vm15, %v5473_v18, 0.0  ;;  %v14414_v3 = vpop.xlane.xlu0 %4810  ;;  %vm16391_vm15 = vmmov %vm16317_vm0 }
0x1827   :  { %9788 = vtanh.f32 %v5419_v15  ;;  %16381 = vst [vmem:[#allocation96_spill] sm:$0xff] %v14414_v3  ;;  %v16384_v15 = vld [vmem:[#allocation58_spill] sm:$0xff] }
0x1828   :  { %v5515_v26 = vsel %vm16378_vm2, %v5471_v5, 0.0  ;;  %9790 = vtanh.f32 %v5421_v29  ;;  %vm16388_vm2 = vmmov %vm16317_vm0  ;;  %v16390_v3 = vld [vmem:[#allocation66_spill] sm:$0xff] }
0x1829   :  { %9792 = vtanh.f32 %v5423_v8 }
0x182a   :  { %5498 = vadd.xlane.f32.xlu0 %v5497_v37  ;;  %v9781_v37 = vpop.eup %9780 }
0x182b   :  { %v5475_v2 = vmul.f32 %v14051_v10, %v9781_v37  ;;  %v14422_v37 = vpop.xlane.xlu0 %4813 }
0x182c   :  { %16383 = vst [vmem:[#allocation89_spill] sm:$0xff] %v14422_v37 }
0x182d   :  { %v5527_v17 = vsel %vm16382_vm1, %v5475_v2, 0.0  ;;  %v5425_v2 = vadd.f32 %v16355_v28, %v14394_v38  ;;  %vm16393_vm1 = vmmov %vm16317_vm0 }
0x182e   :  { %5504 = vadd.xlane.f32.xlu0 %v5503_v59  ;;  %v9783_v59 = vpop.eup %9782 }
0x182f   :  { %v9785_v5 = vpop.eup %9784  ;;  %9794 = vtanh.f32 %v5425_v2  ;;  %v7431_v2 = vmul.f32 %v14238_v46, %v16390_v3 }
0x1830   :  { %v9787_v18 = vpop.eup %9786 }
0x1831   :  { %v5481_v29 = vmul.f32 %v14051_v10, %v9787_v18  ;;  %v16389_v18 = vld [vmem:[#allocation65_spill] sm:$0xff] }
0x1832   :  { %5510 = vadd.xlane.f32.xlu0 %v5509_v51  ;;  %v5477_v51 = vmul.f32 %v14051_v10, %v9783_v59 }
0x1833   :  { %v5545_v8 = vsel %vm16388_vm2, %v5481_v29, 0.0  ;;  %vm16396_vm2 = vmmov %vm16317_vm0 }
0x1834   :  { %v5533_v57 = vsel %vm16317_vm0, %v5477_v51, 0.0 }
0x1836   :  { %5516 = vadd.xlane.f32.xlu0 %v5515_v26  ;;  %v5479_v26 = vmul.f32 %v14051_v10, %v9785_v5  ;;  %v14433_v5 = vpop.xlane.xlu1 %4816 }
0x1837   :  { %16386 = vst [vmem:[#allocation97_spill] sm:$0xff] %v14433_v5 }
0x1838   :  { %v5539_v59 = vsel %vm16385_vm13, %v5479_v26, 0.0  ;;  %vm16395_vm13 = vcmask 1041409  }
0x183a   :  { %5522 = vadd.xlane.f32.xlu0 %v5521_v9  ;;  %v6086_v9 = vadd.f32 %v14279_v35, %v16384_v15  ;;  %v14437_v15 = vpop.xlane.xlu0 %4819 }
0x183b   :  { %16387 = vst [vmem:[#allocation73_spill] sm:$0xff] %v14437_v15  ;;  %v5429_v15 = vadd.f32 %v16360_v16, %v14394_v38 }
0x183c   :  { %v14431_v51 = vrot.slane %v6086_v9, %v16333_v32 }
0x183e   :  { %5528 = vadd.xlane.f32.xlu0 %v5527_v17  ;;  %v9789_v17 = vpop.eup %9788  ;;  %v6104_v9 = vrot.slane %v14431_v51, %v16333_v32 }
0x183f   :  { %v5483_v37 = vmul.f32 %v14051_v10, %v9789_v17  ;;  %v9791_v26 = vpop.eup %9790 }
0x1840   :  { %v9793_v62 = vpop.eup %9792  ;;  %v14457_v3 = vrot.slane %v6104_v9, %v16334_v47 }
0x1841   :  { %v5551_v17 = vsel %vm16391_vm15, %v5483_v37, 0.0  ;;  %vm16397_vm15 = vmmov %vm16317_vm0 }
0x1842   :  { %5534 = vadd.xlane.f32.xlu0 %v5533_v57  ;;  %v5427_v57 = vadd.f32 %v16358_v0, %v14394_v38  ;;  %v6122_v9 = vadd.f32 %v16366_v1, %v14457_v3 }
0x1844   :  { %9796 = vtanh.f32 %v5427_v57  ;;  %v7435_v57 = vrot.slane %v7431_v2, 7  ;;  %v6124_v2 = vadd.f32 %v16368_v54, %v14457_v3 }
0x1845   :  { %9798 = vtanh.f32 %v5429_v15 }
0x1846   :  { %5540 = vadd.xlane.f32.xlu0 %v5539_v59  ;;  %v7430_v59 = vmul.f32 %v14238_v46, %v16389_v18  ;;  %v5431_v46 = vadd.f32 %v16363_v61, %v14394_v38 }
0x1848   :  { %v7434_v21 = vrot.slane %v7430_v59, 7  ;;  %9800 = vtanh.f32 %v5431_v46  ;;  %v6126_v46 = vadd.f32 %v16300_v48, %v14457_v3 }
0x1849   :  { %9802 = vtanh.f32 %v6122_v9  ;;  %v6130_v9 = vadd.f32 %v16304_v25, %v14457_v3 }
0x184a   :  { %5546 = vadd.xlane.f32.xlu0 %v5545_v8  ;;  %v5485_v8 = vmul.f32 %v14051_v10, %v9791_v26  ;;  %9804 = vtanh.f32 %v6124_v2  ;;  %v6097_v2 = vcombine.high %v14431_v51, %v14431_v51  ;;  %v5418_v51 = vadd.f32 %v16338_v45, %v14394_v38 }
0x184b   :  { %9806 = vtanh.f32 %v6126_v46  ;;  %v5414_v46 = vadd.f32 %v16313_v30, %v14302_v31 }
0x184c   :  { %v7418_v5 = vpop.permute.xlu1 %7417 }
0x184d   :  { %v7420_v52 = vpop.permute.xlu0 %7419  ;;  %v7423_v29 = vmul.f32 %v14200_v39, %v7418_v5  ;;  %v5557_v5 = vsel %vm16393_vm1, %v5485_v8, 0.0  ;;  %vm16398_vm1 = vmmov %vm16317_vm0 }
0x184e   :  { %v7424_v18 = vmul.f32 %v14202_v24, %v7420_v52  ;;  %5552 = vadd.xlane.f32.xlu0 %v5551_v17  ;;  %v5487_v24 = vmul.f32 %v14051_v10, %v9793_v62  ;;  %v9795_v52 = vpop.eup %9794 }
0x184f   :  { %v7426_v50 = vmul.f32 %v14249_v53, %v7423_v29 }
0x1850   :  { %v7427_v39 = vmul.f32 %v14249_v53, %v7424_v18  ;;  %v5563_v15 = vsel %vm16317_vm0, %v5487_v24, 0.0  ;;  %v6128_v24 = vadd.f32 %v16301_v20, %v14457_v3 }
0x1851   :  { %v14460_v37 = vadd.f32 %v7434_v21, %v7426_v50  ;;  %v5489_v50 = vmul.f32 %v14051_v10, %v9795_v52  ;;  %v9797_v21 = vpop.eup %9796 }
0x1852   :  { %v14464_v26 = vadd.f32 %v7435_v57, %v7427_v39  ;;  %5558 = vadd.xlane.f32.xlu0 %v5557_v5  ;;  %v5491_v8 = vmul.f32 %v14051_v10, %v9797_v21  ;;  %v9799_v18 = vpop.eup %9798  ;;  %9808 = vtanh.f32 %v6128_v24  ;;  %v5412_v21 = vadd.f32 %v16314_v42, %v14302_v31 }
0x1853   :  { %16392 = vst [vmem:[#allocation95_spill] sm:$0xff] %v14460_v37  ;;  %v7454_v59 = vrot.slane %v14460_v37, 7  ;;  %v5569_v17 = vsel %vm16396_vm2, %v5489_v50, 0.0  ;;  %v5493_v39 = vmul.f32 %v14051_v10, %v9799_v18  ;;  %v9801_v5 = vpop.eup %9800  ;;  %9810 = vtanh.f32 %v6130_v9  ;;  %vm16400_vm2 = vmmov %vm16317_vm0 }
0x1854   :  { %16394 = vst [vmem:[#allocation100_spill] sm:$0xff] %v14464_v26  ;;  %v7455_v29 = vrot.slane %v14464_v26, 6  ;;  %v5575_v57 = vsel %vm16397_vm15, %v5491_v8, 0.0  ;;  %9812 = vtanh.f32 %v5412_v21  ;;  %v6134_v24 = vadd.f32 %v16315_v36, %v14457_v3  ;;  %vm16401_vm15 = vmmov %vm16317_vm0 }
0x1855   :  { %v5581_v52 = vsel %vm16398_vm1, %v5493_v39, 0.0  ;;  %v5416_v39 = vadd.f32 %v16335_v63, %v14302_v31  ;;  %v5420_v31 = vadd.f32 %v16343_v4, %v14394_v38  ;;  %v5422_v9 = vadd.f32 %v16348_v44, %v14394_v38  ;;  %vm16402_vm1 = vmmov %vm16317_vm0 }
0x1856   :  { %5564 = vadd.xlane.f32.xlu0 %v5563_v15  ;;  %v7456_v62 = vsel %vm16395_vm13, %v7455_v29, %v7454_v59  ;;  %v5495_v59 = vmul.f32 %v14051_v10, %v9801_v5  ;;  %v9803_v29 = vpop.eup %9802  ;;  %vm16399_vm13 = vmmov %vm16317_vm0  ;;  %v6111_v5 = vrot.slane %v6097_v2, %v16333_v32  ;;  %v6136_v21 = vadd.f32 %v16316_v22, %v14457_v3 }
0x1857   :  { %7457 = vrot.lane.b32.xlu1 %v7456_v62, %s10329_s27  ;;  %v6186_v50 = vmul.f32 %v14051_v10, %v9803_v29  ;;  %v9805_v62 = vpop.eup %9804  ;;  %v6131_v26 = vadd.f32 %v16311_v43, %v14457_v3 }
0x1858   :  { %v5587_v15 = vsel %vm16317_vm0, %v5495_v59, 0.0  ;;  %v6188_v18 = vmul.f32 %v14051_v10, %v9805_v62 }
0x1859   :  { %v6218_v8 = vsel %vm16399_vm13, %v6186_v50, 0.0  ;;  %v14521_v50 = vrot.slane %v6111_v5, %v16334_v47  ;;  %vm16403_vm13 = vmmov %vm16317_vm0 }
0x185a   :  { %5570 = vadd.xlane.f32.xlu0 %v5569_v17  ;;  %v6132_v17 = vadd.f32 %v16312_v33, %v14457_v3  ;;  %v6224_v10 = vsel %vm16400_vm2, %v6188_v18, 0.0  ;;  %v5428_v18 = vadd.f32 %v16342_v55, %v14394_v38  ;;  %vm16404_vm2 = vmmov %vm16317_vm0 }
0x185c   :  { %9814 = vtanh.f32 %v6132_v17  ;;  %v5426_v17 = vadd.f32 %v16340_v11, %v14394_v38 }
0x185d   :  { %9816 = vtanh.f32 %v5414_v46 }
0x185e   :  { %5576 = vadd.xlane.f32.xlu0 %v5575_v57  ;;  %v9807_v57 = vpop.eup %9806  ;;  %9818 = vtanh.f32 %v5416_v39  ;;  %v6138_v39 = vadd.f32 %v16336_v19, %v14521_v50 }
0x185f   :  { %v9809_v29 = vpop.eup %9808  ;;  %9820 = vtanh.f32 %v5418_v51 }
0x1860   :  { %9822 = vtanh.f32 %v6134_v24 }
0x1861   :  { %9824 = vtanh.f32 %v5420_v31 }
0x1862   :  { %5582 = vadd.xlane.f32.xlu0 %v5581_v52  ;;  %v14511_v52 = vld [vmem:[%s15966_s13] ss:$0 sm:$0xff]  ;;  %9826 = vtanh.f32 %v5422_v9 }
0x1863   :  { %v6190_v59 = vmul.f32 %v14511_v52, %v9807_v57  ;;  %v6192_v2 = vmul.f32 %v14511_v52, %v9809_v29  ;;  %v5430_v57 = vadd.f32 %v16344_v58, %v14394_v38  ;;  %v6140_v29 = vadd.f32 %v16341_v41, %v14521_v50 }
0x1865   :  { %v6230_v62 = vsel %vm16401_vm15, %v6190_v59, 0.0  ;;  %v6236_v51 = vsel %vm16402_vm1, %v6192_v2, 0.0  ;;  %v5432_v59 = vadd.f32 %v16346_v27, %v14394_v38  ;;  %vm16405_vm15 = vmmov %vm16317_vm0 }
0x1866   :  { %5588 = vadd.xlane.f32.xlu0 %v5587_v15  ;;  %v5424_v15 = vadd.f32 %v16337_v6, %v14394_v38  ;;  %v6144_v38 = vadd.f32 %v16352_v13, %v14521_v50  ;;  %vm16406_vm1 = vmmov %vm16317_vm0 }
0x1868   :  { %9828 = vtanh.f32 %v5424_v15  ;;  %v6142_v15 = vadd.f32 %v16345_v14, %v14521_v50 }
0x1869   :  { %9830 = vtanh.f32 %v6136_v21 }
0x186a   :  { %6219 = vadd.xlane.f32.xlu0 %v6218_v8  ;;  %v9811_v8 = vpop.eup %9810  ;;  %9832 = vtanh.f32 %v5426_v17 }
0x186b   :  { %v9813_v46 = vpop.eup %9812  ;;  %v6194_v5 = vmul.f32 %v14511_v52, %v9811_v8  ;;  %9834 = vtanh.f32 %v5428_v18 }
0x186c   :  { %v9815_v24 = vpop.eup %9814  ;;  %9836 = vtanh.f32 %v5430_v57  ;;  %v6146_v57 = vadd.f32 %v16355_v28, %v14521_v50 }
0x186d   :  { %v9817_v31 = vpop.eup %9816  ;;  %9838 = vtanh.f32 %v6138_v39  ;;  %v6242_v2 = vsel %vm16317_vm0, %v6194_v5, 0.0  ;;  %v6196_v17 = vmul.f32 %v14511_v52, %v9815_v24  ;;  %v6152_v5 = vadd.f32 %v16363_v61, %v14521_v50 }
0x186e   :  { %6225 = vadd.xlane.f32.xlu0 %v6224_v10  ;;  %v5476_v10 = vmul.f32 %v14511_v52, %v9813_v46  ;;  %v9819_v9 = vpop.eup %9818  ;;  %v5478_v46 = vmul.f32 %v14511_v52, %v9817_v31  ;;  %9840 = vtanh.f32 %v5432_v59 }
0x186f   :  { %v9821_v21 = vpop.eup %9820  ;;  %9842 = vtanh.f32 %v6140_v29  ;;  %v6248_v59 = vsel %vm16404_vm2, %v6196_v17, 0.0  ;;  %vm16409_vm2 = vmmov %vm16317_vm0 }
0x1870   :  { %v9823_v8 = vpop.eup %9822  ;;  %v5530_v18 = vsel %vm16403_vm13, %v5476_v10, 0.0  ;;  %9844 = vtanh.f32 %v6142_v15  ;;  %v5480_v15 = vmul.f32 %v14511_v52, %v9819_v9  ;;  %vm16408_vm13 = vmmov %vm16317_vm0 }
0x1871   :  { %v9825_v39 = vpop.eup %9824  ;;  %v6198_v31 = vmul.f32 %v14511_v52, %v9823_v8  ;;  %9846 = vtanh.f32 %v6144_v38  ;;  %v6127_v38 = vadd.f32 %v16303_v34, %v14457_v3  ;;  %v6129_v8 = vadd.f32 %v16305_v12, %v14457_v3 }
0x1872   :  { %6231 = vadd.xlane.f32.xlu0 %v6230_v62  ;;  %v6807_v62 = vadd.f32 %v14279_v35, %v13989_v60  ;;  %v6148_v60 = vadd.f32 %v16358_v0, %v14521_v50  ;;  %v9827_v35 = vpop.eup %9826  ;;  %9848 = vtanh.f32 %v6146_v57  ;;  %v5484_v12 = vmul.f32 %v14511_v52, %v9825_v39 }
0x1873   :  { %v9829_v24 = vpop.eup %9828  ;;  %v6254_v57 = vsel %vm16406_vm1, %v6198_v31, 0.0  ;;  %v5486_v31 = vmul.f32 %v14511_v52, %v9827_v35  ;;  %v6133_v39 = vadd.f32 %v16314_v42, %v14457_v3  ;;  %vm16411_vm1 = vmmov %vm16317_vm0 }
0x1874   :  { %v14561_v10 = vrot.slane %v6807_v62, %v16333_v32  ;;  %v9831_v29 = vpop.eup %9830  ;;  %9850 = vtanh.f32 %v6148_v60  ;;  %v6125_v62 = vadd.f32 %v16353_v7, %v14457_v3 }
0x1875   :  { %v9833_v53 = vpop.eup %9832 }
0x1876   :  { %6237 = vadd.xlane.f32.xlu0 %v6236_v51  ;;  %v6150_v51 = vadd.f32 %v16360_v16, %v14521_v50  ;;  %v9835_v17 = vpop.eup %9834  ;;  %v6825_v9 = vrot.slane %v14561_v10, %v16333_v32 }
0x1878   :  { %9852 = vtanh.f32 %v6150_v51  ;;  %v5482_v51 = vmul.f32 %v14511_v52, %v9821_v21 }
0x1879   :  { %9854 = vtanh.f32 %v6152_v5 }
0x187a   :  { %6243 = vadd.xlane.f32.xlu0 %v6242_v2  ;;  %v5536_v2 = vsel %vm16405_vm15, %v5478_v46, 0.0  ;;  %v9837_v46 = vpop.eup %9836  ;;  %vm16410_vm15 = vmmov %vm16317_vm0 }
0x187b   :  { %5531 = vadd.xlane.f32.xlu1 %v5530_v18  ;;  %v6123_v18 = vadd.f32 %v16349_v49, %v14457_v3  ;;  %v9839_v60 = vpop.eup %9838 }
0x187c   :  { %v9841_v37 = vpop.eup %9840 }
0x187d   :  { %9856 = vtanh.f32 %v6123_v18  ;;  %v9843_v5 = vpop.eup %9842 }
0x187e   :  { %6249 = vadd.xlane.f32.xlu0 %v6248_v59  ;;  %v6200_v59 = vmul.f32 %v14511_v52, %v9831_v29  ;;  %9858 = vtanh.f32 %v6125_v62  ;;  %v5488_v29 = vmul.f32 %v14511_v52, %v9829_v24  ;;  %v9845_v18 = vpop.eup %9844  ;;  %v5548_v62 = vsel %vm16409_vm2, %v5482_v51, 0.0  ;;  %vm16413_vm2 = vmmov %vm16317_vm0 }
0x187f   :  { %5537 = vadd.xlane.f32.xlu1 %v5536_v2  ;;  %v5542_v2 = vsel %vm16317_vm0, %v5480_v15, 0.0  ;;  %9860 = vtanh.f32 %v6127_v38  ;;  %v6202_v15 = vmul.f32 %v14511_v52, %v9839_v60  ;;  %v9847_v35 = vpop.eup %9846  ;;  %v5490_v38 = vmul.f32 %v14511_v52, %v9833_v53 }
0x1880   :  { %v6260_v21 = vsel %vm16408_vm13, %v6200_v59, 0.0  ;;  %9862 = vtanh.f32 %v6129_v8  ;;  %v9849_v59 = vpop.eup %9848  ;;  %v5554_v60 = vsel %vm16410_vm15, %v5484_v12, 0.0  ;;  %v5560_v8 = vsel %vm16411_vm1, %v5486_v31, 0.0  ;;  %vm16412_vm13 = vmmov %vm16317_vm0 }
0x1881   :  { %9864 = vtanh.f32 %v6131_v26  ;;  %v5496_v26 = vmul.f32 %v14511_v52, %v9841_v37  ;;  %v9851_v51 = vpop.eup %9850  ;;  %v6204_v42 = vmul.f32 %v14511_v52, %v9843_v5  ;;  %v6206_v12 = vmul.f32 %v14511_v52, %v9845_v18  ;;  %vm16414_vm15 = vmmov %vm16317_vm0 }
0x1882   :  { %6255 = vadd.xlane.f32.xlu0 %v6254_v57  ;;  %v14587_v57 = vrot.slane %v6825_v9, %v16334_v47  ;;  %v5492_v9 = vmul.f32 %v14511_v52, %v9835_v17  ;;  %v9853_v17 = vpop.eup %9852  ;;  %v6208_v31 = vmul.f32 %v14511_v52, %v9847_v35  ;;  %9866 = vtanh.f32 %v6133_v39  ;;  %vm16415_vm1 = vmmov %vm16317_vm0 }
0x1883   :  { %5543 = vadd.xlane.f32.xlu1 %v5542_v2  ;;  %v5494_v2 = vmul.f32 %v14511_v52, %v9837_v46  ;;  %v9855_v37 = vpop.eup %9854  ;;  %v14614_v5 = vsel %vm16413_vm2, %v5490_v38, 0.0  ;;  %v6135_v18 = vadd.f32 %v16313_v30, %v14457_v3  ;;  %v14626_v39 = vsel %vm16317_vm0, %v5496_v26, 0.0  ;;  %vm16417_vm2 = vmmov %vm16317_vm0  ;;  %v16420_v30 = vld [vmem:[#allocation74_spill] sm:$0xff] }
0x1884   :  { %16407 = vst [vmem:[#allocation72_spill] sm:$0xff] %v14587_v57  ;;  %v6843_v53 = vadd.f32 %v16366_v1, %v14587_v57  ;;  %v6845_v46 = vadd.f32 %v16368_v54, %v14587_v57  ;;  %v6139_v38 = vadd.f32 %v16338_v45, %v14521_v50  ;;  %v6847_v54 = vadd.f32 %v16300_v48, %v14587_v57 }
0x1885   :  { %v6278_v26 = vsel %vm16417_vm2, %v6206_v12, 0.0  ;;  %v14643_v45 = vadd.f32 %v16348_v44, %v14521_v50  ;;  %v6214_v44 = vmul.f32 %v14511_v52, %v9853_v17  ;;  %v16421_v17 = vld [vmem:[#allocation53_spill] sm:$0xff]  ;;  %vm16424_vm2 = vmmov %vm16317_vm0 }
0x1886   :  { %6261 = vadd.xlane.f32.xlu0 %v6260_v21  ;;  %v6266_v21 = vsel %vm16317_vm0, %v6202_v15, 0.0  ;;  %v14618_v15 = vsel %vm16414_vm15, %v5492_v9, 0.0  ;;  %9868 = vtanh.f32 %v6843_v53  ;;  %vm16418_vm15 = vmmov %vm16317_vm0  ;;  %v4872_v53 = vadd.f32 %v14192_v40, %v13513_v23 }
0x1887   :  { %v14594_v24 = vpop.xlane.xlu0 %4822  ;;  %5549 = vadd.xlane.f32.xlu1 %v5548_v62  ;;  %v5566_v62 = vsel %vm16412_vm13, %v5488_v29, 0.0  ;;  %v6210_v29 = vmul.f32 %v14511_v52, %v9849_v59  ;;  %v9857_v35 = vpop.eup %9856  ;;  %vm16416_vm13 = vmmov %vm16317_vm0  ;;  %9870 = vtanh.f32 %v6845_v46  ;;  %v6818_v46 = vcombine.high %v14561_v10, %v14561_v10 }
0x1888   :  { %v9859_v59 = vpop.eup %9858  ;;  %v6272_v9 = vsel %vm16416_vm13, %v6204_v42, 0.0  ;;  %9872 = vtanh.f32 %v6135_v18  ;;  %v6849_v40 = vadd.f32 %v16301_v20, %v14587_v57  ;;  %v4904_v34 = vmul.f32 %v4872_v53, %v16421_v17  ;;  %vm16422_vm13 = vmmov %vm16317_vm0 }
0x1889   :  { %v9861_v1 = vpop.eup %9860  ;;  %9874 = vtanh.f32 %v6847_v54  ;;  %v6189_v18 = vmul.f32 %v14511_v52, %v9859_v59  ;;  %v16423_v59 = vld [vmem:[#allocation69_spill] sm:$0xff] }
0x188a   :  { %6267 = vadd.xlane.f32.xlu0 %v6266_v21  ;;  %v14623_v21 = vsel %vm16415_vm1, %v5494_v2, 0.0  ;;  %v14637_v2 = vadd.f32 %v16343_v4, %v14521_v50  ;;  %v9863_v42 = vpop.eup %9862  ;;  %vm16419_vm1 = vmmov %vm16317_vm0 }
0x188b   :  { %v14611_v43 = vpop.xlane.xlu0 %4825  ;;  %5555 = vadd.xlane.f32.xlu1 %v5554_v60  ;;  %v6137_v60 = vadd.f32 %v16335_v63, %v14457_v3  ;;  %v6284_v3 = vsel %vm16418_vm15, %v6208_v31, 0.0  ;;  %v14647_v48 = vpop.xlane.xlu1 %4846  ;;  %v6290_v4 = vsel %vm16419_vm1, %v6210_v29, 0.0  ;;  %v4874_v31 = vadd.f32 %v14196_v56, %v13513_v23  ;;  %vm16425_vm15 = vmmov %vm16317_vm0 }
0x188c   :  { %v9865_v12 = vpop.eup %9864  ;;  %v6216_v29 = vmul.f32 %v14511_v52, %v9855_v37  ;;  %v6191_v56 = vmul.f32 %v14511_v52, %v9861_v1  ;;  %v6193_v10 = vmul.f32 %v14511_v52, %v9863_v42  ;;  %v14673_v1 = vsel %vm16422_vm13, %v6214_v44, 0.0  ;;  %vm16426_vm1 = vmmov %vm16317_vm0 }
0x188d   :  { %9876 = vtanh.f32 %v6137_v60  ;;  %v9867_v37 = vpop.eup %9866  ;;  %v14669_v54 = vmul.f32 %v4874_v31, %v16421_v17  ;;  %v14687_v53 = vsel %vm16426_vm1, %v6189_v18, 0.0  ;;  %vm16427_vm13 = vmmov %vm16317_vm0 }
0x188e   :  { %6273 = vadd.xlane.f32.xlu0 %v6272_v9  ;;  %v6212_v9 = vmul.f32 %v14511_v52, %v9851_v51  ;;  %v6187_v51 = vmul.f32 %v14511_v52, %v9857_v35  ;;  %9878 = vtanh.f32 %v6139_v38  ;;  %v6832_v35 = vrot.slane %v6818_v46, %v16333_v32  ;;  %v16428_v46 = vld [vmem:[#allocation60_spill] sm:$0xff]  ;;  %vm16437_vm1 = vmmov %vm16317_vm0 }
0x188f   :  { %v4829_v63 = vpop.xlane.xlu0 %4828  ;;  %5561 = vadd.xlane.f32.xlu1 %v5560_v8  ;;  %v4873_v8 = vadd.f32 %v16420_v30, %v13513_v23  ;;  %v6195_v30 = vmul.f32 %v14511_v52, %v9865_v12  ;;  %9880 = vtanh.f32 %v6849_v40  ;;  %v14681_v42 = vsel %vm16424_vm2, %v6216_v29, 0.0  ;;  %vm16429_vm2 = vmmov %vm16317_vm0 }
0x1890   :  { %v6296_v20 = vsel %vm16317_vm0, %v6212_v9, 0.0  ;;  %v14684_v38 = vsel %vm16425_vm15, %v6187_v51, 0.0  ;;  %v14690_v44 = vsel %vm16317_vm0, %v6191_v56, 0.0  ;;  %v14693_v9 = vsel %vm16427_vm13, %v6193_v10, 0.0  ;;  %v9869_v31 = vpop.eup %9868  ;;  %v16430_v56 = vld [vmem:[#allocation51_spill] sm:$0xff]  ;;  %vm16435_vm15 = vmmov %vm16317_vm0 }
0x1891   :  { %v4905_v60 = vmul.f32 %v4873_v8, %v16421_v17  ;;  %v6851_v12 = vadd.f32 %v16304_v25, %v14587_v57  ;;  %v4971_v40 = vrot.slane %v4904_v34, %v16428_v46  ;;  %v14703_v29 = vmul.f32 %v14511_v52, %v9867_v37  ;;  %v9871_v18 = vpop.eup %9870  ;;  %v16431_v34 = vld [vmem:[#allocation76_spill] sm:$0xff]  ;;  %v16432_v37 = vld [vmem:[#allocation78_spill] sm:$0xff] }
0x1892   :  { %6279 = vadd.xlane.f32.xlu0 %v6278_v26  ;;  %v14678_v26 = vpop.xlane.xlu1 %4852  ;;  %v6853_v51 = vadd.f32 %v16312_v33, %v14587_v57  ;;  %v4980_v10 = vrot.slane %v14669_v54, %v16430_v56  ;;  %v4876_v25 = vadd.f32 %v16431_v34, %v13513_v23  ;;  %v4889_v33 = vadd.f32 %v4829_v63, %v13513_v23 }
0x1893   :  { %v4832_v7 = vpop.xlane.xlu0 %4831  ;;  %5567 = vadd.xlane.f32.xlu1 %v5566_v62  ;;  %v4875_v62 = vadd.f32 %v16423_v59, %v13513_v23  ;;  %v14710_v59 = vrot.slane %v6832_v35, %v16334_v47  ;;  %v4975_v32 = vrot.slane %v4905_v60, %v16432_v37  ;;  %v6857_v54 = vadd.f32 %v16316_v22, %v14587_v57  ;;  %v16433_v35 = vld [vmem:[#allocation70_spill] sm:$0xff] }
0x1894   :  { %v4877_v47 = vadd.f32 %v16433_v35, %v13513_v23  ;;  %v4890_v61 = vadd.f32 %v4832_v7, %v13513_v23  ;;  %v6907_v34 = vmul.f32 %v14511_v52, %v9869_v31  ;;  %9882 = vtanh.f32 %v6851_v12 }
0x1895   :  { %v4907_v49 = vmul.f32 %v4875_v62, %v16421_v17  ;;  %v4888_v60 = vadd.f32 %v14611_v43, %v13513_v23  ;;  %v6909_v22 = vmul.f32 %v14511_v52, %v9871_v18  ;;  %9884 = vtanh.f32 %v6853_v51 }
0x1896   :  { %6285 = vadd.xlane.f32.xlu0 %v6284_v3  ;;  %v14700_v3 = vsel %vm16429_vm2, %v6195_v30, 0.0  ;;  %v14716_v30 = vpop.eup %9872  ;;  %v14729_v27 = vpop.xlane.xlu1 %4858  ;;  %v14740_v43 = vadd.f32 %v16336_v19, %v14710_v59  ;;  %v4976_v31 = vsel %vm2787_vm3, %v4975_v32, %v4971_v40  ;;  %v4921_v18 = vmul.f32 %v4889_v33, %v16421_v17  ;;  %v16436_v19 = vld [vmem:[#allocation71_spill] sm:$0xff] }
0x1897   :  { %v4835_v8 = vpop.xlane.xlu0 %4834  ;;  %5573 = vadd.xlane.f32.xlu1 %v14614_v5  ;;  %v6855_v5 = vadd.f32 %v16315_v36, %v14587_v57  ;;  %v9875_v36 = vpop.eup %9874  ;;  %v4909_v57 = vmul.f32 %v4877_v47, %v16421_v17  ;;  %v4879_v16 = vadd.f32 %v16436_v19, %v13513_v23  ;;  %v4920_v32 = vmul.f32 %v4888_v60, %v16421_v17 }
0x1898   :  { %v4891_v63 = vadd.f32 %v4835_v8, %v13513_v23  ;;  %v14734_v35 = vpop.eup %9876  ;;  %v16434_v8 = vld [vmem:[#allocation85_spill] sm:$0xff]  ;;  %v14759_v47 = vsel %vm16437_vm1, %v6909_v22, 0.0  ;;  %vm16455_vm13 = vcmask 786112   ;;  %vm16461_vm1 = vcmask 917312  }
0x1899   :  { %9886 = vtanh.f32 %v6855_v5  ;;  %v14742_v12 = vpop.eup %9878  ;;  %v14750_v5 = vsel %vm16435_vm15, %v6907_v34, 0.0  ;;  %v16439_v34 = vld [vmem:[#allocation77_spill] sm:$0xff]  ;;  %vm16456_vm2 = vmmov %vm16455_vm13 }
0x189a   :  { %6291 = vadd.xlane.f32.xlu0 %v6290_v4  ;;  %v4908_v4 = vmul.f32 %v4876_v25, %v16421_v17  ;;  %9888 = vtanh.f32 %v6857_v54  ;;  %v9881_v51 = vpop.eup %9880  ;;  %v4922_v25 = vmul.f32 %v4890_v61, %v16421_v17  ;;  %v16438_v61 = vld [vmem:[#allocation79_spill] sm:$0xff]  ;;  %v4878_v60 = vadd.f32 %v16439_v34, %v13513_v23  ;;  %v14769_v58 = vpop.xlane.xlu1 %4864  ;;  %vm16457_vm15 = vmmov %vm16317_vm0 }
0x189b   :  { %v4838_v62 = vpop.xlane.xlu0 %4837  ;;  %5579 = vadd.xlane.f32.xlu1 %v14618_v15  ;;  %v4985_v15 = vrot.slane %v4907_v49, %v16434_v8  ;;  %v4923_v49 = vmul.f32 %v4891_v63, %v16421_v17  ;;  %v5054_v63 = vrot.slane %v4921_v18, %v16432_v37  ;;  %v14772_v22 = vmul.f32 %v14511_v52, %v9881_v51 }
0x189c   :  { %v4892_v7 = vadd.f32 %v4838_v62, %v13513_v23  ;;  %v6911_v62 = vmul.f32 %v14511_v52, %v9875_v36  ;;  %v4990_v40 = vrot.slane %v4908_v4, %v16438_v61  ;;  %v16441_v4 = vld [vmem:[#allocation50_spill] sm:$0xff]  ;;  %v5050_v18 = vrot.slane %v4920_v32, %v16428_v46 }
0x189d   :  { %v5064_v51 = vrot.slane %v4923_v49, %v16434_v8  ;;  %v16442_v49 = vld [vmem:[#allocation99_spill] sm:$0xff]  ;;  %9890 = vtanh.f32 %v14637_v2 }
0x189e   :  { %6297 = vadd.xlane.f32.xlu0 %v6296_v20  ;;  %v4981_v20 = vsel %vm2794_vm4, %v4980_v10, %v4976_v31  ;;  %v4924_v54 = vmul.f32 %v4892_v7, %v16421_v17  ;;  %v4880_v31 = vadd.f32 %v16441_v4, %v13513_v23  ;;  %v5059_v7 = vrot.slane %v4922_v25, %v16430_v56  ;;  %v16448_v56 = vld [vmem:[#allocation89_spill] sm:$0xff] }
0x189f   :  { %v4841_v33 = vpop.xlane.xlu0 %4840  ;;  %5585 = vadd.xlane.f32.xlu1 %v14623_v21  ;;  %v4986_v19 = vsel %vm2801_vm5, %v4985_v15, %v4981_v20  ;;  %v16440_v21 = vld [vmem:[#allocation86_spill] sm:$0xff]  ;;  %v4911_v15 = vmul.f32 %v4879_v16, %v16421_v17  ;;  %v4895_v20 = vadd.f32 %v14647_v48, %v13513_v23  ;;  %v14792_v16 = vsel %vm16317_vm0, %v6911_v62, 0.0  ;;  %vm16462_vm0 = vmmov %vm16461_vm1 }
0x18a0   :  { %v4893_v36 = vadd.f32 %v4841_v33, %v13513_v23  ;;  %v4995_v10 = vrot.slane %v4909_v57, %v16440_v21  ;;  %v14786_v57 = vpop.eup %9882  ;;  %v4991_v25 = vsel %vm2808_vm6, %v4990_v40, %v4986_v19  ;;  %v4910_v48 = vmul.f32 %v4878_v60, %v16421_v17 }
0x18a1   :  { %v14794_v32 = vpop.eup %9884  ;;  %v4881_v4 = vadd.f32 %v16442_v49, %v13513_v23  ;;  %9892 = vtanh.f32 %v14740_v43 }
0x18a2   :  { %v4925_v33 = vmul.f32 %v4893_v36, %v16421_v17  ;;  %6303 = vadd.xlane.f32.xlu0 %v14673_v1  ;;  %v5069_v36 = vrot.slane %v4924_v54, %v16438_v61  ;;  %v4996_v40 = vsel %vm2815_vm7, %v4995_v10, %v4991_v25  ;;  %v4912_v54 = vmul.f32 %v4880_v31, %v16421_v17  ;;  %v4871_v10 = vpop.xlane.xlu1 %4870  ;;  %v16444_v31 = vld [vmem:[#allocation98_spill] sm:$0xff]  ;;  %v16447_v61 = vld [vmem:[#allocation81_spill] sm:$0xff] }
0x18a3   :  { %v4844_v34 = vpop.xlane.xlu0 %4843  ;;  %5591 = vadd.xlane.f32.xlu1 %v14626_v39  ;;  %v5055_v39 = vsel %vm2787_vm3, %v5054_v63, %v5050_v18  ;;  %v14801_v37 = vpop.eup %9886  ;;  %v4927_v63 = vmul.f32 %v4895_v20, %v16421_v17 }
0x18a4   :  { %v4894_v1 = vadd.f32 %v4844_v34, %v13513_v23  ;;  %v5074_v8 = vrot.slane %v4925_v33, %v16440_v21  ;;  %v5060_v62 = vsel %vm2794_vm4, %v5059_v7, %v5055_v39  ;;  %v14808_v60 = vpop.eup %9888  ;;  %v16443_v34 = vld [vmem:[#allocation87_spill] sm:$0xff]  ;;  %v4897_v33 = vadd.f32 %v14678_v26, %v13513_v23  ;;  %v16446_v26 = vld [vmem:[#allocation96_spill] sm:$0xff] }
0x18a5   :  { %v5005_v49 = vrot.slane %v4911_v15, %v16443_v34  ;;  %v5065_v18 = vsel %vm2801_vm5, %v5064_v51, %v5060_v62  ;;  %v4882_v7 = vadd.f32 %v16444_v31, %v13513_v23  ;;  %v4913_v21 = vmul.f32 %v4881_v4, %v16421_v17 }
0x18a6   :  { %v4926_v19 = vmul.f32 %v4894_v1, %v16421_v17  ;;  %6309 = vadd.xlane.f32.xlu0 %v14681_v42  ;;  %v5070_v42 = vsel %vm2808_vm6, %v5069_v36, %v5065_v18  ;;  %v16445_v1 = vld [vmem:[#allocation80_spill] sm:$0xff]  ;;  %v4883_v51 = vadd.f32 %v16446_v26, %v13513_v23  ;;  %v4884_v31 = vadd.f32 %v16448_v56, %v13513_v23 }
0x18a7   :  { %v4850_v25 = vpop.xlane.xlu0 %4849  ;;  %6222 = vadd.xlane.f32.xlu1 %v14684_v38  ;;  %v5000_v20 = vrot.slane %v4910_v48, %v16445_v1  ;;  %v5075_v62 = vsel %vm2815_vm7, %v5074_v8, %v5070_v42  ;;  %v5010_v38 = vrot.slane %v4912_v54, %v16447_v61  ;;  %v5084_v4 = vrot.slane %v4927_v63, %v16443_v34  ;;  %v16450_v63 = vld [vmem:[#allocation97_spill] sm:$0xff] }
0x18a8   :  { %v5079_v39 = vrot.slane %v4926_v19, %v16445_v1  ;;  %v4896_v15 = vadd.f32 %v4850_v25, %v13513_v23  ;;  %v4929_v18 = vmul.f32 %v4897_v33, %v16421_v17  ;;  %v4899_v8 = vadd.f32 %v14729_v27, %v13513_v23 }
0x18a9   :  { %v5001_v48 = vsel %vm2822_vm8, %v5000_v20, %v4996_v40  ;;  %v4914_v54 = vmul.f32 %v4882_v7, %v16421_v17  ;;  %v4915_v33 = vmul.f32 %v4883_v51, %v16421_v17  ;;  %v14846_v20 = vpop.xlane.xlu1 %5501 }
0x18aa   :  { %v5080_v36 = vsel %vm2822_vm8, %v5079_v39, %v5075_v62  ;;  %v4928_v19 = vmul.f32 %v4896_v15, %v16421_v17  ;;  %6940 = vadd.xlane.f32.xlu0 %v14750_v5  ;;  %v5006_v56 = vsel %vm2829_vm9, %v5005_v49, %v5001_v48  ;;  %v16449_v39 = vld [vmem:[#allocation88_spill] sm:$0xff]  ;;  %v4885_v15 = vadd.f32 %v16450_v63, %v13513_v23  ;;  %v16451_v49 = vld [vmem:[#allocation73_spill] sm:$0xff] }
0x18ab   :  { %v4856_v25 = vpop.xlane.xlu0 %4855  ;;  %6228 = vadd.xlane.f32.xlu1 %v14687_v53  ;;  %v5015_v40 = vrot.slane %v4913_v21, %v16449_v39  ;;  %v5085_v27 = vsel %vm2829_vm9, %v5084_v4, %v5080_v36  ;;  %v4916_v53 = vmul.f32 %v4884_v31, %v16421_v17  ;;  %v4886_v7 = vadd.f32 %v16451_v49, %v13513_v23  ;;  %v16452_v4 = vld [vmem:[#allocation82_spill] sm:$0xff] }
0x18ac   :  { %v5089_v42 = vrot.slane %v4928_v19, %v16447_v61  ;;  %v4898_v5 = vadd.f32 %v4856_v25, %v13513_v23  ;;  %v4887_v21 = vadd.f32 %v14594_v24, %v13513_v23  ;;  %v5094_v51 = vrot.slane %v4929_v18, %v16449_v39 }
0x18ad   :  { %v4931_v19 = vmul.f32 %v4899_v8, %v16421_v17  ;;  %v4901_v36 = vadd.f32 %v14769_v58, %v13513_v23  ;;  %v5011_v48 = vsel %vm2836_vm10, %v5010_v38, %v5006_v56  ;;  %v5020_v25 = vrot.slane %v4914_v54, %v16452_v4  ;;  %v16454_v58 = vld [vmem:[#allocation83_spill] sm:$0xff]  ;;  %v14879_v49 = vpop.xlane.xlu1 %5507 }
0x18ae   :  { %v5090_v26 = vsel %vm2836_vm10, %v5089_v42, %v5085_v27  ;;  %v4930_v62 = vmul.f32 %v4898_v5, %v16421_v17  ;;  %6946 = vadd.xlane.f32.xlu0 %v14759_v47  ;;  %v5016_v24 = vsel %vm2843_vm11, %v5015_v40, %v5011_v48  ;;  %v16453_v5 = vld [vmem:[#allocation90_spill] sm:$0xff]  ;;  %v4903_v8 = vadd.f32 %v4871_v10, %v13513_v23 }
0x18af   :  { %v4862_v31 = vpop.xlane.xlu0 %4861  ;;  %6234 = vadd.xlane.f32.xlu1 %v14690_v44  ;;  %v5025_v18 = vrot.slane %v4915_v33, %v16453_v5  ;;  %v5095_v63 = vsel %vm2843_vm11, %v5094_v51, %v5090_v26  ;;  %v5030_v27 = vrot.slane %v4916_v53, %v16454_v58  ;;  %v4918_v44 = vmul.f32 %v4886_v7, %v16421_v17 }
0x18b0   :  { %v5099_v42 = vrot.slane %v4930_v62, %v16452_v4  ;;  %v4900_v47 = vadd.f32 %v4862_v31, %v13513_v23  ;;  %v4917_v54 = vmul.f32 %v4885_v15, %v16421_v17  ;;  %v4919_v40 = vmul.f32 %v4887_v21, %v16421_v17 }
0x18b1   :  { %v5104_v33 = vrot.slane %v4931_v19, %v16453_v5  ;;  %v4933_v10 = vmul.f32 %v4901_v36, %v16421_v17  ;;  %v5021_v53 = vsel %vm16149_vm12, %v5020_v25, %v5016_v24  ;;  %v4935_v21 = vmul.f32 %v4903_v8, %v16421_v17  ;;  %v16458_v36 = vld [vmem:[#allocation84_spill] sm:$0xff] }
0x18b2   :  { %v5100_v38 = vsel %vm16149_vm12, %v5099_v42, %v5095_v63  ;;  %v4932_v56 = vmul.f32 %v4900_v47, %v16421_v17  ;;  %6952 = vadd.xlane.f32.xlu0 %v14792_v16  ;;  %v6915_v16 = vmul.f32 %v14511_v52, %v14786_v57  ;;  %v5026_v15 = vsel %vm16455_vm13, %v5025_v18, %v5021_v53  ;;  %v16459_v42 = vld [vmem:[#allocation91_spill] sm:$0xff]  ;;  %v16460_v47 = vld [vmem:[#allocation93_spill] sm:$0xff]  ;;  %vm16463_vm13 = vmmov %vm16457_vm15 }
0x18b3   :  { %v4868_v26 = vpop.xlane.xlu0 %4867  ;;  %6240 = vadd.xlane.f32.xlu1 %v14693_v9  ;;  %v5105_v51 = vsel %vm16456_vm2, %v5104_v33, %v5100_v38  ;;  %v6957_v19 = vsel %vm16457_vm15, %v14772_v22, 0.0  ;;  %v5031_v9 = vsel %vm16148_vm14, %v5030_v27, %v5026_v15  ;;  %v5040_v31 = vrot.slane %v4918_v44, %v16458_v36  ;;  %v14911_v38 = vpop.xlane.xlu1 %5513 }
0x18b4   :  { %v5109_v7 = vrot.slane %v4932_v56, %v16454_v58  ;;  %v4902_v62 = vadd.f32 %v4868_v26, %v13513_v23  ;;  %v5035_v57 = vrot.slane %v4917_v54, %v16459_v42  ;;  %v5045_v24 = vrot.slane %v4919_v40, %v16460_v47 }
0x18b5   :  { %v5114_v18 = vrot.slane %v4933_v10, %v16459_v42  ;;  %v6917_v63 = vmul.f32 %v14511_v52, %v14794_v32  ;;  %v5124_v44 = vrot.slane %v4935_v21, %v16460_v47  ;;  %v6963_v2 = vsel %vm16463_vm13, %v6915_v16, 0.0 }
0x18b6   :  { %v5110_v48 = vsel %vm16148_vm14, %v5109_v7, %v5105_v51  ;;  %v4934_v25 = vmul.f32 %v4902_v62, %v16421_v17  ;;  %6958 = vadd.xlane.f32.xlu0 %v6957_v19  ;;  %v6861_v17 = vadd.f32 %v16341_v41, %v14710_v59  ;;  %v5036_v27 = vsel %vm16461_vm1, %v5035_v57, %v5031_v9  ;;  %vm16466_vm14 = vmmov %vm16463_vm13  ;;  %v9891_v51 = vpop.eup %9890 }
0x18b7   :  { %v14899_v8 = vpop.xlane.xlu0 %5498  ;;  %6246 = vadd.xlane.f32.xlu1 %v14700_v3  ;;  %v5115_v3 = vsel %vm16462_vm0, %v5114_v18, %v5110_v48  ;;  %vm16464_vm2 = vcmask 982912   ;;  %v6251_v43 = vsel %vm16466_vm14, %v14703_v29, 0.0  ;;  %v6199_v32 = vmul.f32 %v14511_v52, %v14716_v30  ;;  %v14937_v15 = vpop.xlane.xlu1 %5519 }
0x18b8   :  { %v5119_v22 = vrot.slane %v4934_v25, %v16458_v36  ;;  %v5041_v56 = vsel %vm16464_vm2, %v5040_v31, %v5036_v27  ;;  %vm16465_vm15 = vmmov %vm16464_vm2  ;;  %vm16467_vm1 = vcmask 1048512   ;;  %vm16469_vm0 = vcmask 1041409  }
0x18b9   :  { %v5046_v40 = vsel %vm16467_vm1, %v5045_v24, %v5041_v56  ;;  %vm16468_vm12 = vmmov %vm16467_vm1  ;;  %9894 = vtanh.f32 %v6861_v17  ;;  %v6863_v53 = vadd.f32 %v16345_v14, %v14710_v59  ;;  %v6969_v7 = vsel %vm16463_vm13, %v6917_v63, 0.0 }
0x18ba   :  { %v5120_v54 = vsel %vm16465_vm15, %v5119_v22, %v5115_v3  ;;  %6964 = vadd.xlane.f32.xlu0 %v6963_v2  ;;  %v6919_v29 = vmul.f32 %v14511_v52, %v14801_v37  ;;  %9896 = vtanh.f32 %v14643_v45  ;;  %v6145_v30 = vadd.f32 %v16337_v6, %v14521_v50 }
0x18bb   :  { %v5125_v33 = vsel %vm16468_vm12, %v5124_v44, %v5120_v54  ;;  %v14923_v10 = vpop.xlane.xlu0 %5504  ;;  %6252 = vadd.xlane.f32.xlu1 %v6251_v43  ;;  %vm16470_vm12 = vmmov %vm16463_vm13  ;;  %v6201_v16 = vmul.f32 %v14511_v52, %v14734_v35  ;;  %9898 = vtanh.f32 %v6863_v53  ;;  %v6865_v37 = vadd.f32 %v16352_v13, %v14710_v59  ;;  %v9893_v35 = vpop.eup %9892  ;;  %v16476_v43 = vld [vmem:[#allocation47_spill] sm:$0xff] }
0x18bc   :  { %v5126_v26 = vsel %vm16469_vm0, %v5125_v33, %v5046_v40  ;;  %v6257_v62 = vsel %vm16470_vm12, %v6199_v32, 0.0  ;;  %vm16471_vm14 = vmmov %vm16470_vm12  ;;  %v6921_v19 = vmul.f32 %v14511_v52, %v14808_v60  ;;  %9900 = vtanh.f32 %v6145_v30  ;;  %v14955_v24 = vpop.xlane.xlu1 %5525 }
0x18bd   :  { %5129 = vst [vmem:[#allocation8 + $0x6] sm:$0x3] %v5126_v26  ;;  %v6975_v45 = vsel %vm16471_vm14, %v6919_v29, 0.0  ;;  %v6147_v9 = vadd.f32 %v16340_v11, %v14521_v50  ;;  %vm16472_vm2 = vmmov %vm16470_vm12  ;;  %v6203_v48 = vmul.f32 %v14511_v52, %v14742_v12  ;;  %9902 = vtanh.f32 %v6865_v37  ;;  %v16479_v29 = vld [vmem:[#allocation46_spill] sm:$0xff]  ;;  %v16481_v37 = vld [vmem:[#allocation49_spill] sm:$0xff] }
0x18be   :  { %6970 = vadd.xlane.f32.xlu0 %v6969_v7  ;;  %v6263_v31 = vsel %vm16472_vm2, %v6201_v16, 0.0  ;;  %v6867_v57 = vadd.f32 %v16355_v28, %v14710_v59  ;;  %vm16473_vm15 = vmmov %vm16472_vm2  ;;  %v6923_v18 = vmul.f32 %v14511_v52, %v9893_v35  ;;  %v6149_v22 = vadd.f32 %v16342_v55, %v14521_v50 }
0x18bf   :  { %v14939_v21 = vpop.xlane.xlu0 %5510  ;;  %6258 = vadd.xlane.f32.xlu1 %v6257_v62  ;;  %v6981_v60 = vsel %vm16473_vm15, %v6921_v19, 0.0  ;;  %9904 = vtanh.f32 %v6147_v9  ;;  %vm16474_vm1 = vmmov %vm16472_vm2  ;;  %v6205_v17 = vmul.f32 %v14511_v52, %v9891_v51  ;;  %v6869_v3 = vadd.f32 %v16358_v0, %v14710_v59 }
0x18c0   :  { %v6269_v12 = vsel %vm16474_vm1, %v6203_v48, 0.0  ;;  %9906 = vtanh.f32 %v6867_v57  ;;  %vm16475_vm0 = vmmov %vm16474_vm1  ;;  %v6151_v32 = vadd.f32 %v16476_v43, %v14521_v50  ;;  %v6871_v30 = vadd.f32 %v16479_v29, %v14710_v59  ;;  %v16483_v48 = vld [vmem:[#allocation48_spill] sm:$0xff] }
0x18c1   :  { %v6987_v56 = vsel %vm16475_vm0, %v6923_v18, 0.0  ;;  %9908 = vtanh.f32 %v6149_v22  ;;  %vm16477_vm13 = vmmov %vm16475_vm0  ;;  %v6153_v51 = vadd.f32 %v16481_v37, %v14521_v50  ;;  %v6873_v57 = vadd.f32 %v16483_v48, %v14710_v59  ;;  %v16485_v50 = vld [vmem:[#allocation72_spill] sm:$0xff]  ;;  %v16486_v22 = vld [vmem:[#allocation17_spill] sm:$0xff] }
0x18c2   :  { %6976 = vadd.xlane.f32.xlu0 %v6975_v45  ;;  %vm16478_vm12 = vmmov %vm16475_vm0  ;;  %9910 = vtanh.f32 %v6869_v3 }
0x18c3   :  { %v14951_v25 = vpop.xlane.xlu0 %5516  ;;  %6264 = vadd.xlane.f32.xlu1 %v6263_v31  ;;  %v9895_v63 = vpop.eup %9894  ;;  %v6275_v33 = vsel %vm16478_vm12, %v6205_v17, 0.0  ;;  %vm16480_vm14 = vmmov %vm16475_vm0  ;;  %9912 = vtanh.f32 %v6151_v32  ;;  %v16488_v32 = vld [vmem:[#allocation19_spill] sm:$0xff] }
0x18c4   :  { %v9897_v27 = vpop.eup %9896  ;;  %v6925_v54 = vmul.f32 %v14511_v52, %v9895_v63  ;;  %vm16482_vm2 = vmmov %vm16475_vm0  ;;  %9914 = vtanh.f32 %v6871_v30  ;;  %v6844_v63 = vadd.f32 %v16486_v22, %v16485_v50 }
0x18c5   :  { %v9899_v40 = vpop.eup %9898  ;;  %v6207_v26 = vmul.f32 %v14511_v52, %v9897_v27  ;;  %vm16484_vm15 = vmmov %vm16475_vm0  ;;  %9916 = vtanh.f32 %v6153_v51 }
0x18c6   :  { %6982 = vadd.xlane.f32.xlu0 %v6981_v60  ;;  %v9901_v53 = vpop.eup %9900  ;;  %v6993_v62 = vsel %vm16480_vm14, %v6925_v54, 0.0  ;;  %v6927_v16 = vmul.f32 %v14511_v52, %v9899_v40  ;;  %vm16487_vm1 = vmmov %vm16475_vm0  ;;  %9918 = vtanh.f32 %v6873_v57  ;;  %v6846_v40 = vadd.f32 %v16488_v32, %v16485_v50 }
0x18c7   :  { %v14963_v44 = vpop.xlane.xlu0 %5522  ;;  %6270 = vadd.xlane.f32.xlu1 %v6269_v12  ;;  %v9903_v45 = vpop.eup %9902  ;;  %v6281_v19 = vsel %vm16482_vm2, %v6207_v26, 0.0  ;;  %v6209_v9 = vmul.f32 %v14511_v52, %v9901_v53  ;;  %9920 = vtanh.f32 %v6844_v63  ;;  %vm16490_vm12 = vmmov %vm16475_vm0 }
0x18c8   :  { %v6999_v60 = vsel %vm16484_vm15, %v6927_v16, 0.0  ;;  %v6929_v18 = vmul.f32 %v14511_v52, %v9903_v45  ;;  %9922 = vtanh.f32 %v6846_v40  ;;  %v16491_v45 = vld [vmem:[#allocation21_spill] sm:$0xff]  ;;  %vm16492_vm14 = vmmov %vm16475_vm0 }
0x18c9   :  { %v7458_v2 = vpop.permute.xlu1 %7457  ;;  %v9905_v35 = vpop.eup %9904  ;;  %v6287_v17 = vsel %vm16487_vm1, %v6209_v9, 0.0  ;;  %vm16493_vm2 = vmmov %vm16475_vm0 }
0x18ca   :  { %6988 = vadd.xlane.f32.xlu0 %v6987_v56  ;;  %8600 = vmatmul.mubr.msk.f32.vlgmr.msra.gmra.mrb[110].mxu1 %vm16477_vm13, %v7458_v2  ;;  %v9907_v12 = vpop.eup %9906  ;;  %v6211_v27 = vmul.f32 %v14511_v52, %v9905_v35  ;;  %v7005_v56 = vsel %vm16475_vm0, %v6929_v18, 0.0  ;;  %vm16489_vm13 = vmmov %vm16475_vm0 }
0x18cb   :  { %v14974_v7 = vpop.xlane.xlu0 %5528  ;;  %6276 = vadd.xlane.f32.xlu1 %v6275_v33  ;;  %v9909_v3 = vpop.eup %9908  ;;  %v6931_v54 = vmul.f32 %v14511_v52, %v9907_v12  ;;  %vm16495_vm15 = vmmov %vm16475_vm0 }
0x18cc   :  { %v9911_v33 = vpop.eup %9910  ;;  %v6293_v26 = vsel %vm16489_vm13, %v6211_v27, 0.0  ;;  %v6213_v53 = vmul.f32 %v14511_v52, %v9909_v3  ;;  %vm16496_vm1 = vmmov %vm16475_vm0 }
0x18cd   :  { %v9913_v30 = vpop.eup %9912  ;;  %v7011_v16 = vsel %vm16490_vm12, %v6931_v54, 0.0  ;;  %v6933_v51 = vmul.f32 %v14511_v52, %v9911_v33  ;;  %vm16498_vm13 = vmmov %vm16475_vm0 }
0x18ce   :  { %6994 = vadd.xlane.f32.xlu0 %v6993_v62  ;;  %v9915_v9 = vpop.eup %9914  ;;  %v6299_v35 = vsel %vm16492_vm14, %v6213_v53, 0.0  ;;  %v6215_v57 = vmul.f32 %v14511_v52, %v9913_v30  ;;  %v16497_v30 = vld [vmem:[#allocation26_spill] sm:$0xff]  ;;  %vm16500_vm12 = vmmov %vm16475_vm0 }
0x18cf   :  { %v14984_v31 = vpop.xlane.xlu0 %5534  ;;  %6282 = vadd.xlane.f32.xlu1 %v6281_v19  ;;  %v6848_v19 = vadd.f32 %v16491_v45, %v16485_v50  ;;  %v7017_v63 = vsel %vm16493_vm2, %v6933_v51, 0.0  ;;  %v6935_v12 = vmul.f32 %v14511_v52, %v9915_v9  ;;  %vm16502_vm14 = vmmov %vm16475_vm0 }
0x18d0   :  { %vm16504_vm2 = vmmov %vm16475_vm0 }
0x18d1   :  { %9924 = vtanh.f32 %v6848_v19 }
0x18d2   :  { %7000 = vadd.xlane.f32.xlu0 %v6999_v60  ;;  %v9917_v60 = vpop.eup %9916 }
0x18d3   :  { %v14994_v2 = vpop.xlane.xlu0 %5540  ;;  %6288 = vadd.xlane.f32.xlu1 %v6287_v17  ;;  %v16494_v17 = vld [vmem:[#allocation23_spill] sm:$0xff]  ;;  %v9919_v3 = vpop.eup %9918  ;;  %v6217_v54 = vmul.f32 %v14511_v52, %v9917_v60  ;;  %v16499_v60 = vld [vmem:[#allocation29_spill] sm:$0xff] }
0x18d4   :  { %v6850_v27 = vadd.f32 %v16494_v17, %v16485_v50  ;;  %v9921_v40 = vpop.eup %9920  ;;  %v6937_v53 = vmul.f32 %v14511_v52, %v9919_v3 }
0x18d5   :  { %v6311_v51 = vsel %vm16475_vm0, %v6217_v54, 0.0  ;;  %v6908_v19 = vmul.f32 %v14511_v52, %v9921_v40  ;;  %v9923_v9 = vpop.eup %9922  ;;  %v16501_v54 = vld [vmem:[#allocation31_spill] sm:$0xff] }
0x18d6   :  { %7006 = vadd.xlane.f32.xlu0 %v7005_v56  ;;  %v6305_v56 = vsel %vm16495_vm15, %v6215_v57, 0.0  ;;  %9926 = vtanh.f32 %v6850_v27  ;;  %v7029_v57 = vsel %vm16498_vm13, %v6937_v53, 0.0  ;;  %v15035_v27 = vld [vmem:[%s15966_s13] ss:$0 sm:$0xff]  ;;  %v6856_v40 = vadd.f32 %v16501_v54, %v16485_v50  ;;  %vm16506_vm15 = vmmov %vm16475_vm0 }
0x18d7   :  { %v15002_v62 = vpop.xlane.xlu0 %5546  ;;  %6294 = vadd.xlane.f32.xlu1 %v6293_v26  ;;  %v7023_v26 = vsel %vm16496_vm1, %v6935_v12, 0.0  ;;  %v6942_v12 = vsel %vm16500_vm12, %v6908_v19, 0.0  ;;  %v6910_v52 = vmul.f32 %v15035_v27, %v9923_v9  ;;  %v16503_v19 = vld [vmem:[#allocation33_spill] sm:$0xff]  ;;  %vm16508_vm1 = vmmov %vm16475_vm0 }
0x18d8   :  { %v6858_v9 = vadd.f32 %v16503_v19, %v16485_v50  ;;  %vm16511_vm13 = vmmov %vm16475_vm0 }
0x18d9   :  { %vm16512_vm12 = vmmov %vm16475_vm0 }
0x18da   :  { %7012 = vadd.xlane.f32.xlu0 %v7011_v16  ;;  %v6852_v16 = vadd.f32 %v16497_v30, %v16485_v50  ;;  %v16519_v30 = vld [vmem:[#allocation78_spill] sm:$0xff] }
0x18db   :  { %v15010_v18 = vpop.xlane.xlu0 %5552  ;;  %6300 = vadd.xlane.f32.xlu1 %v6299_v35  ;;  %v9925_v3 = vpop.eup %9924 }
0x18dc   :  { %9928 = vtanh.f32 %v6852_v16  ;;  %v6912_v53 = vmul.f32 %v15035_v27, %v9925_v3 }
0x18de   :  { %7018 = vadd.xlane.f32.xlu0 %v7017_v63  ;;  %v6854_v63 = vadd.f32 %v16499_v60, %v16485_v50  ;;  %v16507_v50 = vld [vmem:[#allocation37_spill] sm:$0xff]  ;;  %v16518_v60 = vld [vmem:[#allocation51_spill] sm:$0xff] }
0x18df   :  { %v15018_v33 = vpop.xlane.xlu0 %5558  ;;  %6306 = vadd.xlane.f32.xlu1 %v6305_v56 }
0x18e0   :  { %9930 = vtanh.f32 %v6854_v63  ;;  %v9927_v16 = vpop.eup %9926 }
0x18e1   :  { %9932 = vtanh.f32 %v6856_v40 }
0x18e2   :  { %7024 = vadd.xlane.f32.xlu0 %v7023_v26  ;;  %v6948_v26 = vsel %vm16502_vm14, %v6910_v52, 0.0  ;;  %9934 = vtanh.f32 %v6858_v9  ;;  %v16505_v52 = vld [vmem:[#allocation35_spill] sm:$0xff]  ;;  %vm16513_vm14 = vmmov %vm16475_vm0 }
0x18e3   :  { %v15026_v35 = vpop.xlane.xlu0 %5564  ;;  %6312 = vadd.xlane.f32.xlu1 %v6311_v51  ;;  %v6860_v3 = vadd.f32 %v16505_v52, %v14710_v59 }
0x18e5   :  { %9936 = vtanh.f32 %v6860_v3 }
0x18e6   :  { %7030 = vadd.xlane.f32.xlu0 %v7029_v57  ;;  %v6954_v57 = vsel %vm16504_vm2, %v6912_v53, 0.0  ;;  %v9929_v63 = vpop.eup %9928  ;;  %v6862_v53 = vadd.f32 %v16507_v50, %v14710_v59  ;;  %vm16514_vm2 = vmmov %vm16475_vm0 }
0x18e7   :  { %v15038_v56 = vpop.xlane.xlu0 %5570  ;;  %6943 = vadd.xlane.f32.xlu1 %v6942_v12  ;;  %v6914_v12 = vmul.f32 %v15035_v27, %v9927_v16 }
0x18e8   :  { %9938 = vtanh.f32 %v6862_v53 }
0x18e9   :  { %v6960_v29 = vsel %vm16506_vm15, %v6914_v12, 0.0  ;;  %v16509_v12 = vld [vmem:[#allocation39_spill] sm:$0xff]  ;;  %vm16515_vm15 = vmmov %vm16475_vm0 }
0x18ea   :  { %v9931_v40 = vpop.eup %9930 }
0x18eb   :  { %v15044_v51 = vpop.xlane.xlu0 %5576  ;;  %6949 = vadd.xlane.f32.xlu1 %v6948_v26  ;;  %v6916_v26 = vmul.f32 %v15035_v27, %v9929_v63  ;;  %v9933_v9 = vpop.eup %9932  ;;  %v6864_v63 = vadd.f32 %v16509_v12, %v14710_v59 }
0x18ec   :  { %v9935_v3 = vpop.eup %9934 }
0x18ed   :  { %v6966_v16 = vsel %vm16508_vm1, %v6916_v26, 0.0  ;;  %v16510_v26 = vld [vmem:[#allocation95_spill] sm:$0xff]  ;;  %9940 = vtanh.f32 %v6864_v63  ;;  %v6870_v63 = vadd.f32 %v16342_v55, %v14710_v59  ;;  %vm16517_vm1 = vmmov %vm16475_vm0 }
0x18ef   :  { %v15050_v48 = vpop.xlane.xlu0 %5582  ;;  %6955 = vadd.xlane.f32.xlu1 %v6954_v57  ;;  %v6918_v57 = vmul.f32 %v15035_v27, %v9931_v40  ;;  %v6866_v40 = vadd.f32 %v16337_v6, %v14710_v59  ;;  %v9937_v12 = vpop.eup %9936 }
0x18f1   :  { %v6972_v13 = vsel %vm16475_vm0, %v6918_v57, 0.0  ;;  %9942 = vtanh.f32 %v6866_v40  ;;  %v6868_v57 = vadd.f32 %v16340_v11, %v14710_v59 }
0x18f3   :  { %v15056_v0 = vpop.xlane.xlu0 %5588  ;;  %6961 = vadd.xlane.f32.xlu1 %v6960_v29  ;;  %v6920_v29 = vmul.f32 %v15035_v27, %v9933_v9  ;;  %v6924_v9 = vmul.f32 %v15035_v27, %v9937_v12  ;;  %9944 = vtanh.f32 %v6868_v57  ;;  %v6872_v12 = vadd.f32 %v16476_v43, %v14710_v59 }
0x18f4   :  { %9946 = vtanh.f32 %v6870_v63  ;;  %v6874_v63 = vadd.f32 %v16481_v37, %v14710_v59  ;;  %v5596_v59 = vadd.f32 %v14879_v49, %v13513_v23 }
0x18f5   :  { %v6978_v53 = vsel %vm16511_vm13, %v6920_v29, 0.0  ;;  %v6990_v29 = vsel %vm16513_vm14, %v6924_v9, 0.0  ;;  %9948 = vtanh.f32 %v6872_v12  ;;  %vm16521_vm13 = vmmov %vm16475_vm0 }
0x18f6   :  { %9950 = vtanh.f32 %v6874_v63  ;;  %vm16526_vm14 = vmmov %vm16475_vm0 }
0x18f7   :  { %v15062_v28 = vpop.xlane.xlu0 %6219  ;;  %6967 = vadd.xlane.f32.xlu1 %v6966_v16  ;;  %v6922_v16 = vmul.f32 %v15035_v27, %v9935_v3 }
0x18fb   :  { %v15068_v14 = vpop.xlane.xlu0 %6225  ;;  %6973 = vadd.xlane.f32.xlu1 %v6972_v13  ;;  %v6984_v13 = vsel %vm16512_vm12, %v6922_v16, 0.0  ;;  %vm16524_vm12 = vmmov %vm16475_vm0 }
0x18fc   :  { %8015 = vrot.lane.b32.xlu0 %v16510_v26, %s10329_s27  ;;  %v9939_v26 = vpop.eup %9938 }
0x18fd   :  { %v6926_v3 = vmul.f32 %v15035_v27, %v9939_v26  ;;  %v9941_v40 = vpop.eup %9940  ;;  %v5593_v26 = vadd.f32 %v14899_v8, %v13513_v23  ;;  %v16516_v8 = vld [vmem:[#allocation55_spill] sm:$0xff] }
0x18fe   :  { %v6928_v11 = vmul.f32 %v15035_v27, %v9941_v40 }
0x18ff   :  { %v15076_v41 = vpop.xlane.xlu0 %6231  ;;  %6979 = vadd.xlane.f32.xlu1 %v6978_v53  ;;  %v6996_v55 = vsel %vm16514_vm2, %v6926_v3, 0.0  ;;  %vm16527_vm2 = vcmask 720512  }
0x1900   :  { %v7002_v3 = vsel %vm16515_vm15, %v6928_v11, 0.0  ;;  %v5609_v11 = vadd.f32 %v15002_v62, %v13513_v23  ;;  %v5611_v62 = vadd.f32 %v15010_v18, %v13513_v23  ;;  %v5599_v18 = vadd.f32 %v14951_v25, %v13513_v23 }
0x1901   :  { %vm16528_vm15 = vcmask 786112  }
0x1903   :  { %v15084_v6 = vpop.xlane.xlu0 %6237  ;;  %6985 = vadd.xlane.f32.xlu1 %v6984_v13  ;;  %v9943_v13 = vpop.eup %9942 }
0x1904   :  { %v6930_v40 = vmul.f32 %v15035_v27, %v9943_v13  ;;  %v9945_v43 = vpop.eup %9944 }
0x1905   :  { %v9947_v50 = vpop.eup %9946 }
0x1906   :  { %v7008_v52 = vsel %vm16517_vm1, %v6930_v40, 0.0  ;;  %v6934_v63 = vmul.f32 %v15035_v27, %v9947_v50  ;;  %v9949_v54 = vpop.eup %9948  ;;  %v5641_v40 = vmul.f32 %v5609_v11, %v16516_v8  ;;  %vm16529_vm1 = vmmov %vm16527_vm2 }
0x1907   :  { %v15088_v53 = vpop.xlane.xlu0 %6243  ;;  %6991 = vadd.xlane.f32.xlu1 %v6990_v29  ;;  %v5595_v29 = vadd.f32 %v14923_v10, %v13513_v23  ;;  %v5625_v10 = vmul.f32 %v5593_v26, %v16516_v8  ;;  %v5628_v26 = vmul.f32 %v5596_v59, %v16516_v8  ;;  %v9951_v22 = vpop.eup %9950 }
0x1908   :  { %v15092_v16 = vpop.xlane.xlu1 %5531  ;;  %v7020_v11 = vsel %vm16521_vm13, %v6934_v63, 0.0  ;;  %v5771_v25 = vrot.slane %v5641_v40, %v16428_v46  ;;  %vm16531_vm13 = vcmask 851712  }
0x1909   :  { %v5627_v13 = vmul.f32 %v5595_v29, %v16516_v8 }
0x190b   :  { %v15096_v57 = vpop.xlane.xlu0 %6249  ;;  %6997 = vadd.xlane.f32.xlu1 %v6996_v55  ;;  %v5594_v55 = vadd.f32 %v14846_v20, %v13513_v23  ;;  %v5597_v20 = vadd.f32 %v14939_v21, %v13513_v23  ;;  %v5692_v21 = vrot.slane %v5625_v10, %v16428_v46 }
0x190c   :  { %v15098_v9 = vpop.xlane.xlu1 %5537 }
0x190d   :  { %v5626_v19 = vmul.f32 %v5594_v55, %v16516_v8  ;;  %v5598_v55 = vadd.f32 %v14911_v38, %v13513_v23  ;;  %v5629_v50 = vmul.f32 %v5597_v20, %v16516_v8  ;;  %v5613_v20 = vadd.f32 %v15018_v33, %v13513_v23  ;;  %v16523_v33 = vld [vmem:[#allocation79_spill] sm:$0xff] }
0x190f   :  { %v15110_v12 = vpop.xlane.xlu0 %6255  ;;  %7003 = vadd.xlane.f32.xlu1 %v7002_v3  ;;  %v6932_v3 = vmul.f32 %v15035_v27, %v9945_v43  ;;  %v5696_v17 = vrot.slane %v5626_v19, %v16519_v30  ;;  %v6936_v19 = vmul.f32 %v15035_v27, %v9949_v54  ;;  %v5630_v63 = vmul.f32 %v5598_v55, %v16516_v8 }
0x1910   :  { %v15114_v37 = vpop.xlane.xlu1 %5543  ;;  %v5631_v54 = vmul.f32 %v5599_v18, %v16516_v8 }
0x1911   :  { %v7014_v59 = vsel %vm16475_vm0, %v6932_v3, 0.0  ;;  %v5697_v32 = vsel %vm2787_vm3, %v5696_v17, %v5692_v21  ;;  %v5601_v17 = vadd.f32 %v14963_v44, %v13513_v23  ;;  %vm16530_vm0 = vmmov %vm16528_vm15 }
0x1913   :  { %v15125_v49 = vpop.xlane.xlu0 %6261  ;;  %7009 = vadd.xlane.f32.xlu1 %v7008_v52  ;;  %v5701_v52 = vrot.slane %v5627_v13, %v16518_v60  ;;  %v5643_v13 = vmul.f32 %v5611_v62, %v16516_v8 }
0x1914   :  { %v5550_v29 = vpop.xlane.xlu1 %5549 }
0x1915   :  { %v5610_v43 = vadd.f32 %v5550_v29, %v13513_v23  ;;  %v16522_v29 = vld [vmem:[#allocation85_spill] sm:$0xff]  ;;  %v5702_v62 = vsel %vm2794_vm4, %v5701_v52, %v5697_v32  ;;  %v5780_v55 = vrot.slane %v5643_v13, %v16518_v60  ;;  %v5615_v32 = vadd.f32 %v15026_v35, %v13513_v23 }
0x1916   :  { %v5706_v38 = vrot.slane %v5628_v26, %v16522_v29  ;;  %v5600_v26 = vadd.f32 %v14937_v15, %v13513_v23  ;;  %v5645_v15 = vmul.f32 %v5613_v20, %v16516_v8  ;;  %v5721_v35 = vrot.slane %v5631_v54, %v16445_v1 }
0x1917   :  { %v5642_v10 = vmul.f32 %v5610_v43, %v16516_v8  ;;  %v15143_v45 = vpop.xlane.xlu0 %6267  ;;  %7015 = vadd.xlane.f32.xlu1 %v7014_v59  ;;  %v5603_v54 = vadd.f32 %v14974_v7, %v13513_v23 }
0x1918   :  { %16520 = vst [vmem:[#allocation75_spill] sm:$0xff] %v15143_v45  ;;  %v5556_v3 = vpop.xlane.xlu1 %5555  ;;  %v5711_v45 = vrot.slane %v5629_v50, %v16523_v33  ;;  %v7026_v50 = vsel %vm16524_vm12, %v6936_v19, 0.0  ;;  %v5707_v18 = vsel %vm2801_vm5, %v5706_v38, %v5702_v62  ;;  %v5632_v13 = vmul.f32 %v5600_v26, %v16516_v8  ;;  %vm16532_vm12 = vmmov %vm16531_vm13 }
0x1919   :  { %v5775_v43 = vrot.slane %v5642_v10, %v16519_v30  ;;  %v5612_v59 = vadd.f32 %v5556_v3, %v13513_v23  ;;  %v5633_v19 = vmul.f32 %v5601_v17, %v16516_v8 }
0x191a   :  { %v5712_v20 = vsel %vm2808_vm6, %v5711_v45, %v5707_v18  ;;  %v5647_v45 = vmul.f32 %v5615_v32, %v16516_v8 }
0x191b   :  { %v5776_v21 = vsel %vm2787_vm3, %v5775_v43, %v5771_v25  ;;  %v5644_v40 = vmul.f32 %v5612_v59, %v16516_v8  ;;  %v15165_v10 = vpop.xlane.xlu0 %6273  ;;  %7021 = vadd.xlane.f32.xlu1 %v7020_v11  ;;  %v6938_v25 = vmul.f32 %v15035_v27, %v9951_v22  ;;  %v16525_v43 = vld [vmem:[#allocation86_spill] sm:$0xff]  ;;  %v5602_v22 = vadd.f32 %v14955_v24, %v13513_v23 }
0x191c   :  { %v5562_v52 = vpop.xlane.xlu1 %5561  ;;  %v5716_v11 = vrot.slane %v5630_v63, %v16525_v43  ;;  %v5781_v59 = vsel %vm2794_vm4, %v5780_v55, %v5776_v21  ;;  %v5790_v27 = vrot.slane %v5645_v15, %v16523_v33  ;;  %v5617_v63 = vadd.f32 %v15038_v56, %v13513_v23 }
0x191d   :  { %v5785_v44 = vrot.slane %v5644_v40, %v16522_v29  ;;  %v5614_v3 = vadd.f32 %v5562_v52, %v13513_v23  ;;  %v7032_v55 = vsel %vm16526_vm14, %v6938_v25, 0.0  ;;  %v5726_v52 = vrot.slane %v5632_v13, %v16443_v34 }
0x191e   :  { %v5717_v24 = vsel %vm2815_vm7, %v5716_v11, %v5712_v20  ;;  %v5604_v15 = vadd.f32 %v15092_v16, %v13513_v23  ;;  %v5800_v25 = vrot.slane %v5647_v45, %v16445_v1  ;;  %v5649_v11 = vmul.f32 %v5617_v63, %v16516_v8 }
0x191f   :  { %v5786_v38 = vsel %vm2801_vm5, %v5785_v44, %v5781_v59  ;;  %v5646_v62 = vmul.f32 %v5614_v3, %v16516_v8  ;;  %v15184_v40 = vpop.xlane.xlu0 %6279  ;;  %7027 = vadd.xlane.f32.xlu1 %v7026_v50  ;;  %v5722_v56 = vsel %vm2822_vm8, %v5721_v35, %v5717_v24  ;;  %v5731_v50 = vrot.slane %v5633_v19, %v16447_v61 }
0x1920   :  { %v5568_v26 = vpop.xlane.xlu1 %5567  ;;  %v5791_v32 = vsel %vm2808_vm6, %v5790_v27, %v5786_v38  ;;  %v5634_v3 = vmul.f32 %v5602_v22, %v16516_v8  ;;  %v5619_v16 = vadd.f32 %v15044_v51, %v13513_v23  ;;  %v5635_v20 = vmul.f32 %v5603_v54, %v16516_v8 }
0x1921   :  { %v5795_v17 = vrot.slane %v5646_v62, %v16525_v43  ;;  %v5616_v21 = vadd.f32 %v5568_v26, %v13513_v23  ;;  %v5727_v19 = vsel %vm2829_vm9, %v5726_v52, %v5722_v56  ;;  %v5605_v38 = vadd.f32 %v14984_v31, %v13513_v23 }
0x1922   :  { %v5636_v62 = vmul.f32 %v5604_v15, %v16516_v8  ;;  %v5732_v27 = vsel %vm2836_vm10, %v5731_v50, %v5727_v19  ;;  %v5606_v51 = vadd.f32 %v15098_v9, %v13513_v23  ;;  %v5736_v54 = vrot.slane %v5634_v3, %v16449_v39 }
0x1923   :  { %v5796_v7 = vsel %vm2815_vm7, %v5795_v17, %v5791_v32  ;;  %v5648_v18 = vmul.f32 %v5616_v21, %v16516_v8  ;;  %v15206_v44 = vpop.xlane.xlu0 %6285  ;;  %7033 = vadd.xlane.f32.xlu1 %v7032_v55  ;;  %v5810_v17 = vrot.slane %v5649_v11, %v16447_v61  ;;  %v5651_v31 = vmul.f32 %v5619_v16, %v16516_v8 }
0x1924   :  { %v5574_v13 = vpop.xlane.xlu1 %5573  ;;  %v5801_v22 = vsel %vm2822_vm8, %v5800_v25, %v5796_v7  ;;  %v5621_v21 = vadd.f32 %v15050_v48, %v13513_v23  ;;  %v5741_v52 = vrot.slane %v5635_v20, %v16452_v4  ;;  %v5737_v15 = vsel %vm2843_vm11, %v5736_v54, %v5732_v27 }
0x1925   :  { %v5805_v59 = vrot.slane %v5648_v18, %v16443_v34  ;;  %v5618_v35 = vadd.f32 %v5574_v13, %v13513_v23  ;;  %v5637_v32 = vmul.f32 %v5605_v38, %v16516_v8  ;;  %v5746_v56 = vrot.slane %v5636_v62, %v16453_v5 }
0x1926   :  { %v5638_v7 = vmul.f32 %v5606_v51, %v16516_v8  ;;  %v5608_v48 = vadd.f32 %v15114_v37, %v13513_v23  ;;  %v5607_v11 = vadd.f32 %v14994_v2, %v13513_v23  ;;  %v5820_v16 = vrot.slane %v5651_v31, %v16452_v4 }
0x1927   :  { %v5806_v45 = vsel %vm2829_vm9, %v5805_v59, %v5801_v22  ;;  %v5650_v63 = vmul.f32 %v5618_v35, %v16516_v8  ;;  %v15226_v26 = vpop.xlane.xlu0 %6291  ;;  %v5653_v13 = vmul.f32 %v5621_v21, %v16516_v8  ;;  %v5623_v20 = vadd.f32 %v15056_v0, %v13513_v23 }
0x1928   :  { %v5580_v55 = vpop.xlane.xlu1 %5579  ;;  %v5811_v50 = vsel %vm2836_vm10, %v5810_v17, %v5806_v45  ;;  %v5742_v35 = vsel %vm16527_vm2, %v5741_v52, %v5737_v15  ;;  %v5756_v2 = vrot.slane %v5638_v7, %v16459_v42  ;;  %v5640_v22 = vmul.f32 %v5608_v48, %v16516_v8  ;;  %v16533_v15 = vld [vmem:[#allocation100_spill] sm:$0xff] }
0x1929   :  { %v5815_v9 = vrot.slane %v5650_v63, %v16449_v39  ;;  %v5620_v24 = vadd.f32 %v5580_v55, %v13513_v23  ;;  %v5747_v38 = vsel %vm16528_vm15, %v5746_v56, %v5742_v35  ;;  %v5751_v45 = vrot.slane %v5637_v32, %v16454_v58 }
0x192a   :  { %v5639_v63 = vmul.f32 %v5607_v11, %v16516_v8  ;;  %v5830_v54 = vrot.slane %v5653_v13, %v16454_v58  ;;  %v5655_v17 = vmul.f32 %v5623_v20, %v16516_v8  ;;  %v6314_v21 = vadd.f32 %v15062_v28, %v13513_v23  ;;  %v16536_v13 = vld [vmem:[#allocation57_spill] sm:$0xff] }
0x192b   :  { %v5816_v18 = vsel %vm2843_vm11, %v5815_v9, %v5811_v50  ;;  %v5652_v3 = vmul.f32 %v5620_v24, %v16516_v8  ;;  %v15245_v25 = vpop.xlane.xlu0 %6297  ;;  %v5752_v9 = vsel %vm16531_vm13, %v5751_v45, %v5747_v38  ;;  %v8014_v32 = vrot.slane %v16533_v15, 7 }
0x192c   :  { %v5586_v59 = vpop.xlane.xlu1 %5585  ;;  %v5821_v62 = vsel %vm16529_vm1, %v5820_v16, %v5816_v18  ;;  %vm16534_vm14 = vcmask 917312   ;;  %v5766_v50 = vrot.slane %v5640_v22, %v16460_v47  ;;  %v5761_v28 = vrot.slane %v5639_v63, %v16458_v36 }
0x192d   :  { %v5825_v37 = vrot.slane %v5652_v3, %v16453_v5  ;;  %v5622_v19 = vadd.f32 %v5586_v59, %v13513_v23  ;;  %v5757_v56 = vsel %vm16534_vm14, %v5756_v2, %v5752_v9  ;;  %vm16535_vm2 = vmmov %vm16534_vm14  ;;  %v5840_v3 = vrot.slane %v5655_v17, %v16458_v36 }
0x192e   :  { %v6316_v11 = vadd.f32 %v15068_v14, %v13513_v23  ;;  %v6346_v20 = vmul.f32 %v6314_v21, %v16536_v13  ;;  %vm16537_vm15 = vcmask 982912   ;;  %v6320_v17 = vadd.f32 %v15084_v6, %v13513_v23 }
0x192f   :  { %v5826_v27 = vsel %vm16530_vm0, %v5825_v37, %v5821_v62  ;;  %v5654_v51 = vmul.f32 %v5622_v19, %v16516_v8  ;;  %v15262_v0 = vpop.xlane.xlu0 %6303  ;;  %v5762_v37 = vsel %vm16537_vm15, %v5761_v28, %v5757_v56  ;;  %vm16538_vm1 = vmmov %vm16537_vm15  ;;  %vm16539_vm0 = vcmask 1048512  }
0x1930   :  { %v5592_v31 = vpop.xlane.xlu1 %5591  ;;  %v5831_v24 = vsel %vm16532_vm12, %v5830_v54, %v5826_v27  ;;  %v5767_v38 = vsel %vm16539_vm0, %v5766_v50, %v5762_v37  ;;  %vm16540_vm13 = vmmov %vm16539_vm0  ;;  %v6348_v22 = vmul.f32 %v6316_v11, %v16536_v13  ;;  %vm16541_vm12 = vcmask 1041409  }
0x1931   :  { %v5835_v55 = vrot.slane %v5654_v51, %v16459_v42  ;;  %v5624_v52 = vadd.f32 %v5592_v31, %v13513_v23  ;;  %v6413_v45 = vrot.slane %v6346_v20, %v16428_v46  ;;  %v6352_v56 = vmul.f32 %v6320_v17, %v16536_v13 }
0x1932   :  { %v6322_v6 = vadd.f32 %v15088_v53, %v13513_v23  ;;  %v6324_v53 = vadd.f32 %v15096_v57, %v13513_v23  ;;  %v6326_v57 = vadd.f32 %v15110_v12, %v13513_v23  ;;  %v6328_v12 = vadd.f32 %v15125_v49, %v13513_v23 }
0x1933   :  { %v5836_v7 = vsel %vm16535_vm2, %v5835_v55, %v5831_v24  ;;  %v5656_v48 = vmul.f32 %v5624_v52, %v16516_v8  ;;  %v15279_v18 = vpop.xlane.xlu0 %6309  ;;  %v6318_v8 = vadd.f32 %v15076_v41, %v13513_v23  ;;  %v6422_v52 = vrot.slane %v6348_v22, %v16518_v60 }
0x1934   :  { %8017 = vrot.lane.b32.xlu1 %v8014_v32, %s10329_s27  ;;  %v6223_v16 = vpop.xlane.xlu1 %6222  ;;  %v5841_v19 = vsel %vm16538_vm1, %v5840_v3, %v5836_v7  ;;  %vm16542_vm14 = vcmask 720512   ;;  %vm16543_vm2 = vcmask 786112   ;;  %vm16544_vm15 = vcmask 851712  }
0x1935   :  { %v5845_v59 = vrot.slane %v5656_v48, %v16460_v47  ;;  %v6315_v35 = vadd.f32 %v6223_v16, %v13513_v23  ;;  %v6350_v54 = vmul.f32 %v6318_v8, %v16536_v13  ;;  %vm16546_vm1 = vcmask 917312  }
0x1936   :  { %vm16547_vm0 = vcmask 982912  }
0x1937   :  { %v5846_v14 = vsel %vm16540_vm13, %v5845_v59, %v5841_v19  ;;  %v6347_v62 = vmul.f32 %v6315_v35, %v16536_v13  ;;  %v15296_v2 = vpop.xlane.xlu0 %6940  ;;  %v6432_v32 = vrot.slane %v6350_v54, %v16523_v33  ;;  %v6442_v59 = vrot.slane %v6352_v56, %v16445_v1  ;;  %vm16548_vm13 = vmmov %vm16542_vm14 }
0x1938   :  { %v5847_v27 = vsel %vm16541_vm12, %v5846_v14, %v5767_v38  ;;  %v6229_v51 = vpop.xlane.xlu1 %6228  ;;  %v6354_v35 = vmul.f32 %v6322_v6, %v16536_v13  ;;  %vm16549_vm12 = vmmov %vm16543_vm2 }
0x1939   :  { %5850 = vst [vmem:[#allocation8 + $0x8] sm:$0x3] %v5847_v27  ;;  %v6417_v41 = vrot.slane %v6347_v62, %v16519_v30  ;;  %v6317_v63 = vadd.f32 %v6229_v51, %v13513_v23  ;;  %v6356_v51 = vmul.f32 %v6324_v53, %v16536_v13 }
0x193a   :  { %v6452_v27 = vrot.slane %v6354_v35, %v16447_v61  ;;  %v16545_v35 = vld [vmem:[#allocation75_spill] sm:$0xff] }
0x193b   :  { %v6418_v31 = vsel %vm2787_vm3, %v6417_v41, %v6413_v45  ;;  %v6349_v21 = vmul.f32 %v6317_v63, %v16536_v13  ;;  %v15308_v55 = vpop.xlane.xlu0 %6946  ;;  %v6330_v53 = vadd.f32 %v16545_v35, %v13513_v23 }
0x193c   :  { %v6235_v9 = vpop.xlane.xlu1 %6234  ;;  %v6423_v50 = vsel %vm2794_vm4, %v6422_v52, %v6418_v31  ;;  %v6462_v52 = vrot.slane %v6356_v51, %v16452_v4 }
0x193d   :  { %v6427_v24 = vrot.slane %v6349_v21, %v16522_v29  ;;  %v6319_v15 = vadd.f32 %v6235_v9, %v13513_v23  ;;  %v6358_v9 = vmul.f32 %v6326_v57, %v16536_v13  ;;  %v6362_v51 = vmul.f32 %v6330_v53, %v16536_v13 }
0x193f   :  { %v6428_v7 = vsel %vm2801_vm5, %v6427_v24, %v6423_v50  ;;  %v6351_v48 = vmul.f32 %v6319_v15, %v16536_v13  ;;  %v15320_v28 = vpop.xlane.xlu0 %6952 }
0x1940   :  { %v6433_v3 = vsel %vm2808_vm6, %v6432_v32, %v6428_v7  ;;  %v6241_v11 = vpop.xlane.xlu1 %6240 }
0x1941   :  { %v6437_v16 = vrot.slane %v6351_v48, %v16525_v43  ;;  %v6321_v20 = vadd.f32 %v6241_v11, %v13513_v23  ;;  %v6472_v48 = vrot.slane %v6358_v9, %v16454_v58 }
0x1943   :  { %v6438_v8 = vsel %vm2815_vm7, %v6437_v16, %v6433_v3  ;;  %v6353_v37 = vmul.f32 %v6321_v20, %v16536_v13  ;;  %v15331_v19 = vpop.xlane.xlu0 %6958  ;;  %v6360_v3 = vmul.f32 %v6328_v12, %v16536_v13 }
0x1944   :  { %v6443_v38 = vsel %vm2822_vm8, %v6442_v59, %v6438_v8  ;;  %v6247_v14 = vpop.xlane.xlu1 %6246 }
0x1945   :  { %v6447_v62 = vrot.slane %v6353_v37, %v16443_v34  ;;  %v6323_v22 = vadd.f32 %v6247_v14, %v13513_v23  ;;  %v6482_v37 = vrot.slane %v6360_v3, %v16458_v36 }
0x1947   :  { %v6448_v45 = vsel %vm2829_vm9, %v6447_v62, %v6443_v38  ;;  %v6355_v41 = vmul.f32 %v6323_v22, %v16536_v13  ;;  %v15342_v63 = vpop.xlane.xlu0 %6964  ;;  %v6332_v38 = vadd.f32 %v15165_v10, %v13513_v23 }
0x1948   :  { %v6453_v54 = vsel %vm2836_vm10, %v6452_v27, %v6448_v45  ;;  %v6253_v17 = vpop.xlane.xlu1 %6252 }
0x1949   :  { %v6457_v31 = vrot.slane %v6355_v41, %v16449_v39  ;;  %v6325_v21 = vadd.f32 %v6253_v17, %v13513_v23  ;;  %v6364_v45 = vmul.f32 %v6332_v38, %v16536_v13  ;;  %v6334_v41 = vadd.f32 %v15184_v40, %v13513_v23 }
0x194b   :  { %v6458_v24 = vsel %vm2843_vm11, %v6457_v31, %v6453_v54  ;;  %v6357_v15 = vmul.f32 %v6325_v21, %v16536_v13  ;;  %v15353_v32 = vpop.xlane.xlu0 %6970  ;;  %v6492_v31 = vrot.slane %v6362_v51, %v16428_v46  ;;  %v6501_v9 = vrot.slane %v6364_v45, %v16518_v60 }
0x194c   :  { %v6463_v56 = vsel %vm16542_vm14, %v6462_v52, %v6458_v24  ;;  %v6259_v6 = vpop.xlane.xlu1 %6258  ;;  %v6366_v12 = vmul.f32 %v6334_v41, %v16536_v13  ;;  %v6336_v24 = vadd.f32 %v15206_v44, %v13513_v23  ;;  %v6338_v44 = vadd.f32 %v15226_v26, %v13513_v23  ;;  %vm16550_vm14 = vmmov %vm16544_vm15 }
0x194d   :  { %v6467_v50 = vrot.slane %v6357_v15, %v16453_v5  ;;  %v6327_v7 = vadd.f32 %v6259_v6, %v13513_v23  ;;  %v6340_v26 = vadd.f32 %v15245_v25, %v13513_v23 }
0x194e   :  { %v6511_v3 = vrot.slane %v6366_v12, %v16523_v33 }
0x194f   :  { %v6468_v11 = vsel %vm16543_vm2, %v6467_v50, %v6463_v56  ;;  %v6359_v49 = vmul.f32 %v6327_v7, %v16536_v13  ;;  %v15362_v16 = vpop.xlane.xlu0 %6976  ;;  %vm16551_vm2 = vmmov %vm16546_vm1 }
0x1950   :  { %v6473_v20 = vsel %vm16544_vm15, %v6472_v48, %v6468_v11  ;;  %v6265_v59 = vpop.xlane.xlu1 %6264  ;;  %v6368_v11 = vmul.f32 %v6336_v24, %v16536_v13  ;;  %v6342_v24 = vadd.f32 %v15262_v0, %v13513_v23  ;;  %v6344_v0 = vadd.f32 %v15279_v18, %v13513_v23 }
0x1951   :  { %v6477_v8 = vrot.slane %v6359_v49, %v16459_v42  ;;  %vm8021_vm15 = vcmask 261127  }
0x1953   :  { %v6478_v14 = vsel %vm16546_vm1, %v6477_v8, %v6473_v20  ;;  %v15372_v62 = vpop.xlane.xlu0 %6982  ;;  %vm16553_vm1 = vmmov %vm16547_vm0 }
0x1954   :  { %v15375_v22 = vsel %vm16547_vm0, %v6482_v37, %v6478_v14  ;;  %v6271_v27 = vpop.xlane.xlu1 %6270  ;;  %v6521_v14 = vrot.slane %v6368_v11, %v16445_v1  ;;  %vm16554_vm0 = vcmask 1048512  }
0x1955   :  { %v6331_v57 = vadd.f32 %v6271_v27, %v13513_v23  ;;  %v6370_v27 = vmul.f32 %v6338_v44, %v16536_v13 }
0x1957   :  { %v6363_v54 = vmul.f32 %v6331_v57, %v16536_v13  ;;  %v15383_v10 = vpop.xlane.xlu0 %6988 }
0x1958   :  { %v6277_v17 = vpop.xlane.xlu1 %6276 }
0x1959   :  { %v6496_v21 = vrot.slane %v6363_v54, %v16519_v30  ;;  %v6333_v52 = vadd.f32 %v6277_v17, %v13513_v23 }
0x195b   :  { %v6497_v40 = vsel %vm2787_vm3, %v6496_v21, %v6492_v31  ;;  %v6365_v15 = vmul.f32 %v6333_v52, %v16536_v13  ;;  %v15394_v56 = vpop.xlane.xlu0 %6994  ;;  %v6531_v21 = vrot.slane %v6370_v27, %v16447_v61  ;;  %v6372_v52 = vmul.f32 %v6340_v26, %v16536_v13 }
0x195c   :  { %v6502_v6 = vsel %vm2794_vm4, %v6501_v9, %v6497_v40  ;;  %v6283_v50 = vpop.xlane.xlu1 %6282 }
0x195d   :  { %v6506_v7 = vrot.slane %v6365_v15, %v16522_v29  ;;  %v6335_v48 = vadd.f32 %v6283_v50, %v13513_v23 }
0x195f   :  { %v6507_v49 = vsel %vm2801_vm5, %v6506_v7, %v6502_v6  ;;  %v6367_v20 = vmul.f32 %v6335_v48, %v16536_v13  ;;  %v15405_v35 = vpop.xlane.xlu0 %7000  ;;  %v6541_v7 = vrot.slane %v6372_v52, %v16452_v4  ;;  %v6329_v48 = vadd.f32 %v6265_v59, %v13513_v23 }
0x1960   :  { %v6512_v53 = vsel %vm2808_vm6, %v6511_v3, %v6507_v49  ;;  %v6289_v8 = vpop.xlane.xlu1 %6288  ;;  %v6374_v49 = vmul.f32 %v6342_v24, %v16536_v13 }
0x1961   :  { %v6516_v37 = vrot.slane %v6367_v20, %v16525_v43  ;;  %v6337_v38 = vadd.f32 %v6289_v8, %v13513_v23  ;;  %v6361_v59 = vmul.f32 %v6329_v48, %v16536_v13 }
0x1962   :  { %v6551_v26 = vrot.slane %v6374_v49, %v16454_v58 }
0x1963   :  { %v6517_v51 = vsel %vm2815_vm7, %v6516_v37, %v6512_v53  ;;  %v6369_v57 = vmul.f32 %v6337_v38, %v16536_v13  ;;  %v15416_v45 = vpop.xlane.xlu0 %7006 }
0x1964   :  { %v6522_v41 = vsel %vm2822_vm8, %v6521_v14, %v6517_v51  ;;  %v6295_v54 = vpop.xlane.xlu1 %6294  ;;  %v6376_v51 = vmul.f32 %v6344_v0, %v16536_v13 }
0x1965   :  { %v6526_v17 = vrot.slane %v6369_v57, %v16443_v34  ;;  %v6339_v31 = vadd.f32 %v6295_v54, %v13513_v23  ;;  %v7035_v57 = vadd.f32 %v15296_v2, %v13513_v23 }
0x1966   :  { %v6561_v24 = vrot.slane %v6376_v51, %v16458_v36 }
0x1967   :  { %v6527_v9 = vsel %vm2829_vm9, %v6526_v17, %v6522_v41  ;;  %v6371_v25 = vmul.f32 %v6339_v31, %v16536_v13  ;;  %v15425_v12 = vpop.xlane.xlu0 %7012  ;;  %v7037_v17 = vadd.f32 %v15308_v55, %v13513_v23 }
0x1968   :  { %v6532_v40 = vsel %vm2836_vm10, %v6531_v21, %v6527_v9  ;;  %v6301_v15 = vpop.xlane.xlu1 %6300  ;;  %v6487_v21 = vrot.slane %v6361_v59, %v16460_v47  ;;  %v7041_v59 = vadd.f32 %v15331_v19, %v13513_v23 }
0x1969   :  { %v6536_v6 = vrot.slane %v6371_v25, %v16449_v39  ;;  %v6341_v50 = vadd.f32 %v6301_v15, %v13513_v23 }
0x196b   :  { %v6537_v3 = vsel %vm2843_vm11, %v6536_v6, %v6532_v40  ;;  %v6373_v11 = vmul.f32 %v6341_v50, %v16536_v13  ;;  %v15436_v44 = vpop.xlane.xlu0 %7018  ;;  %v16552_v40 = vld [vmem:[#allocation59_spill] sm:$0xff] }
0x196c   :  { %v6542_v20 = vsel %vm16548_vm13, %v6541_v7, %v6537_v3  ;;  %v6307_v53 = vpop.xlane.xlu1 %6306  ;;  %v7067_v15 = vmul.f32 %v7035_v57, %v16552_v40  ;;  %v7069_v55 = vmul.f32 %v7037_v17, %v16552_v40  ;;  %v7039_v7 = vadd.f32 %v15320_v28, %v13513_v23  ;;  %vm16555_vm13 = vmmov %vm16554_vm0 }
0x196d   :  { %v6546_v8 = vrot.slane %v6373_v11, %v16453_v5  ;;  %v6343_v37 = vadd.f32 %v6307_v53, %v13513_v23  ;;  %v7043_v17 = vadd.f32 %v15342_v63, %v13513_v23 }
0x196e   :  { %v7134_v53 = vrot.slane %v7067_v15, %v16428_v46 }
0x196f   :  { %v6547_v38 = vsel %vm16549_vm12, %v6546_v8, %v6542_v20  ;;  %v6375_v14 = vmul.f32 %v6343_v37, %v16536_v13  ;;  %v15447_v27 = vpop.xlane.xlu0 %7024  ;;  %vm16556_vm12 = vcmask 1041409   ;;  %v7143_v37 = vrot.slane %v7069_v55, %v16518_v60 }
0x1970   :  { %v6313_v18 = vpop.xlane.xlu1 %6312  ;;  %v6552_v31 = vsel %vm16550_vm14, %v6551_v26, %v6547_v38  ;;  %v7075_v15 = vmul.f32 %v7043_v17, %v16552_v40  ;;  %vm16557_vm14 = vcmask 720512  }
0x1971   :  { %v6556_v41 = vrot.slane %v6375_v14, %v16459_v42  ;;  %v6345_v54 = vadd.f32 %v6313_v18, %v13513_v23 }
0x1973   :  { %v6557_v52 = vsel %vm16551_vm2, %v6556_v41, %v6552_v31  ;;  %v6377_v9 = vmul.f32 %v6345_v54, %v16536_v13  ;;  %v15461_v25 = vpop.xlane.xlu0 %7030  ;;  %v6488_v13 = vsel %vm16554_vm0, %v6487_v21, %v15375_v22  ;;  %v7071_v22 = vmul.f32 %v7039_v7, %v16552_v40 }
0x1974   :  { %v6944_v2 = vpop.xlane.xlu1 %6943  ;;  %v6562_v48 = vsel %vm16553_vm1, %v6561_v24, %v6557_v52  ;;  %v7073_v54 = vmul.f32 %v7041_v59, %v16552_v40  ;;  %v7049_v59 = vadd.f32 %v15372_v62, %v13513_v23  ;;  %vm16558_vm2 = vcmask 786112  }
0x1975   :  { %v6566_v6 = vrot.slane %v6377_v9, %v16460_v47  ;;  %v7036_v50 = vadd.f32 %v6944_v2, %v13513_v23  ;;  %v7153_v41 = vrot.slane %v7071_v22, %v16523_v33  ;;  %vm16559_vm1 = vcmask 851712  }
0x1976   :  { %v7163_v2 = vrot.slane %v7073_v54, %v16445_v1  ;;  %vm16560_vm0 = vcmask 917312  }
0x1977   :  { %v6567_v3 = vsel %vm16555_vm13, %v6566_v6, %v6562_v48  ;;  %v7068_v11 = vmul.f32 %v7036_v50, %v16552_v40  ;;  %v8016_v49 = vpop.permute.xlu0 %8015  ;;  %v7045_v6 = vadd.f32 %v15353_v32, %v13513_v23  ;;  %vm16561_vm13 = vcmask 982912  }
0x1978   :  { %v6568_v0 = vsel %vm16556_vm12, %v6567_v3, %v6488_v13  ;;  %8022 = vst.msk [vmem:[#allocation9 - $0x7] sm:$0x80] %vm8021_vm15, %v8016_v49  ;;  %v6950_v20 = vpop.xlane.xlu1 %6949  ;;  %v7173_v3 = vrot.slane %v7075_v15, %v16447_v61  ;;  %v7047_v49 = vadd.f32 %v15362_v16, %v13513_v23  ;;  %vm16570_vm12 = vmmov %vm16557_vm14 }
0x1979   :  { %6571 = vst [vmem:[#allocation8 + $0xa] sm:$0x3] %v6568_v0  ;;  %v7138_v28 = vrot.slane %v7068_v11, %v16519_v30  ;;  %v7038_v8 = vadd.f32 %v6950_v20, %v13513_v23  ;;  %v7077_v11 = vmul.f32 %v7045_v6, %v16552_v40 }
0x197a   :  { %v7079_v22 = vmul.f32 %v7047_v49, %v16552_v40  ;;  %v7057_v49 = vadd.f32 %v15416_v45, %v13513_v23  ;;  %v10213_v45 = vld [vmem:[%s15965_s12] ss:$0 sm:$0xff] }
0x197b   :  { %v7139_v38 = vsel %vm2787_vm3, %v7138_v28, %v7134_v53  ;;  %v7070_v14 = vmul.f32 %v7038_v8, %v16552_v40 }
0x197c   :  { %v7144_v26 = vsel %vm2794_vm4, %v7143_v37, %v7139_v38  ;;  %v6956_v51 = vpop.xlane.xlu1 %6955  ;;  %v7183_v37 = vrot.slane %v7077_v11, %v16452_v4 }
0x197d   :  { %v7148_v18 = vrot.slane %v7070_v14, %v16522_v29  ;;  %v7040_v57 = vadd.f32 %v6956_v51, %v13513_v23 }
0x197f   :  { %v7149_v19 = vsel %vm2801_vm5, %v7148_v18, %v7144_v26  ;;  %v7072_v31 = vmul.f32 %v7040_v57, %v16552_v40  ;;  %v7193_v57 = vrot.slane %v7079_v22, %v16454_v58 }
0x1980   :  { %v7154_v21 = vsel %vm2808_vm6, %v7153_v41, %v7149_v19  ;;  %v6962_v52 = vpop.xlane.xlu1 %6961  ;;  %v7081_v41 = vmul.f32 %v7049_v59, %v16552_v40  ;;  %v7089_v59 = vmul.f32 %v7057_v49, %v16552_v40 }
0x1981   :  { %v7158_v9 = vrot.slane %v7072_v31, %v16525_v43  ;;  %v7042_v24 = vadd.f32 %v6962_v52, %v13513_v23  ;;  %v7051_v31 = vadd.f32 %v15383_v10, %v13513_v23  ;;  %v7055_v10 = vadd.f32 %v15405_v35, %v13513_v23 }
0x1982   :  { %v7203_v52 = vrot.slane %v7081_v41, %v16458_v36 }
0x1983   :  { %v7159_v63 = vsel %vm2815_vm7, %v7158_v9, %v7154_v21  ;;  %v7074_v50 = vmul.f32 %v7042_v24, %v16552_v40  ;;  %v7053_v9 = vadd.f32 %v15394_v56, %v13513_v23  ;;  %v7083_v6 = vmul.f32 %v7051_v31, %v16552_v40 }
0x1984   :  { %v7164_v55 = vsel %vm2822_vm8, %v7163_v2, %v7159_v63  ;;  %v6968_v7 = vpop.xlane.xlu1 %6967  ;;  %v7087_v11 = vmul.f32 %v7055_v10, %v16552_v40  ;;  %v7061_v31 = vadd.f32 %v15436_v44, %v13513_v23 }
0x1985   :  { %v7168_v48 = vrot.slane %v7074_v50, %v16443_v34  ;;  %v7044_v13 = vadd.f32 %v6968_v7, %v13513_v23  ;;  %v7085_v50 = vmul.f32 %v7053_v9, %v16552_v40  ;;  %v7213_v56 = vrot.slane %v7083_v6, %v16428_v46 }
0x1986   :  { %v7232_v22 = vrot.slane %v7087_v11, %v16523_v33  ;;  %v7093_v44 = vmul.f32 %v7061_v31, %v16552_v40 }
0x1987   :  { %v7169_v32 = vsel %vm2829_vm9, %v7168_v48, %v7164_v55  ;;  %v7076_v0 = vmul.f32 %v7044_v13, %v16552_v40 }
0x1988   :  { %v7174_v20 = vsel %vm2836_vm10, %v7173_v3, %v7169_v32  ;;  %v6974_v53 = vpop.xlane.xlu1 %6973  ;;  %v7222_v3 = vrot.slane %v7085_v50, %v16518_v60 }
0x1989   :  { %v7178_v28 = vrot.slane %v7076_v0, %v16449_v39  ;;  %v7046_v8 = vadd.f32 %v6974_v53, %v13513_v23  ;;  %v7059_v53 = vadd.f32 %v15425_v12, %v13513_v23 }
0x198b   :  { %v7179_v16 = vsel %vm2843_vm11, %v7178_v28, %v7174_v20  ;;  %v7078_v38 = vmul.f32 %v7046_v8, %v16552_v40  ;;  %v7091_v41 = vmul.f32 %v7059_v53, %v16552_v40 }
0x198c   :  { %v7184_v14 = vsel %vm16557_vm14, %v7183_v37, %v7179_v16  ;;  %v6980_v26 = vpop.xlane.xlu1 %6979  ;;  %vm16573_vm14 = vmmov %vm16558_vm2 }
0x198d   :  { %v7188_v51 = vrot.slane %v7078_v38, %v16453_v5  ;;  %v7048_v18 = vadd.f32 %v6980_v26, %v13513_v23  ;;  %v7252_v50 = vrot.slane %v7091_v41, %v16447_v61 }
0x198f   :  { %v7189_v54 = vsel %vm16558_vm2, %v7188_v51, %v7184_v14  ;;  %v7080_v17 = vmul.f32 %v7048_v18, %v16552_v40  ;;  %v16562_v51 = vld [vmem:[#allocation63_spill] sm:$0xff]  ;;  %vm16576_vm2 = vmmov %vm16559_vm1 }
0x1990   :  { %v7194_v62 = vsel %vm16559_vm1, %v7193_v57, %v7189_v54  ;;  %v15530_v19 = vpop.xlane.xlu1 %6985  ;;  %vm8023_vm1 = vcmask 253952  }
0x1991   :  { %v7198_v21 = vrot.slane %v7080_v17, %v16459_v42 }
0x1993   :  { %v7199_v24 = vsel %vm16560_vm0, %v7198_v21, %v7194_v62  ;;  %v7242_v62 = vrot.slane %v7089_v59, %v16445_v1 }
0x1994   :  { %v15540_v2 = vsel %vm16561_vm13, %v7203_v52, %v7199_v24  ;;  %v6992_v15 = vpop.xlane.xlu1 %6991  ;;  %v16563_v24 = vld [vmem:[#allocation64_spill] sm:$0xff]  ;;  %vm16579_vm13 = vcmask 261120  }
0x1995   :  { %v7052_v63 = vadd.f32 %v6992_v15, %v13513_v23 }
0x1997   :  { %v7084_v55 = vmul.f32 %v7052_v63, %v16552_v40 }
0x1998   :  { %v6998_v7 = vpop.xlane.xlu1 %6997 }
0x1999   :  { %v7217_v48 = vrot.slane %v7084_v55, %v16519_v30  ;;  %v7054_v13 = vadd.f32 %v6998_v7, %v13513_v23  ;;  %v16564_v7 = vld [vmem:[#allocation17_spill] sm:$0xff] }
0x199b   :  { %v7218_v32 = vsel %vm2787_vm3, %v7217_v48, %v7213_v56  ;;  %v7086_v35 = vmul.f32 %v7054_v13, %v16552_v40  ;;  %v16565_v48 = vld [vmem:[#allocation16_spill] sm:$0xff] }
0x199c   :  { %v7223_v0 = vsel %vm2794_vm4, %v7222_v3, %v7218_v32  ;;  %v7004_v20 = vpop.xlane.xlu1 %7003  ;;  %v16566_v3 = vld [vmem:[#allocation19_spill] sm:$0xff] }
0x199d   :  { %v7227_v28 = vrot.slane %v7086_v35, %v16522_v29  ;;  %v7056_v8 = vadd.f32 %v7004_v20, %v13513_v23  ;;  %v7527_v37 = vpop.f32.mrb[110].mxu1  ;;  %v16567_v35 = vld [vmem:[#allocation18_spill] sm:$0xff]  ;;  %v7063_v20 = vadd.f32 %v15447_v27, %v13513_v23  ;;  %v7065_v27 = vadd.f32 %v15461_v25, %v13513_v23 }
0x199e   :  { %v7528_v16 = vadd.f32 %v10213_v45, %v7527_v37  ;;  %v8601_v38 = vpop.f32.mrb[111].mxu1  ;;  %v16569_v45 = vld [vmem:[#allocation20_spill] sm:$0xff] }
0x199f   :  { %v7228_v14 = vsel %vm2801_vm5, %v7227_v28, %v7223_v0  ;;  %v7088_v26 = vmul.f32 %v7056_v8, %v16552_v40  ;;  %v16568_v8 = vld [vmem:[#allocation21_spill] sm:$0xff]  ;;  %v7262_v38 = vrot.slane %v7093_v44, %v16452_v4 }
0x19a0   :  { %v7233_v12 = vsel %vm2808_vm6, %v7232_v22, %v7228_v14  ;;  %v15571_v18 = vrot.slane %v7528_v16, %v16562_v51  ;;  %v7010_v57 = vpop.xlane.xlu1 %7009  ;;  %v7050_v14 = vadd.f32 %v15530_v19, %v13513_v23  ;;  %v16572_v19 = vld [vmem:[#allocation22_spill] sm:$0xff] }
0x19a1   :  { %v7237_v54 = vrot.slane %v7088_v26, %v16525_v43  ;;  %v7058_v17 = vadd.f32 %v7010_v57, %v13513_v23  ;;  %v7095_v57 = vmul.f32 %v7063_v20, %v16552_v40 }
0x19a2   :  { %v7546_v21 = vrot.slane %v15571_v18, %v16562_v51 }
0x19a3   :  { %v7238_v52 = vsel %vm2815_vm7, %v7237_v54, %v7233_v12  ;;  %v7090_v9 = vmul.f32 %v7058_v17, %v16552_v40  ;;  %v16571_v17 = vld [vmem:[#allocation23_spill] sm:$0xff] }
0x19a4   :  { %v15584_v15 = vrot.slane %v7546_v21, %v16563_v24  ;;  %v7243_v6 = vsel %vm2822_vm8, %v7242_v62, %v7238_v52  ;;  %v7016_v63 = vpop.xlane.xlu1 %7015  ;;  %v7097_v52 = vmul.f32 %v7065_v27, %v16552_v40 }
0x19a5   :  { %v7247_v10 = vrot.slane %v7090_v9, %v16443_v34  ;;  %v7060_v55 = vadd.f32 %v7016_v63, %v13513_v23  ;;  %v7082_v9 = vmul.f32 %v7050_v14, %v16552_v40 }
0x19a6   :  { %v7565_v56 = vadd.f32 %v16564_v7, %v15584_v15  ;;  %v7564_v13 = vadd.f32 %v16565_v48, %v15584_v15  ;;  %v7567_v11 = vadd.f32 %v16566_v3, %v15584_v15  ;;  %v7566_v0 = vadd.f32 %v16567_v35, %v15584_v15  ;;  %v16575_v48 = vld [vmem:[#allocation24_spill] sm:$0xff] }
0x19a7   :  { %v7248_v49 = vsel %vm2829_vm9, %v7247_v10, %v7243_v6  ;;  %v7092_v32 = vmul.f32 %v7060_v55, %v16552_v40  ;;  %v7569_v37 = vadd.f32 %v16568_v8, %v15584_v15  ;;  %v7568_v16 = vadd.f32 %v16569_v45, %v15584_v15  ;;  %v16574_v55 = vld [vmem:[#allocation26_spill] sm:$0xff]  ;;  %v16577_v45 = vld [vmem:[#allocation29_spill] sm:$0xff] }
0x19a8   :  { %v7253_v53 = vsel %vm2836_vm10, %v7252_v50, %v7248_v49  ;;  %v7022_v28 = vpop.xlane.xlu1 %7021  ;;  %9952 = vtanh.f32 %v7565_v56  ;;  %v7571_v62 = vadd.f32 %v16571_v17, %v15584_v15  ;;  %v7570_v21 = vadd.f32 %v16572_v19, %v15584_v15 }
0x19a9   :  { %v7257_v22 = vrot.slane %v7092_v32, %v16449_v39  ;;  %v7062_v59 = vadd.f32 %v7022_v28, %v13513_v23  ;;  %9954 = vtanh.f32 %v7564_v13  ;;  %v7272_v50 = vrot.slane %v7095_v57, %v16454_v58  ;;  %v15646_v28 = vld [vmem:[%s15966_s13] ss:$0 sm:$0xff]  ;;  %s10335_s13 = smov [#allocation9]  }
0x19aa   :  { %9956 = vtanh.f32 %v7567_v11  ;;  %v7573_v44 = vadd.f32 %v16574_v55, %v15584_v15  ;;  %v7572_v13 = vadd.f32 %v16575_v48, %v15584_v15  ;;  %v7282_v11 = vrot.slane %v7097_v52, %v16458_v36  ;;  %s8054_s3 = sshll.u32 %s10335_s13, 4  ;;  %s8055_s3 = int_to_ptr.vmem [resolvable:$true] %s8054_s3 }
0x19ab   :  { %v7258_v26 = vsel %vm2843_vm11, %v7257_v22, %v7253_v53  ;;  %v7094_v12 = vmul.f32 %v7062_v59, %v16552_v40  ;;  %9958 = vtanh.f32 %v7566_v0  ;;  %v7208_v49 = vrot.slane %v7082_v9, %v16460_v47  ;;  %s10249_s22 = scalar_lea.vmem %s8055_s3, 32  ;;  %p10254_p0 = scmp.lt.s32.totalorder %s8055_s3, %s8055_s3 }
0x19ac   :  { %v7263_v41 = vsel %vm16570_vm12, %v7262_v38, %v7258_v26  ;;  %v7028_v54 = vpop.xlane.xlu1 %7027  ;;  %9960 = vtanh.f32 %v7569_v37  ;;  %v7539_v0 = vcombine.high %v15571_v18, %v15571_v18  ;;  %v16578_v18 = vld [vmem:[#allocation28_spill] sm:$0xff]  ;;  %vm16580_vm12 = vcmask 982912   ;;  %p10250_p13 = scmp.ne.s32.totalorder %s8055_s3, %s10249_s22  ;;  %p10255_p1 = scmp.lt.s32.totalorder %s10249_s22, %s10249_s22 }
0x19ad   :  { %v7267_v25 = vrot.slane %v7094_v12, %v16453_v5  ;;  %v7064_v31 = vadd.f32 %v7028_v54, %v13513_v23  ;;  %9962 = vtanh.f32 %v7568_v16  ;;  %v7575_v16 = vadd.f32 %v16577_v45, %v15584_v15 }
0x19ae   :  { %9964 = vtanh.f32 %v7571_v62  ;;  %v7574_v38 = vadd.f32 %v16578_v18, %v15584_v15  ;;  %v16597_v18 = vld [vmem:[#allocation37_spill] sm:$0xff]  ;;  %p10256_p2 = por %p10255_p1, %p10254_p0 }
0x19af   :  { %v7268_v6 = vsel %vm16573_vm14, %v7267_v25, %v7263_v41  ;;  %v7096_v63 = vmul.f32 %v7064_v31, %v16552_v40  ;;  %9966 = vtanh.f32 %v7570_v21  ;;  %vm16581_vm14 = vmmov %vm16579_vm13  ;;  %v7553_v31 = vrot.slane %v7539_v0, %v16562_v51  ;;  %v16585_v21 = vld [vmem:[#allocation31_spill] sm:$0xff] }
0x19b0   :  { %v7034_v10 = vpop.xlane.xlu1 %7033  ;;  %v7273_v32 = vsel %vm16576_vm2, %v7272_v50, %v7268_v6  ;;  %9968 = vtanh.f32 %v7573_v44  ;;  %vm16582_vm2 = vcmask 1048512   ;;  %v7577_v52 = vadd.f32 %v16585_v21, %v15584_v15  ;;  %v16593_v0 = vld [vmem:[#allocation35_spill] sm:$0xff]  ;;  %p10257_p3 = pnand %p10256_p2, %p10250_p13 }
0x19b1   :  { %v7277_v7 = vrot.slane %v7096_v63, %v16459_v42  ;;  %v7066_v56 = vadd.f32 %v7034_v10, %v13513_v23  ;;  %9970 = vtanh.f32 %v7572_v13  ;;  %v7209_v62 = vsel %vm16582_vm2, %v7208_v49, %v15540_v2  ;;  %v16587_v63 = vld [vmem:[#allocation30_spill] sm:$0xff] }
0x19b2   :  { %v9953_v3 = vpop.eup %9952  ;;  %9972 = vtanh.f32 %v7575_v16  ;;  %v7576_v2 = vadd.f32 %v16587_v63, %v15584_v15  ;;  %v15675_v44 = vrot.slane %v7553_v31, %v16563_v24 }
0x19b3   :  { %v9955_v35 = vpop.eup %9954  ;;  %v7278_v20 = vsel %vm16560_vm0, %v7277_v7, %v7273_v32  ;;  %v7098_v53 = vmul.f32 %v7066_v56, %v16552_v40  ;;  %v7629_v8 = vmul.f32 %v15646_v28, %v9953_v3  ;;  %vm16583_vm0 = vmmov %vm16582_vm2  ;;  %9974 = vtanh.f32 %v7574_v38  ;;  %v16589_v7 = vld [vmem:[#allocation33_spill] sm:$0xff]  ;;  %v16591_v3 = vld [vmem:[#allocation32_spill] sm:$0xff] }
0x19b4   :  { %v9957_v37 = vpop.eup %9956  ;;  %v8018_v22 = vpop.permute.xlu1 %8017  ;;  %v7628_v59 = vmul.f32 %v15646_v28, %v9955_v35  ;;  %v7283_v57 = vsel %vm16580_vm12, %v7282_v11, %v7278_v20  ;;  %vm16586_vm12 = vmmov %vm16581_vm14  ;;  %9976 = vtanh.f32 %v7577_v52  ;;  %v7579_v56 = vadd.f32 %v16589_v7, %v15584_v15 }
0x19b5   :  { %v9959_v27 = vpop.eup %9958  ;;  %v7287_v40 = vrot.slane %v7098_v53, %v16460_v47  ;;  %8024 = vst.msk [vmem:[#allocation9 + $0x1] sm:$0x1] %vm8023_vm1, %v8018_v22  ;;  %v7663_v14 = vsel %vm16579_vm13, %v7629_v8, 0.0  ;;  %v7631_v26 = vmul.f32 %v15646_v28, %v9957_v37  ;;  %vm16584_vm13 = vcmask 1041409   ;;  %vm16590_vm2 = vmmov %vm16586_vm12  ;;  %v16595_v37 = vld [vmem:[#allocation34_spill] sm:$0xff] }
0x19b6   :  { %v9961_v12 = vpop.eup %9960  ;;  %7664 = vadd.xlane.f32.xlu1 %v7663_v14  ;;  %v7660_v41 = vsel %vm16581_vm14, %v7628_v59, 0.0  ;;  %v7630_v54 = vmul.f32 %v15646_v28, %v9959_v27  ;;  %vm16588_vm14 = vmmov %vm16586_vm12  ;;  %9978 = vtanh.f32 %v7576_v2  ;;  %v7578_v11 = vadd.f32 %v16591_v3, %v15584_v15  ;;  %v16599_v14 = vld [vmem:[#allocation36_spill] sm:$0xff]  ;;  %v16604_v2 = vld [vmem:[#allocation41_spill] sm:$0xff] }
0x19b7   :  { %v9963_v17 = vpop.eup %9962  ;;  %v7288_v25 = vsel %vm16583_vm0, %v7287_v40, %v7283_v57  ;;  %7661 = vadd.xlane.f32.xlu0 %v7660_v41  ;;  %v7669_v9 = vsel %vm16586_vm12, %v7631_v26, 0.0  ;;  %v7633_v6 = vmul.f32 %v15646_v28, %v9961_v12  ;;  %vm16592_vm0 = vmmov %vm16590_vm2  ;;  %9980 = vtanh.f32 %v7579_v56 }
0x19b8   :  { %v7289_v19 = vsel %vm16584_vm13, %v7288_v25, %v7209_v62  ;;  %v9965_v50 = vpop.eup %9964  ;;  %v7666_v10 = vsel %vm16588_vm14, %v7630_v54, 0.0  ;;  %v7632_v51 = vmul.f32 %v15646_v28, %v9963_v17  ;;  %v7581_v20 = vadd.f32 %v16593_v0, %v15675_v44  ;;  %vm16594_vm13 = vmmov %vm16592_vm0  ;;  %v16601_v17 = vld [vmem:[#allocation39_spill] sm:$0xff] }
0x19b9   :  { %7292 = vst [vmem:[#allocation8 + $0xc] sm:$0x3] %v7289_v19  ;;  %v9967_v55 = vpop.eup %9966  ;;  %v7675_v48 = vsel %vm16590_vm2, %v7633_v6, 0.0  ;;  %v7635_v13 = vmul.f32 %v15646_v28, %v9965_v50  ;;  %9982 = vtanh.f32 %v7578_v11  ;;  %v7580_v15 = vadd.f32 %v16595_v37, %v15675_v44  ;;  %vm16596_vm12 = vmmov %vm16592_vm0  ;;  %v16602_v19 = vld [vmem:[#allocation38_spill] sm:$0xff]  ;;  %v16608_v11 = vld [vmem:[#allocation43_spill] sm:$0xff] }
0x19ba   :  { %7670 = vadd.xlane.f32.xlu1 %v7669_v9  ;;  %v9969_v49 = vpop.eup %9968  ;;  %v7672_v32 = vsel %vm16592_vm0, %v7632_v51, 0.0  ;;  %v7634_v35 = vmul.f32 %v15646_v28, %v9967_v55  ;;  %9984 = vtanh.f32 %v7581_v20  ;;  %v7583_v38 = vadd.f32 %v16597_v18, %v15675_v44  ;;  %vm16598_vm14 = vmmov %vm16592_vm0  ;;  %v16606_v55 = vld [vmem:[#allocation40_spill] sm:$0xff] }
0x19bb   :  { %7667 = vadd.xlane.f32.xlu0 %v7666_v10  ;;  %v9971_v24 = vpop.eup %9970  ;;  %v7681_v53 = vsel %vm16594_vm13, %v7635_v13, 0.0  ;;  %v7637_v8 = vmul.f32 %v15646_v28, %v9969_v49  ;;  %9986 = vtanh.f32 %v7580_v15  ;;  %v7582_v26 = vadd.f32 %v16599_v14, %v15675_v44  ;;  %vm16600_vm2 = vmmov %vm16592_vm0  ;;  %v16611_v15 = vld [vmem:[#allocation45_spill] sm:$0xff] }
0x19bc   :  { %v9973_v22 = vpop.eup %9972  ;;  %v7678_v59 = vsel %vm16596_vm12, %v7634_v35, 0.0  ;;  %v7636_v45 = vmul.f32 %v15646_v28, %v9971_v24  ;;  %9988 = vtanh.f32 %v7583_v38  ;;  %v7585_v62 = vadd.f32 %v16601_v17, %v15675_v44  ;;  %vm16603_vm13 = vmmov %vm16592_vm0  ;;  %v16610_v24 = vld [vmem:[#allocation42_spill] sm:$0xff] }
0x19bd   :  { %v9975_v16 = vpop.eup %9974  ;;  %v7687_v27 = vsel %vm16598_vm14, %v7637_v8, 0.0  ;;  %v7639_v40 = vmul.f32 %v15646_v28, %v9973_v22  ;;  %9990 = vtanh.f32 %v7582_v26  ;;  %v7584_v21 = vadd.f32 %v16602_v19, %v15675_v44  ;;  %vm16605_vm12 = vmmov %vm16592_vm0  ;;  %v16615_v26 = vld [vmem:[#allocation47_spill] sm:$0xff] }
0x19be   :  { %7676 = vadd.xlane.f32.xlu1 %v7675_v48  ;;  %v9977_v12 = vpop.eup %9976  ;;  %v7684_v57 = vsel %vm16600_vm2, %v7636_v45, 0.0  ;;  %v7638_v41 = vmul.f32 %v15646_v28, %v9975_v16  ;;  %9992 = vtanh.f32 %v7585_v62  ;;  %v7587_v50 = vadd.f32 %v16604_v2, %v15675_v44  ;;  %vm16607_vm14 = vmmov %vm16592_vm0  ;;  %v16613_v16 = vld [vmem:[#allocation44_spill] sm:$0xff] }
0x19bf   :  { %7673 = vadd.xlane.f32.xlu0 %v7672_v32  ;;  %v7693_v25 = vsel %vm16592_vm0, %v7639_v40, 0.0  ;;  %v7641_v31 = vmul.f32 %v15646_v28, %v9977_v12  ;;  %9994 = vtanh.f32 %v7584_v21  ;;  %v7586_v7 = vadd.f32 %v16606_v55, %v15675_v44  ;;  %vm16609_vm2 = vmmov %vm16592_vm0  ;;  %v16619_v21 = vld [vmem:[#allocation49_spill] sm:$0xff] }
0x19c0   :  { %v9979_v54 = vpop.eup %9978  ;;  %v7690_v9 = vsel %vm16603_vm13, %v7638_v41, 0.0  ;;  %9996 = vtanh.f32 %v7587_v50  ;;  %v7589_v49 = vadd.f32 %v16608_v11, %v15675_v44  ;;  %v7588_v0 = vadd.f32 %v16610_v24, %v15675_v44  ;;  %vm16612_vm13 = vmmov %vm16592_vm0 }
0x19c1   :  { %v9981_v52 = vpop.eup %9980  ;;  %v7640_v6 = vmul.f32 %v15646_v28, %v9979_v54  ;;  %v7699_v10 = vsel %vm16605_vm12, %v7641_v31, 0.0  ;;  %9998 = vtanh.f32 %v7586_v7  ;;  %v7591_v22 = vadd.f32 %v16611_v15, %v15675_v44  ;;  %vm16614_vm12 = vmmov %vm16592_vm0  ;;  %v16617_v54 = vld [vmem:[#allocation46_spill] sm:$0xff] }
0x19c2   :  { %7682 = vadd.xlane.f32.xlu1 %v7681_v53  ;;  %v7643_v51 = vmul.f32 %v15646_v28, %v9981_v52  ;;  %10000 = vtanh.f32 %v7589_v49  ;;  %v7590_v18 = vadd.f32 %v16613_v16, %v15675_v44  ;;  %v7593_v12 = vadd.f32 %v16615_v26, %v15675_v44 }
0x19c3   :  { %7679 = vadd.xlane.f32.xlu0 %v7678_v59  ;;  %v9983_v63 = vpop.eup %9982  ;;  %v7696_v48 = vsel %vm16607_vm14, %v7640_v6, 0.0  ;;  %10002 = vtanh.f32 %v7588_v0  ;;  %vm16616_vm14 = vmmov %vm16592_vm0  ;;  %v7592_v17 = vadd.f32 %v16617_v54, %v15675_v44  ;;  %v7595_v52 = vadd.f32 %v16619_v21, %v15675_v44 }
0x19c4   :  { %v9985_v56 = vpop.eup %9984  ;;  %v7642_v13 = vmul.f32 %v15646_v28, %v9983_v63  ;;  %v7705_v32 = vsel %vm16609_vm2, %v7643_v51, 0.0  ;;  %10004 = vtanh.f32 %v7591_v22  ;;  %vm16618_vm2 = vmmov %vm16592_vm0  ;;  %v16620_v63 = vld [vmem:[#allocation48_spill] sm:$0xff] }
0x19c5   :  { %v9987_v3 = vpop.eup %9986  ;;  %v7645_v35 = vmul.f32 %v15646_v28, %v9985_v56  ;;  %10006 = vtanh.f32 %v7590_v18  ;;  %v7594_v2 = vadd.f32 %v16620_v63, %v15675_v44 }
0x19c6   :  { %7688 = vadd.xlane.f32.xlu1 %v7687_v27  ;;  %v9989_v20 = vpop.eup %9988  ;;  %v7702_v53 = vsel %vm16592_vm0, %v7642_v13, 0.0  ;;  %v7644_v8 = vmul.f32 %v15646_v28, %v9987_v3  ;;  %10008 = vtanh.f32 %v7593_v12 }
0x19c7   :  { %7685 = vadd.xlane.f32.xlu0 %v7684_v57  ;;  %v9991_v37 = vpop.eup %9990  ;;  %v7711_v59 = vsel %vm16612_vm13, %v7645_v35, 0.0  ;;  %v7647_v45 = vmul.f32 %v15646_v28, %v9989_v20  ;;  %10010 = vtanh.f32 %v7592_v17  ;;  %vm16621_vm13 = vmmov %vm16592_vm0 }
0x19c8   :  { %v9993_v38 = vpop.eup %9992  ;;  %v7708_v27 = vsel %vm16614_vm12, %v7644_v8, 0.0  ;;  %v7646_v40 = vmul.f32 %v15646_v28, %v9991_v37  ;;  %10012 = vtanh.f32 %v7595_v52  ;;  %vm16622_vm12 = vmmov %vm16592_vm0 }
0x19c9   :  { %v9995_v14 = vpop.eup %9994  ;;  %v7717_v57 = vsel %vm16616_vm14, %v7647_v45, 0.0  ;;  %v7649_v41 = vmul.f32 %v15646_v28, %v9993_v38  ;;  %10014 = vtanh.f32 %v7594_v2  ;;  %vm16623_vm14 = vmmov %vm16592_vm0 }
0x19ca   :  { %7694 = vadd.xlane.f32.xlu1 %v7693_v25  ;;  %v9997_v62 = vpop.eup %9996  ;;  %v7714_v25 = vsel %vm16618_vm2, %v7646_v40, 0.0  ;;  %v7648_v31 = vmul.f32 %v15646_v28, %v9995_v14  ;;  %vm16624_vm2 = vmmov %vm16592_vm0  ;;  %v16630_v40 = vld [vmem:[#allocation92_spill] sm:$0xff]  ;;  %v16631_v14 = vld [vmem:[#allocation94_spill] sm:$0xff] }
0x19cb   :  { %7691 = vadd.xlane.f32.xlu0 %v7690_v9  ;;  %v9999_v19 = vpop.eup %9998  ;;  %v7723_v9 = vsel %vm16592_vm0, %v7649_v41, 0.0  ;;  %v7651_v6 = vmul.f32 %v15646_v28, %v9997_v62  ;;  %v8027_v26 = vrot.slane %v16631_v14, 7 }
0x19cc   :  { %v10001_v50 = vpop.eup %10000  ;;  %v7650_v51 = vmul.f32 %v15646_v28, %v9999_v19 }
0x19cd   :  { %v10003_v55 = vpop.eup %10002  ;;  %v7729_v7 = vsel %vm16622_vm12, %v7651_v6, 0.0  ;;  %v7653_v56 = vmul.f32 %v15646_v28, %v10001_v50  ;;  %vm16626_vm12 = vmmov %vm16592_vm0 }
0x19ce   :  { %7700 = vadd.xlane.f32.xlu1 %v7699_v10  ;;  %v7720_v10 = vsel %vm16621_vm13, %v7648_v31, 0.0  ;;  %v7726_v13 = vsel %vm16623_vm14, %v7650_v51, 0.0  ;;  %v7652_v44 = vmul.f32 %v15646_v28, %v10003_v55  ;;  %vm16625_vm13 = vmmov %vm16592_vm0 }
0x19cf   :  { %7697 = vadd.xlane.f32.xlu0 %v7696_v48  ;;  %v10005_v48 = vpop.eup %10004  ;;  %v7735_v11 = vsel %vm16624_vm2, %v7653_v56, 0.0  ;;  %vm16627_vm14 = vmmov %vm16592_vm0 }
0x19d0   :  { %v10007_v3 = vpop.eup %10006  ;;  %v7655_v49 = vmul.f32 %v15646_v28, %v10005_v48  ;;  %v7732_v35 = vsel %vm16592_vm0, %v7652_v44, 0.0  ;;  %vm16628_vm2 = vmmov %vm16592_vm0 }
0x19d1   :  { %v7654_v24 = vmul.f32 %v15646_v28, %v10007_v3 }
0x19d2   :  { %7706 = vadd.xlane.f32.xlu1 %v7705_v32  ;;  %v10009_v32 = vpop.eup %10008  ;;  %v7741_v20 = vsel %vm16625_vm13, %v7655_v49, 0.0  ;;  %vm16629_vm13 = vmmov %vm16592_vm0 }
0x19d3   :  { %7703 = vadd.xlane.f32.xlu0 %v7702_v53  ;;  %v10011_v0 = vpop.eup %10010  ;;  %v7657_v53 = vmul.f32 %v15646_v28, %v10009_v32  ;;  %v7738_v37 = vsel %vm16626_vm12, %v7654_v24, 0.0 }
0x19d4   :  { %v10013_v8 = vpop.eup %10012  ;;  %v7656_v15 = vmul.f32 %v15646_v28, %v10011_v0 }
0x19d5   :  { %v10015_v22 = vpop.eup %10014  ;;  %v7659_v45 = vmul.f32 %v15646_v28, %v10013_v8 }
0x19d6   :  { %7712 = vadd.xlane.f32.xlu1 %v7711_v59  ;;  %v7747_v59 = vsel %vm16627_vm14, %v7657_v53, 0.0  ;;  %v7744_v16 = vsel %vm16628_vm2, %v7656_v15, 0.0  ;;  %v7658_v18 = vmul.f32 %v15646_v28, %v10015_v22 }
0x19d7   :  { %7709 = vadd.xlane.f32.xlu0 %v7708_v27  ;;  %v7753_v38 = vsel %vm16592_vm0, %v7659_v45, 0.0 }
0x19d8   :  { %v7750_v27 = vsel %vm16629_vm13, %v7658_v18, 0.0 }
0x19da   :  { %7718 = vadd.xlane.f32.xlu1 %v7717_v57 }
0x19db   :  { %7715 = vadd.xlane.f32.xlu0 %v7714_v25 }
0x19de   :  { %7724 = vadd.xlane.f32.xlu1 %v7723_v9 }
0x19df   :  { %7721 = vadd.xlane.f32.xlu0 %v7720_v10 }
0x19e2   :  { %7730 = vadd.xlane.f32.xlu1 %v7729_v7 }
0x19e3   :  { %7727 = vadd.xlane.f32.xlu0 %v7726_v13 }
0x19e6   :  { %7736 = vadd.xlane.f32.xlu1 %v7735_v11 }
0x19e7   :  { %7733 = vadd.xlane.f32.xlu0 %v7732_v35 }
0x19ea   :  { %7742 = vadd.xlane.f32.xlu1 %v7741_v20 }
0x19eb   :  { %7739 = vadd.xlane.f32.xlu0 %v7738_v37 }
0x19ee   :  { %7748 = vadd.xlane.f32.xlu1 %v7747_v59 }
0x19ef   :  { %7745 = vadd.xlane.f32.xlu0 %v7744_v16 }
0x19f2   :  { %7754 = vadd.xlane.f32.xlu1 %v7753_v38 }
0x19f3   :  { %7751 = vadd.xlane.f32.xlu0 %v7750_v27 }
0x1a03   :  { %8028 = vrot.lane.b32.xlu1 %v16630_v40, %s10330_s28 }
0x1a09   :  { %8030 = vrot.lane.b32.xlu0 %v8027_v26, %s10330_s28 }
0x1a0a   :  { %10260 = shalt.err (!%p10257_p3)
}
0x1a0b   :  { %s10261_s2 = scalar_lea.hbm %s15969_s16, 32 }
0x1a0c   :  { %p10262_p4 = scmp.ne.s32.totalorder %s15969_s16, %s10261_s2  ;;  %p10265_p5 = scmp.lt.u32.totalorder %s10261_s2, %s15969_s16 }
0x1a0e   :  { %p10267_p6 = pnand %p10265_p5, %p10262_p4 }
0x1a10   :  { %10270 = shalt.err (!%p10267_p6)
}
0x1a11   :  { %8057 = dma.vmem_to_hbm [thread:$0]  %s8055_s3, 32, %s15969_s16, [#allocation10]   ;;  %v16632_v55 = vld [vmem:[#allocation68_spill] sm:$0xff] }
0x1a12   :  { %s10336_s16 = smov [#allocation11]   ;;  %s10337_s30 = smov [#allocation8]  }
0x1a13   :  { %s8064_s0 = sshll.u32 %s10336_s16, 4  ;;  %s8041_s14 = sshll.u32 %s10337_s30, 4  ;;  %s8065_s0 = int_to_ptr.vmem [resolvable:$true] %s8064_s0  ;;  %s8042_s14 = int_to_ptr.vmem [resolvable:$true] %s8041_s14 }
0x1a14   :  { %s10271_s19 = scalar_lea.vmem %s8065_s0, 32  ;;  %p10276_p8 = scmp.lt.s32.totalorder %s8065_s0, %s8065_s0 }
0x1a15   :  { %p10272_p7 = scmp.ne.s32.totalorder %s8065_s0, %s10271_s19  ;;  %p10277_p9 = scmp.lt.s32.totalorder %s10271_s19, %s10271_s19 }
0x1a17   :  { %p10278_p10 = por %p10277_p9, %p10276_p8 }
0x1a19   :  { %p10279_p11 = pnand %p10278_p10, %p10272_p7 }
0x1a43   :  { %v7665_v28 = vpop.xlane.xlu1 %7664 }
0x1a44   :  { %v7662_v12 = vpop.xlane.xlu0 %7661  ;;  %v7757_v63 = vadd.f32 %v7665_v28, %v13513_v23 }
0x1a45   :  { %v7756_v2 = vadd.f32 %v7662_v12, %v13513_v23 }
0x1a46   :  { %v7789_v7 = vmul.f32 %v7757_v63, %v16632_v55 }
0x1a47   :  { %v7671_v57 = vpop.xlane.xlu1 %7670  ;;  %v7788_v56 = vmul.f32 %v7756_v2, %v16632_v55 }
0x1a48   :  { %v7668_v41 = vpop.xlane.xlu0 %7667  ;;  %v7759_v48 = vadd.f32 %v7671_v57, %v13513_v23  ;;  %v7859_v32 = vrot.slane %v7789_v7, %v16519_v30 }
0x1a49   :  { %v7758_v50 = vadd.f32 %v7668_v41, %v13513_v23  ;;  %v7855_v35 = vrot.slane %v7788_v56, %v16428_v46 }
0x1a4a   :  { %v7791_v24 = vmul.f32 %v7759_v48, %v16632_v55 }
0x1a4b   :  { %v7677_v54 = vpop.xlane.xlu1 %7676  ;;  %v7790_v13 = vmul.f32 %v7758_v50, %v16632_v55  ;;  %v7860_v18 = vsel %vm2787_vm3, %v7859_v32, %v7855_v35 }
0x1a4c   :  { %v7674_v17 = vpop.xlane.xlu0 %7673  ;;  %v7761_v8 = vadd.f32 %v7677_v54, %v13513_v23  ;;  %v7869_v38 = vrot.slane %v7791_v24, %v16522_v29 }
0x1a4d   :  { %v7760_v44 = vadd.f32 %v7674_v17, %v13513_v23  ;;  %v7864_v20 = vrot.slane %v7790_v13, %v16518_v60 }
0x1a4e   :  { %v7793_v57 = vmul.f32 %v7761_v8, %v16632_v55 }
0x1a4f   :  { %v7683_v62 = vpop.xlane.xlu1 %7682  ;;  %v7792_v37 = vmul.f32 %v7760_v44, %v16632_v55  ;;  %v7865_v14 = vsel %vm2794_vm4, %v7864_v20, %v7860_v18 }
0x1a50   :  { %v7680_v25 = vpop.xlane.xlu0 %7679  ;;  %v7763_v27 = vadd.f32 %v7683_v62, %v13513_v23 }
0x1a51   :  { %v7762_v59 = vadd.f32 %v7680_v25, %v13513_v23  ;;  %v7874_v41 = vrot.slane %v7792_v37, %v16523_v33 }
0x1a53   :  { %v7689_v31 = vpop.xlane.xlu1 %7688  ;;  %v7794_v25 = vmul.f32 %v7762_v59, %v16632_v55 }
0x1a54   :  { %v7686_v19 = vpop.xlane.xlu0 %7685  ;;  %v7765_v56 = vadd.f32 %v7689_v31, %v13513_v23 }
0x1a55   :  { %v7764_v62 = vadd.f32 %v7686_v19, %v13513_v23  ;;  %v7879_v19 = vrot.slane %v7793_v57, %v16525_v43 }
0x1a56   :  { %v7797_v8 = vmul.f32 %v7765_v56, %v16632_v55 }
0x1a57   :  { %v15783_v21 = vpop.xlane.xlu1 %7694  ;;  %v7796_v35 = vmul.f32 %v7764_v62, %v16632_v55 }
0x1a58   :  { %v7692_v52 = vpop.xlane.xlu0 %7691 }
0x1a59   :  { %v7766_v31 = vadd.f32 %v7692_v52, %v13513_v23  ;;  %v7767_v52 = vadd.f32 %v15783_v21, %v13513_v23 }
0x1a5b   :  { %v15785_v9 = vpop.xlane.xlu1 %7700 }
0x1a5c   :  { %v15787_v6 = vpop.xlane.xlu0 %7697 }
0x1a5f   :  { %v15792_v10 = vpop.xlane.xlu1 %7706 }
0x1a60   :  { %v15794_v51 = vpop.xlane.xlu0 %7703 }
0x1a63   :  { %v7713_v3 = vpop.xlane.xlu1 %7712 }
0x1a64   :  { %v7773_v11 = vadd.f32 %v7713_v3, %v13513_v23  ;;  %v7710_v49 = vpop.xlane.xlu0 %7709 }
0x1a65   :  { %v7772_v0 = vadd.f32 %v7710_v49, %v13513_v23 }
0x1a66   :  { %v7805_v53 = vmul.f32 %v7773_v11, %v16632_v55 }
0x1a67   :  { %v7804_v15 = vmul.f32 %v7772_v0, %v16632_v55  ;;  %v7719_v22 = vpop.xlane.xlu1 %7718 }
0x1a68   :  { %v7775_v45 = vadd.f32 %v7719_v22, %v13513_v23  ;;  %v7716_v16 = vpop.xlane.xlu0 %7715  ;;  %v7938_v26 = vrot.slane %v7805_v53, %v16519_v30  ;;  %v7870_v30 = vsel %vm2801_vm5, %v7869_v38, %v7865_v14  ;;  %v7894_v38 = vrot.slane %v7796_v35, %v16447_v61 }
0x1a69   :  { %v7774_v40 = vadd.f32 %v7716_v16, %v13513_v23  ;;  %v7934_v28 = vrot.slane %v7804_v15, %v16428_v46  ;;  %v7795_v46 = vmul.f32 %v7763_v27, %v16632_v55  ;;  %v7875_v3 = vsel %vm2808_vm6, %v7874_v41, %v7870_v30 }
0x1a6a   :  { %v7807_v12 = vmul.f32 %v7775_v45, %v16632_v55  ;;  %v7880_v59 = vsel %vm2815_vm7, %v7879_v19, %v7875_v3  ;;  %v7768_v14 = vadd.f32 %v15787_v6, %v13513_v23 }
0x1a6b   :  { %v7806_v54 = vmul.f32 %v7774_v40, %v16632_v55  ;;  %v7725_v17 = vpop.xlane.xlu1 %7724  ;;  %v7939_v48 = vsel %vm2787_vm3, %v7938_v26, %v7934_v28  ;;  %v7889_v0 = vrot.slane %v7795_v46, %v16443_v34  ;;  %v7899_v28 = vrot.slane %v7797_v8, %v16449_v39 }
0x1a6c   :  { %v7777_v63 = vadd.f32 %v7725_v17, %v13513_v23  ;;  %v7722_v2 = vpop.xlane.xlu0 %7721  ;;  %v7948_v13 = vrot.slane %v7807_v12, %v16522_v29  ;;  %v7799_v17 = vmul.f32 %v7767_v52, %v16632_v55  ;;  %v7800_v46 = vmul.f32 %v7768_v14, %v16632_v55 }
0x1a6d   :  { %v7943_v50 = vrot.slane %v7806_v54, %v16518_v60  ;;  %v7776_v7 = vadd.f32 %v7722_v2, %v13513_v23  ;;  %v7884_v60 = vrot.slane %v7794_v25, %v16445_v1  ;;  %vm16633_vm3 = vcmask 720512  }
0x1a6e   :  { %v7809_v44 = vmul.f32 %v7777_v63, %v16632_v55  ;;  %v7914_v35 = vrot.slane %v7800_v46, %v16454_v58 }
0x1a6f   :  { %v7944_v11 = vsel %vm2794_vm4, %v7943_v50, %v7939_v48  ;;  %v7808_v49 = vmul.f32 %v7776_v7, %v16632_v55  ;;  %v7731_v32 = vpop.xlane.xlu1 %7730  ;;  %v7885_v18 = vsel %vm2822_vm8, %v7884_v60, %v7880_v59  ;;  %v7770_v50 = vadd.f32 %v15794_v51, %v13513_v23  ;;  %vm16634_vm4 = vmmov %vm16633_vm3 }
0x1a70   :  { %v7779_v24 = vadd.f32 %v7731_v32, %v13513_v23  ;;  %v7728_v29 = vpop.xlane.xlu0 %7727  ;;  %v7958_v37 = vrot.slane %v7809_v44, %v16525_v43  ;;  %v7949_v15 = vsel %vm2801_vm5, %v7948_v13, %v7944_v11  ;;  %v7798_v43 = vmul.f32 %v7766_v31, %v16632_v55 }
0x1a71   :  { %v7953_v20 = vrot.slane %v7808_v49, %v16523_v33  ;;  %v7778_v53 = vadd.f32 %v7728_v29, %v13513_v23  ;;  %v7890_v54 = vsel %vm2829_vm9, %v7889_v0, %v7885_v18  ;;  %v7802_v31 = vmul.f32 %v7770_v50, %v16632_v55 }
0x1a72   :  { %v7811_v22 = vmul.f32 %v7779_v24, %v16632_v55  ;;  %v7904_v63 = vrot.slane %v7798_v43, %v16452_v4  ;;  %vm16635_vm5 = vcmask 786112  }
0x1a73   :  { %v7954_v45 = vsel %vm2808_vm6, %v7953_v20, %v7949_v15  ;;  %v7810_v16 = vmul.f32 %v7778_v53, %v16632_v55  ;;  %v7737_v33 = vpop.xlane.xlu1 %7736  ;;  %vm16636_vm6 = vcmask 851712  }
0x1a74   :  { %v7781_v27 = vadd.f32 %v7737_v33, %v13513_v23  ;;  %v7734_v40 = vpop.xlane.xlu0 %7733  ;;  %v7968_v12 = vrot.slane %v7811_v22, %v16443_v34  ;;  %v7959_v57 = vsel %vm2815_vm7, %v7958_v37, %v7954_v45  ;;  %v7769_v34 = vadd.f32 %v15785_v9, %v13513_v23  ;;  %vm16637_vm7 = vmmov %vm16635_vm5 }
0x1a75   :  { %v7963_v26 = vrot.slane %v7810_v16, %v16445_v1  ;;  %v7780_v21 = vadd.f32 %v7734_v40, %v13513_v23  ;;  %v7895_v1 = vsel %vm2836_vm10, %v7894_v38, %v7890_v54  ;;  %v7909_v9 = vrot.slane %v7799_v17, %v16453_v5 }
0x1a76   :  { %v7813_v41 = vmul.f32 %v7781_v27, %v16632_v55  ;;  %v7900_v19 = vsel %vm2843_vm11, %v7899_v28, %v7895_v1  ;;  %v7924_v45 = vrot.slane %v7802_v31, %v16458_v36 }
0x1a77   :  { %v7964_v25 = vsel %vm2822_vm8, %v7963_v26, %v7959_v57  ;;  %v7812_v6 = vmul.f32 %v7780_v21, %v16632_v55  ;;  %v7743_v62 = vpop.xlane.xlu1 %7742  ;;  %v7905_v51 = vsel %vm16633_vm3, %v7904_v63, %v7900_v19  ;;  %vm16638_vm8 = vmmov %vm16636_vm6 }
0x1a78   :  { %v7783_v2 = vadd.f32 %v7743_v62, %v13513_v23  ;;  %v7740_v30 = vpop.xlane.xlu0 %7739  ;;  %v7978_v48 = vrot.slane %v7813_v41, %v16449_v39  ;;  %v7969_v13 = vsel %vm2829_vm9, %v7968_v12, %v7964_v25  ;;  %v7771_v39 = vadd.f32 %v15792_v10, %v13513_v23 }
0x1a79   :  { %v7973_v7 = vrot.slane %v7812_v6, %v16447_v61  ;;  %v7782_v56 = vadd.f32 %v7740_v30, %v13513_v23  ;;  %v7801_v61 = vmul.f32 %v7769_v34, %v16632_v55  ;;  %v7910_v22 = vsel %vm16635_vm5, %v7909_v9, %v7905_v51 }
0x1a7a   :  { %v7815_v44 = vmul.f32 %v7783_v2, %v16632_v55  ;;  %v7803_v59 = vmul.f32 %v7771_v39, %v16632_v55  ;;  %vm16639_vm9 = vcmask 917312  }
0x1a7b   :  { %v7974_v3 = vsel %vm2836_vm10, %v7973_v7, %v7969_v13  ;;  %v7814_v11 = vmul.f32 %v7782_v56, %v16632_v55  ;;  %v7749_v49 = vpop.xlane.xlu1 %7748  ;;  %v7919_v15 = vrot.slane %v7801_v61, %v16459_v42  ;;  %vm16640_vm10 = vcmask 982912  }
0x1a7c   :  { %v7785_v32 = vadd.f32 %v7749_v49, %v13513_v23  ;;  %v7746_v60 = vpop.xlane.xlu0 %7745  ;;  %v7988_v0 = vrot.slane %v7815_v44, %v16453_v5  ;;  %v7979_v20 = vsel %vm2843_vm11, %v7978_v48, %v7974_v3  ;;  %v7915_v5 = vsel %vm16636_vm6, %v7914_v35, %v7910_v22  ;;  %vm16641_vm11 = vmmov %vm16639_vm9 }
0x1a7d   :  { %v7983_v24 = vrot.slane %v7814_v11, %v16452_v4  ;;  %v7784_v29 = vadd.f32 %v7746_v60, %v13513_v23  ;;  %v7929_v26 = vrot.slane %v7803_v59, %v16460_v47  ;;  %v7920_v21 = vsel %vm16639_vm9, %v7919_v15, %v7915_v5 }
0x1a7e   :  { %v7817_v53 = vmul.f32 %v7785_v32, %v16632_v55 }
0x1a7f   :  { %v7984_v8 = vsel %vm16634_vm4, %v7983_v24, %v7979_v20  ;;  %v7816_v10 = vmul.f32 %v7784_v29, %v16632_v55  ;;  %v7755_v37 = vpop.xlane.xlu1 %7754 }
0x1a80   :  { %v7787_v4 = vadd.f32 %v7755_v37, %v13513_v23  ;;  %v7752_v52 = vpop.xlane.xlu0 %7751  ;;  %v7998_v18 = vrot.slane %v7817_v53, %v16459_v42  ;;  %v7989_v38 = vsel %vm16637_vm7, %v7988_v0, %v7984_v8  ;;  %v7925_v42 = vsel %vm16640_vm10, %v7924_v45, %v7920_v21 }
0x1a81   :  { %v7993_v16 = vrot.slane %v7816_v10, %v16454_v58  ;;  %v7786_v33 = vadd.f32 %v7752_v52, %v13513_v23 }
0x1a82   :  { %v7819_v43 = vmul.f32 %v7787_v4, %v16632_v55 }
0x1a83   :  { %v7994_v27 = vsel %vm16638_vm8, %v7993_v16, %v7989_v38  ;;  %v7818_v40 = vmul.f32 %v7786_v33, %v16632_v55  ;;  %v8029_v14 = vpop.permute.xlu1 %8028 }
0x1a84   :  { %v8008_v58 = vrot.slane %v7819_v43, %v16460_v47  ;;  %8034 = vst.msk [vmem:[#allocation11 - $0x7] sm:$0x80] %vm8021_vm15, %v8029_v14  ;;  %v8031_v23 = vpop.permute.xlu0 %8030  ;;  %v7999_v55 = vsel %vm16641_vm11, %v7998_v18, %v7994_v27 }
0x1a85   :  { %v8003_v28 = vrot.slane %v7818_v40, %v16458_v36  ;;  %8035 = vst.msk [vmem:[#allocation11 + $0x1] sm:$0x1] %vm8023_vm1, %v8031_v23 }
0x1a86   :  { %10282 = shalt.err (!%p10279_p11)
}
0x1a87   :  { %s10283_s20 = scalar_lea.hbm %s15970_s17, 32 }
0x1a88   :  { %p10284_p12 = scmp.ne.s32.totalorder %s15970_s17, %s10283_s20  ;;  %p10287_p13 = scmp.lt.u32.totalorder %s10283_s20, %s15970_s17 }
0x1a8a   :  { %p10289_p0 = pnand %p10287_p13, %p10284_p12 }
0x1a8c   :  { %10292 = shalt.err (!%p10289_p0)
}
0x1a8d   :  { %8067 = dma.vmem_to_hbm [thread:$0]  %s8065_s0, 32, %s15970_s17, [#allocation10]   ;;  %vm16642_vm15 = vmmov %vm16640_vm10  ;;  %vm16643_vm1 = vcmask 1048512   ;;  %vm16645_vm14 = vcmask 1041409  }
0x1a8e   :  { %v8004_v36 = vsel %vm16642_vm15, %v8003_v28, %v7999_v55  ;;  %v7930_v47 = vsel %vm16643_vm1, %v7929_v26, %v7925_v42  ;;  %vm16644_vm12 = vmmov %vm16643_vm1  ;;  %s10293_s12 = scalar_lea.vmem %s8042_s14, 256  ;;  %p10298_p2 = scmp.lt.s32.totalorder %s8042_s14, %s8042_s14 }
0x1a8f   :  { %v8009_v12 = vsel %vm16644_vm12, %v8008_v58, %v8004_v36  ;;  %p10294_p1 = scmp.ne.s32.totalorder %s8042_s14, %s10293_s12  ;;  %p10299_p3 = scmp.lt.s32.totalorder %s10293_s12, %s10293_s12 }
0x1a90   :  { %v8010_v57 = vsel %vm16645_vm14, %v8009_v12, %v7930_v47 }
0x1a91   :  { %8013 = vst [vmem:[#allocation8 + $0xe] sm:$0x3] %v8010_v57  ;;  %p10300_p4 = por %p10299_p3, %p10298_p2 }
0x1a93   :  { %p10301_p5 = pnand %p10300_p4, %p10294_p1 }
0x1a95   :  { %10304 = shalt.err (!%p10301_p5)
}
0x1a96   :  { %s10305_s17 = scalar_lea.hbm %s15968_s15, 256 }
0x1a97   :  { %p10306_p6 = scmp.ne.s32.totalorder %s15968_s15, %s10305_s17  ;;  %p10309_p7 = scmp.lt.u32.totalorder %s10305_s17, %s15968_s15 }
0x1a99   :  { %p10311_p8 = pnand %p10309_p7, %p10306_p6 }
0x1a9b   :  { %10314 = shalt.err (!%p10311_p8)
}
0x1a9c   :  { %s10338_s2 = smov 2  }
0x1a9d   :  { %8047 = dma.vmem_to_hbm [thread:$0]  %s8042_s14, 256, %s15968_s15, [#allocation5], %s10329_s27, %s10329_s27, %s10338_s2  }
0x1a9e   :  { %10319 = dma.done.wait [#allocation5], 256  }
0x1a9f   :  { %10320 = vsyncadd [#allocation5], 4294967040 }
0x1aa0   :  { %10321 = dma.done.wait [#allocation10], 64  }
0x1aa1   :  { %10322 = vsyncadd [#allocation10], 4294967232 }
0x1aa2   :  { %8077 = vsyncpa [#allocation4], 1 }
0x1aa3   :  { %8078 = vsyncpa [#allocation5], 1 }
0x1aa4   :  { %8079 = vsyncpa [#allocation10], 1 }
0x1aa5   :  { %8080 = vsyncpa [#allocation6], 1 }

</bundles_post_ra>
